<compile_context>
chip_gen: v5e
topology: v5e:2x2
jax: 0.10.0
libtpu: 0.0.40
codegen_flags: <defaults>
</compile_context>

<pallas_src>
import functools
import math

import jax
import jax.numpy as jnp
from jax.experimental import pallas as pl
from jax.experimental.pallas import tpu as pltpu

LANE = 128
SUBLANE = 8


def _round_up(x, m):
    return ((x + m - 1) // m) * m


def make_layer_call(B, T, H, W, Cin, Ch, Kh, Kw):
    """Builds a pallas_call running a whole (B, T) ConvGRU layer."""
    ph, pw = Kh // 2, Kw // 2
    Cin_p = _round_up(Cin, LANE)
    Ch_p = _round_up(Ch, LANE)
    C_comb = Cin_p + Ch_p

    # Internal spatial layout: rows of width W_pad (halo columns on the right
    # provide SAME zero padding), flattened to M = H * W_pad sublane rows.
    W_pad = _round_up(W + 2 * pw, SUBLANE)
    M = H * W_pad
    off0 = ph * W_pad + _round_up(pw, SUBLANE)          # interior start, 8-aligned
    R = _round_up(off0 + M + ph * W_pad + pw, SUBLANE)  # total padded rows

    def kernel(x_ref, wg_ref, bg_ref, wc_ref, bc_ref, out_ref, h_ref, pad_ref):
        t = pl.program_id(1)

        @pl.when(t == 0)
        def _init():
            # New sequence: zero hidden state and the guard/halo rows only
            # (interior rows are fully overwritten every step).
            h_ref[...] = jnp.zeros((M, Ch_p), jnp.float32)
            pad_ref[0:off0, :] = jnp.zeros((off0, C_comb), jnp.float32)
            pad_ref[off0 + M:R, :] = jnp.zeros((R - off0 - M, C_comb), jnp.float32)

        x = x_ref[0, 0]      # (M, Cin_p)  halo columns already zero (host glue)
        h = h_ref[...]       # (M, Ch_p)   halo columns kept zero below

        # Merged conv operand [x | h]; single dot per tap.
        pad_ref[off0:off0 + M, 0:Cin_p] = x
        pad_ref[off0:off0 + M, Cin_p:C_comb] = h

        def conv(w_ref, b_ref, n_out):
            acc = jnp.broadcast_to(b_ref[...], (M, n_out))
            for dy in range(Kh):
                for dx in range(Kw):
                    s = off0 + (dy - ph) * W_pad + (dx - pw)   # static offset
                    acc = acc + jnp.dot(pad_ref[s:s + M, :], w_ref[dy, dx],
                                        preferred_element_type=jnp.float32)
            return acc

        # conv_gates on [x | h] -> reset / update (each padded to 128 lanes).
        gates = conv(wg_ref, bg_ref, 2 * Ch_p)
        reset = jax.nn.sigmoid(gates[:, :Ch_p])
        update = jax.nn.sigmoid(gates[:, Ch_p:])

        # conv_can on [x | reset*h] (reuse the padded buffer, only the h half
        # is rewritten).
        pad_ref[off0:off0 + M, Cin_p:C_comb] = reset * h
        cnm = jnp.tanh(conv(wc_ref, bc_ref, Ch_p))

        # Keep the spatial halo columns of h exactly zero so they keep acting
        # as SAME padding for the next step / next layer.
        col = jax.lax.broadcasted_iota(jnp.int32, (M, 1), 0) % W_pad
        halo = (col < W).astype(jnp.float32)
        h_next = (h + update * (cnm - h)) * halo

        h_ref[...] = h_next
        out_ref[0, 0] = h_next.astype(out_ref.dtype)

    call = pl.pallas_call(
        kernel,
        out_shape=jax.ShapeDtypeStruct((B, T, M, Ch_p), jnp.float32),
        grid=(B, T),
        in_specs=[
            pl.BlockSpec((1, 1, M, Cin_p), lambda b, t: (b, t, 0, 0)),
            pl.BlockSpec((Kh, Kw, C_comb, 2 * Ch_p), lambda b, t: (0, 0, 0, 0)),
            pl.BlockSpec((1, 2 * Ch_p), lambda b, t: (0, 0)),
            pl.BlockSpec((Kh, Kw, C_comb, Ch_p), lambda b, t: (0, 0, 0, 0)),
            pl.BlockSpec((1, Ch_p), lambda b, t: (0, 0)),
        ],
        out_specs=pl.BlockSpec((1, 1, M, Ch_p), lambda b, t: (b, t, 0, 0)),
        scratch_shapes=[
            pltpu.VMEM((M, Ch_p), jnp.float32),    # persistent hidden state
            pltpu.VMEM((R, C_comb), jnp.float32),  # zero-padded [x | h] operand
        ],
        compiler_params=pltpu.CompilerParams(
            dimension_semantics=("parallel", "arbitrary"),
            vmem_limit_bytes=48 * 1024 * 1024),
    )
    return call, (W_pad, M, Cin_p, Ch_p)


def _to_internal(x_bthwc, W_pad, C_p):
    """(B,T,H,W,C) -> (B,T,H*W_pad,C_p) with zero halo columns / channels."""
    B, T, H, W, C = x_bthwc.shape
    x = jnp.pad(x_bthwc, ((0, 0), (0, 0), (0, 0), (0, W_pad - W), (0, C_p - C)))
    return x.reshape(B, T, H * W_pad, C_p)


def _from_internal(y, H, W, W_pad, C):
    """(B,T,H*W_pad,C_p) -> (B,T,H,W,C)."""
    B, T, M, C_p = y.shape
    return y.reshape(B, T, H, W_pad, C_p)[:, :, :, :W, :C]


def _pack_layer_params(wgx, wgh, bg, wcx, wch, bc, Cin_p, Ch_p):
    """Pad HWIO weights/biases to lane-aligned channel widths and merge the
    x/h input-channel halves into one contraction axis."""
    Kh, Kw, Cin, two_ch = wgx.shape
    Ch = two_ch // 2
    C_comb = Cin_p + Ch_p

    wg = jnp.zeros((Kh, Kw, C_comb, 2 * Ch_p), jnp.float32)
    wg = wg.at[:, :, :Cin, :Ch].set(wgx[..., :Ch])
    wg = wg.at[:, :, :Cin, Ch_p:Ch_p + Ch].set(wgx[..., Ch:])
    wg = wg.at[:, :, Cin_p:Cin_p + Ch, :Ch].set(wgh[..., :Ch])
    wg = wg.at[:, :, Cin_p:Cin_p + Ch, Ch_p:Ch_p + Ch].set(wgh[..., Ch:])
    bgp = jnp.zeros((1, 2 * Ch_p), jnp.float32)
    bgp = bgp.at[:, :Ch].set(bg[:, :Ch]).at[:, Ch_p:Ch_p + Ch].set(bg[:, Ch:])

    wc = jnp.zeros((Kh, Kw, C_comb, Ch_p), jnp.float32)
    wc = wc.at[:, :, :Cin, :Ch].set(wcx)
    wc = wc.at[:, :, Cin_p:Cin_p + Ch, :Ch].set(wch)
    bcp = jnp.zeros((1, Ch_p), jnp.float32).at[:, :Ch].set(bc)
    return wg, bgp, wc, bcp


def conv_rnn_forward(x_seq, params, batch_first=False):
    """x_seq: (T,B,C,H,W) if not batch_first else (B,T,C,H,W).
    Returns last-layer output (B, T, hidden_dim, H, W) (return_all_layers=False)."""
    if not batch_first:
        x_seq = jnp.transpose(x_seq, (1, 0, 2, 3, 4))
    B, T, C, H, W = x_seq.shape
    cur = jnp.transpose(x_seq, (0, 1, 3, 4, 2))          # (B, T, H, W, C)

    for (wgx, wgh, bg, wcx, wch, bc) in params:
        Kh, Kw, Cin, _ = wgx.shape
        Ch = wch.shape[-1]
        call, (W_pad, M, Cin_p, Ch_p) = make_layer_call(B, T, H, W, Cin, Ch, Kh, Kw)
        wg, bgp, wc, bcp = _pack_layer_params(wgx, wgh, bg, wcx, wch, bc,
                                              Cin_p, Ch_p)
        x_int = _to_internal(cur, W_pad, Cin_p)          # (B, T, M, Cin_p)
        y_int = call(x_int, wg, bgp, wc, bcp)            # (B, T, M, Ch_p)
        cur = _from_internal(y_int, H, W, W_pad, Ch)     # (B, T, H, W, Ch)

    return jnp.transpose(cur, (0, 1, 4, 2, 3))           # (B, T, Ch, H, W)


def conv_rnn_forward_ref(x_seq, params, batch_first=False):
    """Pure-JAX reference (lax.conv) matching the PyTorch semantics."""
    if not batch_first:
        x_seq = jnp.transpose(x_seq, (1, 0, 2, 3, 4))
    B, T, C, H, W = x_seq.shape
    cur = jnp.transpose(x_seq, (0, 1, 3, 4, 2))          # (B, T, H, W, C)
    dn = ('NHWC', 'HWIO', 'NHWC')
    for (wgx, wgh, bg, wcx, wch, bc) in params:
        Ch = wch.shape[-1]
        wg = jnp.concatenate([wgx, wgh], axis=2)
        wc = jnp.concatenate([wcx, wch], axis=2)
        h = jnp.zeros((B, H, W, Ch), jnp.float32)
        outs = []
        for t in range(T):
            x = cur[:, t]
            comb = jnp.concatenate([x, h], axis=-1)
            g = jax.lax.conv_general_dilated(comb, wg, (1, 1), 'SAME',
                                             dimension_numbers=dn)
            g = g + bg.reshape(1, 1, 1, -1)
            reset = jax.nn.sigmoid(g[..., :Ch])
            update = jax.nn.sigmoid(g[..., Ch:])
            comb2 = jnp.concatenate([x, reset * h], axis=-1)
            cc = jax.lax.conv_general_dilated(comb2, wc, (1, 1), 'SAME',
                                              dimension_numbers=dn)
            cc = cc + bc.reshape(1, 1, 1, -1)
            h = (1.0 - update) * h + update * jnp.tanh(cc)
            outs.append(h)
        cur = jnp.stack(outs, axis=1)
    return jnp.transpose(cur, (0, 1, 4, 2, 3))


def init_params(key, input_dim, hidden_dims, kernel_size):
    """Deterministic synthetic parameters (HWIO, gate/candidate convs split
    into input-channel and hidden-channel halves)."""
    Kh, Kw = kernel_size
    params = []
    cin = input_dim
    for ch in hidden_dims:
        key, k0, k1, k2, k3, k4, k5 = jax.random.split(key, 7)
        bound = 1.0 / math.sqrt((cin + ch) * Kh * Kw)
        u = lambda k, shp: jax.random.uniform(k, shp, jnp.float32, -bound, bound)
        wgx = u(k0, (Kh, Kw, cin, 2 * ch))
        wgh = u(k1, (Kh, Kw, ch, 2 * ch))
        bg = u(k2, (1, 2 * ch))
        wcx = u(k3, (Kh, Kw, cin, ch))
        wch = u(k4, (Kh, Kw, ch, ch))
        bc = u(k5, (1, ch))
        params.append((wgx, wgh, bg, wcx, wch, bc))
        cin = ch
    return params


if __name__ == "__main__":
    T, B, Cin, H, W = 8, 2, 4, 8, 8
    hidden_dims = [8, 8]          # num_layers = 2
    kernel_size = (3, 3)

    key = jax.random.PRNGKey(0)
    kx, kp = jax.random.split(key)
    x = jax.random.normal(kx, (T, B, Cin, H, W), jnp.float32)  # batch_first=False
    params = init_params(kp, Cin, hidden_dims, kernel_size)

    fwd = jax.jit(functools.partial(conv_rnn_forward, batch_first=False))
    out = jax.block_until_ready(fwd(x, params))

    assert out.shape == (B, T, hidden_dims[-1], H, W), out.shape

    ref = conv_rnn_forward_ref(x, params, batch_first=False)
    max_err = float(jnp.max(jnp.abs(out - ref)))
    assert max_err < 2e-4, f"mismatch vs reference: {max_err}"

    print("KERNEL_OK")
</pallas_src>

<mosaic_0001>
module attributes {stable_mosaic.version = 11 : i64} {
  func.func @kernel(%arg0: i32, %arg1: i32, %arg2: memref<1x1x128x128xf32, #tpu.memory_space<vmem>>, %arg3: memref<3x3x256x256xf32, #tpu.memory_space<vmem>>, %arg4: memref<1x256xf32, #tpu.memory_space<vmem>>, %arg5: memref<3x3x256x128xf32, #tpu.memory_space<vmem>>, %arg6: memref<1x128xf32, #tpu.memory_space<vmem>>, %arg7: memref<1x1x128x128xf32, #tpu.memory_space<vmem>>, %arg8: memref<128x128xf32, #tpu.memory_space<vmem>>, %arg9: memref<176x256xf32, #tpu.memory_space<vmem>>) attributes {dimension_semantics = [#tpu.dimension_semantics<parallel>, #tpu.dimension_semantics<arbitrary>], iteration_bounds = array<i64: 2, 8>, scalar_prefetch = 0 : i64, scratch_operands = 2 : i64, tpu.core_type = #tpu.core_type<tc>, window_params = [{transform_indices = @transform_0, window_bounds = array<i64: 1, 1, 128, 128>}, {pipeline_mode = #tpu.pipeline_mode<synchronous>, transform_indices = @transform_1, window_bounds = array<i64: 3, 3, 256, 256>}, {pipeline_mode = #tpu.pipeline_mode<synchronous>, transform_indices = @transform_2, window_bounds = array<i64: 1, 256>}, {pipeline_mode = #tpu.pipeline_mode<synchronous>, transform_indices = @transform_3, window_bounds = array<i64: 3, 3, 256, 128>}, {pipeline_mode = #tpu.pipeline_mode<synchronous>, transform_indices = @transform_4, window_bounds = array<i64: 1, 128>}, {transform_indices = @transform_5, window_bounds = array<i64: 1, 1, 128, 128>}]} {
    %c0_i32 = arith.constant 0 : i32
    %0 = arith.cmpi eq, %arg1, %c0_i32 : i32
    %1 = arith.extui %0 : i1 to i32
    %c0_i32_0 = arith.constant 0 : i32
    %2 = arith.cmpi ne, %1, %c0_i32_0 : i32
    scf.if %2 {
      %cst_141 = arith.constant 0.000000e+00 : f32
      %149 = vector.broadcast %cst_141 : f32 to vector<128x128xf32>
      %c0_142 = arith.constant 0 : index
      %c0_143 = arith.constant 0 : index
      %150 = vector.load %arg8[%c0_142, %c0_143] : memref<128x128xf32, #tpu.memory_space<vmem>>, vector<128x128xf32>
      tpu.vector_store %arg8[%c0_142, %c0_143], %149 {strides = array<i32>} : memref<128x128xf32, #tpu.memory_space<vmem>>, vector<128x128xf32>,
      %cst_144 = arith.constant 0.000000e+00 : f32
      %151 = vector.broadcast %cst_144 : f32 to vector<24x256xf32>
      %c0_145 = arith.constant 0 : index
      %c0_146 = arith.constant 0 : index
      %152 = vector.load %arg9[%c0_145, %c0_146] : memref<176x256xf32, #tpu.memory_space<vmem>>, vector<24x256xf32>
      tpu.vector_store %arg9[%c0_145, %c0_146], %151 {strides = array<i32>} : memref<176x256xf32, #tpu.memory_space<vmem>>, vector<24x256xf32>,
      %cst_147 = arith.constant 0.000000e+00 : f32
      %153 = vector.broadcast %cst_147 : f32 to vector<24x256xf32>
      %c152 = arith.constant 152 : index
      %c0_148 = arith.constant 0 : index
      %154 = vector.load %arg9[%c152, %c0_148] : memref<176x256xf32, #tpu.memory_space<vmem>>, vector<24x256xf32>
      tpu.vector_store %arg9[%c152, %c0_148], %153 {strides = array<i32>} : memref<176x256xf32, #tpu.memory_space<vmem>>, vector<24x256xf32>,
    } else {
    }
    %c0 = arith.constant 0 : index
    %c0_1 = arith.constant 0 : index
    %c0_2 = arith.constant 0 : index
    %c0_3 = arith.constant 0 : index
    %3 = vector.load %arg2[%c0, %c0_1, %c0_2, %c0_3] : memref<1x1x128x128xf32, #tpu.memory_space<vmem>>, vector<1x1x128x128xf32>
    %4 = vector.shape_cast %3 : vector<1x1x128x128xf32> to vector<128x128xf32>
    %c0_4 = arith.constant 0 : index
    %c0_5 = arith.constant 0 : index
    %5 = vector.load %arg8[%c0_4, %c0_5] : memref<128x128xf32, #tpu.memory_space<vmem>>, vector<128x128xf32>
    %c24 = arith.constant 24 : index
    %c0_6 = arith.constant 0 : index
    %6 = vector.load %arg9[%c24, %c0_6] : memref<176x256xf32, #tpu.memory_space<vmem>>, vector<128x128xf32>
    tpu.vector_store %arg9[%c24, %c0_6], %4 {strides = array<i32>} : memref<176x256xf32, #tpu.memory_space<vmem>>, vector<128x128xf32>,
    %c24_7 = arith.constant 24 : index
    %c128 = arith.constant 128 : index
    %7 = vector.load %arg9[%c24_7, %c128] : memref<176x256xf32, #tpu.memory_space<vmem>>, vector<128x128xf32>
    tpu.vector_store %arg9[%c24_7, %c128], %5 {strides = array<i32>} : memref<176x256xf32, #tpu.memory_space<vmem>>, vector<128x128xf32>,
    %c0_8 = arith.constant 0 : index
    %c0_9 = arith.constant 0 : index
    %8 = vector.load %arg4[%c0_8, %c0_9] : memref<1x256xf32, #tpu.memory_space<vmem>>, vector<1x256xf32>
    %9 = vector.shape_cast %8 : vector<1x256xf32> to vector<1x256xf32>
    %10 = vector.broadcast %9 : vector<1x256xf32> to vector<128x256xf32>
    %c7 = arith.constant 7 : index
    %c0_10 = arith.constant 0 : index
    %11 = vector.load %arg9[%c7, %c0_10] : memref<176x256xf32, #tpu.memory_space<vmem>>, vector<128x256xf32>
    %c0_11 = arith.constant 0 : index
    %c0_12 = arith.constant 0 : index
    %c0_13 = arith.constant 0 : index
    %c0_14 = arith.constant 0 : index
    %12 = vector.load %arg3[%c0_11, %c0_12, %c0_13, %c0_14] : memref<3x3x256x256xf32, #tpu.memory_space<vmem>>, vector<1x1x256x256xf32>
    %13 = vector.shape_cast %12 : vector<1x1x256x256xf32> to vector<256x256xf32>
    %cst = arith.constant dense<0.000000e+00> : vector<128x256xf32>
    %14 = tpu.matmul %11, %13, %cst {dimension_numbers = #tpu.dot_dimension_numbers<[1], [0], [0], [1], [0, 0, 1, 1], [], []>} : vector<128x256xf32>, vector<256x256xf32>, vector<128x256xf32> -> vector<128x256xf32>
    %15 = arith.addf %10, %14 : vector<128x256xf32>
    %c8 = arith.constant 8 : index
    %c0_15 = arith.constant 0 : index
    %16 = vector.load %arg9[%c8, %c0_15] : memref<176x256xf32, #tpu.memory_space<vmem>>, vector<128x256xf32>
    %c0_16 = arith.constant 0 : index
    %c1 = arith.constant 1 : index
    %c0_17 = arith.constant 0 : index
    %c0_18 = arith.constant 0 : index
    %17 = vector.load %arg3[%c0_16, %c1, %c0_17, %c0_18] : memref<3x3x256x256xf32, #tpu.memory_space<vmem>>, vector<1x1x256x256xf32>
    %18 = vector.shape_cast %17 : vector<1x1x256x256xf32> to vector<256x256xf32>
    %cst_19 = arith.constant dense<0.000000e+00> : vector<128x256xf32>
    %19 = tpu.matmul %16, %18, %cst_19 {dimension_numbers = #tpu.dot_dimension_numbers<[1], [0], [0], [1], [0, 0, 1, 1], [], []>} : vector<128x256xf32>, vector<256x256xf32>, vector<128x256xf32> -> vector<128x256xf32>
    %20 = arith.addf %15, %19 : vector<128x256xf32>
    %c9 = arith.constant 9 : index
    %c0_20 = arith.constant 0 : index
    %21 = vector.load %arg9[%c9, %c0_20] : memref<176x256xf32, #tpu.memory_space<vmem>>, vector<128x256xf32>
    %c0_21 = arith.constant 0 : index
    %c2 = arith.constant 2 : index
    %c0_22 = arith.constant 0 : index
    %c0_23 = arith.constant 0 : index
    %22 = vector.load %arg3[%c0_21, %c2, %c0_22, %c0_23] : memref<3x3x256x256xf32, #tpu.memory_space<vmem>>, vector<1x1x256x256xf32>
    %23 = vector.shape_cast %22 : vector<1x1x256x256xf32> to vector<256x256xf32>
    %cst_24 = arith.constant dense<0.000000e+00> : vector<128x256xf32>
    %24 = tpu.matmul %21, %23, %cst_24 {dimension_numbers = #tpu.dot_dimension_numbers<[1], [0], [0], [1], [0, 0, 1, 1], [], []>} : vector<128x256xf32>, vector<256x256xf32>, vector<128x256xf32> -> vector<128x256xf32>
    %25 = arith.addf %20, %24 : vector<128x256xf32>
    %c23 = arith.constant 23 : index
    %c0_25 = arith.constant 0 : index
    %26 = vector.load %arg9[%c23, %c0_25] : memref<176x256xf32, #tpu.memory_space<vmem>>, vector<128x256xf32>
    %c1_26 = arith.constant 1 : index
    %c0_27 = arith.constant 0 : index
    %c0_28 = arith.constant 0 : index
    %c0_29 = arith.constant 0 : index
    %27 = vector.load %arg3[%c1_26, %c0_27, %c0_28, %c0_29] : memref<3x3x256x256xf32, #tpu.memory_space<vmem>>, vector<1x1x256x256xf32>
    %28 = vector.shape_cast %27 : vector<1x1x256x256xf32> to vector<256x256xf32>
    %cst_30 = arith.constant dense<0.000000e+00> : vector<128x256xf32>
    %29 = tpu.matmul %26, %28, %cst_30 {dimension_numbers = #tpu.dot_dimension_numbers<[1], [0], [0], [1], [0, 0, 1, 1], [], []>} : vector<128x256xf32>, vector<256x256xf32>, vector<128x256xf32> -> vector<128x256xf32>
    %30 = arith.addf %25, %29 : vector<128x256xf32>
    %c24_31 = arith.constant 24 : index
    %c0_32 = arith.constant 0 : index
    %31 = vector.load %arg9[%c24_31, %c0_32] : memref<176x256xf32, #tpu.memory_space<vmem>>, vector<128x256xf32>
    %c1_33 = arith.constant 1 : index
    %c1_34 = arith.constant 1 : index
    %c0_35 = arith.constant 0 : index
    %c0_36 = arith.constant 0 : index
    %32 = vector.load %arg3[%c1_33, %c1_34, %c0_35, %c0_36] : memref<3x3x256x256xf32, #tpu.memory_space<vmem>>, vector<1x1x256x256xf32>
    %33 = vector.shape_cast %32 : vector<1x1x256x256xf32> to vector<256x256xf32>
    %cst_37 = arith.constant dense<0.000000e+00> : vector<128x256xf32>
    %34 = tpu.matmul %31, %33, %cst_37 {dimension_numbers = #tpu.dot_dimension_numbers<[1], [0], [0], [1], [0, 0, 1, 1], [], []>} : vector<128x256xf32>, vector<256x256xf32>, vector<128x256xf32> -> vector<128x256xf32>
    %35 = arith.addf %30, %34 : vector<128x256xf32>
    %c25 = arith.constant 25 : index
    %c0_38 = arith.constant 0 : index
    %36 = vector.load %arg9[%c25, %c0_38] : memref<176x256xf32, #tpu.memory_space<vmem>>, vector<128x256xf32>
    %c1_39 = arith.constant 1 : index
    %c2_40 = arith.constant 2 : index
    %c0_41 = arith.constant 0 : index
    %c0_42 = arith.constant 0 : index
    %37 = vector.load %arg3[%c1_39, %c2_40, %c0_41, %c0_42] : memref<3x3x256x256xf32, #tpu.memory_space<vmem>>, vector<1x1x256x256xf32>
    %38 = vector.shape_cast %37 : vector<1x1x256x256xf32> to vector<256x256xf32>
    %cst_43 = arith.constant dense<0.000000e+00> : vector<128x256xf32>
    %39 = tpu.matmul %36, %38, %cst_43 {dimension_numbers = #tpu.dot_dimension_numbers<[1], [0], [0], [1], [0, 0, 1, 1], [], []>} : vector<128x256xf32>, vector<256x256xf32>, vector<128x256xf32> -> vector<128x256xf32>
    %40 = arith.addf %35, %39 : vector<128x256xf32>
    %c39 = arith.constant 39 : index
    %c0_44 = arith.constant 0 : index
    %41 = vector.load %arg9[%c39, %c0_44] : memref<176x256xf32, #tpu.memory_space<vmem>>, vector<128x256xf32>
    %c2_45 = arith.constant 2 : index
    %c0_46 = arith.constant 0 : index
    %c0_47 = arith.constant 0 : index
    %c0_48 = arith.constant 0 : index
    %42 = vector.load %arg3[%c2_45, %c0_46, %c0_47, %c0_48] : memref<3x3x256x256xf32, #tpu.memory_space<vmem>>, vector<1x1x256x256xf32>
    %43 = vector.shape_cast %42 : vector<1x1x256x256xf32> to vector<256x256xf32>
    %cst_49 = arith.constant dense<0.000000e+00> : vector<128x256xf32>
    %44 = tpu.matmul %41, %43, %cst_49 {dimension_numbers = #tpu.dot_dimension_numbers<[1], [0], [0], [1], [0, 0, 1, 1], [], []>} : vector<128x256xf32>, vector<256x256xf32>, vector<128x256xf32> -> vector<128x256xf32>
    %45 = arith.addf %40, %44 : vector<128x256xf32>
    %c40 = arith.constant 40 : index
    %c0_50 = arith.constant 0 : index
    %46 = vector.load %arg9[%c40, %c0_50] : memref<176x256xf32, #tpu.memory_space<vmem>>, vector<128x256xf32>
    %c2_51 = arith.constant 2 : index
    %c1_52 = arith.constant 1 : index
    %c0_53 = arith.constant 0 : index
    %c0_54 = arith.constant 0 : index
    %47 = vector.load %arg3[%c2_51, %c1_52, %c0_53, %c0_54] : memref<3x3x256x256xf32, #tpu.memory_space<vmem>>, vector<1x1x256x256xf32>
    %48 = vector.shape_cast %47 : vector<1x1x256x256xf32> to vector<256x256xf32>
    %cst_55 = arith.constant dense<0.000000e+00> : vector<128x256xf32>
    %49 = tpu.matmul %46, %48, %cst_55 {dimension_numbers = #tpu.dot_dimension_numbers<[1], [0], [0], [1], [0, 0, 1, 1], [], []>} : vector<128x256xf32>, vector<256x256xf32>, vector<128x256xf32> -> vector<128x256xf32>
    %50 = arith.addf %45, %49 : vector<128x256xf32>
    %c41 = arith.constant 41 : index
    %c0_56 = arith.constant 0 : index
    %51 = vector.load %arg9[%c41, %c0_56] : memref<176x256xf32, #tpu.memory_space<vmem>>, vector<128x256xf32>
    %c2_57 = arith.constant 2 : index
    %c2_58 = arith.constant 2 : index
    %c0_59 = arith.constant 0 : index
    %c0_60 = arith.constant 0 : index
    %52 = vector.load %arg3[%c2_57, %c2_58, %c0_59, %c0_60] : memref<3x3x256x256xf32, #tpu.memory_space<vmem>>, vector<1x1x256x256xf32>
    %53 = vector.shape_cast %52 : vector<1x1x256x256xf32> to vector<256x256xf32>
    %cst_61 = arith.constant dense<0.000000e+00> : vector<128x256xf32>
    %54 = tpu.matmul %51, %53, %cst_61 {dimension_numbers = #tpu.dot_dimension_numbers<[1], [0], [0], [1], [0, 0, 1, 1], [], []>} : vector<128x256xf32>, vector<256x256xf32>, vector<128x256xf32> -> vector<128x256xf32>
    %55 = arith.addf %50, %54 : vector<128x256xf32>
    %56 = vector.extract_strided_slice %55 {offsets = [0, 0], sizes = [128, 128], strides = [1, 1]} : vector<128x256xf32> to vector<128x128xf32>
    %57 = arith.negf %56 : vector<128x128xf32>
    %58 = math.exp %57 : vector<128x128xf32>
    %cst_62 = arith.constant 1.000000e+00 : f32
    %59 = vector.broadcast %cst_62 : f32 to vector<128x128xf32>
    %60 = arith.addf %59, %58 : vector<128x128xf32>
    %61 = arith.divf %59, %60 : vector<128x128xf32>
    %62 = vector.extract_strided_slice %55 {offsets = [0, 128], sizes = [128, 128], strides = [1, 1]} : vector<128x256xf32> to vector<128x128xf32>
    %63 = arith.negf %62 : vector<128x128xf32>
    %64 = math.exp %63 : vector<128x128xf32>
    %cst_63 = arith.constant 1.000000e+00 : f32
    %65 = vector.broadcast %cst_63 : f32 to vector<128x128xf32>
    %66 = arith.addf %65, %64 : vector<128x128xf32>
    %67 = arith.divf %65, %66 : vector<128x128xf32>
    %68 = arith.mulf %61, %5 : vector<128x128xf32>
    %c24_64 = arith.constant 24 : index
    %c128_65 = arith.constant 128 : index
    %69 = vector.load %arg9[%c24_64, %c128_65] : memref<176x256xf32, #tpu.memory_space<vmem>>, vector<128x128xf32>
    tpu.vector_store %arg9[%c24_64, %c128_65], %68 {strides = array<i32>} : memref<176x256xf32, #tpu.memory_space<vmem>>, vector<128x128xf32>,
    %c0_66 = arith.constant 0 : index
    %c0_67 = arith.constant 0 : index
    %70 = vector.load %arg6[%c0_66, %c0_67] : memref<1x128xf32, #tpu.memory_space<vmem>>, vector<1x128xf32>
    %71 = vector.shape_cast %70 : vector<1x128xf32> to vector<1x128xf32>
    %72 = vector.broadcast %71 : vector<1x128xf32> to vector<128x128xf32>
    %c7_68 = arith.constant 7 : index
    %c0_69 = arith.constant 0 : index
    %73 = vector.load %arg9[%c7_68, %c0_69] : memref<176x256xf32, #tpu.memory_space<vmem>>, vector<128x256xf32>
    %c0_70 = arith.constant 0 : index
    %c0_71 = arith.constant 0 : index
    %c0_72 = arith.constant 0 : index
    %c0_73 = arith.constant 0 : index
    %74 = vector.load %arg5[%c0_70, %c0_71, %c0_72, %c0_73] : memref<3x3x256x128xf32, #tpu.memory_space<vmem>>, vector<1x1x256x128xf32>
    %75 = vector.shape_cast %74 : vector<1x1x256x128xf32> to vector<256x128xf32>
    %cst_74 = arith.constant dense<0.000000e+00> : vector<128x128xf32>
    %76 = tpu.matmul %73, %75, %cst_74 {dimension_numbers = #tpu.dot_dimension_numbers<[1], [0], [0], [1], [0, 0, 1, 1], [], []>} : vector<128x256xf32>, vector<256x128xf32>, vector<128x128xf32> -> vector<128x128xf32>
    %77 = arith.addf %72, %76 : vector<128x128xf32>
    %c8_75 = arith.constant 8 : index
    %c0_76 = arith.constant 0 : index
    %78 = vector.load %arg9[%c8_75, %c0_76] : memref<176x256xf32, #tpu.memory_space<vmem>>, vector<128x256xf32>
    %c0_77 = arith.constant 0 : index
    %c1_78 = arith.constant 1 : index
    %c0_79 = arith.constant 0 : index
    %c0_80 = arith.constant 0 : index
    %79 = vector.load %arg5[%c0_77, %c1_78, %c0_79, %c0_80] : memref<3x3x256x128xf32, #tpu.memory_space<vmem>>, vector<1x1x256x128xf32>
    %80 = vector.shape_cast %79 : vector<1x1x256x128xf32> to vector<256x128xf32>
    %cst_81 = arith.constant dense<0.000000e+00> : vector<128x128xf32>
    %81 = tpu.matmul %78, %80, %cst_81 {dimension_numbers = #tpu.dot_dimension_numbers<[1], [0], [0], [1], [0, 0, 1, 1], [], []>} : vector<128x256xf32>, vector<256x128xf32>, vector<128x128xf32> -> vector<128x128xf32>
    %82 = arith.addf %77, %81 : vector<128x128xf32>
    %c9_82 = arith.constant 9 : index
    %c0_83 = arith.constant 0 : index
    %83 = vector.load %arg9[%c9_82, %c0_83] : memref<176x256xf32, #tpu.memory_space<vmem>>, vector<128x256xf32>
    %c0_84 = arith.constant 0 : index
    %c2_85 = arith.constant 2 : index
    %c0_86 = arith.constant 0 : index
    %c0_87 = arith.constant 0 : index
    %84 = vector.load %arg5[%c0_84, %c2_85, %c0_86, %c0_87] : memref<3x3x256x128xf32, #tpu.memory_space<vmem>>, vector<1x1x256x128xf32>
    %85 = vector.shape_cast %84 : vector<1x1x256x128xf32> to vector<256x128xf32>
    %cst_88 = arith.constant dense<0.000000e+00> : vector<128x128xf32>
    %86 = tpu.matmul %83, %85, %cst_88 {dimension_numbers = #tpu.dot_dimension_numbers<[1], [0], [0], [1], [0, 0, 1, 1], [], []>} : vector<128x256xf32>, vector<256x128xf32>, vector<128x128xf32> -> vector<128x128xf32>
    %87 = arith.addf %82, %86 : vector<128x128xf32>
    %c23_89 = arith.constant 23 : index
    %c0_90 = arith.constant 0 : index
    %88 = vector.load %arg9[%c23_89, %c0_90] : memref<176x256xf32, #tpu.memory_space<vmem>>, vector<128x256xf32>
    %c1_91 = arith.constant 1 : index
    %c0_92 = arith.constant 0 : index
    %c0_93 = arith.constant 0 : index
    %c0_94 = arith.constant 0 : index
    %89 = vector.load %arg5[%c1_91, %c0_92, %c0_93, %c0_94] : memref<3x3x256x128xf32, #tpu.memory_space<vmem>>, vector<1x1x256x128xf32>
    %90 = vector.shape_cast %89 : vector<1x1x256x128xf32> to vector<256x128xf32>
    %cst_95 = arith.constant dense<0.000000e+00> : vector<128x128xf32>
    %91 = tpu.matmul %88, %90, %cst_95 {dimension_numbers = #tpu.dot_dimension_numbers<[1], [0], [0], [1], [0, 0, 1, 1], [], []>} : vector<128x256xf32>, vector<256x128xf32>, vector<128x128xf32> -> vector<128x128xf32>
    %92 = arith.addf %87, %91 : vector<128x128xf32>
    %c24_96 = arith.constant 24 : index
    %c0_97 = arith.constant 0 : index
    %93 = vector.load %arg9[%c24_96, %c0_97] : memref<176x256xf32, #tpu.memory_space<vmem>>, vector<128x256xf32>
    %c1_98 = arith.constant 1 : index
    %c1_99 = arith.constant 1 : index
    %c0_100 = arith.constant 0 : index
    %c0_101 = arith.constant 0 : index
    %94 = vector.load %arg5[%c1_98, %c1_99, %c0_100, %c0_101] : memref<3x3x256x128xf32, #tpu.memory_space<vmem>>, vector<1x1x256x128xf32>
    %95 = vector.shape_cast %94 : vector<1x1x256x128xf32> to vector<256x128xf32>
    %cst_102 = arith.constant dense<0.000000e+00> : vector<128x128xf32>
    %96 = tpu.matmul %93, %95, %cst_102 {dimension_numbers = #tpu.dot_dimension_numbers<[1], [0], [0], [1], [0, 0, 1, 1], [], []>} : vector<128x256xf32>, vector<256x128xf32>, vector<128x128xf32> -> vector<128x128xf32>
    %97 = arith.addf %92, %96 : vector<128x128xf32>
    %c25_103 = arith.constant 25 : index
    %c0_104 = arith.constant 0 : index
    %98 = vector.load %arg9[%c25_103, %c0_104] : memref<176x256xf32, #tpu.memory_space<vmem>>, vector<128x256xf32>
    %c1_105 = arith.constant 1 : index
    %c2_106 = arith.constant 2 : index
    %c0_107 = arith.constant 0 : index
    %c0_108 = arith.constant 0 : index
    %99 = vector.load %arg5[%c1_105, %c2_106, %c0_107, %c0_108] : memref<3x3x256x128xf32, #tpu.memory_space<vmem>>, vector<1x1x256x128xf32>
    %100 = vector.shape_cast %99 : vector<1x1x256x128xf32> to vector<256x128xf32>
    %cst_109 = arith.constant dense<0.000000e+00> : vector<128x128xf32>
    %101 = tpu.matmul %98, %100, %cst_109 {dimension_numbers = #tpu.dot_dimension_numbers<[1], [0], [0], [1], [0, 0, 1, 1], [], []>} : vector<128x256xf32>, vector<256x128xf32>, vector<128x128xf32> -> vector<128x128xf32>
    %102 = arith.addf %97, %101 : vector<128x128xf32>
    %c39_110 = arith.constant 39 : index
    %c0_111 = arith.constant 0 : index
    %103 = vector.load %arg9[%c39_110, %c0_111] : memref<176x256xf32, #tpu.memory_space<vmem>>, vector<128x256xf32>
    %c2_112 = arith.constant 2 : index
    %c0_113 = arith.constant 0 : index
    %c0_114 = arith.constant 0 : index
    %c0_115 = arith.constant 0 : index
    %104 = vector.load %arg5[%c2_112, %c0_113, %c0_114, %c0_115] : memref<3x3x256x128xf32, #tpu.memory_space<vmem>>, vector<1x1x256x128xf32>
    %105 = vector.shape_cast %104 : vector<1x1x256x128xf32> to vector<256x128xf32>
    %cst_116 = arith.constant dense<0.000000e+00> : vector<128x128xf32>
    %106 = tpu.matmul %103, %105, %cst_116 {dimension_numbers = #tpu.dot_dimension_numbers<[1], [0], [0], [1], [0, 0, 1, 1], [], []>} : vector<128x256xf32>, vector<256x128xf32>, vector<128x128xf32> -> vector<128x128xf32>
    %107 = arith.addf %102, %106 : vector<128x128xf32>
    %c40_117 = arith.constant 40 : index
    %c0_118 = arith.constant 0 : index
    %108 = vector.load %arg9[%c40_117, %c0_118] : memref<176x256xf32, #tpu.memory_space<vmem>>, vector<128x256xf32>
    %c2_119 = arith.constant 2 : index
    %c1_120 = arith.constant 1 : index
    %c0_121 = arith.constant 0 : index
    %c0_122 = arith.constant 0 : index
    %109 = vector.load %arg5[%c2_119, %c1_120, %c0_121, %c0_122] : memref<3x3x256x128xf32, #tpu.memory_space<vmem>>, vector<1x1x256x128xf32>
    %110 = vector.shape_cast %109 : vector<1x1x256x128xf32> to vector<256x128xf32>
    %cst_123 = arith.constant dense<0.000000e+00> : vector<128x128xf32>
    %111 = tpu.matmul %108, %110, %cst_123 {dimension_numbers = #tpu.dot_dimension_numbers<[1], [0], [0], [1], [0, 0, 1, 1], [], []>} : vector<128x256xf32>, vector<256x128xf32>, vector<128x128xf32> -> vector<128x128xf32>
    %112 = arith.addf %107, %111 : vector<128x128xf32>
    %c41_124 = arith.constant 41 : index
    %c0_125 = arith.constant 0 : index
    %113 = vector.load %arg9[%c41_124, %c0_125] : memref<176x256xf32, #tpu.memory_space<vmem>>, vector<128x256xf32>
    %c2_126 = arith.constant 2 : index
    %c2_127 = arith.constant 2 : index
    %c0_128 = arith.constant 0 : index
    %c0_129 = arith.constant 0 : index
    %114 = vector.load %arg5[%c2_126, %c2_127, %c0_128, %c0_129] : memref<3x3x256x128xf32, #tpu.memory_space<vmem>>, vector<1x1x256x128xf32>
    %115 = vector.shape_cast %114 : vector<1x1x256x128xf32> to vector<256x128xf32>
    %cst_130 = arith.constant dense<0.000000e+00> : vector<128x128xf32>
    %116 = tpu.matmul %113, %115, %cst_130 {dimension_numbers = #tpu.dot_dimension_numbers<[1], [0], [0], [1], [0, 0, 1, 1], [], []>} : vector<128x256xf32>, vector<256x128xf32>, vector<128x128xf32> -> vector<128x128xf32>
    %117 = arith.addf %112, %116 : vector<128x128xf32>
    %118 = math.tanh %117 : vector<128x128xf32>
    %119 = tpu.iota {dimensions = array<i32: 0>} : vector<128x1xi32>
    %c16_i32 = arith.constant 16 : i32
    %c0_i32_131 = arith.constant 0 : i32
    %120 = arith.cmpi eq, %c16_i32, %c0_i32_131 : i32
    %c1_i32 = arith.constant 1 : i32
    %121 = arith.select %120, %c1_i32, %c16_i32 : i32
    %122 = vector.broadcast %121 : i32 to vector<128x1xi32>
    %123 = arith.remsi %119, %122 : vector<128x1xi32>
    %c0_i32_132 = arith.constant 0 : i32
    %124 = vector.broadcast %c0_i32_132 : i32 to vector<128x1xi32>
    %125 = arith.cmpi ne, %123, %124 : vector<128x1xi32>
    %c0_i32_133 = arith.constant 0 : i32
    %126 = vector.broadcast %c0_i32_133 : i32 to vector<128x1xi32>
    %127 = arith.cmpi slt, %123, %126 : vector<128x1xi32>
    %c0_i32_134 = arith.constant 0 : i32
    %128 = arith.cmpi slt, %121, %c0_i32_134 : i32
    %129 = vector.broadcast %128 : i1 to vector<128x1xi1>
    %130 = vector.broadcast %129 : vector<128x1xi1> to vector<128x1xi1>
    %131 = arith.xori %127, %130 : vector<128x1xi1>
    %132 = arith.andi %131, %125 : vector<128x1xi1>
    %133 = vector.broadcast %121 : i32 to vector<128x1xi32>
    %134 = arith.addi %123, %133 : vector<128x1xi32>
    %135 = arith.select %132, %134, %123 : vector<128x1xi1>, vector<128x1xi32>
    %c8_i32 = arith.constant 8 : i32
    %136 = vector.broadcast %c8_i32 : i32 to vector<128x1xi32>
    %137 = arith.cmpi slt, %135, %136 : vector<128x1xi32>
    %138 = arith.extui %137 : vector<128x1xi1> to vector<128x1xi32>
    %139 = arith.sitofp %138 : vector<128x1xi32> to vector<128x1xf32>
    %140 = arith.subf %118, %5 : vector<128x128xf32>
    %141 = arith.mulf %67, %140 : vector<128x128xf32>
    %142 = arith.addf %5, %141 : vector<128x128xf32>
    %143 = vector.broadcast %139 : vector<128x1xf32> to vector<128x128xf32>
    %144 = arith.mulf %142, %143 : vector<128x128xf32>
    %c0_135 = arith.constant 0 : index
    %c0_136 = arith.constant 0 : index
    %145 = vector.load %arg8[%c0_135, %c0_136] : memref<128x128xf32, #tpu.memory_space<vmem>>, vector<128x128xf32>
    tpu.vector_store %arg8[%c0_135, %c0_136], %144 {strides = array<i32>} : memref<128x128xf32, #tpu.memory_space<vmem>>, vector<128x128xf32>,
    %c0_137 = arith.constant 0 : index
    %c0_138 = arith.constant 0 : index
    %c0_139 = arith.constant 0 : index
    %c0_140 = arith.constant 0 : index
    %146 = vector.load %arg7[%c0_137, %c0_138, %c0_139, %c0_140] : memref<1x1x128x128xf32, #tpu.memory_space<vmem>>, vector<1x1x128x128xf32>
    %147 = vector.shape_cast %146 : vector<1x1x128x128xf32> to vector<128x128xf32>
    %148 = vector.shape_cast %144 : vector<128x128xf32> to vector<1x1x128x128xf32>
    tpu.vector_store %arg7[%c0_137, %c0_138, %c0_139, %c0_140], %148 {strides = array<i32>} : memref<1x1x128x128xf32, #tpu.memory_space<vmem>>, vector<1x1x128x128xf32>,
    return
  }
  func.func @transform_0(%arg0: i32, %arg1: i32) -> (i32, i32, i32, i32) {
    %c0_i32 = arith.constant 0 : i32
    %c0_i32_0 = arith.constant 0 : i32
    %c0_i32_1 = arith.constant 0 : i32
    return %arg0, %arg1, %c0_i32, %c0_i32_0 : i32, i32, i32, i32
  }
  func.func @transform_1(%arg0: i32, %arg1: i32) -> (i32, i32, i32, i32) {
    %c0_i32 = arith.constant 0 : i32
    %c0_i32_0 = arith.constant 0 : i32
    %c0_i32_1 = arith.constant 0 : i32
    %c0_i32_2 = arith.constant 0 : i32
    %c0_i32_3 = arith.constant 0 : i32
    return %c0_i32, %c0_i32_0, %c0_i32_1, %c0_i32_2 : i32, i32, i32, i32
  }
  func.func @transform_2(%arg0: i32, %arg1: i32) -> (i32, i32) {
    %c0_i32 = arith.constant 0 : i32
    %c0_i32_0 = arith.constant 0 : i32
    %c0_i32_1 = arith.constant 0 : i32
    return %c0_i32, %c0_i32_0 : i32, i32
  }
  func.func @transform_3(%arg0: i32, %arg1: i32) -> (i32, i32, i32, i32) {
    %c0_i32 = arith.constant 0 : i32
    %c0_i32_0 = arith.constant 0 : i32
    %c0_i32_1 = arith.constant 0 : i32
    %c0_i32_2 = arith.constant 0 : i32
    %c0_i32_3 = arith.constant 0 : i32
    return %c0_i32, %c0_i32_0, %c0_i32_1, %c0_i32_2 : i32, i32, i32, i32
  }
  func.func @transform_4(%arg0: i32, %arg1: i32) -> (i32, i32) {
    %c0_i32 = arith.constant 0 : i32
    %c0_i32_0 = arith.constant 0 : i32
    %c0_i32_1 = arith.constant 0 : i32
    return %c0_i32, %c0_i32_0 : i32, i32
  }
  func.func @transform_5(%arg0: i32, %arg1: i32) -> (i32, i32, i32, i32) {
    %c0_i32 = arith.constant 0 : i32
    %c0_i32_0 = arith.constant 0 : i32
    %c0_i32_1 = arith.constant 0 : i32
    return %arg0, %arg1, %c0_i32, %c0_i32_0 : i32, i32, i32, i32
  }
}

</mosaic_0001>

<bundles_post_ra>
// kernel: conv_rnn_forward.2
= control target key start
LH: loop header
LB: loop body
LE: loop exit
PB: predicated region body
PF: predicated region fallthrough
CT: control target
= control target key end

     0   :  { %s9557_s18 = smov 0   ;;  %s9559_s19 = smov 0   ;;  %s17229_s0 = inlined_call_operand.vmem [shape: f32[2,8,128,128], index: 0, kind: input, shape index: {}]   ;;  %s17230_s1 = inlined_call_operand.vmem [shape: f32[3,3,256,256], index: 1, kind: input, shape index: {}]   ;;  %s17231_s2 = inlined_call_operand.vmem [shape: f32[1,256], index: 2, kind: input, shape index: {}]   ;;  %s17232_s3 = inlined_call_operand.vmem [shape: f32[3,3,256,128], index: 3, kind: input, shape index: {}]   ;;  %s17233_s4 = inlined_call_operand.vmem [shape: f32[1,128], index: 4, kind: input, shape index: {}]   ;;  %s17234_s5 = inlined_call_operand.vmem [shape: f32[2,8,128,128], index: 5, kind: output, shape index: {}]  }
   0x1   :  { %s9561_s20 = smov 0   ;;  %s9563_s21 = smov 0  }
   0x2   :  { %s9565_s22 = smov 0  }
   0x3 LB: > { %s24_s23 = sadd.s32 1, %s9516_s20  ;;  %s27_s24 = sadd.s32 1, %s9520_s21  ;;  %s9524_s22 = sphi %s9565_s22, %s15_s22   ;;  %s9520_s21 = sphi %s9563_s21, %s18261_s21   ;;  %s9516_s20 = sphi %s9561_s20, %s18260_s20   ;;  %s9512_s19 = sphi %s9559_s19, %s18259_s19   ;;  %s9508_s18 = sphi %s9557_s18, %s18258_s18  }
   0x4   : > { %p25_p0 = scmp.ge.s32.totalorder %s24_s23, 8  ;;  %p8303_p1 = scmp.ge.s32.totalorder %s9524_s22, 1 }
   0x5   : > { %p207_p2 = scmp.lt.s32.totalorder %s9524_s22, 17 }
   0x6   : > { %s18263_s23 = smov (%p25_p0, %s24_s23), 0  ;;  %s18265_s24 = smov (!%p25_p0, %s27_s24), %s9520_s21 }
   0x7   : > { %p208_p3 = pnand %p8303_p1, %p207_p2  ;;  %p29_p4 = scmp.ge.s32.totalorder %s18265_s24, 2 }
   0x9   : > { %s18267_s24 = smov (%p29_p4, %s18265_s24), 0  ;;  %211 = sbr.rel (%p208_p3) target bundleno = 1986 (0x7c2), region = 40 }
   0xe   : > { %p243_p5 = scmp.lt.s32.totalorder %s9512_s19, 1  ;;  %p245_p6 = scmp.lt.s32.totalorder %s9508_s18, 7 }
   0xf   : > { %p8310_p7 = scmp.ne.s32.totalorder %s9508_s18, 0 }
  0x10   : > { %s18269_s19 = smov (!%p243_p5, %s9512_s19), 1 }
  0x11   : > { %s246_s25 = scalar_select %p245_p6, %s9508_s18, 7 }
  0x12   : > { %s8305_s26 = sshll.u32 %s18269_s19, 7  ;;  %264 = sbr.rel (%p8310_p7) target bundleno = 52 (0x34), region = 44 }
  0x13   : > { %s8304_s27 = sshll.u32 %s246_s25, 4 }
  0x14   : > { %s249_s28 = sadd.s32 %s8305_s26, %s8304_s27 }
  0x15   : > { %s8306_s29 = sshll.u32 %s249_s28, 3 }
  0x16   : > { %s9590_s7 = scalar_lea.vmem %s17229_s0, %s8306_s29  ;;  %s9595_s10 = scalar_lea.vmem %s17234_s5, %s8306_s29 }
  0x17   : > { %v9526_v0 = vmov 0.0  }
  0x18   : > { %265 = vst [vmem:[#allocation2 + $0x30] sm:$0xff] %v9526_v0 }
  0x19   : > { %266 = vst [vmem:[#allocation2] sm:$0xff] %v9526_v0 }
  0x1a   : > { %267 = vst [vmem:[#allocation2 + $0x58] sm:$0xff] %v9526_v0 }
  0x1b   : > { %268 = vst [vmem:[#allocation2 + $0x18] sm:$0xff] %v9526_v0 }
  0x1c   : > { %269 = vst [vmem:[#allocation2 + $0x50] sm:$0xff] %v9526_v0 }
  0x1d   : > { %270 = vst [vmem:[#allocation2 + $0x68] sm:$0xff] %v9526_v0 }
  0x1e   : > { %271 = vst [vmem:[#allocation2 + $0x8] sm:$0xff] %v9526_v0 }
  0x1f   : > { %272 = vst [vmem:[#allocation2 + $0x48] sm:$0xff] %v9526_v0 }
  0x20   : > { %273 = vst [vmem:[#allocation2 + $0x40] sm:$0xff] %v9526_v0 }
  0x21   : > { %274 = vst [vmem:[#allocation2 + $0x20] sm:$0xff] %v9526_v0 }
  0x22   : > { %275 = vst [vmem:[#allocation2 + $0x10] sm:$0xff] %v9526_v0 }
  0x23   : > { %276 = vst [vmem:[#allocation2 + $0x38] sm:$0xff] %v9526_v0 }
  0x24   : > { %277 = vst [vmem:[#allocation2 + $0x60] sm:$0xff] %v9526_v0 }
  0x25   : > { %278 = vst [vmem:[#allocation2 + $0x70] sm:$0xff] %v9526_v0 }
  0x26   : > { %279 = vst [vmem:[#allocation2 + $0x78] sm:$0xff] %v9526_v0 }
  0x27   : > { %280 = vst [vmem:[#allocation2 + $0x28] sm:$0xff] %v9526_v0 }
  0x28   : > { %281 = vst [vmem:[#allocation3 + $0xc0] sm:$0xff] %v9526_v0 }
  0x29   : > { %282 = vst [vmem:[#allocation3 + $0x40] sm:$0xff] %v9526_v0 }
  0x2a   : > { %283 = vst [vmem:[#allocation3 + $0x98] sm:$0xff] %v9526_v0 }
  0x2b   : > { %284 = vst [vmem:[#allocation3 + $0xf0] sm:$0xff] %v9526_v0 }
  0x2c   : > { %285 = vst [vmem:[#allocation3 + $0x100] sm:$0xff] %v9526_v0 }
  0x2d   : > { %286 = vst [vmem:[#allocation3 + $0x8] sm:$0xff] %v9526_v0 }
  0x2e   : > { %287 = vst [vmem:[#allocation3 + $0xd8] sm:$0xff] %v9526_v0 }
  0x2f   : > { %288 = vst [vmem:[#allocation3 + $0xf8] sm:$0xff] %v9526_v0 }
  0x30   : > { %289 = vst [vmem:[#allocation3 + $0x58] sm:$0xff] %v9526_v0 }
  0x31   : > { %290 = vst [vmem:[#allocation3 + $0x60] sm:$0xff] %v9526_v0 }
  0x32   : > { %291 = vst [vmem:[#allocation3 + $0x38] sm:$0xff] %v9526_v0 }
  0x33   : > { %292 = vst [vmem:[#allocation3 + $0xd0] sm:$0xff] %v9526_v0 }
  0x34 PF: > { %v427_v1 = vld [vmem:[%s17230_s1 + $0xf0] sm:$0xff]  ;;  %v425_v3 = vld [vmem:[%s17230_s1 + $0xe0] sm:$0xff]  ;;  %v9640_v15 = vld [vmem:[%s9590_s7 + $0x28] sm:$0xff]  ;;  %vm495_vm0 = vcmask 1040384   ;;  %vm1378_vm1 = vcmask 1046528  }
  0x35   : > { %v459_v2 = vld [vmem:[%s17230_s1 + $0x1f0] sm:$0xff]  ;;  %594 = vmatpush.msra.mxu0 %v427_v1  ;;  %9113 = vmatpush.msra.mxu2 %v427_v1  ;;  %v457_v4 = vld [vmem:[%s17230_s1 + $0x1e0] sm:$0xff]  ;;  %330 = vst [vmem:[#allocation3 + $0x110] sm:$0xff] %v9640_v15  ;;  %v9653_v19 = vld [vmem:[#allocation2 + $0x68] sm:$0xff]  ;;  %v17236_v50 = vrot.slane %v9640_v15, 7 }
  0x36   : > { %659 = vmatpush.msra.mxu1 %v459_v2  ;;  %9129 = vmatpush.msra.mxu3 %v459_v2  ;;  %v423_v5 = vld [vmem:[%s17230_s1 + $0xd0] sm:$0xff]  ;;  %v421_v7 = vld [vmem:[%s17230_s1 + $0xc0] sm:$0xff]  ;;  %v9658_v21 = vld [vmem:[#allocation2 + $0x8] sm:$0xff]  ;;  %346 = vst [vmem:[#allocation3 + $0x158] sm:$0xff] %v9653_v19  ;;  %v17235_v55 = vrot.slane %v9653_v19, 7 }
  0x37   : > { %595 = vmatpush.msra.mxu0 %v425_v3  ;;  %9114 = vmatpush.msra.mxu2 %v425_v3  ;;  %v455_v6 = vld [vmem:[%s17230_s1 + $0x1d0] sm:$0xff]  ;;  %v453_v8 = vld [vmem:[%s17230_s1 + $0x1c0] sm:$0xff]  ;;  %347 = vst [vmem:[#allocation3 + $0xe0] sm:$0xff] %v9658_v21  ;;  %v9666_v23 = vld [vmem:[%s9590_s7 + $0x38] sm:$0xff]  ;;  %v532_v56 = vrot.slane %v9658_v21, 7 }
  0x38   : > { %660 = vmatpush.msra.mxu1 %v457_v4  ;;  %9130 = vmatpush.msra.mxu3 %v457_v4  ;;  %v419_v9 = vld [vmem:[%s17230_s1 + $0xb0] sm:$0xff]  ;;  %v417_v11 = vld [vmem:[%s17230_s1 + $0xa0] sm:$0xff]  ;;  %332 = vst [vmem:[#allocation3 + $0x80] sm:$0xff] %v9666_v23  ;;  %v9672_v25 = vld [vmem:[#allocation2 + $0x48] sm:$0xff] }
  0x39   : > { %596 = vmatpush.msra.mxu0 %v423_v5  ;;  %9115 = vmatpush.msra.mxu2 %v423_v5  ;;  %v451_v10 = vld [vmem:[%s17230_s1 + $0x1b0] sm:$0xff]  ;;  %v449_v12 = vld [vmem:[%s17230_s1 + $0x1a0] sm:$0xff]  ;;  %348 = vst [vmem:[#allocation3 + $0x20] sm:$0xff] %v9672_v25  ;;  %v9714_v39 = vld [vmem:[%s9590_s7 + $0x8] sm:$0xff]  ;;  %v9779_v0 = vsel %vm495_vm0, %v17235_v55, %v532_v56 }
  0x3a   : > { %661 = vmatpush.msra.mxu1 %v455_v6  ;;  %9131 = vmatpush.msra.mxu3 %v455_v6  ;;  %v415_v13 = vld [vmem:[%s17230_s1 + $0x90] sm:$0xff]  ;;  %v413_v16 = vld [vmem:[%s17230_s1 + $0x80] sm:$0xff]  ;;  %v9716_v40 = vld [vmem:[#allocation3 + $0x98] sm:$0xff]  ;;  %326 = vst [vmem:[#allocation3 + $0xe8] sm:$0xff] %v9714_v39 }
  0x3b   : > { %597 = vmatpush.msra.mxu0 %v421_v7  ;;  %9116 = vmatpush.msra.mxu2 %v421_v7  ;;  %v447_v14 = vld [vmem:[%s17230_s1 + $0x190] sm:$0xff]  ;;  %v445_v18 = vld [vmem:[%s17230_s1 + $0x180] sm:$0xff]  ;;  %v9720_v42 = vld [vmem:[%s9590_s7 + $0x48] sm:$0xff]  ;;  %v497_v49 = vrot.slane %v9716_v40, 7 }
  0x3c   : > { %662 = vmatpush.msra.mxu1 %v453_v8  ;;  %9132 = vmatpush.msra.mxu3 %v453_v8  ;;  %v9646_v17 = vld [vmem:[%s9590_s7 + $0x30] sm:$0xff]  ;;  %v409_v24 = vld [vmem:[%s17230_s1 + $0x60] sm:$0xff]  ;;  %334 = vst [vmem:[#allocation3 + $0x88] sm:$0xff] %v9720_v42  ;;  %v9787_v3 = vld [vmem:[#allocation2 + $0x58] sm:$0xff] }
  0x3d   : > { %598 = vmatpush.msra.mxu0 %v419_v9  ;;  %9117 = vmatpush.msra.mxu2 %v419_v9  ;;  %331 = vst [vmem:[#allocation3 + $0x128] sm:$0xff] %v9646_v17  ;;  %v411_v20 = vld [vmem:[%s17230_s1 + $0x70] sm:$0xff]  ;;  %v441_v26 = vld [vmem:[%s17230_s1 + $0x160] sm:$0xff]  ;;  %v530_v51 = vrot.slane %v9646_v17, 7  ;;  %v9792_v5 = vld [vmem:[#allocation3 + $0x8] sm:$0xff] }
  0x3e   : > { %663 = vmatpush.msra.mxu1 %v451_v10  ;;  %9133 = vmatpush.msra.mxu3 %v451_v10  ;;  %v443_v22 = vld [vmem:[%s17230_s1 + $0x170] sm:$0xff]  ;;  %v9682_v28 = vld [vmem:[%s9590_s7] sm:$0xff]  ;;  %343 = vst [vmem:[#allocation3] sm:$0xff] %v9787_v3  ;;  %v428_v7 = vld [vmem:[%s17230_s1 + $0xf8] sm:$0xff] }
  0x3f   : > { %599 = vmatpush.msra.mxu0 %v417_v11  ;;  %9118 = vmatpush.msra.mxu2 %v417_v11  ;;  %v407_v27 = vld [vmem:[%s17230_s1 + $0x50] sm:$0xff]  ;;  %325 = vst [vmem:[#allocation3 + $0x30] sm:$0xff] %v9682_v28  ;;  %v9689_v30 = vld [vmem:[%s9590_s7 + $0x40] sm:$0xff]  ;;  %v9766_v61 = vsel %vm495_vm0, %v17236_v50, %v530_v51  ;;  %v460_v8 = vld [vmem:[%s17230_s1 + $0x1f8] sm:$0xff] }
  0x40   : > { %664 = vmatpush.msra.mxu1 %v449_v12  ;;  %9134 = vmatpush.msra.mxu3 %v449_v12  ;;  %v439_v29 = vld [vmem:[%s17230_s1 + $0x150] sm:$0xff]  ;;  %v405_v31 = vld [vmem:[%s17230_s1 + $0x40] sm:$0xff]  ;;  %333 = vst [vmem:[#allocation3 + $0x70] sm:$0xff] %v9689_v30  ;;  %v534_v12 = vrot.slane %v9666_v23, 7  ;;  %v440_v50 = vld [vmem:[%s17230_s1 + $0x158] sm:$0xff] }
  0x41   : > { %600 = vmatpush.msra.mxu0 %v415_v13  ;;  %9119 = vmatpush.msra.mxu2 %v415_v13  ;;  %v437_v32 = vld [vmem:[%s17230_s1 + $0x140] sm:$0xff]  ;;  %v9698_v33 = vld [vmem:[#allocation2 + $0x30] sm:$0xff]  ;;  %v504_v13 = vrot.slane %v9792_v5, 7 }
  0x42   : > { %665 = vmatpush.msra.mxu1 %v447_v14  ;;  %9135 = vmatpush.msra.mxu3 %v447_v14  ;;  %v403_v34 = vld [vmem:[%s17230_s1 + $0x30] sm:$0xff]  ;;  %341 = vst [vmem:[#allocation3 + $0xb0] sm:$0xff] %v9698_v33  ;;  %v9707_v36 = vld [vmem:[#allocation2 + $0x40] sm:$0xff]  ;;  %v536_v14 = vrot.slane %v9672_v25, 7 }
  0x43   : > { %601 = vmatpush.msra.mxu0 %v413_v16  ;;  %9120 = vmatpush.msra.mxu2 %v413_v16  ;;  %v435_v35 = vld [vmem:[%s17230_s1 + $0x130] sm:$0xff]  ;;  %v401_v37 = vld [vmem:[%s17230_s1 + $0x20] sm:$0xff]  ;;  %349 = vst [vmem:[#allocation3 + $0x50] sm:$0xff] %v9707_v36  ;;  %v426_v16 = vld [vmem:[%s17230_s1 + $0xe8] sm:$0xff] }
  0x44   : > { %666 = vmatpush.msra.mxu1 %v445_v18  ;;  %9136 = vmatpush.msra.mxu3 %v445_v18  ;;  %v363_v38 = vld [vmem:[#allocation3 + $0xc0] sm:$0x80]  ;;  %v9722_v43 = vld [vmem:[#allocation3 + $0xf0] sm:$0xff]  ;;  %v458_v18 = vld [vmem:[%s17230_s1 + $0x1e8] sm:$0xff] }
  0x45   : > { %602 = vmatpush.msra.mxu0 %v411_v20  ;;  %9121 = vmatpush.msra.mxu2 %v411_v20  ;;  %v364_v41 = vld [vmem:[#allocation3 + $0x40] sm:$0x80]  ;;  %v399_v47 = vld [vmem:[%s17230_s1 + $0x10] sm:$0xff]  ;;  %v496_v48 = vrot.slane %v363_v38, 7  ;;  %v500_v54 = vrot.slane %v9722_v43, 7 }
  0x46   : > { %667 = vmatpush.msra.mxu1 %v443_v22  ;;  %9137 = vmatpush.msra.mxu3 %v443_v22  ;;  %v9725_v44 = vld [vmem:[#allocation2] sm:$0xff]  ;;  %v431_v52 = vld [vmem:[%s17230_s1 + $0x110] sm:$0xff]  ;;  %v499_v53 = vrot.slane %v364_v41, 7 }
  0x47   : > { %603 = vmatpush.msra.mxu0 %v409_v24  ;;  %9122 = vmatpush.msra.mxu2 %v409_v24  ;;  %v433_v45 = vld [vmem:[%s17230_s1 + $0x120] sm:$0xff]  ;;  %342 = vst [vmem:[#allocation3 + $0x48] sm:$0xff] %v9725_v44  ;;  %v9750_v58 = vld [vmem:[%s9590_s7 + $0x10] sm:$0xff]  ;;  %v9759_v60 = vsel %vm495_vm0, %v496_v48, %v497_v49  ;;  %v9831_v24 = vld [vmem:[%s9590_s7 + $0x18] sm:$0xff] }
  0x48   : > { %668 = vmatpush.msra.mxu1 %v441_v26  ;;  %9138 = vmatpush.msra.mxu3 %v441_v26  ;;  %v9731_v46 = vld [vmem:[#allocation2 + $0x20] sm:$0xff]  ;;  %327 = vst [vmem:[#allocation3 + $0x68] sm:$0xff] %v9750_v58  ;;  %v9769_v62 = vld [vmem:[%s9590_s7 + $0x50] sm:$0xff]  ;;  %v9774_v63 = vsel %vm495_vm0, %v499_v53, %v500_v54  ;;  %v424_v26 = vld [vmem:[%s17230_s1 + $0xd8] sm:$0xff] }
  0x49   : > { %604 = vmatpush.msra.mxu0 %v407_v27  ;;  %9123 = vmatpush.msra.mxu2 %v407_v27  ;;  %350 = vst [vmem:[#allocation3 + $0x118] sm:$0xff] %v9731_v46  ;;  %v397_v57 = vld [vmem:[%s17230_s1] sm:$0xff]  ;;  %v8341_v1 = vld [vmem:[%s17230_s1 + $0x2f0] sm:$0xff]  ;;  %v456_v27 = vld [vmem:[%s17230_s1 + $0x1d8] sm:$0xff] }
  0x4a   : > { %669 = vmatpush.msra.mxu1 %v439_v29  ;;  %9139 = vmatpush.msra.mxu3 %v439_v29  ;;  %v429_v59 = vld [vmem:[%s17230_s1 + $0x100] sm:$0xff]  ;;  %17386 = vst [vmem:[#allocation4_spill] sm:$0xff] %v9769_v62  ;;  %v8373_v4 = vld [vmem:[%s17230_s1 + $0x3f0] sm:$0xff]  ;;  %v454_v48 = vld [vmem:[%s17230_s1 + $0x1c8] sm:$0xff] }
  0x4b   : > { %605 = vmatpush.msra.mxu0 %v405_v31  ;;  %9124 = vmatpush.msra.mxu2 %v405_v31  ;;  %v9784_v2 = vld [vmem:[#allocation3 + $0x100] sm:$0xff]  ;;  %335 = vst [vmem:[#allocation3 + $0x130] sm:$0xff] %v9769_v62  ;;  %v9795_v6 = vld [vmem:[#allocation2 + $0x10] sm:$0xff]  ;;  %v9852_v31 = vsel %vm495_vm0, %v530_v51, %v534_v12  ;;  %v538_v51 = vrot.slane %v9689_v30, 7 }
  0x4c   : > { %670 = vmatpush.msra.mxu1 %v437_v32  ;;  %9140 = vmatpush.msra.mxu3 %v437_v32  ;;  %17387 = vst [vmem:[#allocation5_spill] sm:$0xff] %v9795_v6  ;;  %v8339_v9 = vld [vmem:[%s17230_s1 + $0x2e0] sm:$0xff]  ;;  %v502_v11 = vrot.slane %v9784_v2, 7  ;;  %v8337_v20 = vld [vmem:[%s17230_s1 + $0x2d0] sm:$0xff]  ;;  %v9855_v32 = vld [vmem:[%s9590_s7 + $0x58] sm:$0xff] }
  0x4d   : > { %606 = vmatpush.msra.mxu0 %v403_v34  ;;  %9125 = vmatpush.msra.mxu2 %v403_v34  ;;  %351 = vst [vmem:[#allocation3 + $0x108] sm:$0xff] %v9795_v6  ;;  %v8371_v10 = vld [vmem:[%s17230_s1 + $0x3e0] sm:$0xff]  ;;  %v8369_v22 = vld [vmem:[%s17230_s1 + $0x3d0] sm:$0xff]  ;;  %v9862_v34 = vsel %vm495_vm0, %v500_v54, %v504_v13  ;;  %v508_v54 = vrot.slane %v9698_v33, 7 }
  0x4e   : > { %671 = vmatpush.msra.mxu1 %v435_v35  ;;  %9141 = vmatpush.msra.mxu3 %v435_v35  ;;  %328 = vst [vmem:[#allocation3 + $0x148] sm:$0xff] %v9831_v24  ;;  %v9845_v29 = vsel %vm495_vm0, %v497_v49, %v502_v11  ;;  %v9867_v35 = vsel %vm495_vm0, %v532_v56, %v536_v14  ;;  %v8335_v38 = vld [vmem:[%s17230_s1 + $0x2c0] sm:$0xff]  ;;  %v506_v49 = vrot.slane %v9682_v28, 7  ;;  %v8365_v53 = vld [vmem:[%s17230_s1 + $0x3b0] sm:$0xff]  ;;  %v540_v56 = vrot.slane %v9707_v36, 7 }
  0x4f   : > { %607 = vmatpush.msra.mxu0 %v401_v37  ;;  %9126 = vmatpush.msra.mxu2 %v401_v37  ;;  %17388 = vst [vmem:[#allocation6_spill] sm:$0xff] %v9855_v32  ;;  %v9870_v37 = vld [vmem:[#allocation2 + $0x18] sm:$0xff]  ;;  %v8367_v41 = vld [vmem:[%s17230_s1 + $0x3c0] sm:$0xff] }
  0x50   : > { %672 = vmatpush.msra.mxu1 %v433_v45  ;;  %9142 = vmatpush.msra.mxu3 %v433_v45  ;;  %336 = vst [vmem:[#allocation3 + $0xa8] sm:$0xff] %v9855_v32  ;;  %v9879_v45 = vld [vmem:[#allocation2 + $0x38] sm:$0xff] }
  0x51   : > { %608 = vmatpush.msra.mxu0 %v399_v47  ;;  %9127 = vmatpush.msra.mxu2 %v399_v47  ;;  %344 = vst [vmem:[#allocation3 + $0x18] sm:$0xff] %v9870_v37  ;;  %v422_v47 = vld [vmem:[%s17230_s1 + $0xc8] sm:$0xff] }
  0x52   : > { %673 = vmatpush.msra.mxu1 %v431_v52  ;;  %9143 = vmatpush.msra.mxu3 %v431_v52  ;;  %17389 = vst [vmem:[#allocation7_spill] sm:$0xff] %v9879_v45  ;;  %v8333_v52 = vld [vmem:[%s17230_s1 + $0x2b0] sm:$0xff] }
  0x53   : > { %609 = vmatpush.msra.mxu0 %v397_v57  ;;  %9128 = vmatpush.msra.mxu2 %v397_v57  ;;  %352 = vst [vmem:[#allocation3 + $0xb8] sm:$0xff] %v9879_v45  ;;  %v420_v57 = vld [vmem:[%s17230_s1 + $0xb8] sm:$0xff] }
  0x54   : > { %674 = vmatpush.msra.mxu1 %v429_v59  ;;  %9144 = vmatpush.msra.mxu3 %v429_v59  ;;  %v452_v59 = vld [vmem:[%s17230_s1 + $0x1b8] sm:$0xff] }
  0x55   : > { %610 = vmatmul.f32.vlgmr.msra.gmra.mxu0 %v9759_v60  ;;  %634 = vmatmul.f32.vlgmr.msra.gmra.mxu2 %v9766_v61 }
  0x56   : > { %675 = vmatmul.f32.vlgmr.msra.gmra.mxu1 %v9774_v63  ;;  %699 = vmatmul.f32.vlgmr.msra.gmra.mxu3 %v9779_v0 }
  0x57   : > { %953 = vmatpush.msrb.mxu0 %v8341_v1  ;;  %1018 = vmatpush.msrb.mxu1 %v8373_v4  ;;  %v8331_v1 = vld [vmem:[%s17230_s1 + $0x2a0] sm:$0xff] }
  0x58   : > { %724 = vmatpush.msrb.mxu2 %v428_v7  ;;  %789 = vmatpush.msrb.mxu3 %v460_v8  ;;  %v8363_v4 = vld [vmem:[%s17230_s1 + $0x3a0] sm:$0xff]  ;;  %v418_v8 = vld [vmem:[%s17230_s1 + $0xa8] sm:$0xff] }
  0x59   : > { %954 = vmatpush.msrb.mxu0 %v8339_v9  ;;  %1019 = vmatpush.msrb.mxu1 %v8371_v10  ;;  %v9915_v7 = vld [vmem:[%s9590_s7 + $0x20] sm:$0xff]  ;;  %v450_v9 = vld [vmem:[%s17230_s1 + $0x1a8] sm:$0xff]  ;;  %v9929_v10 = vsel %vm495_vm0, %v502_v11, %v506_v49  ;;  %v9953_v11 = vsel %vm495_vm0, %v536_v14, %v540_v56 }
  0x5a   : > { %725 = vmatpush.msrb.mxu2 %v426_v16  ;;  %790 = vmatpush.msrb.mxu3 %v458_v18  ;;  %329 = vst [vmem:[#allocation3 + $0x28] sm:$0xff] %v9915_v7  ;;  %v9936_v16 = vsel %vm495_vm0, %v534_v12, %v538_v51  ;;  %v9939_v18 = vld [vmem:[%s9590_s7 + $0x60] sm:$0xff]  ;;  %v8329_v12 = vld [vmem:[%s17230_s1 + $0x290] sm:$0xff] }
  0x5b   : > { %955 = vmatpush.msrb.mxu0 %v8337_v20  ;;  %1020 = vmatpush.msrb.mxu1 %v8369_v22  ;;  %17390 = vst [vmem:[#allocation8_spill] sm:$0xff] %v9939_v18  ;;  %v9946_v20 = vsel %vm495_vm0, %v504_v13, %v508_v54  ;;  %v9959_v22 = vld [vmem:[#allocation2 + $0x50] sm:$0xff]  ;;  %v9968_v14 = vld [vmem:[#allocation2 + $0x60] sm:$0xff] }
  0x5c   : > { %726 = vmatpush.msrb.mxu2 %v424_v26  ;;  %791 = vmatpush.msrb.mxu3 %v456_v27  ;;  %337 = vst [vmem:[#allocation3 + $0xc8] sm:$0xff] %v9939_v18  ;;  %v9962_v26 = vld [vmem:[%s9590_s7 + $0x68] sm:$0xff]  ;;  %v8361_v13 = vld [vmem:[%s17230_s1 + $0x390] sm:$0xff] }
  0x5d   : > { %613 = vmatmul.f32.gmra.mxu0 %v9845_v29  ;;  %637 = vmatmul.f32.gmra.mxu2 %v9852_v31  ;;  %17391 = vst [vmem:[#allocation9_spill] sm:$0xff] %v9962_v26  ;;  %v9970_v27 = vld [vmem:[#allocation2 + $0x70] sm:$0xff] }
  0x5e   : > { %678 = vmatmul.f32.gmra.mxu1 %v9862_v34  ;;  %702 = vmatmul.f32.gmra.mxu3 %v9867_v35  ;;  %345 = vst [vmem:[#allocation3 + $0x150] sm:$0xff] %v9959_v22 }
  0x5f   : > { %956 = vmatpush.msrb.mxu0 %v8335_v38  ;;  %1021 = vmatpush.msrb.mxu1 %v8367_v41  ;;  %17392 = vst [vmem:[#allocation10_spill] sm:$0xff] %v9968_v14  ;;  %v416_v38 = vld [vmem:[%s17230_s1 + $0x98] sm:$0xff] }
  0x60   : > { %727 = vmatpush.msrb.mxu2 %v422_v47  ;;  %792 = vmatpush.msrb.mxu3 %v454_v48  ;;  %17393 = vst [vmem:[#allocation11_spill] sm:$0xff] %v9970_v27  ;;  %v448_v41 = vld [vmem:[%s17230_s1 + $0x198] sm:$0xff]  ;;  %v510_v47 = vrot.slane %v9714_v39, 7  ;;  %v542_v48 = vrot.slane %v9720_v42, 7 }
  0x61   : > { %957 = vmatpush.msrb.mxu0 %v8333_v52  ;;  %1022 = vmatpush.msrb.mxu1 %v8365_v53  ;;  %353 = vst [vmem:[#allocation3 + $0x90] sm:$0xff] %v9968_v14  ;;  %v8327_v52 = vld [vmem:[%s17230_s1 + $0x280] sm:$0xff] }
  0x62   : > { %728 = vmatpush.msrb.mxu2 %v420_v57  ;;  %793 = vmatpush.msrb.mxu3 %v452_v59  ;;  %v8359_v53 = vld [vmem:[%s17230_s1 + $0x380] sm:$0xff]  ;;  %338 = vst [vmem:[#allocation3 + $0x140] sm:$0xff] %v9962_v26  ;;  %v512_v57 = vrot.slane %v9725_v44, 7  ;;  %v544_v59 = vrot.slane %v9731_v46, 7  ;;  %v10016_v55 = vsel %vm495_vm0, %v506_v49, %v510_v47 }
  0x63   : > { %958 = vmatpush.msrb.mxu0 %v8331_v1  ;;  %1023 = vmatpush.msrb.mxu1 %v8363_v4  ;;  %v414_v1 = vld [vmem:[%s17230_s1 + $0x88] sm:$0xff]  ;;  %354 = vst [vmem:[#allocation3 + $0x10] sm:$0xff] %v9970_v27  ;;  %v8323_v49 = vld [vmem:[%s17230_s1 + $0x260] sm:$0xff] }
  0x64   : > { %729 = vmatpush.msrb.mxu2 %v418_v8  ;;  %794 = vmatpush.msrb.mxu3 %v450_v9  ;;  %v446_v4 = vld [vmem:[%s17230_s1 + $0x188] sm:$0xff]  ;;  %v8325_v8 = vld [vmem:[%s17230_s1 + $0x270] sm:$0xff]  ;;  %v8319_v27 = vld [vmem:[%s17230_s1 + $0x240] sm:$0xff] }
  0x65   : > { %616 = vmatmul.f32.gmra.mxu0 %v9929_v10  ;;  %640 = vmatmul.f32.gmra.mxu2 %v9936_v16  ;;  %v8357_v9 = vld [vmem:[%s17230_s1 + $0x370] sm:$0xff]  ;;  %v8351_v26 = vld [vmem:[%s17230_s1 + $0x340] sm:$0xff] }
  0x66   : > { %681 = vmatmul.f32.gmra.mxu1 %v9946_v20  ;;  %705 = vmatmul.f32.gmra.mxu3 %v9953_v11 }
  0x67   : > { %959 = vmatpush.msrb.mxu0 %v8329_v12  ;;  %1024 = vmatpush.msrb.mxu1 %v8361_v13  ;;  %v412_v12 = vld [vmem:[%s17230_s1 + $0x78] sm:$0xff] }
  0x68   : > { %730 = vmatpush.msrb.mxu2 %v416_v38  ;;  %795 = vmatpush.msrb.mxu3 %v448_v41  ;;  %v444_v13 = vld [vmem:[%s17230_s1 + $0x178] sm:$0xff]  ;;  %v10021_v38 = vsel %vm495_vm0, %v538_v51, %v542_v48  ;;  %v10026_v41 = vsel %vm495_vm0, %v508_v54, %v512_v57  ;;  %v8355_v51 = vld [vmem:[%s17230_s1 + $0x360] sm:$0xff]  ;;  %v410_v54 = vld [vmem:[%s17230_s1 + $0x68] sm:$0xff] }
  0x69   : > { %960 = vmatpush.msrb.mxu0 %v8327_v52  ;;  %1025 = vmatpush.msrb.mxu1 %v8359_v53  ;;  %v10031_v52 = vsel %vm495_vm0, %v540_v56, %v544_v59  ;;  %v442_v56 = vld [vmem:[%s17230_s1 + $0x168] sm:$0xff]  ;;  %v514_v53 = vrot.slane %v9750_v58, 7 }
  0x6a   : > { %731 = vmatpush.msrb.mxu2 %v414_v1  ;;  %796 = vmatpush.msrb.mxu3 %v446_v4  ;;  %v546_v1 = vrot.slane %v9769_v62, 7  ;;  %v8321_v4 = vld [vmem:[%s17230_s1 + $0x250] sm:$0xff] }
  0x6b   : > { %961 = vmatpush.msrb.mxu0 %v8325_v8  ;;  %1026 = vmatpush.msrb.mxu1 %v8357_v9  ;;  %v8353_v8 = vld [vmem:[%s17230_s1 + $0x350] sm:$0xff]  ;;  %v516_v9 = vrot.slane %v9787_v3, 7 }
  0x6c   : > { %732 = vmatpush.msrb.mxu2 %v412_v12  ;;  %797 = vmatpush.msrb.mxu3 %v444_v13  ;;  %v548_v12 = vrot.slane %v9795_v6, 7  ;;  %v408_v13 = vld [vmem:[%s17230_s1 + $0x58] sm:$0xff]  ;;  %v10078_v6 = vsel %vm495_vm0, %v510_v47, %v514_v53  ;;  %v10081_v62 = vsel %vm495_vm0, %v542_v48, %v546_v1  ;;  %v8349_v47 = vld [vmem:[%s17230_s1 + $0x330] sm:$0xff]  ;;  %v550_v48 = vrot.slane %v9855_v32, 7 }
  0x6d   : > { %619 = vmatmul.f32.gmra.mxu0 %v10016_v55  ;;  %643 = vmatmul.f32.gmra.mxu2 %v10021_v38  ;;  %17394 = vst [vmem:[#allocation12_spill] sm:$0xff] %v10081_v62  ;;  %v8313_v32 = vld [vmem:[%s17230_s1 + $0x210] sm:$0xff] }
  0x6e   : > { %684 = vmatmul.f32.gmra.mxu1 %v10026_v41  ;;  %708 = vmatmul.f32.gmra.mxu3 %v10031_v52 }
  0x6f   : > { %962 = vmatpush.msrb.mxu0 %v8323_v49  ;;  %1027 = vmatpush.msrb.mxu1 %v8355_v51  ;;  %v406_v49 = vld [vmem:[%s17230_s1 + $0x48] sm:$0xff] }
  0x70   : > { %733 = vmatpush.msrb.mxu2 %v410_v54  ;;  %798 = vmatpush.msrb.mxu3 %v442_v56  ;;  %v438_v51 = vld [vmem:[%s17230_s1 + $0x148] sm:$0xff]  ;;  %v10084_v54 = vsel %vm495_vm0, %v512_v57, %v516_v9  ;;  %v10087_v56 = vsel %vm495_vm0, %v544_v59, %v548_v12  ;;  %v8315_v57 = vld [vmem:[%s17230_s1 + $0x220] sm:$0xff] }
  0x71   : > { %963 = vmatpush.msrb.mxu0 %v8321_v4  ;;  %1028 = vmatpush.msrb.mxu1 %v8353_v8  ;;  %17395 = vst [vmem:[#allocation13_spill] sm:$0xff] %v10087_v56  ;;  %v8317_v4 = vld [vmem:[%s17230_s1 + $0x230] sm:$0xff]  ;;  %v8347_v59 = vld [vmem:[%s17230_s1 + $0x320] sm:$0xff]  ;;  %v520_v8 = vrot.slane %v9870_v37, 7 }
  0x72   : > { %734 = vmatpush.msrb.mxu2 %v408_v13  ;;  %799 = vmatpush.msrb.mxu3 %v440_v50  ;;  %v404_v50 = vld [vmem:[%s17230_s1 + $0x38] sm:$0xff]  ;;  %v552_v13 = vrot.slane %v9879_v45, 7 }
  0x73   : > { %964 = vmatpush.msrb.mxu0 %v8319_v27  ;;  %1029 = vmatpush.msrb.mxu1 %v8351_v26  ;;  %v436_v26 = vld [vmem:[%s17230_s1 + $0x138] sm:$0xff]  ;;  %v518_v27 = vrot.slane %v9831_v24, 7 }
  0x74   : > { %735 = vmatpush.msrb.mxu2 %v406_v49  ;;  %800 = vmatpush.msrb.mxu3 %v438_v51  ;;  %v402_v49 = vld [vmem:[%s17230_s1 + $0x28] sm:$0xff] }
  0x75   : > { %622 = vmatmul.f32.gmra.mxu0 %v10078_v6  ;;  %646 = vmatmul.f32.gmra.mxu2 %v10081_v62  ;;  %v434_v51 = vld [vmem:[%s17230_s1 + $0x128] sm:$0xff]  ;;  %v10134_v45 = vsel %vm495_vm0, %v514_v53, %v518_v27  ;;  %v10137_v62 = vsel %vm495_vm0, %v546_v1, %v550_v48  ;;  %v8343_v53 = vld [vmem:[%s17230_s1 + $0x300] sm:$0xff] }
  0x76   : > { %687 = vmatmul.f32.gmra.mxu1 %v10084_v54  ;;  %711 = vmatmul.f32.gmra.mxu3 %v10087_v56  ;;  %v8345_v56 = vld [vmem:[%s17230_s1 + $0x310] sm:$0xff]  ;;  %v398_v1 = vld [vmem:[%s17230_s1 + $0x8] sm:$0xff] }
  0x77   : > { %965 = vmatpush.msrb.mxu0 %v8317_v4  ;;  %1030 = vmatpush.msrb.mxu1 %v8349_v47  ;;  %v400_v4 = vld [vmem:[%s17230_s1 + $0x18] sm:$0xff] }
  0x78   : > { %736 = vmatpush.msrb.mxu2 %v404_v50  ;;  %801 = vmatpush.msrb.mxu3 %v436_v26  ;;  %v432_v47 = vld [vmem:[%s17230_s1 + $0x118] sm:$0xff]  ;;  %v10140_v50 = vsel %vm495_vm0, %v516_v9, %v520_v8  ;;  %v10143_v26 = vsel %vm495_vm0, %v548_v12, %v552_v13  ;;  %v522_v9 = vrot.slane %v9915_v7, 7  ;;  %v554_v12 = vrot.slane %v9939_v18, 7 }
  0x79   : > { %966 = vmatpush.msrb.mxu0 %v8315_v57  ;;  %1031 = vmatpush.msrb.mxu1 %v8347_v59  ;;  %17396 = vst [vmem:[#allocation14_spill] sm:$0xff] %v10143_v26  ;;  %v8311_v57 = vld [vmem:[%s17230_s1 + $0x200] sm:$0xff]  ;;  %v8437_v59 = vld [vmem:[%s17230_s1 + $0x5f0] sm:$0xff] }
  0x7a   : > { %737 = vmatpush.msrb.mxu2 %v402_v49  ;;  %802 = vmatpush.msrb.mxu3 %v434_v51  ;;  %v524_v49 = vrot.slane %v9959_v22, 7  ;;  %v556_v51 = vrot.slane %v9968_v14, 7  ;;  %v10178_v18 = vsel %vm495_vm0, %v518_v27, %v522_v9  ;;  %v17398_v14 = vrot.slane %v9653_v19, 7 }
  0x7b   : > { %967 = vmatpush.msrb.mxu0 %v8313_v32  ;;  %1032 = vmatpush.msrb.mxu1 %v8345_v56  ;;  %v430_v32 = vld [vmem:[%s17230_s1 + $0x108] sm:$0xff]  ;;  %v8405_v56 = vld [vmem:[%s17230_s1 + $0x4f0] sm:$0xff] }
  0x7c   : > { %738 = vmatpush.msrb.mxu2 %v400_v4  ;;  %803 = vmatpush.msrb.mxu3 %v432_v47  ;;  %v8403_v4 = vld [vmem:[%s17230_s1 + $0x4e0] sm:$0xff] }
  0x7d   : > { %625 = vmatmul.f32.gmra.mxu0 %v10134_v45  ;;  %649 = vmatmul.f32.gmra.mxu2 %v10137_v62  ;;  %v8435_v47 = vld [vmem:[%s17230_s1 + $0x5e0] sm:$0xff] }
  0x7e   : > { %690 = vmatmul.f32.gmra.mxu1 %v10140_v50  ;;  %714 = vmatmul.f32.gmra.mxu3 %v10143_v26  ;;  %v10181_v26 = vsel %vm495_vm0, %v550_v48, %v554_v12  ;;  %v8401_v48 = vld [vmem:[%s17230_s1 + $0x4d0] sm:$0xff] }
  0x7f   : > { %968 = vmatpush.msrb.mxu0 %v8311_v57  ;;  %1033 = vmatpush.msrb.mxu1 %v8343_v53  ;;  %v10184_v57 = vsel %vm495_vm0, %v520_v8, %v524_v49  ;;  %v10187_v53 = vsel %vm495_vm0, %v552_v13, %v556_v51  ;;  %v8433_v8 = vld [vmem:[%s17230_s1 + $0x5d0] sm:$0xff]  ;;  %v8342_v13 = vld [vmem:[%s17230_s1 + $0x2f8] sm:$0xff] }
  0x80   : > { %739 = vmatpush.msrb.mxu2 %v398_v1  ;;  %804 = vmatpush.msrb.mxu3 %v430_v32  ;;  %v395_v1 = vld [vmem:[#allocation3 + $0x140] sm:$0x7f]  ;;  %v396_v32 = vld [vmem:[#allocation3 + $0x10] sm:$0x7f] }
  0x81   : > { %1477 = vmatpush.msra.mxu0 %v8405_v56  ;;  %1542 = vmatpush.msra.mxu1 %v8437_v59  ;;  %v558_v27 = vrot.slane %v395_v1, 7  ;;  %v560_v56 = vrot.slane %v396_v32, 7  ;;  %v8374_v59 = vld [vmem:[%s17230_s1 + $0x3f8] sm:$0xff]  ;;  %v10216_v32 = vsel %vm495_vm0, %v524_v49, %v17398_v14  ;;  %v8431_v14 = vld [vmem:[%s17230_s1 + $0x5c0] sm:$0xff]  ;;  %v8372_v49 = vld [vmem:[%s17230_s1 + $0x3e8] sm:$0xff] }
  0x82   : > { %1083 = vmatpush.msra.mxu2 %v8342_v13  ;;  %1148 = vmatpush.msra.mxu3 %v8374_v59  ;;  %v8413_v59 = vld [vmem:[%s17230_s1 + $0x530] sm:$0xff] }
  0x83   : > { %1478 = vmatpush.msra.mxu0 %v8403_v4  ;;  %1543 = vmatpush.msra.mxu1 %v8435_v47  ;;  %v17397_v4 = vrot.slane %v9640_v15, 7  ;;  %v10211_v1 = vsel %vm495_vm0, %v554_v12, %v558_v27  ;;  %v8340_v12 = vld [vmem:[%s17230_s1 + $0x2e8] sm:$0xff]  ;;  %v8429_v27 = vld [vmem:[%s17230_s1 + $0x5b0] sm:$0xff] }
  0x84   : > { %1084 = vmatpush.msra.mxu2 %v8340_v12  ;;  %1149 = vmatpush.msra.mxu3 %v8372_v49  ;;  %v8354_v12 = vld [vmem:[%s17230_s1 + $0x358] sm:$0xff]  ;;  %v8379_v49 = vld [vmem:[%s17230_s1 + $0x420] sm:$0xff] }
  0x85   : > { %628 = vmatmul.f32.gmra.mxu0 %v10178_v18  ;;  %652 = vmatmul.f32.gmra.mxu2 %v10181_v26  ;;  %v10208_v47 = vsel %vm495_vm0, %v522_v9, %v17397_v4  ;;  %v8399_v9 = vld [vmem:[%s17230_s1 + $0x4c0] sm:$0xff] }
  0x86   : > { %693 = vmatmul.f32.gmra.mxu1 %v10184_v57  ;;  %717 = vmatmul.f32.gmra.mxu3 %v10187_v53  ;;  %v357_v4 = vld [vmem:[%s17231_s2] sm:$0x3] }
  0x87   : > { %1479 = vmatpush.msra.mxu0 %v8401_v48  ;;  %1544 = vmatpush.msra.mxu1 %v8433_v8  ;;  %v10219_v48 = vsel %vm495_vm0, %v556_v51, %v560_v56  ;;  %v8397_v51 = vld [vmem:[%s17230_s1 + $0x4b0] sm:$0xff]  ;;  %v8338_v8 = vld [vmem:[%s17230_s1 + $0x2d8] sm:$0xff] }
  0x88   : > { %1085 = vmatpush.msra.mxu2 %v8338_v8  ;;  %v8381_v56 = vld [vmem:[%s17230_s1 + $0x430] sm:$0xff] }
  0x89   : > { %1480 = vmatpush.msra.mxu0 %v8399_v9  ;;  %1545 = vmatpush.msra.mxu1 %v8431_v14  ;;  %v8322_v14 = vld [vmem:[%s17230_s1 + $0x258] sm:$0xff] }
  0x8b   : > { %1481 = vmatpush.msra.mxu0 %v8397_v51  ;;  %1546 = vmatpush.msra.mxu1 %v8429_v27  ;;  %v8411_v51 = vld [vmem:[%s17230_s1 + $0x520] sm:$0xff] }
  0x8d   : > { %631 = vmatmul.f32.gmra.mxu0 %v10208_v47  ;;  %655 = vmatmul.f32.gmra.mxu2 %v10211_v1 }
  0x8e   : > { %696 = vmatmul.f32.gmra.mxu1 %v10216_v32  ;;  %720 = vmatmul.f32.gmra.mxu3 %v10219_v48 }
  0x95   : > { %740 = vmatmul.f32.vlgmr.msrb.gmra.mxu2 %v9759_v60  ;;  %969 = vmatmul.f32.vlgmr.msrb.gmra.mxu0 %v9716_v40  ;;  %v8370_v40 = vld [vmem:[%s17230_s1 + $0x3d8] sm:$0xff]  ;;  %v8427_v60 = vld [vmem:[%s17230_s1 + $0x5a0] sm:$0xff] }
  0x96   : > { %805 = vmatmul.f32.vlgmr.msrb.gmra.mxu3 %v9774_v63  ;;  %1034 = vmatmul.f32.vlgmr.msrb.gmra.mxu1 %v9722_v43  ;;  %v8395_v43 = vld [vmem:[%s17230_s1 + $0x4a0] sm:$0xff]  ;;  %v8336_v63 = vld [vmem:[%s17230_s1 + $0x2c8] sm:$0xff] }
  0x97   : > { %1150 = vmatpush.msra.mxu3 %v8370_v40  ;;  %1482 = vmatpush.msra.mxu0 %v8395_v43  ;;  %v8320_v40 = vld [vmem:[%s17230_s1 + $0x248] sm:$0xff] }
  0x98   : > { %1547 = vmatpush.msra.mxu1 %v8427_v60  ;;  %1086 = vmatpush.msra.mxu2 %v8336_v63  ;;  %v8352_v43 = vld [vmem:[%s17230_s1 + $0x348] sm:$0xff]  ;;  %v8377_v60 = vld [vmem:[%s17230_s1 + $0x410] sm:$0xff] }
  0x99   : > { %v8409_v63 = vld [vmem:[%s17230_s1 + $0x510] sm:$0xff] }
  0x9d   : > { %743 = vmatmul.f32.gmra.mxu2 %v9845_v29  ;;  %972 = vmatmul.f32.gmra.mxu0 %v9784_v2  ;;  %v8368_v2 = vld [vmem:[%s17230_s1 + $0x3c8] sm:$0xff]  ;;  %v8425_v29 = vld [vmem:[%s17230_s1 + $0x590] sm:$0xff] }
  0x9e   : > { %808 = vmatmul.f32.gmra.mxu3 %v9862_v34  ;;  %1037 = vmatmul.f32.gmra.mxu1 %v9792_v5  ;;  %v8393_v5 = vld [vmem:[%s17230_s1 + $0x490] sm:$0xff]  ;;  %v8334_v34 = vld [vmem:[%s17230_s1 + $0x2b8] sm:$0xff] }
  0x9f   : > { %1151 = vmatpush.msra.mxu3 %v8368_v2  ;;  %1483 = vmatpush.msra.mxu0 %v8393_v5 }
  0xa0   : > { %1548 = vmatpush.msra.mxu1 %v8425_v29  ;;  %1087 = vmatpush.msra.mxu2 %v8334_v34  ;;  %v8318_v29 = vld [vmem:[%s17230_s1 + $0x238] sm:$0xff] }
  0xa1   : > { %v8350_v34 = vld [vmem:[%s17230_s1 + $0x338] sm:$0xff] }
  0xa5   : > { %746 = vmatmul.f32.gmra.mxu2 %v9929_v10  ;;  %975 = vmatmul.f32.gmra.mxu0 %v9682_v28  ;;  %v8366_v28 = vld [vmem:[%s17230_s1 + $0x3b8] sm:$0xff]  ;;  %v8423_v10 = vld [vmem:[%s17230_s1 + $0x580] sm:$0xff] }
  0xa6   : > { %811 = vmatmul.f32.gmra.mxu3 %v9946_v20  ;;  %1040 = vmatmul.f32.gmra.mxu1 %v9698_v33  ;;  %v8391_v33 = vld [vmem:[%s17230_s1 + $0x480] sm:$0xff]  ;;  %v8332_v20 = vld [vmem:[%s17230_s1 + $0x2a8] sm:$0xff] }
  0xa7   : > { %1152 = vmatpush.msra.mxu3 %v8366_v28  ;;  %1484 = vmatpush.msra.mxu0 %v8391_v33  ;;  %v8375_v28 = vld [vmem:[%s17230_s1 + $0x400] sm:$0xff] }
  0xa8   : > { %1549 = vmatpush.msra.mxu1 %v8423_v10  ;;  %1088 = vmatpush.msra.mxu2 %v8332_v20  ;;  %v8407_v33 = vld [vmem:[%s17230_s1 + $0x500] sm:$0xff] }
  0xad   : > { %749 = vmatmul.f32.gmra.mxu2 %v10016_v55  ;;  %978 = vmatmul.f32.gmra.mxu0 %v9714_v39  ;;  %v8364_v39 = vld [vmem:[%s17230_s1 + $0x3a8] sm:$0xff]  ;;  %v8421_v55 = vld [vmem:[%s17230_s1 + $0x570] sm:$0xff] }
  0xae   : > { %814 = vmatmul.f32.gmra.mxu3 %v10026_v41  ;;  %1043 = vmatmul.f32.gmra.mxu1 %v9725_v44  ;;  %v8389_v44 = vld [vmem:[%s17230_s1 + $0x470] sm:$0xff]  ;;  %v8419_v41 = vld [vmem:[%s17230_s1 + $0x560] sm:$0xff] }
  0xaf   : > { %1153 = vmatpush.msra.mxu3 %v8364_v39  ;;  %1485 = vmatpush.msra.mxu0 %v8389_v44  ;;  %v8314_v39 = vld [vmem:[%s17230_s1 + $0x218] sm:$0xff] }
  0xb0   : > { %1550 = vmatpush.msra.mxu1 %v8421_v55  ;;  %v8346_v44 = vld [vmem:[%s17230_s1 + $0x318] sm:$0xff] }
  0xb2   : > { %1551 = vmatpush.msra.mxu1 %v8419_v41  ;;  %v17414_v41 = vld [vmem:[#allocation12_spill] sm:$0xff] }
  0xb5   : > { %752 = vmatmul.f32.gmra.mxu2 %v10078_v6  ;;  %981 = vmatmul.f32.gmra.mxu0 %v9750_v58  ;;  %v8330_v6 = vld [vmem:[%s17230_s1 + $0x298] sm:$0xff] }
  0xb6   : > { %817 = vmatmul.f32.gmra.mxu3 %v10084_v54  ;;  %1046 = vmatmul.f32.gmra.mxu1 %v9787_v3  ;;  %v8362_v58 = vld [vmem:[%s17230_s1 + $0x398] sm:$0xff]  ;;  %v8387_v3 = vld [vmem:[%s17230_s1 + $0x460] sm:$0xff]  ;;  %v8417_v54 = vld [vmem:[%s17230_s1 + $0x550] sm:$0xff] }
  0xb7   : > { %1089 = vmatpush.msra.mxu2 %v8330_v6  ;;  %1154 = vmatpush.msra.mxu3 %v8362_v58  ;;  %v8312_v58 = vld [vmem:[%s17230_s1 + $0x208] sm:$0xff] }
  0xb8   : > { %1486 = vmatpush.msra.mxu0 %v8387_v3  ;;  %1552 = vmatpush.msra.mxu1 %v8417_v54  ;;  %v8344_v3 = vld [vmem:[%s17230_s1 + $0x308] sm:$0xff]  ;;  %v8469_v54 = vld [vmem:[%s17230_s1 + $0x6f0] sm:$0xff] }
  0xbd   : > { %755 = vmatmul.f32.gmra.mxu2 %v10134_v45  ;;  %984 = vmatmul.f32.gmra.mxu0 %v9831_v24  ;;  %v8328_v24 = vld [vmem:[%s17230_s1 + $0x288] sm:$0xff]  ;;  %v8385_v45 = vld [vmem:[%s17230_s1 + $0x450] sm:$0xff] }
  0xbe   : > { %820 = vmatmul.f32.gmra.mxu3 %v10140_v50  ;;  %1049 = vmatmul.f32.gmra.mxu1 %v9870_v37  ;;  %v8360_v37 = vld [vmem:[%s17230_s1 + $0x388] sm:$0xff]  ;;  %v8415_v50 = vld [vmem:[%s17230_s1 + $0x540] sm:$0xff] }
  0xbf   : > { %1090 = vmatpush.msra.mxu2 %v8328_v24  ;;  %1155 = vmatpush.msra.mxu3 %v8360_v37  ;;  %v17415_v24 = vld [vmem:[#allocation4_spill] sm:$0xff]  ;;  %v17416_v37 = vld [vmem:[#allocation13_spill] sm:$0xff] }
  0xc0   : > { %1487 = vmatpush.msra.mxu0 %v8385_v45  ;;  %1553 = vmatpush.msra.mxu1 %v8415_v50  ;;  %v17417_v45 = vld [vmem:[#allocation5_spill] sm:$0xff] }
  0xc2   : > { %1554 = vmatpush.msra.mxu1 %v8413_v59  ;;  %v17421_v59 = vld [vmem:[#allocation6_spill] sm:$0xff] }
  0xc4   : > { %1555 = vmatpush.msra.mxu1 %v8411_v51 }
  0xc5   : > { %758 = vmatmul.f32.gmra.mxu2 %v10178_v18  ;;  %987 = vmatmul.f32.gmra.mxu0 %v9915_v7  ;;  %v8326_v7 = vld [vmem:[%s17230_s1 + $0x278] sm:$0xff] }
  0xc6   : > { %823 = vmatmul.f32.gmra.mxu3 %v10184_v57  ;;  %1052 = vmatmul.f32.gmra.mxu1 %v9959_v22  ;;  %v8358_v18 = vld [vmem:[%s17230_s1 + $0x378] sm:$0xff]  ;;  %v8383_v22 = vld [vmem:[%s17230_s1 + $0x440] sm:$0xff] }
  0xc7   : > { %1091 = vmatpush.msra.mxu2 %v8326_v7  ;;  %1156 = vmatpush.msra.mxu3 %v8358_v18  ;;  %v8501_v7 = vld [vmem:[%s17230_s1 + $0x7f0] sm:$0xff] }
  0xc8   : > { %1488 = vmatpush.msra.mxu0 %v8383_v22  ;;  %1556 = vmatpush.msra.mxu1 %v8409_v63 }
  0xca   : > { %1489 = vmatpush.msra.mxu0 %v8381_v56  ;;  %1557 = vmatpush.msra.mxu1 %v8407_v33  ;;  %v8406_v33 = vld [vmem:[%s17230_s1 + $0x4f8] sm:$0xff] }
  0xcc   : > { %1490 = vmatpush.msra.mxu0 %v8379_v49  ;;  %2065 = vmatpush.msrb.mxu1 %v8501_v7  ;;  %v10555_v7 = vld [vmem:[#allocation3 + $0x30] sm:$0xff] }
  0xcd   : > { %761 = vmatmul.f32.gmra.mxu2 %v10208_v47  ;;  %990 = vmatmul.f32.gmra.mxu0 %v9640_v15  ;;  %v8324_v15 = vld [vmem:[%s17230_s1 + $0x268] sm:$0xff] }
  0xce   : > { %826 = vmatmul.f32.gmra.mxu3 %v10216_v32  ;;  %1055 = vmatmul.f32.gmra.mxu1 %v9653_v19  ;;  %v8356_v19 = vld [vmem:[%s17230_s1 + $0x368] sm:$0xff] }
  0xcf   : > { %1092 = vmatpush.msra.mxu2 %v8324_v15  ;;  %1157 = vmatpush.msra.mxu3 %v8356_v19 }
  0xd0   : > { %1491 = vmatpush.msra.mxu0 %v8377_v60 }
  0xd1   : > { %1093 = vmatpush.msra.mxu2 %v8322_v14  ;;  %1158 = vmatpush.msra.mxu3 %v8354_v12 }
  0xd2   : > { %v10359_v57 = vpop.f32.mrf.mxu0  ;;  %1492 = vmatpush.msra.mxu0 %v8375_v28  ;;  %v1248_v28 = vld [vmem:[#allocation3 + $0x8] sm:$0xff] }
  0xd3   : > { %17399 = vst [vmem:[#allocation15_spill] sm:$0xff] %v10359_v57  ;;  %v10361_v13 = vpop.f32.mrf.mxu1  ;;  %1094 = vmatpush.msra.mxu2 %v8320_v40  ;;  %1159 = vmatpush.msra.mxu3 %v8352_v43  ;;  %v8465_v40 = vld [vmem:[%s17230_s1 + $0x6d0] sm:$0xff] }
  0xd4   : > { %17400 = vst [vmem:[#allocation16_spill] sm:$0xff] %v10361_v13  ;;  %2000 = vmatpush.msrb.mxu0 %v8469_v54  ;;  %v8497_v43 = vld [vmem:[%s17230_s1 + $0x7d0] sm:$0xff] }
  0xd5   : > { %764 = vmatmul.f32.gmra.mxu2 %v9766_v61  ;;  %993 = vmatmul.f32.gmra.mxu0 %v9646_v17 }
  0xd6   : > { %829 = vmatmul.f32.gmra.mxu3 %v9779_v0  ;;  %1058 = vmatmul.f32.gmra.mxu1 %v9658_v21  ;;  %v10382_v0 = vperm.slane %v357_v4, 0  ;;  %v17422_v4 = vld [vmem:[#allocation14_spill] sm:$0xff] }
  0xd7   : > { %1095 = vmatpush.msra.mxu2 %v8318_v29  ;;  %1160 = vmatpush.msra.mxu3 %v8350_v34  ;;  %v1246_v29 = vld [vmem:[#allocation3 + $0xf0] sm:$0xfe] }
  0xd8   : > { %v635_v61 = vpop.f32.mrf.mxu2  ;;  %17401 = vst [vmem:[#allocation17_spill] sm:$0xff] %v10382_v0 }
  0xd9   : > { %v700_v17 = vpop.f32.mrf.mxu3 }
  0xda   : > { %v701_v21 = vadd.f32 %v700_v17, %v635_v61  ;;  %v10384_v47 = vpop.f32.mrf.mxu0  ;;  %v17423_v61 = vld [vmem:[#allocation7_spill] sm:$0xff]  ;;  %v8467_v17 = vld [vmem:[%s17230_s1 + $0x6e0] sm:$0xff] }
  0xdb   : > { %17402 = vst [vmem:[#allocation18_spill] sm:$0xff] %v10384_v47  ;;  %v10386_v32 = vpop.f32.mrf.mxu1  ;;  %2001 = vmatpush.msrb.mxu0 %v8467_v17  ;;  %v1385_v17 = vrot.slane %v10555_v7, 1 }
  0xdc   : > { %17403 = vst [vmem:[#allocation19_spill] sm:$0xff] %v10386_v32  ;;  %v10389_v9 = vadd.f32 %v701_v21, %v10382_v0  ;;  %v8499_v21 = vld [vmem:[%s17230_s1 + $0x7e0] sm:$0xff] }
  0xdd   : > { %767 = vmatmul.f32.gmra.mxu2 %v9852_v31  ;;  %996 = vmatmul.f32.gmra.mxu0 %v9666_v23 }
  0xde   : > { %17404 = vst [vmem:[#allocation20_spill] sm:$0xff] %v10389_v9  ;;  %832 = vmatmul.f32.gmra.mxu3 %v9867_v35  ;;  %1061 = vmatmul.f32.gmra.mxu1 %v9672_v25 }
  0xdf   : > { %2066 = vmatpush.msrb.mxu1 %v8499_v21  ;;  %2002 = vmatpush.msrb.mxu0 %v8465_v40  ;;  %v8461_v21 = vld [vmem:[%s17230_s1 + $0x6b0] sm:$0xff] }
  0xe0   : > { %v638_v27 = vpop.f32.mrf.mxu2 }
  0xe1   : > { %v703_v31 = vpop.f32.mrf.mxu3  ;;  %2067 = vmatpush.msrb.mxu1 %v8497_v43 }
  0xe2   : > { %v704_v8 = vadd.f32 %v703_v31, %v638_v27  ;;  %v10407_v23 = vpop.f32.mrf.mxu0  ;;  %v17427_v31 = vld [vmem:[#allocation8_spill] sm:$0xff] }
  0xe3   : > { %17405 = vst [vmem:[#allocation21_spill] sm:$0xff] %v10407_v23  ;;  %v10409_v35 = vpop.f32.mrf.mxu1 }
  0xe4   : > { %17406 = vst [vmem:[#allocation22_spill] sm:$0xff] %v10409_v35  ;;  %v10412_v25 = vadd.f32 %v704_v8, %v10382_v0  ;;  %v17428_v8 = vld [vmem:[#allocation10_spill] sm:$0xff] }
  0xe5   : > { %770 = vmatmul.f32.gmra.mxu2 %v9936_v16  ;;  %999 = vmatmul.f32.gmra.mxu0 %v9689_v30 }
  0xe6   : > { %17407 = vst [vmem:[#allocation23_spill] sm:$0xff] %v10412_v25  ;;  %835 = vmatmul.f32.gmra.mxu3 %v9953_v11  ;;  %1064 = vmatmul.f32.gmra.mxu1 %v9707_v36 }
  0xe8   : > { %v641_v2 = vpop.f32.mrf.mxu2 }
  0xe9   : > { %v706_v16 = vpop.f32.mrf.mxu3 }
  0xea   : > { %v707_v5 = vadd.f32 %v706_v16, %v641_v2  ;;  %v10430_v30 = vpop.f32.mrf.mxu0 }
  0xeb   : > { %17408 = vst [vmem:[#allocation24_spill] sm:$0xff] %v10430_v30  ;;  %v10432_v11 = vpop.f32.mrf.mxu1 }
  0xec   : > { %17409 = vst [vmem:[#allocation25_spill] sm:$0xff] %v10432_v11  ;;  %v10435_v36 = vadd.f32 %v707_v5, %v10382_v0  ;;  %v1247_v5 = vld [vmem:[#allocation3 + $0x100] sm:$0xff]  ;;  %v10856_v11 = vld [vmem:[%s9590_s7 + $0x70] sm:$0xff] }
  0xed   : > { %773 = vmatmul.f32.gmra.mxu2 %v10021_v38  ;;  %1002 = vmatmul.f32.gmra.mxu0 %v9720_v42  ;;  %v8316_v42 = vld [vmem:[%s17230_s1 + $0x228] sm:$0xff]  ;;  %17456 = vst [vmem:[#allocation50_spill] sm:$0xff] %v10856_v11 }
  0xee   : > { %17410 = vst [vmem:[#allocation26_spill] sm:$0xff] %v10435_v36  ;;  %838 = vmatmul.f32.gmra.mxu3 %v10031_v52  ;;  %1067 = vmatmul.f32.gmra.mxu1 %v9731_v46  ;;  %v8348_v46 = vld [vmem:[%s17230_s1 + $0x328] sm:$0xff] }
  0xef   : > { %1096 = vmatpush.msra.mxu2 %v8316_v42  ;;  %1161 = vmatpush.msra.mxu3 %v8348_v46  ;;  %v17432_v42 = vld [vmem:[#allocation9_spill] sm:$0xff]  ;;  %v17433_v46 = vld [vmem:[#allocation11_spill] sm:$0xff]  ;;  %339 = vst [vmem:[#allocation3 + $0x138] sm:$0xff] %v10856_v11 }
  0xf0   : > { %v644_v10 = vpop.f32.mrf.mxu2  ;;  %v10899_v11 = vld [vmem:[#allocation3 + $0xa8] sm:$0xff] }
  0xf1   : > { %v709_v38 = vpop.f32.mrf.mxu3  ;;  %1097 = vmatpush.msra.mxu2 %v8314_v39  ;;  %1162 = vmatpush.msra.mxu3 %v8346_v44  ;;  %v8463_v39 = vld [vmem:[%s17230_s1 + $0x6c0] sm:$0xff]  ;;  %17465 = vst [vmem:[#allocation59_spill] sm:$0xff] %v10899_v11 }
  0xf2   : > { %v710_v52 = vadd.f32 %v709_v38, %v644_v10  ;;  %v10459_v20 = vpop.f32.mrf.mxu0  ;;  %v8438_v10 = vld [vmem:[%s17230_s1 + $0x5f8] sm:$0xff]  ;;  %v8495_v44 = vld [vmem:[%s17230_s1 + $0x7c0] sm:$0xff]  ;;  %2003 = vmatpush.msrb.mxu0 %v8463_v39 }
  0xf3   : > { %17411 = vst [vmem:[#allocation27_spill] sm:$0xff] %v10459_v20  ;;  %v10467_v55 = vpop.f32.mrf.mxu1  ;;  %1098 = vmatpush.msra.mxu2 %v8312_v58  ;;  %1163 = vmatpush.msra.mxu3 %v8344_v3  ;;  %v1382_v58 = vrot.slane %v1246_v29, 1  ;;  %v1383_v3 = vrot.slane %v1248_v28, 1  ;;  %v8434_v29 = vld [vmem:[%s17230_s1 + $0x5d8] sm:$0xff]  ;;  %v9349_v28 = vld [vmem:[#allocation3 + $0x100] sm:$0xff] }
  0xf4   : > { %17412 = vst [vmem:[#allocation28_spill] sm:$0xff] %v10467_v55  ;;  %v10470_v6 = vadd.f32 %v710_v52, %v10382_v0  ;;  %v1380_v52 = vrot.slane %v1247_v5, 1  ;;  %2068 = vmatpush.msrb.mxu1 %v8495_v44  ;;  %2004 = vmatpush.msrb.mxu0 %v8461_v21  ;;  %v8402_v5 = vld [vmem:[%s17230_s1 + $0x4d8] sm:$0xff]  ;;  %v8457_v21 = vld [vmem:[%s17230_s1 + $0x690] sm:$0xff] }
  0xf5   : > { %776 = vmatmul.f32.gmra.mxu2 %v17414_v41  ;;  %1005 = vmatmul.f32.gmra.mxu0 %v17415_v24  ;;  %v10553_v54 = vsel %vm1378_vm1, %v1382_v58, %v1383_v3 }
  0xf6   : > { %17413 = vst [vmem:[#allocation29_spill] sm:$0xff] %v10470_v6  ;;  %841 = vmatmul.f32.gmra.mxu3 %v17416_v37  ;;  %1070 = vmatmul.f32.gmra.mxu1 %v17417_v45  ;;  %v10583_v43 = vsel %vm1378_vm1, %v1380_v52, %v1385_v17 }
  0xf7   : > { %1607 = vmatpush.msrb.mxu2 %v8406_v33  ;;  %1672 = vmatpush.msrb.mxu3 %v8438_v10  ;;  %v9350_v33 = vld [vmem:[#allocation3 + $0x8] sm:$0xff] }
  0xf8   : > { %v647_v18 = vpop.f32.mrf.mxu2 }
  0xf9   : > { %v712_v22 = vpop.f32.mrf.mxu3 }
  0xfa   : > { %v713_v50 = vadd.f32 %v712_v22, %v647_v18  ;;  %v10488_v15 = vpop.f32.mrf.mxu0  ;;  %v10560_v22 = vld [vmem:[#allocation3 + $0xb0] sm:$0xff] }
  0xfb   : > { %17418 = vst [vmem:[#allocation12_spill] sm:$0xff] %v10488_v15  ;;  %v10490_v19 = vpop.f32.mrf.mxu1  ;;  %v10828_v15 = vld [vmem:[#allocation3 + $0x88] sm:$0xff] }
  0xfc   : > { %17419 = vst [vmem:[#allocation4_spill] sm:$0xff] %v10490_v19  ;;  %v10493_v56 = vadd.f32 %v713_v50, %v10382_v0  ;;  %v8404_v50 = vld [vmem:[%s17230_s1 + $0x4e8] sm:$0xff] }
  0xfd   : > { %779 = vmatmul.f32.gmra.mxu2 %v10137_v62  ;;  %1008 = vmatmul.f32.gmra.mxu0 %v17421_v59  ;;  %v8436_v59 = vld [vmem:[%s17230_s1 + $0x5e8] sm:$0xff] }
  0xfe   : > { %17420 = vst [vmem:[#allocation13_spill] sm:$0xff] %v10493_v56  ;;  %844 = vmatmul.f32.gmra.mxu3 %v17422_v4  ;;  %1073 = vmatmul.f32.gmra.mxu1 %v17423_v61  ;;  %v9347_v4 = vld [vmem:[#allocation3 + $0x98] sm:$0xff]  ;;  %v9348_v61 = vld [vmem:[#allocation3 + $0xf0] sm:$0xff] }
  0xff   : > { %1608 = vmatpush.msrb.mxu2 %v8404_v50  ;;  %1673 = vmatpush.msrb.mxu3 %v8436_v59  ;;  %v8432_v50 = vld [vmem:[%s17230_s1 + $0x5c8] sm:$0xff]  ;;  %v9351_v59 = vld [vmem:[#allocation3 + $0x30] sm:$0xff] }
 0x100   : > { %v650_v14 = vpop.f32.mrf.mxu2 }
 0x101   : > { %v715_v12 = vpop.f32.mrf.mxu3  ;;  %1609 = vmatpush.msrb.mxu2 %v8402_v5  ;;  %1674 = vmatpush.msrb.mxu3 %v8434_v29 }
 0x102   : > { %v716_v49 = vadd.f32 %v715_v12, %v650_v14  ;;  %v10505_v62 = vpop.f32.mrf.mxu0  ;;  %v8493_v14 = vld [vmem:[%s17230_s1 + $0x7b0] sm:$0xff]  ;;  %v1387_v12 = vrot.slane %v10560_v22, 1 }
 0x103   : > { %17424 = vst [vmem:[#allocation5_spill] sm:$0xff] %v10505_v62  ;;  %v10507_v51 = vpop.f32.mrf.mxu1  ;;  %2069 = vmatpush.msrb.mxu1 %v8493_v14  ;;  %v8489_v14 = vld [vmem:[%s17230_s1 + $0x790] sm:$0xff]  ;;  %1675 = vmatpush.msrb.mxu3 %v8432_v50  ;;  %v9356_v50 = vld [vmem:[#allocation3 + $0x48] sm:$0xff] }
 0x104   : > { %17425 = vst [vmem:[#allocation6_spill] sm:$0xff] %v10507_v51  ;;  %v10510_v27 = vadd.f32 %v716_v49, %v10382_v0 }
 0x105   : > { %782 = vmatmul.f32.gmra.mxu2 %v10181_v26  ;;  %1011 = vmatmul.f32.gmra.mxu0 %v17427_v31 }
 0x106   : > { %17426 = vst [vmem:[#allocation14_spill] sm:$0xff] %v10510_v27  ;;  %847 = vmatmul.f32.gmra.mxu3 %v10187_v53  ;;  %1076 = vmatmul.f32.gmra.mxu1 %v17428_v8  ;;  %v1245_v53 = vld [vmem:[#allocation3 + $0x98] sm:$0xfe] }
 0x107   : > { %v1379_v38 = vrot.slane %v1245_v53, 1  ;;  %v10592_v53 = vld [vmem:[#allocation3 + $0x48] sm:$0xff] }
 0x108   : > { %v653_v60 = vpop.f32.mrf.mxu2 }
 0x109   : > { %v718_v63 = vpop.f32.mrf.mxu3  ;;  %v10548_v37 = vsel %vm1378_vm1, %v1379_v38, %v1380_v52  ;;  %v1391_v38 = vrot.slane %v10592_v53, 1 }
 0x10a   : > { %v719_v2 = vadd.f32 %v718_v63, %v653_v60  ;;  %v10522_v26 = vpop.f32.mrf.mxu0  ;;  %v10588_v63 = vsel %vm1378_vm1, %v1383_v3, %v1387_v12 }
 0x10b   : > { %17429 = vst [vmem:[#allocation7_spill] sm:$0xff] %v10522_v26  ;;  %v10524_v16 = vpop.f32.mrf.mxu1 }
 0x10c   : > { %17430 = vst [vmem:[#allocation8_spill] sm:$0xff] %v10524_v16  ;;  %v10527_v34 = vadd.f32 %v719_v2, %v10382_v0  ;;  %v10590_v2 = vld [vmem:[#allocation3 + $0xe8] sm:$0xff]  ;;  %v10796_v16 = vld [vmem:[#allocation3 + $0x70] sm:$0xff] }
 0x10d   : > { %785 = vmatmul.f32.gmra.mxu2 %v10211_v1  ;;  %1014 = vmatmul.f32.gmra.mxu0 %v17432_v42  ;;  %v1389_v10 = vrot.slane %v10590_v2, 1  ;;  %v8459_v42 = vld [vmem:[%s17230_s1 + $0x6a0] sm:$0xff] }
 0x10e   : > { %17431 = vst [vmem:[#allocation10_spill] sm:$0xff] %v10527_v34  ;;  %850 = vmatmul.f32.gmra.mxu3 %v10219_v48  ;;  %1079 = vmatmul.f32.gmra.mxu1 %v17433_v46  ;;  %v8491_v46 = vld [vmem:[%s17230_s1 + $0x7a0] sm:$0xff] }
 0x10f   : > { %2005 = vmatpush.msrb.mxu0 %v8459_v42  ;;  %2070 = vmatpush.msrb.mxu1 %v8491_v46  ;;  %v10615_v3 = vsel %vm1378_vm1, %v1385_v17, %v1389_v10 }
 0x110   : > { %v656_v1 = vpop.f32.mrf.mxu2 }
 0x111   : > { %v721_v48 = vpop.f32.mrf.mxu3  ;;  %2006 = vmatpush.msrb.mxu0 %v8457_v21  ;;  %2071 = vmatpush.msrb.mxu1 %v8489_v14  ;;  %v9358_v21 = vld [vmem:[#allocation3 + $0x18] sm:$0xff] }
 0x112   : > { %v722_v41 = vadd.f32 %v721_v48, %v656_v1  ;;  %v10545_v24 = vpop.f32.mrf.mxu0  ;;  %v10620_v48 = vsel %vm1378_vm1, %v1387_v12, %v1391_v38  ;;  %v9354_v12 = vld [vmem:[#allocation3] sm:$0xff]  ;;  %v1399_v14 = vrot.slane %v9358_v21, 1 }
 0x113   : > { %17434 = vst [vmem:[#allocation9_spill] sm:$0xff] %v10545_v24  ;;  %v10550_v45 = vpop.f32.mrf.mxu1 }
 0x114   : > { %17435 = vst [vmem:[#allocation11_spill] sm:$0xff] %v10550_v45  ;;  %v10558_v18 = vadd.f32 %v722_v41, %v10382_v0  ;;  %v8400_v41 = vld [vmem:[%s17230_s1 + $0x4c8] sm:$0xff]  ;;  %v10764_v0 = vld [vmem:[#allocation3 + $0x80] sm:$0xff] }
 0x115   : > { %1099 = vmatmul.f32.vlgmr.msra.gmra.mxu2 %v9347_v4  ;;  %1493 = vmatmul.f32.vlgmr.msra.gmra.mxu0 %v10548_v37  ;;  %v9352_v4 = vld [vmem:[#allocation3 + $0xb0] sm:$0xff] }
 0x116   : > { %17436 = vst [vmem:[#allocation30_spill] sm:$0xff] %v10558_v18  ;;  %1164 = vmatmul.f32.vlgmr.msra.gmra.mxu3 %v9348_v61  ;;  %1558 = vmatmul.f32.vlgmr.msra.gmra.mxu1 %v10553_v54  ;;  %v9353_v61 = vld [vmem:[#allocation3 + $0x68] sm:$0xff] }
 0x117   : > { %v1393_v17 = vrot.slane %v9353_v61, 1  ;;  %1610 = vmatpush.msrb.mxu2 %v8400_v41  ;;  %v9355_v41 = vld [vmem:[#allocation3 + $0xe8] sm:$0xff] }
 0x118   : > { %v741_v49 = vpop.f32.mrf.mxu2 }
 0x119   : > { %v806_v31 = vpop.f32.mrf.mxu3 }
 0x11a   : > { %v10578_v8 = vadd.f32 %v806_v31, %v741_v49  ;;  %v10580_v40 = vpop.f32.mrf.mxu0  ;;  %v1395_v49 = vrot.slane %v9354_v12, 1 }
 0x11b   : > { %17437 = vst [vmem:[#allocation31_spill] sm:$0xff] %v10580_v40  ;;  %v10585_v60 = vpop.f32.mrf.mxu1 }
 0x11c   : > { %17438 = vst [vmem:[#allocation32_spill] sm:$0xff] %v10585_v60  ;;  %v10646_v46 = vsel %vm1378_vm1, %v1391_v38, %v1395_v49  ;;  %v8455_v38 = vld [vmem:[%s17230_s1 + $0x680] sm:$0xff]  ;;  %v10672_v27 = vsel %vm1378_vm1, %v1395_v49, %v1399_v14  ;;  %v8453_v49 = vld [vmem:[%s17230_s1 + $0x670] sm:$0xff] }
 0x11d   : > { %1102 = vmatmul.f32.gmra.mxu2 %v9349_v28  ;;  %1496 = vmatmul.f32.gmra.mxu0 %v10583_v43 }
 0x11e   : > { %1167 = vmatmul.f32.gmra.mxu3 %v9350_v33  ;;  %1561 = vmatmul.f32.gmra.mxu1 %v10588_v63  ;;  %v10641_v33 = vsel %vm1378_vm1, %v1389_v10, %v1393_v17  ;;  %v9357_v10 = vld [vmem:[#allocation3 + $0x148] sm:$0xff] }
 0x11f   : > { %2007 = vmatpush.msrb.mxu0 %v8455_v38 }
 0x120   : > { %v744_v52 = vpop.f32.mrf.mxu2 }
 0x121   : > { %v809_v39 = vpop.f32.mrf.mxu3  ;;  %2008 = vmatpush.msrb.mxu0 %v8453_v49  ;;  %v8426_v49 = vld [vmem:[%s17230_s1 + $0x598] sm:$0xff] }
 0x122   : > { %v10610_v44 = vadd.f32 %v809_v39, %v744_v52  ;;  %v10612_v58 = vpop.f32.mrf.mxu0  ;;  %v8398_v52 = vld [vmem:[%s17230_s1 + $0x4b8] sm:$0xff] }
 0x123   : > { %17439 = vst [vmem:[#allocation33_spill] sm:$0xff] %v10612_v58  ;;  %v10617_v1 = vpop.f32.mrf.mxu1  ;;  %v8430_v39 = vld [vmem:[%s17230_s1 + $0x5b8] sm:$0xff]  ;;  %1611 = vmatpush.msrb.mxu2 %v8398_v52  ;;  %v8396_v52 = vld [vmem:[%s17230_s1 + $0x4a8] sm:$0xff] }
 0x124   : > { %17440 = vst [vmem:[#allocation34_spill] sm:$0xff] %v10617_v1  ;;  %1676 = vmatpush.msrb.mxu3 %v8430_v39  ;;  %v8428_v39 = vld [vmem:[%s17230_s1 + $0x5a8] sm:$0xff] }
 0x125   : > { %1105 = vmatmul.f32.gmra.mxu2 %v9351_v59  ;;  %1499 = vmatmul.f32.gmra.mxu0 %v10615_v3  ;;  %v1397_v59 = vrot.slane %v9357_v10, 1 }
 0x126   : > { %1170 = vmatmul.f32.gmra.mxu3 %v9352_v4  ;;  %1564 = vmatmul.f32.gmra.mxu1 %v10620_v48  ;;  %v8487_v4 = vld [vmem:[%s17230_s1 + $0x780] sm:$0xff] }
 0x127   : > { %2072 = vmatpush.msrb.mxu1 %v8487_v4  ;;  %v10667_v18 = vsel %vm1378_vm1, %v1393_v17, %v1397_v59  ;;  %v9359_v17 = vld [vmem:[#allocation3 + $0x28] sm:$0xff]  ;;  %v8485_v4 = vld [vmem:[%s17230_s1 + $0x770] sm:$0xff]  ;;  %1612 = vmatpush.msrb.mxu2 %v8396_v52  ;;  %v10702_v52 = vld [vmem:[#allocation3 + $0x158] sm:$0xff] }
 0x128   : > { %v747_v31 = vpop.f32.mrf.mxu2  ;;  %v1401_v38 = vrot.slane %v9359_v17, 1  ;;  %1677 = vmatpush.msrb.mxu3 %v8428_v39  ;;  %v8394_v39 = vld [vmem:[%s17230_s1 + $0x498] sm:$0xff] }
 0x129   : > { %v812_v5 = vpop.f32.mrf.mxu3  ;;  %2073 = vmatpush.msrb.mxu1 %v8485_v4  ;;  %v8483_v4 = vld [vmem:[%s17230_s1 + $0x760] sm:$0xff]  ;;  %1613 = vmatpush.msrb.mxu2 %v8394_v39 }
 0x12a   : > { %v10636_v29 = vadd.f32 %v812_v5, %v747_v31  ;;  %v10638_v28 = vpop.f32.mrf.mxu0  ;;  %v10693_v36 = vsel %vm1378_vm1, %v1397_v59, %v1401_v38  ;;  %1678 = vmatpush.msrb.mxu3 %v8426_v49  ;;  %v10734_v39 = vld [vmem:[#allocation3 + $0xe0] sm:$0xff]  ;;  %v8392_v49 = vld [vmem:[%s17230_s1 + $0x488] sm:$0xff] }
 0x12b   : > { %17441 = vst [vmem:[#allocation35_spill] sm:$0xff] %v10638_v28  ;;  %v10643_v42 = vpop.f32.mrf.mxu1  ;;  %2074 = vmatpush.msrb.mxu1 %v8483_v4  ;;  %v10732_v28 = vld [vmem:[#allocation3 + $0x128] sm:$0xff]  ;;  %v8481_v4 = vld [vmem:[%s17230_s1 + $0x750] sm:$0xff]  ;;  %1614 = vmatpush.msrb.mxu2 %v8392_v49  ;;  %v10766_v49 = vld [vmem:[#allocation3 + $0x20] sm:$0xff] }
 0x12c   : > { %17442 = vst [vmem:[#allocation36_spill] sm:$0xff] %v10643_v42 }
 0x12d   : > { %1108 = vmatmul.f32.gmra.mxu2 %v9355_v41  ;;  %1502 = vmatmul.f32.gmra.mxu0 %v10641_v33 }
 0x12e   : > { %1173 = vmatmul.f32.gmra.mxu3 %v9356_v50  ;;  %1567 = vmatmul.f32.gmra.mxu1 %v10646_v46 }
 0x12f   : > { %2075 = vmatpush.msrb.mxu1 %v8481_v4  ;;  %v9361_v4 = vld [vmem:[#allocation3 + $0x110] sm:$0xff] }
 0x130   : > { %v750_v31 = vpop.f32.mrf.mxu2 }
 0x131   : > { %v815_v5 = vpop.f32.mrf.mxu3 }
 0x132   : > { %v10662_v41 = vadd.f32 %v815_v5, %v750_v31  ;;  %v10664_v50 = vpop.f32.mrf.mxu0  ;;  %v9360_v31 = vld [vmem:[#allocation3 + $0x150] sm:$0xff] }
 0x133   : > { %17443 = vst [vmem:[#allocation37_spill] sm:$0xff] %v10664_v50  ;;  %v10669_v34 = vpop.f32.mrf.mxu1  ;;  %v1403_v5 = vrot.slane %v9360_v31, 1 }
 0x134   : > { %17444 = vst [vmem:[#allocation38_spill] sm:$0xff] %v10669_v34  ;;  %v10700_v34 = vld [vmem:[#allocation3 + $0x110] sm:$0xff] }
 0x135   : > { %1111 = vmatmul.f32.gmra.mxu2 %v9353_v61  ;;  %1505 = vmatmul.f32.gmra.mxu0 %v10667_v18  ;;  %v10698_v9 = vsel %vm1378_vm1, %v1399_v14, %v1403_v5  ;;  %v1405_v59 = vrot.slane %v10700_v34, 1  ;;  %v8451_v14 = vld [vmem:[%s17230_s1 + $0x660] sm:$0xff] }
 0x136   : > { %1176 = vmatmul.f32.gmra.mxu3 %v9354_v12  ;;  %1570 = vmatmul.f32.gmra.mxu1 %v10672_v27 }
 0x137   : > { %2009 = vmatpush.msrb.mxu0 %v8451_v14  ;;  %v8424_v14 = vld [vmem:[%s17230_s1 + $0x588] sm:$0xff] }
 0x138   : > { %v753_v61 = vpop.f32.mrf.mxu2  ;;  %1679 = vmatpush.msrb.mxu3 %v8424_v14  ;;  %v8390_v14 = vld [vmem:[%s17230_s1 + $0x478] sm:$0xff] }
 0x139   : > { %v818_v12 = vpop.f32.mrf.mxu3  ;;  %1615 = vmatpush.msrb.mxu2 %v8390_v14  ;;  %v10798_v14 = vld [vmem:[#allocation3 + $0x50] sm:$0xff] }
 0x13a   : > { %v10688_v56 = vadd.f32 %v818_v12, %v753_v61  ;;  %v10690_v6 = vpop.f32.mrf.mxu0  ;;  %v1407_v61 = vrot.slane %v10702_v52, 1 }
 0x13b   : > { %17445 = vst [vmem:[#allocation39_spill] sm:$0xff] %v10690_v6  ;;  %v10695_v25 = vpop.f32.mrf.mxu1  ;;  %v10725_v6 = vsel %vm1378_vm1, %v1401_v38, %v1405_v59  ;;  %v1409_v38 = vrot.slane %v10732_v28, 1 }
 0x13c   : > { %17446 = vst [vmem:[#allocation40_spill] sm:$0xff] %v10695_v25  ;;  %v10730_v42 = vsel %vm1378_vm1, %v1403_v5, %v1407_v61  ;;  %v8449_v5 = vld [vmem:[%s17230_s1 + $0x650] sm:$0xff] }
 0x13d   : > { %1114 = vmatmul.f32.gmra.mxu2 %v9357_v10  ;;  %1508 = vmatmul.f32.gmra.mxu0 %v10693_v36 }
 0x13e   : > { %1179 = vmatmul.f32.gmra.mxu3 %v9358_v21  ;;  %1573 = vmatmul.f32.gmra.mxu1 %v10698_v9 }
 0x13f   : > { %2010 = vmatpush.msrb.mxu0 %v8449_v5  ;;  %v8422_v5 = vld [vmem:[%s17230_s1 + $0x578] sm:$0xff] }
 0x140   : > { %v756_v10 = vpop.f32.mrf.mxu2  ;;  %1680 = vmatpush.msrb.mxu3 %v8422_v5  ;;  %v8388_v5 = vld [vmem:[%s17230_s1 + $0x468] sm:$0xff] }
 0x141   : > { %v821_v21 = vpop.f32.mrf.mxu3  ;;  %1616 = vmatpush.msrb.mxu2 %v8388_v5  ;;  %v10830_v5 = vld [vmem:[#allocation3 + $0x118] sm:$0xff] }
 0x142   : > { %v10720_v12 = vadd.f32 %v821_v21, %v756_v10  ;;  %v10722_v25 = vpop.f32.mrf.mxu0  ;;  %v1411_v10 = vrot.slane %v10734_v39, 1 }
 0x143   : > { %17447 = vst [vmem:[#allocation41_spill] sm:$0xff] %v10722_v25  ;;  %v10727_v50 = vpop.f32.mrf.mxu1  ;;  %v10757_v25 = vsel %vm1378_vm1, %v1405_v59, %v1409_v38  ;;  %v9362_v59 = vld [vmem:[#allocation3 + $0x158] sm:$0xff] }
 0x144   : > { %17448 = vst [vmem:[#allocation42_spill] sm:$0xff] %v10727_v50  ;;  %v10762_v58 = vsel %vm1378_vm1, %v1407_v61, %v1411_v10  ;;  %v1413_v61 = vrot.slane %v10764_v0, 1 }
 0x145   : > { %1117 = vmatmul.f32.gmra.mxu2 %v9359_v17  ;;  %1511 = vmatmul.f32.gmra.mxu0 %v10725_v6 }
 0x146   : > { %1182 = vmatmul.f32.gmra.mxu3 %v9360_v31  ;;  %1576 = vmatmul.f32.gmra.mxu1 %v10730_v42  ;;  %v10789_v40 = vsel %vm1378_vm1, %v1409_v38, %v1413_v61  ;;  %v9364_v38 = vld [vmem:[#allocation3 + $0xe0] sm:$0xff] }
 0x148   : > { %v759_v17 = vpop.f32.mrf.mxu2 }
 0x149   : > { %v824_v31 = vpop.f32.mrf.mxu3 }
 0x14a   : > { %v10752_v21 = vadd.f32 %v824_v31, %v759_v17  ;;  %v10754_v50 = vpop.f32.mrf.mxu0  ;;  %v8447_v17 = vld [vmem:[%s17230_s1 + $0x640] sm:$0xff] }
 0x14b   : > { %17449 = vst [vmem:[#allocation43_spill] sm:$0xff] %v10754_v50  ;;  %v10759_v1 = vpop.f32.mrf.mxu1  ;;  %v8479_v31 = vld [vmem:[%s17230_s1 + $0x740] sm:$0xff]  ;;  %2011 = vmatpush.msrb.mxu0 %v8447_v17  ;;  %v8420_v17 = vld [vmem:[%s17230_s1 + $0x568] sm:$0xff] }
 0x14c   : > { %17450 = vst [vmem:[#allocation44_spill] sm:$0xff] %v10759_v1  ;;  %v1415_v1 = vrot.slane %v10766_v49, 1  ;;  %2076 = vmatpush.msrb.mxu1 %v8479_v31  ;;  %v9363_v31 = vld [vmem:[#allocation3 + $0x128] sm:$0xff]  ;;  %1681 = vmatpush.msrb.mxu3 %v8420_v17  ;;  %v8386_v17 = vld [vmem:[%s17230_s1 + $0x458] sm:$0xff] }
 0x14d   : > { %1120 = vmatmul.f32.gmra.mxu2 %v9361_v4  ;;  %1514 = vmatmul.f32.gmra.mxu0 %v10757_v25 }
 0x14e   : > { %1185 = vmatmul.f32.gmra.mxu3 %v9362_v59  ;;  %1579 = vmatmul.f32.gmra.mxu1 %v10762_v58  ;;  %v10794_v24 = vsel %vm1378_vm1, %v1411_v10, %v1415_v1  ;;  %v1417_v10 = vrot.slane %v10796_v16, 1 }
 0x14f   : > { %1617 = vmatpush.msrb.mxu2 %v8386_v17  ;;  %v10863_v17 = vld [vmem:[#allocation3 + $0x130] sm:$0xff] }
 0x150   : > { %v762_v4 = vpop.f32.mrf.mxu2  ;;  %v10821_v51 = vsel %vm1378_vm1, %v1413_v61, %v1417_v10  ;;  %v9366_v61 = vld [vmem:[#allocation3 + $0x20] sm:$0xff] }
 0x151   : > { %v827_v59 = vpop.f32.mrf.mxu3 }
 0x152   : > { %v10784_v50 = vadd.f32 %v827_v59, %v762_v4  ;;  %v10786_v60 = vpop.f32.mrf.mxu0  ;;  %v8445_v4 = vld [vmem:[%s17230_s1 + $0x630] sm:$0xff] }
 0x153   : > { %17451 = vst [vmem:[#allocation45_spill] sm:$0xff] %v10786_v60  ;;  %v10791_v45 = vpop.f32.mrf.mxu1  ;;  %v8477_v59 = vld [vmem:[%s17230_s1 + $0x730] sm:$0xff]  ;;  %2012 = vmatpush.msrb.mxu0 %v8445_v4  ;;  %v8418_v4 = vld [vmem:[%s17230_s1 + $0x558] sm:$0xff] }
 0x154   : > { %17452 = vst [vmem:[#allocation46_spill] sm:$0xff] %v10791_v45  ;;  %v1419_v45 = vrot.slane %v10798_v14, 1  ;;  %2077 = vmatpush.msrb.mxu1 %v8477_v59  ;;  %v9365_v59 = vld [vmem:[#allocation3 + $0x80] sm:$0xff]  ;;  %1682 = vmatpush.msrb.mxu3 %v8418_v4  ;;  %v10866_v4 = vld [vmem:[#allocation2 + $0x78] sm:$0xff] }
 0x155   : > { %1123 = vmatmul.f32.gmra.mxu2 %v9363_v31  ;;  %1517 = vmatmul.f32.gmra.mxu0 %v10789_v40  ;;  %17459 = vst [vmem:[#allocation53_spill] sm:$0xff] %v10866_v4 }
 0x156   : > { %1188 = vmatmul.f32.gmra.mxu3 %v9364_v38  ;;  %1582 = vmatmul.f32.gmra.mxu1 %v10794_v24  ;;  %v10826_v19 = vsel %vm1378_vm1, %v1415_v1, %v1419_v45  ;;  %v1421_v1 = vrot.slane %v10828_v15, 1  ;;  %355 = vst [vmem:[#allocation3 + $0x78] sm:$0xff] %v10866_v4 }
 0x158   : > { %v765_v31 = vpop.f32.mrf.mxu2  ;;  %v10853_v20 = vsel %vm1378_vm1, %v1417_v10, %v1421_v1  ;;  %v8384_v10 = vld [vmem:[%s17230_s1 + $0x448] sm:$0xff] }
 0x159   : > { %v830_v38 = vpop.f32.mrf.mxu3  ;;  %1618 = vmatpush.msrb.mxu2 %v8384_v10  ;;  %v10901_v10 = vld [vmem:[#allocation3 + $0xb8] sm:$0xff] }
 0x15a   : > { %v10816_v60 = vadd.f32 %v830_v38, %v765_v31  ;;  %v10818_v26 = vpop.f32.mrf.mxu0  ;;  %v8443_v31 = vld [vmem:[%s17230_s1 + $0x620] sm:$0xff]  ;;  %17466 = vst [vmem:[#allocation60_spill] sm:$0xff] %v10901_v10 }
 0x15b   : > { %17453 = vst [vmem:[#allocation47_spill] sm:$0xff] %v10818_v26  ;;  %v10823_v62 = vpop.f32.mrf.mxu1  ;;  %v8475_v38 = vld [vmem:[%s17230_s1 + $0x720] sm:$0xff]  ;;  %2013 = vmatpush.msrb.mxu0 %v8443_v31  ;;  %v10868_v31 = vld [vmem:[#allocation3 + $0x108] sm:$0xff] }
 0x15c   : > { %17454 = vst [vmem:[#allocation48_spill] sm:$0xff] %v10823_v62  ;;  %v1423_v62 = vrot.slane %v10830_v5, 1  ;;  %2078 = vmatpush.msrb.mxu1 %v8475_v38  ;;  %v8416_v38 = vld [vmem:[%s17230_s1 + $0x548] sm:$0xff]  ;;  %v1427_v23 = vrot.slane %v10868_v31, 1 }
 0x15d   : > { %1126 = vmatmul.f32.gmra.mxu2 %v9365_v59  ;;  %1520 = vmatmul.f32.gmra.mxu0 %v10821_v51 }
 0x15e   : > { %1191 = vmatmul.f32.gmra.mxu3 %v9366_v61  ;;  %1585 = vmatmul.f32.gmra.mxu1 %v10826_v19  ;;  %v10861_v35 = vsel %vm1378_vm1, %v1419_v45, %v1423_v62  ;;  %v9367_v45 = vld [vmem:[#allocation3 + $0x70] sm:$0xff]  ;;  %v10897_v4 = vsel %vm1378_vm1, %v1423_v62, %v1427_v23  ;;  %v1429_v62 = vrot.slane %v10899_v11, 1 }
 0x15f   : > { %17458 = vst [vmem:[#allocation52_spill] sm:$0xff] %v10861_v35  ;;  %1683 = vmatpush.msrb.mxu3 %v8416_v38  ;;  %v9369_v38 = vld [vmem:[#allocation3 + $0x88] sm:$0xff] }
 0x160   : > { %v768_v59 = vpop.f32.mrf.mxu2  ;;  %17464 = vst [vmem:[#allocation58_spill] sm:$0xff] %v10897_v4 }
 0x161   : > { %v833_v61 = vpop.f32.mrf.mxu3 }
 0x162   : > { %v10848_v26 = vadd.f32 %v833_v61, %v768_v59  ;;  %v10850_v55 = vpop.f32.mrf.mxu0  ;;  %v9368_v59 = vld [vmem:[#allocation3 + $0x50] sm:$0xff]  ;;  %v1425_v61 = vrot.slane %v10863_v17, 1 }
 0x163   : > { %17455 = vst [vmem:[#allocation49_spill] sm:$0xff] %v10850_v55  ;;  %v10858_v30 = vpop.f32.mrf.mxu1  ;;  %v8473_v55 = vld [vmem:[%s17230_s1 + $0x710] sm:$0xff] }
 0x164   : > { %17457 = vst [vmem:[#allocation51_spill] sm:$0xff] %v10858_v30  ;;  %v8441_v30 = vld [vmem:[%s17230_s1 + $0x610] sm:$0xff]  ;;  %2079 = vmatpush.msrb.mxu1 %v8473_v55  ;;  %v10892_v13 = vsel %vm1378_vm1, %v1421_v1, %v1425_v61  ;;  %v8414_v55 = vld [vmem:[%s17230_s1 + $0x538] sm:$0xff] }
 0x165   : > { %1129 = vmatmul.f32.gmra.mxu2 %v9367_v45  ;;  %1523 = vmatmul.f32.gmra.mxu0 %v10853_v20  ;;  %17462 = vst [vmem:[#allocation56_spill] sm:$0xff] %v10892_v13  ;;  %v9370_v1 = vld [vmem:[#allocation3 + $0x118] sm:$0xff] }
 0x166   : > { %1194 = vmatmul.f32.gmra.mxu3 %v9368_v59  ;;  %1588 = vmatmul.f32.gmra.mxu1 %v10861_v35  ;;  %v10975_v35 = vld [vmem:[#allocation3 + $0x140] sm:$0xff] }
 0x167   : > { %2014 = vmatpush.msrb.mxu0 %v8441_v30  ;;  %v8382_v30 = vld [vmem:[%s17230_s1 + $0x438] sm:$0xff]  ;;  %1684 = vmatpush.msrb.mxu3 %v8414_v55  ;;  %17479 = vst [vmem:[#allocation73_spill] sm:$0xff] %v10975_v35 }
 0x168   : > { %v771_v45 = vpop.f32.mrf.mxu2  ;;  %1619 = vmatpush.msrb.mxu2 %v8382_v30  ;;  %v10930_v30 = vsel %vm1378_vm1, %v1425_v61, %v1429_v62  ;;  %v8378_v55 = vld [vmem:[%s17230_s1 + $0x418] sm:$0xff]  ;;  %v8376_v61 = vld [vmem:[%s17230_s1 + $0x408] sm:$0xff] }
 0x169   : > { %v836_v59 = vpop.f32.mrf.mxu3  ;;  %17469 = vst [vmem:[#allocation63_spill] sm:$0xff] %v10930_v30 }
 0x16a   : > { %v10887_v32 = vadd.f32 %v836_v59, %v771_v45  ;;  %v10889_v47 = vpop.f32.mrf.mxu0  ;;  %v8439_v45 = vld [vmem:[%s17230_s1 + $0x600] sm:$0xff] }
 0x16b   : > { %17461 = vst [vmem:[#allocation55_spill] sm:$0xff] %v10889_v47  ;;  %v10894_v57 = vpop.f32.mrf.mxu1  ;;  %v8471_v59 = vld [vmem:[%s17230_s1 + $0x700] sm:$0xff]  ;;  %2015 = vmatpush.msrb.mxu0 %v8439_v45  ;;  %v8412_v47 = vld [vmem:[%s17230_s1 + $0x528] sm:$0xff]  ;;  %v8410_v45 = vld [vmem:[%s17230_s1 + $0x518] sm:$0xff] }
 0x16c   : > { %17460 = vst [vmem:[#allocation54_spill] sm:$0xff] %v10887_v32  ;;  %2080 = vmatpush.msrb.mxu1 %v8471_v59  ;;  %1685 = vmatpush.msrb.mxu3 %v8412_v47  ;;  %v10943_v47 = vld [vmem:[#allocation3 + $0xc8] sm:$0xff] }
 0x16d   : > { %17463 = vst [vmem:[#allocation57_spill] sm:$0xff] %v10894_v57  ;;  %1132 = vmatmul.f32.gmra.mxu2 %v9369_v38  ;;  %1526 = vmatmul.f32.gmra.mxu0 %v10892_v13  ;;  %v1431_v57 = vrot.slane %v10901_v10, 1 }
 0x16e   : > { %1197 = vmatmul.f32.gmra.mxu3 %v9370_v1  ;;  %1591 = vmatmul.f32.gmra.mxu1 %v10897_v4  ;;  %v8380_v1 = vld [vmem:[%s17230_s1 + $0x428] sm:$0xff]  ;;  %17472 = vst [vmem:[#allocation66_spill] sm:$0xff] %v10943_v47 }
 0x16f   : > { %1620 = vmatpush.msrb.mxu2 %v8380_v1  ;;  %v10941_v1 = vsel %vm1378_vm1, %v1427_v23, %v1431_v57  ;;  %1686 = vmatpush.msrb.mxu3 %v8410_v45  ;;  %v9372_v23 = vld [vmem:[#allocation3 + $0x108] sm:$0xff]  ;;  %v8533_v45 = vld [vmem:[%s17230_s1 + $0x8f0] sm:$0xff] }
 0x170   : > { %v774_v38 = vpop.f32.mrf.mxu2  ;;  %17471 = vst [vmem:[#allocation65_spill] sm:$0xff] %v10941_v1  ;;  %2359 = vmatpush.msra.mxu0 %v8533_v45  ;;  %v8531_v45 = vld [vmem:[%s17230_s1 + $0x8e0] sm:$0xff] }
 0x171   : > { %v839_v4 = vpop.f32.mrf.mxu3  ;;  %1621 = vmatpush.msrb.mxu2 %v8378_v55  ;;  %v1433_v55 = vrot.slane %v10943_v47, 1 }
 0x172   : > { %v10925_v13 = vadd.f32 %v839_v4, %v774_v38  ;;  %v10927_v32 = vpop.f32.mrf.mxu0  ;;  %v10945_v4 = vld [vmem:[#allocation3 + $0x90] sm:$0xff]  ;;  %v8408_v38 = vld [vmem:[%s17230_s1 + $0x508] sm:$0xff]  ;;  %2360 = vmatpush.msra.mxu0 %v8531_v45 }
 0x173   : > { %17468 = vst [vmem:[#allocation62_spill] sm:$0xff] %v10927_v32  ;;  %v10938_v59 = vpop.f32.mrf.mxu1  ;;  %v9371_v32 = vld [vmem:[#allocation3 + $0x130] sm:$0xff]  ;;  %1622 = vmatpush.msrb.mxu2 %v8376_v61  ;;  %1687 = vmatpush.msrb.mxu3 %v8408_v38  ;;  %v10968_v47 = vsel %vm1378_vm1, %v1429_v62, %v1433_v55  ;;  %v9373_v38 = vld [vmem:[#allocation3 + $0xa8] sm:$0xff]  ;;  %v1437_v62 = vrot.slane %v10975_v35, 1  ;;  %v1278_v35 = vld [vmem:[#allocation3 + $0x78] sm:$0x1] }
 0x174   : > { %17467 = vst [vmem:[#allocation61_spill] sm:$0xff] %v10925_v13  ;;  %v1435_v13 = vrot.slane %v10945_v4, 1  ;;  %v10977_v61 = vld [vmem:[#allocation3 + $0x10] sm:$0xff] }
 0x175   : > { %17470 = vst [vmem:[#allocation64_spill] sm:$0xff] %v10938_v59  ;;  %1135 = vmatmul.f32.gmra.mxu2 %v9371_v32  ;;  %1529 = vmatmul.f32.gmra.mxu0 %v10930_v30  ;;  %v8565_v59 = vld [vmem:[%s17230_s1 + $0x9f0] sm:$0xff] }
 0x176   : > { %17473 = vst [vmem:[#allocation67_spill] sm:$0xff] %v10945_v4  ;;  %1200 = vmatmul.f32.gmra.mxu3 %v9372_v23  ;;  %1594 = vmatmul.f32.gmra.mxu1 %v10941_v1  ;;  %v10973_v11 = vsel %vm1378_vm1, %v1431_v57, %v1435_v13  ;;  %v8563_v57 = vld [vmem:[%s17230_s1 + $0x9e0] sm:$0xff]  ;;  %v9375_v4 = vld [vmem:[#allocation3 + $0xc8] sm:$0xff]  ;;  %v9376_v45 = vld [vmem:[#allocation3 + $0x90] sm:$0xff] }
 0x177   : > { %2424 = vmatpush.msra.mxu1 %v8565_v59  ;;  %17476 = vst [vmem:[#allocation70_spill] sm:$0xff] %v10968_v47  ;;  %v9374_v59 = vld [vmem:[#allocation3 + $0xb8] sm:$0xff] }
 0x178   : > { %v777_v32 = vpop.f32.mrf.mxu2  ;;  %17478 = vst [vmem:[#allocation72_spill] sm:$0xff] %v10973_v11 }
 0x179   : > { %v842_v23 = vpop.f32.mrf.mxu3  ;;  %2425 = vmatpush.msra.mxu1 %v8563_v57 }
 0x17a   : > { %v10963_v30 = vadd.f32 %v842_v23, %v777_v32  ;;  %v10965_v1 = vpop.f32.mrf.mxu0  ;;  %v1439_v32 = vrot.slane %v10977_v61, 1 }
 0x17b   : > { %17475 = vst [vmem:[#allocation69_spill] sm:$0xff] %v10965_v1  ;;  %v10970_v10 = vpop.f32.mrf.mxu1  ;;  %v10994_v1 = vsel %vm1378_vm1, %v1433_v55, %v1437_v62  ;;  %v8529_v55 = vld [vmem:[%s17230_s1 + $0x8d0] sm:$0xff] }
 0x17c   : > { %17474 = vst [vmem:[#allocation68_spill] sm:$0xff] %v10963_v30  ;;  %v1277_v30 = vld [vmem:[#allocation3 + $0x138] sm:$0x1]  ;;  %2361 = vmatpush.msra.mxu0 %v8529_v55 }
 0x17d   : > { %17477 = vst [vmem:[#allocation71_spill] sm:$0xff] %v10970_v10  ;;  %1138 = vmatmul.f32.gmra.mxu2 %v9373_v38  ;;  %1532 = vmatmul.f32.gmra.mxu0 %v10968_v47  ;;  %v10999_v47 = vsel %vm1378_vm1, %v1435_v13, %v1439_v32  ;;  %v1441_v57 = vrot.slane %v1277_v30, 1  ;;  %v8561_v13 = vld [vmem:[%s17230_s1 + $0x9d0] sm:$0xff]  ;;  %v8502_v55 = vld [vmem:[%s17230_s1 + $0x7f8] sm:$0xff] }
 0x17e   : > { %1203 = vmatmul.f32.gmra.mxu3 %v9374_v59  ;;  %1597 = vmatmul.f32.gmra.mxu1 %v10973_v11  ;;  %17482 = vst [vmem:[#allocation76_spill] sm:$0xff] %v10994_v1 }
 0x17f   : > { %17484 = vst [vmem:[#allocation78_spill] sm:$0xff] %v10999_v47  ;;  %2426 = vmatpush.msra.mxu1 %v8561_v13  ;;  %v9377_v13 = vld [vmem:[#allocation3 + $0x140] sm:$0xff]  ;;  %2195 = vmatpush.msra.mxu3 %v8502_v55  ;;  %v1908_v55 = vrot.slane %v10590_v2, 7 }
 0x180   : > { %v780_v23 = vpop.f32.mrf.mxu2 }
 0x181   : > { %v845_v38 = vpop.f32.mrf.mxu3 }
 0x182   : > { %v10989_v10 = vadd.f32 %v845_v38, %v780_v23  ;;  %v10991_v59 = vpop.f32.mrf.mxu0  ;;  %v1443_v23 = vrot.slane %v1278_v35, 1  ;;  %v8470_v35 = vld [vmem:[%s17230_s1 + $0x6f8] sm:$0xff] }
 0x183   : > { %17481 = vst [vmem:[#allocation75_spill] sm:$0xff] %v10991_v59  ;;  %v10996_v11 = vpop.f32.mrf.mxu1  ;;  %2130 = vmatpush.msra.mxu2 %v8470_v35 }
 0x184   : > { %17480 = vst [vmem:[#allocation74_spill] sm:$0xff] %v10989_v10  ;;  %v1770_v10 = vld [vmem:[#allocation3 + $0x8] sm:$0x80] }
 0x185   : > { %17483 = vst [vmem:[#allocation77_spill] sm:$0xff] %v10996_v11  ;;  %1141 = vmatmul.f32.gmra.mxu2 %v9375_v4  ;;  %1535 = vmatmul.f32.gmra.mxu0 %v10994_v1  ;;  %v1769_v1 = vld [vmem:[#allocation3 + $0x100] sm:$0x80] }
 0x186   : > { %1206 = vmatmul.f32.gmra.mxu3 %v9376_v45  ;;  %1600 = vmatmul.f32.gmra.mxu1 %v10999_v47  ;;  %v11014_v45 = vsel %vm1378_vm1, %v1437_v62, %v1441_v57  ;;  %v11019_v47 = vsel %vm1378_vm1, %v1439_v32, %v1443_v23  ;;  %v9378_v62 = vld [vmem:[#allocation3 + $0x10] sm:$0xff]  ;;  %v1902_v32 = vrot.slane %v1769_v1, 7  ;;  %v1903_v57 = vrot.slane %v10555_v7, 7  ;;  %v8527_v23 = vld [vmem:[%s17230_s1 + $0x8c0] sm:$0xff] }
 0x187   : > { %17486 = vst [vmem:[#allocation80_spill] sm:$0xff] %v11014_v45  ;;  %2362 = vmatpush.msra.mxu0 %v8527_v23  ;;  %v1910_v23 = vrot.slane %v10592_v53, 7  ;;  %v11084_v53 = vld [vmem:[#allocation3 + $0x68] sm:$0xff] }
 0x188   : > { %v783_v38 = vpop.f32.mrf.mxu2  ;;  %17488 = vst [vmem:[#allocation82_spill] sm:$0xff] %v11019_v47 }
 0x189   : > { %v848_v4 = vpop.f32.mrf.mxu3  ;;  %17493 = vst [vmem:[#allocation87_spill] sm:$0xff] %v11084_v53 }
 0x18a   : > { %v11009_v11 = vadd.f32 %v848_v4, %v783_v38  ;;  %v11011_v59 = vpop.f32.mrf.mxu0  ;;  %v8559_v38 = vld [vmem:[%s17230_s1 + $0x9c0] sm:$0xff]  ;;  %v1905_v4 = vrot.slane %v1770_v10, 7  ;;  %v8500_v10 = vld [vmem:[%s17230_s1 + $0x7e8] sm:$0xff] }
 0x18b   : > { %17485 = vst [vmem:[#allocation79_spill] sm:$0xff] %v11011_v59  ;;  %v11016_v30 = vpop.f32.mrf.mxu1  ;;  %2427 = vmatpush.msra.mxu1 %v8559_v38  ;;  %v11042_v59 = vsel %vm495_vm0, %v1902_v32, %v1903_v57  ;;  %v8525_v32 = vld [vmem:[%s17230_s1 + $0x8b0] sm:$0xff]  ;;  %2196 = vmatpush.msra.mxu3 %v8500_v10  ;;  %v11088_v10 = vld [vmem:[#allocation3] sm:$0xff] }
 0x18c   : > { %17487 = vst [vmem:[#allocation81_spill] sm:$0xff] %v11016_v30  ;;  %2363 = vmatpush.msra.mxu0 %v8525_v32  ;;  %v8523_v32 = vld [vmem:[%s17230_s1 + $0x8a0] sm:$0xff] }
 0x18d   : > { %1144 = vmatmul.f32.gmra.mxu2 %v9377_v13  ;;  %1538 = vmatmul.f32.gmra.mxu0 %v11014_v45  ;;  %v1906_v13 = vrot.slane %v10560_v22, 7  ;;  %v8468_v22 = vld [vmem:[%s17230_s1 + $0x6e8] sm:$0xff]  ;;  %17494 = vst [vmem:[#allocation88_spill] sm:$0xff] %v11088_v10 }
 0x18e   : > { %1209 = vmatmul.f32.gmra.mxu3 %v9378_v62  ;;  %1603 = vmatmul.f32.gmra.mxu1 %v11019_v47 }
 0x18f   : > { %v11047_v45 = vsel %vm495_vm0, %v1905_v4, %v1906_v13  ;;  %2131 = vmatpush.msra.mxu2 %v8468_v22  ;;  %2364 = vmatpush.msra.mxu0 %v8523_v32  ;;  %v11124_v32 = vld [vmem:[#allocation3 + $0x18] sm:$0xff] }
 0x190   : > { %v786_v30 = vpop.f32.mrf.mxu2  ;;  %17498 = vst [vmem:[#allocation92_spill] sm:$0xff] %v11124_v32 }
 0x191   : > { %v851_v62 = vpop.f32.mrf.mxu3 }
 0x192   : > { %v11037_v1 = vadd.f32 %v851_v62, %v786_v30  ;;  %v11039_v7 = vpop.f32.mrf.mxu0  ;;  %v9379_v30 = vld [vmem:[%s17231_s2] sm:$0x3] }
 0x193   : > { %17489 = vst [vmem:[#allocation83_spill] sm:$0xff] %v11039_v7  ;;  %v11044_v47 = vpop.f32.mrf.mxu1  ;;  %v11060_v35 = vperm.slane %v9379_v30, 1  ;;  %v11077_v30 = vsel %vm495_vm0, %v1903_v57, %v1908_v55  ;;  %v11082_v7 = vsel %vm495_vm0, %v1906_v13, %v1910_v23  ;;  %v8498_v57 = vld [vmem:[%s17230_s1 + $0x7d8] sm:$0xff]  ;;  %v1912_v13 = vrot.slane %v11084_v53, 7 }
 0x194   : > { %17490 = vst [vmem:[#allocation84_spill] sm:$0xff] %v11044_v47  ;;  %2197 = vmatpush.msra.mxu3 %v8498_v57 }
 0x195   : > { %1623 = vmatmul.f32.vlgmr.msrb.gmra.mxu2 %v10548_v37  ;;  %2016 = vmatmul.f32.vlgmr.msrb.gmra.mxu0 %v11042_v59  ;;  %v8557_v37 = vld [vmem:[%s17230_s1 + $0x9b0] sm:$0xff]  ;;  %v855_v4 = vadd.f32 %v10578_v8, %v11060_v35  ;;  %v8466_v8 = vld [vmem:[%s17230_s1 + $0x6d8] sm:$0xff] }
 0x196   : > { %1688 = vmatmul.f32.vlgmr.msrb.gmra.mxu3 %v10553_v54  ;;  %2081 = vmatmul.f32.vlgmr.msrb.gmra.mxu1 %v11047_v45 }
 0x197   : > { %2428 = vmatpush.msra.mxu1 %v8557_v37  ;;  %v8555_v37 = vld [vmem:[%s17230_s1 + $0x9a0] sm:$0xff]  ;;  %2132 = vmatpush.msra.mxu2 %v8466_v8  ;;  %v11120_v8 = vld [vmem:[#allocation3 + $0x148] sm:$0xff] }
 0x198   : > { %v1100_v38 = vpop.f32.mrf.mxu2  ;;  %17497 = vst [vmem:[#allocation91_spill] sm:$0xff] %v11120_v8 }
 0x199   : > { %v1165_v54 = vpop.f32.mrf.mxu3  ;;  %2429 = vmatpush.msra.mxu1 %v8555_v37  ;;  %v8521_v37 = vld [vmem:[%s17230_s1 + $0x890] sm:$0xff] }
 0x19a   : > { %v1166_v2 = vadd.f32 %v1165_v54, %v1100_v38  ;;  %v11074_v62 = vpop.f32.mrf.mxu0  ;;  %v1914_v38 = vrot.slane %v11088_v10, 7  ;;  %v857_v54 = vadd.f32 %v10610_v44, %v11060_v35  ;;  %v8464_v44 = vld [vmem:[%s17230_s1 + $0x6c8] sm:$0xff]  ;;  %2365 = vmatpush.msra.mxu0 %v8521_v37  ;;  %v11160_v37 = vld [vmem:[#allocation3 + $0x150] sm:$0xff] }
 0x19b   : > { %17491 = vst [vmem:[#allocation85_spill] sm:$0xff] %v11074_v62  ;;  %v11079_v47 = vpop.f32.mrf.mxu1  ;;  %2133 = vmatpush.msra.mxu2 %v8464_v44  ;;  %v11156_v44 = vld [vmem:[#allocation3 + $0x28] sm:$0xff] }
 0x19c   : > { %17492 = vst [vmem:[#allocation86_spill] sm:$0xff] %v11079_v47  ;;  %v11086_v22 = vadd.f32 %v1166_v2, %v855_v4  ;;  %v11113_v47 = vsel %vm495_vm0, %v1908_v55, %v1912_v13  ;;  %v11118_v53 = vsel %vm495_vm0, %v1910_v23, %v1914_v38  ;;  %v8496_v55 = vld [vmem:[%s17230_s1 + $0x7c8] sm:$0xff]  ;;  %v1916_v23 = vrot.slane %v11120_v8, 7 }
 0x19d   : > { %1626 = vmatmul.f32.gmra.mxu2 %v10583_v43  ;;  %2019 = vmatmul.f32.gmra.mxu0 %v11077_v30  ;;  %17501 = vst [vmem:[#allocation95_spill] sm:$0xff] %v11156_v44 }
 0x19e   : > { %1691 = vmatmul.f32.gmra.mxu3 %v10588_v63  ;;  %2084 = vmatmul.f32.gmra.mxu1 %v11082_v7 }
 0x19f   : > { %2198 = vmatpush.msra.mxu3 %v8496_v55 }
 0x1a0   : > { %v1103_v43 = vpop.f32.mrf.mxu2 }
 0x1a1   : > { %v1168_v63 = vpop.f32.mrf.mxu3 }
 0x1a2   : > { %v1169_v4 = vadd.f32 %v1168_v63, %v1103_v43  ;;  %v11110_v2 = vpop.f32.mrf.mxu0  ;;  %v8553_v43 = vld [vmem:[%s17230_s1 + $0x990] sm:$0xff]  ;;  %v1918_v63 = vrot.slane %v11124_v32, 7 }
 0x1a3   : > { %17495 = vst [vmem:[#allocation89_spill] sm:$0xff] %v11110_v2  ;;  %v11115_v62 = vpop.f32.mrf.mxu1  ;;  %2430 = vmatpush.msra.mxu1 %v8553_v43  ;;  %v11149_v2 = vsel %vm495_vm0, %v1912_v13, %v1916_v23  ;;  %v8494_v13 = vld [vmem:[%s17230_s1 + $0x7b8] sm:$0xff]  ;;  %v8519_v43 = vld [vmem:[%s17230_s1 + $0x880] sm:$0xff] }
 0x1a4   : > { %17496 = vst [vmem:[#allocation90_spill] sm:$0xff] %v11115_v62  ;;  %v11122_v57 = vadd.f32 %v1169_v4, %v857_v54  ;;  %v859_v54 = vadd.f32 %v10636_v29, %v11060_v35  ;;  %v11154_v10 = vsel %vm495_vm0, %v1914_v38, %v1918_v63  ;;  %v8462_v29 = vld [vmem:[%s17230_s1 + $0x6b8] sm:$0xff]  ;;  %v1920_v38 = vrot.slane %v11156_v44, 7  ;;  %2199 = vmatpush.msra.mxu3 %v8494_v13  ;;  %v8460_v13 = vld [vmem:[%s17230_s1 + $0x6a8] sm:$0xff] }
 0x1a5   : > { %1629 = vmatmul.f32.gmra.mxu2 %v10615_v3  ;;  %2022 = vmatmul.f32.gmra.mxu0 %v11113_v47 }
 0x1a6   : > { %1694 = vmatmul.f32.gmra.mxu3 %v10620_v48  ;;  %2087 = vmatmul.f32.gmra.mxu1 %v11118_v53 }
 0x1a7   : > { %2134 = vmatpush.msra.mxu2 %v8462_v29  ;;  %2366 = vmatpush.msra.mxu0 %v8519_v43  ;;  %v8549_v43 = vld [vmem:[%s17230_s1 + $0x970] sm:$0xff] }
 0x1a8   : > { %v1106_v3 = vpop.f32.mrf.mxu2 }
 0x1a9   : > { %v1171_v48 = vpop.f32.mrf.mxu3  ;;  %2135 = vmatpush.msra.mxu2 %v8460_v13  ;;  %v8458_v13 = vld [vmem:[%s17230_s1 + $0x698] sm:$0xff] }
 0x1aa   : > { %v1172_v4 = vadd.f32 %v1171_v48, %v1106_v3  ;;  %v11146_v62 = vpop.f32.mrf.mxu0  ;;  %v8551_v3 = vld [vmem:[%s17230_s1 + $0x980] sm:$0xff]  ;;  %v1922_v48 = vrot.slane %v11160_v37, 7 }
 0x1ab   : > { %17499 = vst [vmem:[#allocation93_spill] sm:$0xff] %v11146_v62  ;;  %v11151_v8 = vpop.f32.mrf.mxu1  ;;  %2431 = vmatpush.msra.mxu1 %v8551_v3  ;;  %v11185_v62 = vsel %vm495_vm0, %v1916_v23, %v1920_v38  ;;  %v1924_v23 = vrot.slane %v10700_v34, 7  ;;  %v1926_v3 = vrot.slane %v10702_v52, 7  ;;  %2136 = vmatpush.msra.mxu2 %v8458_v13  ;;  %v8456_v13 = vld [vmem:[%s17230_s1 + $0x688] sm:$0xff] }
 0x1ac   : > { %17500 = vst [vmem:[#allocation94_spill] sm:$0xff] %v11151_v8  ;;  %v11158_v55 = vadd.f32 %v1172_v4, %v859_v54  ;;  %v861_v54 = vadd.f32 %v10662_v41, %v11060_v35  ;;  %v11190_v32 = vsel %vm495_vm0, %v1918_v63, %v1922_v48  ;;  %v8492_v41 = vld [vmem:[%s17230_s1 + $0x7a8] sm:$0xff]  ;;  %v8517_v63 = vld [vmem:[%s17230_s1 + $0x870] sm:$0xff] }
 0x1ad   : > { %1632 = vmatmul.f32.gmra.mxu2 %v10641_v33  ;;  %2025 = vmatmul.f32.gmra.mxu0 %v11149_v2 }
 0x1ae   : > { %1697 = vmatmul.f32.gmra.mxu3 %v10646_v46  ;;  %2090 = vmatmul.f32.gmra.mxu1 %v11154_v10 }
 0x1af   : > { %2200 = vmatpush.msra.mxu3 %v8492_v41  ;;  %2367 = vmatpush.msra.mxu0 %v8517_v63  ;;  %v8547_v41 = vld [vmem:[%s17230_s1 + $0x960] sm:$0xff]  ;;  %v1930_v63 = vrot.slane %v10734_v39, 7 }
 0x1b0   : > { %v1109_v33 = vpop.f32.mrf.mxu2  ;;  %2432 = vmatpush.msra.mxu1 %v8549_v43  ;;  %v865_v43 = vadd.f32 %v10720_v12, %v11060_v35  ;;  %v8488_v12 = vld [vmem:[%s17230_s1 + $0x788] sm:$0xff]  ;;  %2137 = vmatpush.msra.mxu2 %v8456_v13  ;;  %v8454_v13 = vld [vmem:[%s17230_s1 + $0x678] sm:$0xff] }
 0x1b1   : > { %v1174_v46 = vpop.f32.mrf.mxu3 }
 0x1b2   : > { %v1175_v4 = vadd.f32 %v1174_v46, %v1109_v33  ;;  %v11182_v8 = vpop.f32.mrf.mxu0  ;;  %v863_v33 = vadd.f32 %v10688_v56, %v11060_v35  ;;  %v8490_v56 = vld [vmem:[%s17230_s1 + $0x798] sm:$0xff]  ;;  %2433 = vmatpush.msra.mxu1 %v8547_v41  ;;  %v867_v41 = vadd.f32 %v10752_v21, %v11060_v35  ;;  %2138 = vmatpush.msra.mxu2 %v8454_v13  ;;  %v8452_v13 = vld [vmem:[%s17230_s1 + $0x668] sm:$0xff] }
 0x1b3   : > { %17502 = vst [vmem:[#allocation96_spill] sm:$0xff] %v11182_v8  ;;  %v11187_v44 = vpop.f32.mrf.mxu1  ;;  %2201 = vmatpush.msra.mxu3 %v8490_v56  ;;  %v8545_v56 = vld [vmem:[%s17230_s1 + $0x950] sm:$0xff]  ;;  %v8486_v21 = vld [vmem:[%s17230_s1 + $0x778] sm:$0xff] }
 0x1b4   : > { %17503 = vst [vmem:[#allocation97_spill] sm:$0xff] %v11187_v44  ;;  %v11192_v29 = vadd.f32 %v1175_v4, %v861_v54  ;;  %v11217_v54 = vsel %vm495_vm0, %v1920_v38, %v1924_v23  ;;  %v11222_v44 = vsel %vm495_vm0, %v1922_v48, %v1926_v3  ;;  %v1928_v38 = vrot.slane %v10732_v28, 7  ;;  %v8515_v48 = vld [vmem:[%s17230_s1 + $0x860] sm:$0xff]  ;;  %2434 = vmatpush.msra.mxu1 %v8545_v56 }
 0x1b5   : > { %1635 = vmatmul.f32.gmra.mxu2 %v10667_v18  ;;  %2028 = vmatmul.f32.gmra.mxu0 %v11185_v62  ;;  %v869_v56 = vadd.f32 %v10784_v50, %v11060_v35  ;;  %v8484_v50 = vld [vmem:[%s17230_s1 + $0x768] sm:$0xff] }
 0x1b6   : > { %1700 = vmatmul.f32.gmra.mxu3 %v10672_v27  ;;  %2093 = vmatmul.f32.gmra.mxu1 %v11190_v32 }
 0x1b7   : > { %2368 = vmatpush.msra.mxu0 %v8515_v48  ;;  %v1934_v48 = vrot.slane %v10766_v49, 7  ;;  %2202 = vmatpush.msra.mxu3 %v8488_v12  ;;  %v8543_v12 = vld [vmem:[%s17230_s1 + $0x940] sm:$0xff] }
 0x1b8   : > { %v1112_v18 = vpop.f32.mrf.mxu2  ;;  %2435 = vmatpush.msra.mxu1 %v8543_v12  ;;  %2139 = vmatpush.msra.mxu2 %v8452_v13  ;;  %v871_v12 = vadd.f32 %v10816_v60, %v11060_v35  ;;  %v8450_v13 = vld [vmem:[%s17230_s1 + $0x658] sm:$0xff] }
 0x1b9   : > { %v1177_v27 = vpop.f32.mrf.mxu3  ;;  %2203 = vmatpush.msra.mxu3 %v8486_v21  ;;  %v8541_v21 = vld [vmem:[%s17230_s1 + $0x930] sm:$0xff]  ;;  %v8482_v60 = vld [vmem:[%s17230_s1 + $0x758] sm:$0xff] }
 0x1ba   : > { %v1178_v34 = vadd.f32 %v1177_v27, %v1112_v18  ;;  %v11214_v46 = vpop.f32.mrf.mxu0  ;;  %v11249_v27 = vsel %vm495_vm0, %v1924_v23, %v1928_v38  ;;  %v1932_v23 = vrot.slane %v10764_v0, 7  ;;  %2436 = vmatpush.msra.mxu1 %v8541_v21  ;;  %2140 = vmatpush.msra.mxu2 %v8450_v13  ;;  %v873_v21 = vadd.f32 %v10848_v26, %v11060_v35  ;;  %v8448_v26 = vld [vmem:[%s17230_s1 + $0x648] sm:$0xff] }
 0x1bb   : > { %17504 = vst [vmem:[#allocation98_spill] sm:$0xff] %v11214_v46  ;;  %v11219_v4 = vpop.f32.mrf.mxu1  ;;  %2204 = vmatpush.msra.mxu3 %v8484_v50  ;;  %v8539_v50 = vld [vmem:[%s17230_s1 + $0x920] sm:$0xff] }
 0x1bc   : > { %17505 = vst [vmem:[#allocation99_spill] sm:$0xff] %v11219_v4  ;;  %v11224_v52 = vadd.f32 %v1178_v34, %v863_v33  ;;  %v11254_v34 = vsel %vm495_vm0, %v1926_v3, %v1930_v63  ;;  %v8513_v3 = vld [vmem:[%s17230_s1 + $0x850] sm:$0xff]  ;;  %2437 = vmatpush.msra.mxu1 %v8539_v50  ;;  %2141 = vmatpush.msra.mxu2 %v8448_v26 }
 0x1bd   : > { %1638 = vmatmul.f32.gmra.mxu2 %v10693_v36  ;;  %2031 = vmatmul.f32.gmra.mxu0 %v11217_v54 }
 0x1be   : > { %1703 = vmatmul.f32.gmra.mxu3 %v10698_v9  ;;  %2096 = vmatmul.f32.gmra.mxu1 %v11222_v44 }
 0x1bf   : > { %2369 = vmatpush.msra.mxu0 %v8513_v3  ;;  %v1938_v3 = vrot.slane %v10798_v14, 7  ;;  %2205 = vmatpush.msra.mxu3 %v8482_v60 }
 0x1c0   : > { %v1115_v36 = vpop.f32.mrf.mxu2 }
 0x1c1   : > { %v1180_v9 = vpop.f32.mrf.mxu3 }
 0x1c2   : > { %v1181_v28 = vadd.f32 %v1180_v9, %v1115_v36  ;;  %v11246_v18 = vpop.f32.mrf.mxu0  ;;  %v11281_v9 = vsel %vm495_vm0, %v1928_v38, %v1932_v23  ;;  %v1936_v38 = vrot.slane %v10796_v16, 7 }
 0x1c3   : > { %17506 = vst [vmem:[#allocation100_spill] sm:$0xff] %v11246_v18  ;;  %v11251_v33 = vpop.f32.mrf.mxu1 }
 0x1c4   : > { %17507 = vst [vmem:[#allocation101_spill] sm:$0xff] %v11251_v33  ;;  %v11256_v39 = vadd.f32 %v1181_v28, %v865_v43  ;;  %v11286_v28 = vsel %vm495_vm0, %v1930_v63, %v1934_v48  ;;  %v8511_v63 = vld [vmem:[%s17230_s1 + $0x840] sm:$0xff] }
 0x1c5   : > { %1641 = vmatmul.f32.gmra.mxu2 %v10725_v6  ;;  %2034 = vmatmul.f32.gmra.mxu0 %v11249_v27 }
 0x1c6   : > { %1706 = vmatmul.f32.gmra.mxu3 %v10730_v42  ;;  %2099 = vmatmul.f32.gmra.mxu1 %v11254_v34 }
 0x1c7   : > { %2370 = vmatpush.msra.mxu0 %v8511_v63  ;;  %v1942_v63 = vrot.slane %v10830_v5, 7 }
 0x1c8   : > { %v1118_v6 = vpop.f32.mrf.mxu2 }
 0x1c9   : > { %v1183_v42 = vpop.f32.mrf.mxu3 }
 0x1ca   : > { %v1184_v0 = vadd.f32 %v1183_v42, %v1118_v6  ;;  %v11278_v36 = vpop.f32.mrf.mxu0  ;;  %v11313_v42 = vsel %vm495_vm0, %v1932_v23, %v1936_v38  ;;  %v1940_v23 = vrot.slane %v10828_v15, 7 }
 0x1cb   : > { %17508 = vst [vmem:[#allocation102_spill] sm:$0xff] %v11278_v36  ;;  %v11283_v43 = vpop.f32.mrf.mxu1 }
 0x1cc   : > { %17509 = vst [vmem:[#allocation103_spill] sm:$0xff] %v11283_v43  ;;  %v11288_v49 = vadd.f32 %v1184_v0, %v867_v41  ;;  %v11318_v0 = vsel %vm495_vm0, %v1934_v48, %v1938_v3  ;;  %v8509_v48 = vld [vmem:[%s17230_s1 + $0x830] sm:$0xff] }
 0x1cd   : > { %1644 = vmatmul.f32.gmra.mxu2 %v10757_v25  ;;  %2037 = vmatmul.f32.gmra.mxu0 %v11281_v9 }
 0x1ce   : > { %1709 = vmatmul.f32.gmra.mxu3 %v10762_v58  ;;  %2102 = vmatmul.f32.gmra.mxu1 %v11286_v28 }
 0x1cf   : > { %2371 = vmatpush.msra.mxu0 %v8509_v48  ;;  %v1946_v48 = vrot.slane %v10868_v31, 7 }
 0x1d0   : > { %v1121_v25 = vpop.f32.mrf.mxu2 }
 0x1d1   : > { %v1186_v58 = vpop.f32.mrf.mxu3  ;;  %v11387_v13 = vsel %vm495_vm0, %v1942_v63, %v1946_v48 }
 0x1d2   : > { %v1187_v16 = vadd.f32 %v1186_v58, %v1121_v25  ;;  %v11310_v6 = vpop.f32.mrf.mxu0  ;;  %v11345_v58 = vsel %vm495_vm0, %v1936_v38, %v1940_v23  ;;  %v1944_v38 = vrot.slane %v10863_v17, 7 }
 0x1d3   : > { %17510 = vst [vmem:[#allocation104_spill] sm:$0xff] %v11310_v6  ;;  %v11315_v41 = vpop.f32.mrf.mxu1 }
 0x1d4   : > { %17511 = vst [vmem:[#allocation105_spill] sm:$0xff] %v11315_v41  ;;  %v11320_v14 = vadd.f32 %v1187_v16, %v869_v56  ;;  %v11350_v16 = vsel %vm495_vm0, %v1938_v3, %v1942_v63  ;;  %v8507_v3 = vld [vmem:[%s17230_s1 + $0x820] sm:$0xff] }
 0x1d5   : > { %1647 = vmatmul.f32.gmra.mxu2 %v10789_v40  ;;  %2040 = vmatmul.f32.gmra.mxu0 %v11313_v42  ;;  %v17518_v63 = vld [vmem:[#allocation52_spill] sm:$0xff] }
 0x1d6   : > { %1712 = vmatmul.f32.gmra.mxu3 %v10794_v24  ;;  %2105 = vmatmul.f32.gmra.mxu1 %v11318_v0 }
 0x1d7   : > { %2372 = vmatpush.msra.mxu0 %v8507_v3  ;;  %v17519_v3 = vld [vmem:[#allocation59_spill] sm:$0xff] }
 0x1d8   : > { %v1124_v40 = vpop.f32.mrf.mxu2  ;;  %v1948_v50 = vrot.slane %v17519_v3, 7 }
 0x1d9   : > { %v1189_v24 = vpop.f32.mrf.mxu3 }
 0x1da   : > { %v1190_v15 = vadd.f32 %v1189_v24, %v1124_v40  ;;  %v11342_v25 = vpop.f32.mrf.mxu0  ;;  %v11377_v24 = vsel %vm495_vm0, %v1940_v23, %v1944_v38  ;;  %v8480_v23 = vld [vmem:[%s17230_s1 + $0x748] sm:$0xff] }
 0x1db   : > { %17512 = vst [vmem:[#allocation106_spill] sm:$0xff] %v11342_v25  ;;  %v11347_v56 = vpop.f32.mrf.mxu1  ;;  %2206 = vmatpush.msra.mxu3 %v8480_v23  ;;  %v11416_v25 = vsel %vm495_vm0, %v1944_v38, %v1948_v50  ;;  %v8446_v23 = vld [vmem:[%s17230_s1 + $0x638] sm:$0xff]  ;;  %v17525_v38 = vld [vmem:[#allocation58_spill] sm:$0xff] }
 0x1dc   : > { %17513 = vst [vmem:[#allocation107_spill] sm:$0xff] %v11347_v56  ;;  %v11352_v5 = vadd.f32 %v1190_v15, %v871_v12  ;;  %v11380_v12 = vld [vmem:[%s9590_s7 + $0x78] sm:$0xff]  ;;  %v11382_v15 = vld [vmem:[#allocation2 + $0x28] sm:$0xff]  ;;  %2142 = vmatpush.msra.mxu2 %v8446_v23 }
 0x1dd   : > { %1650 = vmatmul.f32.gmra.mxu2 %v10821_v51  ;;  %2043 = vmatmul.f32.gmra.mxu0 %v11345_v58  ;;  %17515 = vst [vmem:[#allocation109_spill] sm:$0xff] %v11380_v12 }
 0x1de   : > { %1715 = vmatmul.f32.gmra.mxu3 %v10826_v19  ;;  %2108 = vmatmul.f32.gmra.mxu1 %v11350_v16  ;;  %17516 = vst [vmem:[#allocation110_spill] sm:$0xff] %v11382_v15 }
 0x1df   : > { %340 = vst [vmem:[#allocation3 + $0xa0] sm:$0xff] %v11380_v12 }
 0x1e0   : > { %v1127_v51 = vpop.f32.mrf.mxu2  ;;  %356 = vst [vmem:[#allocation3 + $0x120] sm:$0xff] %v11382_v15 }
 0x1e1   : > { %v1192_v19 = vpop.f32.mrf.mxu3 }
 0x1e2   : > { %v1193_v17 = vadd.f32 %v1192_v19, %v1127_v51  ;;  %v11374_v40 = vpop.f32.mrf.mxu0  ;;  %v8505_v51 = vld [vmem:[%s17230_s1 + $0x810] sm:$0xff] }
 0x1e3   : > { %17514 = vst [vmem:[#allocation108_spill] sm:$0xff] %v11374_v40  ;;  %v11384_v31 = vpop.f32.mrf.mxu1  ;;  %v8537_v19 = vld [vmem:[%s17230_s1 + $0x910] sm:$0xff]  ;;  %2373 = vmatpush.msra.mxu0 %v8505_v51  ;;  %v17524_v51 = vld [vmem:[#allocation56_spill] sm:$0xff] }
 0x1e4   : > { %17517 = vst [vmem:[#allocation111_spill] sm:$0xff] %v11384_v31  ;;  %v11390_v60 = vadd.f32 %v1193_v17, %v873_v21  ;;  %v17520_v21 = vld [vmem:[#allocation60_spill] sm:$0xff]  ;;  %2438 = vmatpush.msra.mxu1 %v8537_v19  ;;  %v17521_v31 = vld [vmem:[#allocation54_spill] sm:$0xff] }
 0x1e5   : > { %1653 = vmatmul.f32.gmra.mxu2 %v10853_v20  ;;  %2046 = vmatmul.f32.gmra.mxu0 %v11377_v24  ;;  %v1950_v17 = vrot.slane %v17520_v21, 7  ;;  %v875_v40 = vadd.f32 %v17521_v31, %v11060_v35  ;;  %v8478_v31 = vld [vmem:[%s17230_s1 + $0x738] sm:$0xff]  ;;  %v8535_v21 = vld [vmem:[%s17230_s1 + $0x900] sm:$0xff] }
 0x1e6   : > { %1718 = vmatmul.f32.gmra.mxu3 %v17518_v63  ;;  %2111 = vmatmul.f32.gmra.mxu1 %v11387_v13  ;;  %v1801_v8 = vld [vmem:[#allocation3 + $0xa0] sm:$0x7f] }
 0x1e7   : > { %v11421_v6 = vsel %vm495_vm0, %v1946_v48, %v1950_v17  ;;  %v17526_v48 = vld [vmem:[#allocation66_spill] sm:$0xff]  ;;  %2207 = vmatpush.msra.mxu3 %v8478_v31  ;;  %2439 = vmatpush.msra.mxu1 %v8535_v21  ;;  %v8474_v21 = vld [vmem:[%s17230_s1 + $0x718] sm:$0xff] }
 0x1e8   : > { %v1130_v20 = vpop.f32.mrf.mxu2  ;;  %v1952_v19 = vrot.slane %v17526_v48, 7 }
 0x1e9   : > { %v1195_v63 = vpop.f32.mrf.mxu3 }
 0x1ea   : > { %v1196_v3 = vadd.f32 %v1195_v63, %v1130_v20  ;;  %v11413_v56 = vpop.f32.mrf.mxu0  ;;  %v17527_v20 = vld [vmem:[#allocation67_spill] sm:$0xff]  ;;  %v11454_v31 = vsel %vm495_vm0, %v1948_v50, %v1952_v19  ;;  %v8440_v50 = vld [vmem:[%s17230_s1 + $0x608] sm:$0xff] }
 0x1eb   : > { %17522 = vst [vmem:[#allocation52_spill] sm:$0xff] %v11413_v56  ;;  %v11418_v41 = vpop.f32.mrf.mxu1  ;;  %v1954_v63 = vrot.slane %v17527_v20, 7 }
 0x1ec   : > { %17523 = vst [vmem:[#allocation59_spill] sm:$0xff] %v11418_v41  ;;  %v11423_v26 = vadd.f32 %v1196_v3, %v875_v40  ;;  %v8503_v40 = vld [vmem:[%s17230_s1 + $0x800] sm:$0xff]  ;;  %v17528_v41 = vld [vmem:[#allocation61_spill] sm:$0xff] }
 0x1ed   : > { %1656 = vmatmul.f32.gmra.mxu2 %v17524_v51  ;;  %2049 = vmatmul.f32.gmra.mxu0 %v11416_v25  ;;  %v8444_v51 = vld [vmem:[%s17230_s1 + $0x628] sm:$0xff]  ;;  %v877_v56 = vadd.f32 %v17528_v41, %v11060_v35 }
 0x1ee   : > { %1721 = vmatmul.f32.gmra.mxu3 %v17525_v38  ;;  %2114 = vmatmul.f32.gmra.mxu1 %v11421_v6  ;;  %v8476_v38 = vld [vmem:[%s17230_s1 + $0x728] sm:$0xff] }
 0x1ef   : > { %2374 = vmatpush.msra.mxu0 %v8503_v40  ;;  %2143 = vmatpush.msra.mxu2 %v8444_v51  ;;  %v8442_v40 = vld [vmem:[%s17230_s1 + $0x618] sm:$0xff]  ;;  %v11465_v51 = vsel %vm495_vm0, %v1950_v17, %v1954_v63  ;;  %v17533_v17 = vld [vmem:[#allocation73_spill] sm:$0xff] }
 0x1f0   : > { %v1133_v3 = vpop.f32.mrf.mxu2  ;;  %2208 = vmatpush.msra.mxu3 %v8476_v38  ;;  %v17531_v38 = vld [vmem:[#allocation63_spill] sm:$0xff] }
 0x1f1   : > { %v1198_v48 = vpop.f32.mrf.mxu3  ;;  %2144 = vmatpush.msra.mxu2 %v8442_v40  ;;  %v1956_v40 = vrot.slane %v17533_v17, 7 }
 0x1f2   : > { %v1199_v20 = vadd.f32 %v1198_v48, %v1133_v3  ;;  %v11451_v23 = vpop.f32.mrf.mxu0  ;;  %2209 = vmatpush.msra.mxu3 %v8474_v21  ;;  %v8472_v3 = vld [vmem:[%s17230_s1 + $0x708] sm:$0xff]  ;;  %v1958_v21 = vrot.slane %v10977_v61, 7 }
 0x1f3   : > { %17529 = vst [vmem:[#allocation60_spill] sm:$0xff] %v11451_v23  ;;  %v11462_v43 = vpop.f32.mrf.mxu1  ;;  %v17532_v48 = vld [vmem:[#allocation65_spill] sm:$0xff]  ;;  %2145 = vmatpush.msra.mxu2 %v8440_v50  ;;  %v11492_v33 = vsel %vm495_vm0, %v1952_v19, %v1956_v40  ;;  %v17537_v50 = vld [vmem:[#allocation70_spill] sm:$0xff]  ;;  %v8595_v19 = vld [vmem:[%s17230_s1 + $0xae0] sm:$0xff] }
 0x1f4   : > { %17530 = vst [vmem:[#allocation54_spill] sm:$0xff] %v11462_v43  ;;  %v11467_v41 = vadd.f32 %v1199_v20, %v877_v56  ;;  %v8597_v56 = vld [vmem:[%s17230_s1 + $0xaf0] sm:$0xff]  ;;  %2210 = vmatpush.msra.mxu3 %v8472_v3  ;;  %v17534_v43 = vld [vmem:[#allocation68_spill] sm:$0xff]  ;;  %v11497_v4 = vsel %vm495_vm0, %v1954_v63, %v1958_v21 }
 0x1f5   : > { %1659 = vmatmul.f32.gmra.mxu2 %v17531_v38  ;;  %2052 = vmatmul.f32.gmra.mxu0 %v11454_v31  ;;  %v8629_v20 = vld [vmem:[%s17230_s1 + $0xbf0] sm:$0xff]  ;;  %v879_v23 = vadd.f32 %v17534_v43, %v11060_v35  ;;  %v17538_v3 = vld [vmem:[#allocation72_spill] sm:$0xff] }
 0x1f6   : > { %1724 = vmatmul.f32.gmra.mxu3 %v17532_v48  ;;  %2117 = vmatmul.f32.gmra.mxu1 %v11465_v51  ;;  %v17539_v43 = vld [vmem:[#allocation50_spill] sm:$0xff]  ;;  %v8627_v63 = vld [vmem:[%s17230_s1 + $0xbe0] sm:$0xff] }
 0x1f7   : > { %2882 = vmatpush.msrb.mxu0 %v8597_v56  ;;  %2947 = vmatpush.msrb.mxu1 %v8629_v20  ;;  %v1960_v56 = vrot.slane %v17539_v43, 7 }
 0x1f8   : > { %v1136_v38 = vpop.f32.mrf.mxu2 }
 0x1f9   : > { %v1201_v48 = vpop.f32.mrf.mxu3  ;;  %2883 = vmatpush.msrb.mxu0 %v8595_v19  ;;  %2948 = vmatpush.msrb.mxu1 %v8627_v63  ;;  %v11518_v43 = vsel %vm495_vm0, %v1956_v40, %v1960_v56  ;;  %v1802_v19 = vld [vmem:[#allocation3 + $0x120] sm:$0x7f]  ;;  %v8593_v40 = vld [vmem:[%s17230_s1 + $0xad0] sm:$0xff] }
 0x1fa   : > { %v1202_v17 = vadd.f32 %v1201_v48, %v1136_v38  ;;  %v11489_v36 = vpop.f32.mrf.mxu0  ;;  %v17544_v63 = vld [vmem:[#allocation76_spill] sm:$0xff] }
 0x1fb   : > { %17535 = vst [vmem:[#allocation56_spill] sm:$0xff] %v11489_v36  ;;  %v11494_v18 = vpop.f32.mrf.mxu1  ;;  %2884 = vmatpush.msrb.mxu0 %v8593_v40  ;;  %v17548_v40 = vld [vmem:[#allocation80_spill] sm:$0xff] }
 0x1fc   : > { %17536 = vst [vmem:[#allocation58_spill] sm:$0xff] %v11494_v18  ;;  %v11499_v61 = vadd.f32 %v1202_v17, %v879_v23  ;;  %v17540_v23 = vld [vmem:[#allocation53_spill] sm:$0xff]  ;;  %v17541_v17 = vld [vmem:[#allocation74_spill] sm:$0xff] }
 0x1fd   : > { %1662 = vmatmul.f32.gmra.mxu2 %v17537_v50  ;;  %2055 = vmatmul.f32.gmra.mxu0 %v11492_v33  ;;  %v1962_v20 = vrot.slane %v17540_v23, 7  ;;  %v881_v50 = vadd.f32 %v17541_v17, %v11060_v35  ;;  %v17545_v17 = vld [vmem:[#allocation78_spill] sm:$0xff] }
 0x1fe   : > { %1727 = vmatmul.f32.gmra.mxu3 %v17538_v3  ;;  %2120 = vmatmul.f32.gmra.mxu1 %v11497_v4 }
 0x1ff   : > { %v11523_v46 = vsel %vm495_vm0, %v1958_v21, %v1962_v20  ;;  %v8625_v21 = vld [vmem:[%s17230_s1 + $0xbd0] sm:$0xff] }
 0x200   : > { %v1139_v38 = vpop.f32.mrf.mxu2  ;;  %2949 = vmatpush.msrb.mxu1 %v8625_v21 }
 0x201   : > { %v1204_v48 = vpop.f32.mrf.mxu3 }
 0x202   : > { %v1205_v3 = vadd.f32 %v1204_v48, %v1139_v38  ;;  %v11515_v18 = vpop.f32.mrf.mxu0  ;;  %v1964_v38 = vrot.slane %v1801_v8, 7  ;;  %v1966_v48 = vrot.slane %v1802_v19, 7  ;;  %v8534_v19 = vld [vmem:[%s17230_s1 + $0x8f8] sm:$0xff] }
 0x203   : > { %17542 = vst [vmem:[#allocation66_spill] sm:$0xff] %v11515_v18  ;;  %v11520_v36 = vpop.f32.mrf.mxu1  ;;  %2489 = vmatpush.msrb.mxu2 %v8534_v19  ;;  %v8564_v19 = vld [vmem:[%s17230_s1 + $0x9e8] sm:$0xff] }
 0x204   : > { %17543 = vst [vmem:[#allocation67_spill] sm:$0xff] %v11520_v36  ;;  %v11525_v23 = vadd.f32 %v1205_v3, %v881_v50  ;;  %v11542_v8 = vsel %vm495_vm0, %v1960_v56, %v1964_v38  ;;  %v11547_v15 = vsel %vm495_vm0, %v1962_v20, %v1966_v48  ;;  %v17549_v56 = vld [vmem:[#allocation82_spill] sm:$0xff]  ;;  %v8591_v20 = vld [vmem:[%s17230_s1 + $0xac0] sm:$0xff] }
 0x205   : > { %1665 = vmatmul.f32.gmra.mxu2 %v17544_v63  ;;  %2058 = vmatmul.f32.gmra.mxu0 %v11518_v43  ;;  %v883_v63 = vadd.f32 %v11009_v11, %v11060_v35  ;;  %v8566_v11 = vld [vmem:[%s17230_s1 + $0x9f8] sm:$0xff]  ;;  %v8623_v38 = vld [vmem:[%s17230_s1 + $0xbc0] sm:$0xff] }
 0x206   : > { %1730 = vmatmul.f32.gmra.mxu3 %v17545_v17  ;;  %2123 = vmatmul.f32.gmra.mxu1 %v11523_v46 }
 0x207   : > { %2554 = vmatpush.msrb.mxu3 %v8566_v11  ;;  %2885 = vmatpush.msrb.mxu0 %v8591_v20  ;;  %v11582_v11 = vld [vmem:[#allocation3 + $0x30] sm:$0xff] }
 0x208   : > { %v1142_v50 = vpop.f32.mrf.mxu2  ;;  %2950 = vmatpush.msrb.mxu1 %v8623_v38  ;;  %v8621_v20 = vld [vmem:[%s17230_s1 + $0xbb0] sm:$0xff] }
 0x209   : > { %v1207_v3 = vpop.f32.mrf.mxu3  ;;  %2555 = vmatpush.msrb.mxu3 %v8564_v19  ;;  %v11609_v19 = vld [vmem:[#allocation3 + $0xe8] sm:$0xff] }
 0x20a   : > { %v1208_v17 = vadd.f32 %v1207_v3, %v1142_v50  ;;  %v11539_v36 = vpop.f32.mrf.mxu0  ;;  %v885_v50 = vadd.f32 %v11037_v1, %v11060_v35  ;;  %v11586_v1 = vld [vmem:[#allocation3 + $0xb0] sm:$0xff]  ;;  %2951 = vmatpush.msrb.mxu1 %v8621_v20  ;;  %v8619_v20 = vld [vmem:[%s17230_s1 + $0xba0] sm:$0xff] }
 0x20b   : > { %17546 = vst [vmem:[#allocation61_spill] sm:$0xff] %v11539_v36  ;;  %v11544_v18 = vpop.f32.mrf.mxu1  ;;  %v8589_v35 = vld [vmem:[%s17230_s1 + $0xab0] sm:$0xff]  ;;  %v12064_v36 = vld [vmem:[#allocation3 + $0x28] sm:$0xff] }
 0x20c   : > { %17547 = vst [vmem:[#allocation63_spill] sm:$0xff] %v11544_v18  ;;  %v11549_v12 = vadd.f32 %v1208_v17, %v883_v63  ;;  %2886 = vmatpush.msrb.mxu0 %v8589_v35  ;;  %v11613_v35 = vld [vmem:[#allocation3 + $0x48] sm:$0xff]  ;;  %2952 = vmatpush.msrb.mxu1 %v8619_v20  ;;  %v8617_v20 = vld [vmem:[%s17230_s1 + $0xb90] sm:$0xff] }
 0x20d   : > { %1668 = vmatmul.f32.gmra.mxu2 %v17548_v40  ;;  %2061 = vmatmul.f32.gmra.mxu0 %v11542_v8 }
 0x20e   : > { %1733 = vmatmul.f32.gmra.mxu3 %v17549_v56  ;;  %2126 = vmatmul.f32.gmra.mxu1 %v11547_v15  ;;  %v8532_v56 = vld [vmem:[%s17230_s1 + $0x8e8] sm:$0xff] }
 0x20f   : > { %2490 = vmatpush.msrb.mxu2 %v8532_v56  ;;  %v8562_v56 = vld [vmem:[%s17230_s1 + $0x9d8] sm:$0xff]  ;;  %2953 = vmatpush.msrb.mxu1 %v8617_v20  ;;  %v8615_v20 = vld [vmem:[%s17230_s1 + $0xb80] sm:$0xff] }
 0x210   : > { %v1145_v21 = vpop.f32.mrf.mxu2  ;;  %2556 = vmatpush.msrb.mxu3 %v8562_v56  ;;  %v17556_v56 = vld [vmem:[#allocation87_spill] sm:$0xff] }
 0x211   : > { %v1210_v48 = vpop.f32.mrf.mxu3  ;;  %2954 = vmatpush.msrb.mxu1 %v8615_v20 }
 0x212   : > { %v1211_v3 = vadd.f32 %v1210_v48, %v1145_v21  ;;  %v11569_v63 = vpop.f32.mrf.mxu0 }
 0x213   : > { %17550 = vst [vmem:[#allocation65_spill] sm:$0xff] %v11569_v63  ;;  %v11571_v17 = vpop.f32.mrf.mxu1  ;;  %v12097_v63 = vld [vmem:[#allocation3 + $0x110] sm:$0xff] }
 0x214   : > { %17551 = vst [vmem:[#allocation73_spill] sm:$0xff] %v11571_v17  ;;  %v11573_v40 = vadd.f32 %v1211_v3, %v885_v50  ;;  %v8530_v3 = vld [vmem:[%s17230_s1 + $0x8d8] sm:$0xff] }
 0x215   : > { %2146 = vmatmul.f32.vlgmr.msra.gmra.mxu2 %v11042_v59  ;;  %2375 = vmatmul.f32.vlgmr.msra.gmra.mxu0 %v11582_v11  ;;  %17599 = vst [vmem:[#allocation135_spill] sm:$0xff] %v12097_v63 }
 0x216   : > { %2211 = vmatmul.f32.vlgmr.msra.gmra.mxu3 %v11047_v45  ;;  %2440 = vmatmul.f32.vlgmr.msra.gmra.mxu1 %v11586_v1 }
 0x217   : > { %2491 = vmatpush.msrb.mxu2 %v8530_v3  ;;  %v8560_v3 = vld [vmem:[%s17230_s1 + $0x9c8] sm:$0xff] }
 0x218   : > { %v1624_v59 = vpop.f32.mrf.mxu2  ;;  %2557 = vmatpush.msrb.mxu3 %v8560_v3  ;;  %v17560_v3 = vld [vmem:[#allocation91_spill] sm:$0xff] }
 0x219   : > { %v1689_v38 = vpop.f32.mrf.mxu3 }
 0x21a   : > { %v1690_v21 = vadd.f32 %v1689_v38, %v1624_v59  ;;  %v11595_v45 = vpop.f32.mrf.mxu0 }
 0x21b   : > { %17552 = vst [vmem:[#allocation68_spill] sm:$0xff] %v11595_v45  ;;  %v11597_v48 = vpop.f32.mrf.mxu1  ;;  %v8528_v45 = vld [vmem:[%s17230_s1 + $0x8c8] sm:$0xff] }
 0x21c   : > { %17553 = vst [vmem:[#allocation70_spill] sm:$0xff] %v11597_v48  ;;  %v11600_v50 = vadd.f32 %v1690_v21, %v11086_v22  ;;  %v8587_v22 = vld [vmem:[%s17230_s1 + $0xaa0] sm:$0xff]  ;;  %2492 = vmatpush.msrb.mxu2 %v8528_v45  ;;  %v8558_v45 = vld [vmem:[%s17230_s1 + $0x9b8] sm:$0xff] }
 0x21d   : > { %2149 = vmatmul.f32.gmra.mxu2 %v11077_v30  ;;  %2378 = vmatmul.f32.gmra.mxu0 %v11609_v19 }
 0x21e   : > { %2214 = vmatmul.f32.gmra.mxu3 %v11082_v7  ;;  %2443 = vmatmul.f32.gmra.mxu1 %v11613_v35 }
 0x21f   : > { %2887 = vmatpush.msrb.mxu0 %v8587_v22  ;;  %v17557_v22 = vld [vmem:[#allocation88_spill] sm:$0xff]  ;;  %2558 = vmatpush.msrb.mxu3 %v8558_v45  ;;  %v17564_v45 = vld [vmem:[#allocation95_spill] sm:$0xff] }
 0x220   : > { %v1627_v30 = vpop.f32.mrf.mxu2 }
 0x221   : > { %v1692_v59 = vpop.f32.mrf.mxu3 }
 0x222   : > { %v1693_v38 = vadd.f32 %v1692_v59, %v1627_v30  ;;  %v11622_v7 = vpop.f32.mrf.mxu0 }
 0x223   : > { %17554 = vst [vmem:[#allocation72_spill] sm:$0xff] %v11622_v7  ;;  %v11624_v21 = vpop.f32.mrf.mxu1  ;;  %v12029_v7 = vld [vmem:[#allocation3 + $0x148] sm:$0xff] }
 0x224   : > { %17555 = vst [vmem:[#allocation50_spill] sm:$0xff] %v11624_v21  ;;  %v11627_v48 = vadd.f32 %v1693_v38, %v11122_v57  ;;  %v8585_v57 = vld [vmem:[%s17230_s1 + $0xa90] sm:$0xff] }
 0x225   : > { %2152 = vmatmul.f32.gmra.mxu2 %v11113_v47  ;;  %2381 = vmatmul.f32.gmra.mxu0 %v17556_v56 }
 0x226   : > { %2217 = vmatmul.f32.gmra.mxu3 %v11118_v53  ;;  %2446 = vmatmul.f32.gmra.mxu1 %v17557_v22  ;;  %v8526_v22 = vld [vmem:[%s17230_s1 + $0x8b8] sm:$0xff] }
 0x227   : > { %2888 = vmatpush.msrb.mxu0 %v8585_v57  ;;  %v17561_v57 = vld [vmem:[#allocation92_spill] sm:$0xff]  ;;  %2493 = vmatpush.msrb.mxu2 %v8526_v22  ;;  %v8556_v22 = vld [vmem:[%s17230_s1 + $0x9a8] sm:$0xff] }
 0x228   : > { %v1630_v30 = vpop.f32.mrf.mxu2  ;;  %2559 = vmatpush.msrb.mxu3 %v8556_v22  ;;  %v11705_v22 = vld [vmem:[#allocation3 + $0x110] sm:$0xff] }
 0x229   : > { %v1695_v47 = vpop.f32.mrf.mxu3 }
 0x22a   : > { %v1696_v59 = vadd.f32 %v1695_v47, %v1630_v30  ;;  %v11645_v38 = vpop.f32.mrf.mxu0 }
 0x22b   : > { %17558 = vst [vmem:[#allocation53_spill] sm:$0xff] %v11645_v38  ;;  %v11647_v53 = vpop.f32.mrf.mxu1  ;;  %v11994_v38 = vld [vmem:[#allocation3 + $0x68] sm:$0xff] }
 0x22c   : > { %17559 = vst [vmem:[#allocation74_spill] sm:$0xff] %v11647_v53  ;;  %v11650_v56 = vadd.f32 %v1696_v59, %v11158_v55  ;;  %v8583_v55 = vld [vmem:[%s17230_s1 + $0xa80] sm:$0xff] }
 0x22d   : > { %2155 = vmatmul.f32.gmra.mxu2 %v11149_v2  ;;  %2384 = vmatmul.f32.gmra.mxu0 %v17560_v3 }
 0x22e   : > { %2220 = vmatmul.f32.gmra.mxu3 %v11154_v10  ;;  %2449 = vmatmul.f32.gmra.mxu1 %v17561_v57  ;;  %v8524_v57 = vld [vmem:[%s17230_s1 + $0x8a8] sm:$0xff] }
 0x22f   : > { %2889 = vmatpush.msrb.mxu0 %v8583_v55  ;;  %v8613_v55 = vld [vmem:[%s17230_s1 + $0xb70] sm:$0xff]  ;;  %2494 = vmatpush.msrb.mxu2 %v8524_v57  ;;  %v8554_v57 = vld [vmem:[%s17230_s1 + $0x998] sm:$0xff] }
 0x230   : > { %v1633_v30 = vpop.f32.mrf.mxu2  ;;  %2955 = vmatpush.msrb.mxu1 %v8613_v55  ;;  %2560 = vmatpush.msrb.mxu3 %v8554_v57  ;;  %v11732_v57 = vld [vmem:[#allocation3 + $0x128] sm:$0xff] }
 0x231   : > { %v1698_v2 = vpop.f32.mrf.mxu3 }
 0x232   : > { %v1699_v47 = vadd.f32 %v1698_v2, %v1633_v30  ;;  %v11668_v59 = vpop.f32.mrf.mxu0 }
 0x233   : > { %17562 = vst [vmem:[#allocation76_spill] sm:$0xff] %v11668_v59  ;;  %v11670_v10 = vpop.f32.mrf.mxu1 }
 0x234   : > { %17563 = vst [vmem:[#allocation78_spill] sm:$0xff] %v11670_v10  ;;  %v11673_v3 = vadd.f32 %v1699_v47, %v11192_v29  ;;  %v8581_v29 = vld [vmem:[%s17230_s1 + $0xa70] sm:$0xff]  ;;  %v8522_v47 = vld [vmem:[%s17230_s1 + $0x898] sm:$0xff] }
 0x235   : > { %2158 = vmatmul.f32.gmra.mxu2 %v11185_v62  ;;  %2387 = vmatmul.f32.gmra.mxu0 %v17564_v45  ;;  %v11709_v45 = vld [vmem:[#allocation3 + $0x158] sm:$0xff] }
 0x236   : > { %2223 = vmatmul.f32.gmra.mxu3 %v11190_v32  ;;  %2452 = vmatmul.f32.gmra.mxu1 %v11160_v37  ;;  %v8598_v10 = vld [vmem:[%s17230_s1 + $0xaf8] sm:$0xff] }
 0x237   : > { %2890 = vmatpush.msrb.mxu0 %v8581_v29  ;;  %v8611_v29 = vld [vmem:[%s17230_s1 + $0xb60] sm:$0xff]  ;;  %2495 = vmatpush.msrb.mxu2 %v8522_v47  ;;  %v8552_v47 = vld [vmem:[%s17230_s1 + $0x988] sm:$0xff] }
 0x238   : > { %v1636_v20 = vpop.f32.mrf.mxu2  ;;  %2956 = vmatpush.msrb.mxu1 %v8611_v29  ;;  %v8609_v29 = vld [vmem:[%s17230_s1 + $0xb50] sm:$0xff]  ;;  %2561 = vmatpush.msrb.mxu3 %v8552_v47  ;;  %v11759_v47 = vld [vmem:[#allocation3 + $0x80] sm:$0xff] }
 0x239   : > { %v1701_v62 = vpop.f32.mrf.mxu3 }
 0x23a   : > { %v1702_v30 = vadd.f32 %v1701_v62, %v1636_v20  ;;  %v11691_v2 = vpop.f32.mrf.mxu0  ;;  %2957 = vmatpush.msrb.mxu1 %v8609_v29  ;;  %v8607_v29 = vld [vmem:[%s17230_s1 + $0xb40] sm:$0xff] }
 0x23b   : > { %17565 = vst [vmem:[#allocation80_spill] sm:$0xff] %v11691_v2  ;;  %v11693_v32 = vpop.f32.mrf.mxu1  ;;  %v2654_v2 = vld [vmem:[#allocation3 + $0x48] sm:$0xff] }
 0x23c   : > { %17566 = vst [vmem:[#allocation82_spill] sm:$0xff] %v11693_v32  ;;  %v11696_v37 = vadd.f32 %v1702_v30, %v11224_v52  ;;  %v8579_v52 = vld [vmem:[%s17230_s1 + $0xa60] sm:$0xff]  ;;  %v8520_v32 = vld [vmem:[%s17230_s1 + $0x888] sm:$0xff]  ;;  %2958 = vmatpush.msrb.mxu1 %v8607_v29  ;;  %v8605_v29 = vld [vmem:[%s17230_s1 + $0xb30] sm:$0xff]  ;;  %v2788_v59 = vrot.slane %v2654_v2, 1 }
 0x23d   : > { %2161 = vmatmul.f32.gmra.mxu2 %v11217_v54  ;;  %2390 = vmatmul.f32.gmra.mxu0 %v11705_v22  ;;  %v11999_v2 = vld [vmem:[#allocation3] sm:$0xff] }
 0x23e   : > { %2226 = vmatmul.f32.gmra.mxu3 %v11222_v44  ;;  %2455 = vmatmul.f32.gmra.mxu1 %v11709_v45 }
 0x23f   : > { %2891 = vmatpush.msrb.mxu0 %v8579_v52  ;;  %v11736_v52 = vld [vmem:[#allocation3 + $0xe0] sm:$0xff]  ;;  %2496 = vmatpush.msrb.mxu2 %v8520_v32  ;;  %v8550_v32 = vld [vmem:[%s17230_s1 + $0x978] sm:$0xff] }
 0x240   : > { %v1639_v54 = vpop.f32.mrf.mxu2  ;;  %2562 = vmatpush.msrb.mxu3 %v8550_v32  ;;  %v11786_v32 = vld [vmem:[#allocation3 + $0x70] sm:$0xff]  ;;  %2959 = vmatpush.msrb.mxu1 %v8605_v29  ;;  %v8603_v29 = vld [vmem:[%s17230_s1 + $0xb20] sm:$0xff] }
 0x241   : > { %v1704_v55 = vpop.f32.mrf.mxu3 }
 0x242   : > { %v1705_v20 = vadd.f32 %v1704_v55, %v1639_v54  ;;  %v11718_v44 = vpop.f32.mrf.mxu0  ;;  %2960 = vmatpush.msrb.mxu1 %v8603_v29  ;;  %v8601_v29 = vld [vmem:[%s17230_s1 + $0xb10] sm:$0xff] }
 0x243   : > { %17567 = vst [vmem:[#allocation87_spill] sm:$0xff] %v11718_v44  ;;  %v11720_v62 = vpop.f32.mrf.mxu1  ;;  %v8518_v44 = vld [vmem:[%s17230_s1 + $0x878] sm:$0xff] }
 0x244   : > { %17568 = vst [vmem:[#allocation88_spill] sm:$0xff] %v11720_v62  ;;  %v11723_v30 = vadd.f32 %v1705_v20, %v11256_v39  ;;  %v8577_v39 = vld [vmem:[%s17230_s1 + $0xa50] sm:$0xff]  ;;  %2497 = vmatpush.msrb.mxu2 %v8518_v44  ;;  %v8548_v44 = vld [vmem:[%s17230_s1 + $0x968] sm:$0xff]  ;;  %2961 = vmatpush.msrb.mxu1 %v8601_v29  ;;  %v8599_v29 = vld [vmem:[%s17230_s1 + $0xb00] sm:$0xff] }
 0x245   : > { %2164 = vmatmul.f32.gmra.mxu2 %v11249_v27  ;;  %2393 = vmatmul.f32.gmra.mxu0 %v11732_v57 }
 0x246   : > { %2229 = vmatmul.f32.gmra.mxu3 %v11254_v34  ;;  %2458 = vmatmul.f32.gmra.mxu1 %v11736_v52 }
 0x247   : > { %2892 = vmatpush.msrb.mxu0 %v8577_v39  ;;  %v11763_v39 = vld [vmem:[#allocation3 + $0x20] sm:$0xff]  ;;  %2563 = vmatpush.msrb.mxu3 %v8548_v44  ;;  %v11813_v44 = vld [vmem:[#allocation3 + $0x88] sm:$0xff] }
 0x248   : > { %v1642_v27 = vpop.f32.mrf.mxu2  ;;  %2962 = vmatpush.msrb.mxu1 %v8599_v29 }
 0x249   : > { %v1707_v54 = vpop.f32.mrf.mxu3 }
 0x24a   : > { %v1708_v55 = vadd.f32 %v1707_v54, %v1642_v27  ;;  %v11745_v34 = vpop.f32.mrf.mxu0 }
 0x24b   : > { %17569 = vst [vmem:[#allocation91_spill] sm:$0xff] %v11745_v34  ;;  %v11747_v20 = vpop.f32.mrf.mxu1  ;;  %v8516_v34 = vld [vmem:[%s17230_s1 + $0x868] sm:$0xff] }
 0x24c   : > { %17570 = vst [vmem:[#allocation92_spill] sm:$0xff] %v11747_v20  ;;  %v11750_v62 = vadd.f32 %v1708_v55, %v11288_v49  ;;  %v8575_v49 = vld [vmem:[%s17230_s1 + $0xa40] sm:$0xff]  ;;  %2498 = vmatpush.msrb.mxu2 %v8516_v34  ;;  %v8546_v34 = vld [vmem:[%s17230_s1 + $0x958] sm:$0xff] }
 0x24d   : > { %2167 = vmatmul.f32.gmra.mxu2 %v11281_v9  ;;  %2396 = vmatmul.f32.gmra.mxu0 %v11759_v47 }
 0x24e   : > { %2232 = vmatmul.f32.gmra.mxu3 %v11286_v28  ;;  %2461 = vmatmul.f32.gmra.mxu1 %v11763_v39 }
 0x24f   : > { %2893 = vmatpush.msrb.mxu0 %v8575_v49  ;;  %v11790_v49 = vld [vmem:[#allocation3 + $0x50] sm:$0xff]  ;;  %2564 = vmatpush.msrb.mxu3 %v8546_v34 }
 0x250   : > { %v1645_v9 = vpop.f32.mrf.mxu2  ;;  %v11840_v34 = vld [vmem:[#allocation3 + $0x130] sm:$0xff] }
 0x251   : > { %v1710_v27 = vpop.f32.mrf.mxu3 }
 0x252   : > { %v1711_v54 = vadd.f32 %v1710_v27, %v1645_v9  ;;  %v11772_v28 = vpop.f32.mrf.mxu0 }
 0x253   : > { %17571 = vst [vmem:[#allocation95_spill] sm:$0xff] %v11772_v28  ;;  %v11774_v55 = vpop.f32.mrf.mxu1  ;;  %v8514_v28 = vld [vmem:[%s17230_s1 + $0x858] sm:$0xff] }
 0x254   : > { %17572 = vst [vmem:[#allocation112_spill] sm:$0xff] %v11774_v55  ;;  %v11777_v20 = vadd.f32 %v1711_v54, %v11320_v14  ;;  %v8573_v14 = vld [vmem:[%s17230_s1 + $0xa30] sm:$0xff]  ;;  %2499 = vmatpush.msrb.mxu2 %v8514_v28  ;;  %v8544_v28 = vld [vmem:[%s17230_s1 + $0x948] sm:$0xff] }
 0x255   : > { %2170 = vmatmul.f32.gmra.mxu2 %v11313_v42  ;;  %2399 = vmatmul.f32.gmra.mxu0 %v11786_v32 }
 0x256   : > { %2235 = vmatmul.f32.gmra.mxu3 %v11318_v0  ;;  %2464 = vmatmul.f32.gmra.mxu1 %v11790_v49 }
 0x257   : > { %2894 = vmatpush.msrb.mxu0 %v8573_v14  ;;  %v11817_v14 = vld [vmem:[#allocation3 + $0x118] sm:$0xff]  ;;  %2565 = vmatpush.msrb.mxu3 %v8544_v28  ;;  %v11867_v28 = vld [vmem:[#allocation3 + $0xa8] sm:$0xff] }
 0x258   : > { %v1648_v42 = vpop.f32.mrf.mxu2 }
 0x259   : > { %v1713_v9 = vpop.f32.mrf.mxu3 }
 0x25a   : > { %v1714_v27 = vadd.f32 %v1713_v9, %v1648_v42  ;;  %v11799_v0 = vpop.f32.mrf.mxu0 }
 0x25b   : > { %17573 = vst [vmem:[#allocation113_spill] sm:$0xff] %v11799_v0  ;;  %v11801_v54 = vpop.f32.mrf.mxu1  ;;  %v8512_v0 = vld [vmem:[%s17230_s1 + $0x848] sm:$0xff] }
 0x25c   : > { %17574 = vst [vmem:[#allocation114_spill] sm:$0xff] %v11801_v54  ;;  %v11804_v55 = vadd.f32 %v1714_v27, %v11352_v5  ;;  %v8571_v5 = vld [vmem:[%s17230_s1 + $0xa20] sm:$0xff]  ;;  %2500 = vmatpush.msrb.mxu2 %v8512_v0  ;;  %v8542_v0 = vld [vmem:[%s17230_s1 + $0x938] sm:$0xff] }
 0x25d   : > { %2173 = vmatmul.f32.gmra.mxu2 %v11345_v58  ;;  %2402 = vmatmul.f32.gmra.mxu0 %v11813_v44 }
 0x25e   : > { %2238 = vmatmul.f32.gmra.mxu3 %v11350_v16  ;;  %2467 = vmatmul.f32.gmra.mxu1 %v11817_v14 }
 0x25f   : > { %2895 = vmatpush.msrb.mxu0 %v8571_v5  ;;  %v11844_v5 = vld [vmem:[#allocation3 + $0x108] sm:$0xff]  ;;  %2566 = vmatpush.msrb.mxu3 %v8542_v0  ;;  %v8538_v0 = vld [vmem:[%s17230_s1 + $0x918] sm:$0xff] }
 0x260   : > { %v1651_v58 = vpop.f32.mrf.mxu2 }
 0x261   : > { %v1716_v42 = vpop.f32.mrf.mxu3 }
 0x262   : > { %v1717_v9 = vadd.f32 %v1716_v42, %v1651_v58  ;;  %v11826_v16 = vpop.f32.mrf.mxu0 }
 0x263   : > { %17575 = vst [vmem:[#allocation115_spill] sm:$0xff] %v11826_v16  ;;  %v11828_v27 = vpop.f32.mrf.mxu1  ;;  %v8510_v16 = vld [vmem:[%s17230_s1 + $0x838] sm:$0xff] }
 0x264   : > { %17576 = vst [vmem:[#allocation116_spill] sm:$0xff] %v11828_v27  ;;  %v11831_v54 = vadd.f32 %v1717_v9, %v11390_v60  ;;  %v8569_v60 = vld [vmem:[%s17230_s1 + $0xa10] sm:$0xff]  ;;  %2501 = vmatpush.msrb.mxu2 %v8510_v16  ;;  %v8506_v16 = vld [vmem:[%s17230_s1 + $0x818] sm:$0xff] }
 0x265   : > { %2176 = vmatmul.f32.gmra.mxu2 %v11377_v24  ;;  %2405 = vmatmul.f32.gmra.mxu0 %v11840_v34 }
 0x266   : > { %2241 = vmatmul.f32.gmra.mxu3 %v11387_v13  ;;  %2470 = vmatmul.f32.gmra.mxu1 %v11844_v5 }
 0x267   : > { %2896 = vmatpush.msrb.mxu0 %v8569_v60  ;;  %v11871_v60 = vld [vmem:[#allocation3 + $0xb8] sm:$0xff] }
 0x268   : > { %v1654_v24 = vpop.f32.mrf.mxu2 }
 0x269   : > { %v1719_v58 = vpop.f32.mrf.mxu3 }
 0x26a   : > { %v1720_v42 = vadd.f32 %v1719_v58, %v1654_v24  ;;  %v11853_v13 = vpop.f32.mrf.mxu0  ;;  %v8540_v24 = vld [vmem:[%s17230_s1 + $0x928] sm:$0xff] }
 0x26b   : > { %17577 = vst [vmem:[#allocation117_spill] sm:$0xff] %v11853_v13  ;;  %v11855_v9 = vpop.f32.mrf.mxu1  ;;  %2567 = vmatpush.msrb.mxu3 %v8540_v24  ;;  %v11906_v24 = vld [vmem:[#allocation3 + $0xc8] sm:$0xff]  ;;  %v11927_v13 = vld [vmem:[#allocation3 + $0x140] sm:$0xff] }
 0x26c   : > { %17578 = vst [vmem:[#allocation118_spill] sm:$0xff] %v11855_v9  ;;  %v11858_v27 = vadd.f32 %v1720_v42, %v11423_v26  ;;  %v8567_v26 = vld [vmem:[%s17230_s1 + $0xa00] sm:$0xff] }
 0x26d   : > { %2179 = vmatmul.f32.gmra.mxu2 %v11416_v25  ;;  %2408 = vmatmul.f32.gmra.mxu0 %v11867_v28 }
 0x26e   : > { %2244 = vmatmul.f32.gmra.mxu3 %v11421_v6  ;;  %2473 = vmatmul.f32.gmra.mxu1 %v11871_v60  ;;  %v8508_v6 = vld [vmem:[%s17230_s1 + $0x828] sm:$0xff] }
 0x26f   : > { %2897 = vmatpush.msrb.mxu0 %v8567_v26  ;;  %2502 = vmatpush.msrb.mxu2 %v8508_v6  ;;  %v8536_v6 = vld [vmem:[%s17230_s1 + $0x908] sm:$0xff] }
 0x270   : > { %v1657_v25 = vpop.f32.mrf.mxu2  ;;  %2568 = vmatpush.msrb.mxu3 %v8538_v0 }
 0x271   : > { %v1722_v58 = vpop.f32.mrf.mxu3  ;;  %2503 = vmatpush.msrb.mxu2 %v8506_v16 }
 0x272   : > { %v1723_v42 = vadd.f32 %v1722_v58, %v1657_v25  ;;  %v11886_v9 = vpop.f32.mrf.mxu0  ;;  %v8504_v25 = vld [vmem:[%s17230_s1 + $0x808] sm:$0xff]  ;;  %v11910_v58 = vld [vmem:[#allocation3 + $0x90] sm:$0xff]  ;;  %2569 = vmatpush.msrb.mxu3 %v8536_v6  ;;  %v8659_v6 = vld [vmem:[%s17230_s1 + $0xce0] sm:$0xff] }
 0x273   : > { %17579 = vst [vmem:[#allocation119_spill] sm:$0xff] %v11886_v9  ;;  %v11894_v26 = vpop.f32.mrf.mxu1  ;;  %2504 = vmatpush.msrb.mxu2 %v8504_v25  ;;  %v11931_v25 = vld [vmem:[#allocation3 + $0x10] sm:$0xff] }
 0x274   : > { %17580 = vst [vmem:[#allocation120_spill] sm:$0xff] %v11894_v26  ;;  %v11897_v29 = vadd.f32 %v1723_v42, %v11467_v41  ;;  %v8661_v41 = vld [vmem:[%s17230_s1 + $0xcf0] sm:$0xff] }
 0x275   : > { %2182 = vmatmul.f32.gmra.mxu2 %v11454_v31  ;;  %2411 = vmatmul.f32.gmra.mxu0 %v11906_v24  ;;  %v8693_v42 = vld [vmem:[%s17230_s1 + $0xdf0] sm:$0xff] }
 0x276   : > { %2247 = vmatmul.f32.gmra.mxu3 %v11465_v51  ;;  %2476 = vmatmul.f32.gmra.mxu1 %v11910_v58 }
 0x277   : > { %3405 = vmatpush.msra.mxu0 %v8661_v41  ;;  %3470 = vmatpush.msra.mxu1 %v8693_v42 }
 0x278   : > { %v1660_v31 = vpop.f32.mrf.mxu2  ;;  %3012 = vmatpush.msra.mxu2 %v8598_v10 }
 0x279   : > { %v1725_v16 = vpop.f32.mrf.mxu3  ;;  %3406 = vmatpush.msra.mxu0 %v8659_v6  ;;  %v11952_v6 = vld [vmem:[#allocation3 + $0x78] sm:$0xff] }
 0x27a   : > { %v1726_v0 = vadd.f32 %v1725_v16, %v1660_v31  ;;  %v11919_v51 = vpop.f32.mrf.mxu0 }
 0x27b   : > { %17581 = vst [vmem:[#allocation121_spill] sm:$0xff] %v11919_v51  ;;  %v11921_v26 = vpop.f32.mrf.mxu1 }
 0x27c   : > { %17582 = vst [vmem:[#allocation122_spill] sm:$0xff] %v11921_v26  ;;  %v11924_v9 = vadd.f32 %v1726_v0, %v11499_v61  ;;  %v8691_v61 = vld [vmem:[%s17230_s1 + $0xde0] sm:$0xff]  ;;  %v11948_v0 = vld [vmem:[#allocation3 + $0x138] sm:$0xff]  ;;  %v2652_v26 = vld [vmem:[#allocation3 + $0xb0] sm:$0xfe] }
 0x27d   : > { %2185 = vmatmul.f32.gmra.mxu2 %v11492_v33  ;;  %2414 = vmatmul.f32.gmra.mxu0 %v11927_v13 }
 0x27e   : > { %2250 = vmatmul.f32.gmra.mxu3 %v11497_v4  ;;  %2479 = vmatmul.f32.gmra.mxu1 %v11931_v25 }
 0x27f   : > { %3471 = vmatpush.msra.mxu1 %v8691_v61  ;;  %v8657_v61 = vld [vmem:[%s17230_s1 + $0xcd0] sm:$0xff] }
 0x280   : > { %v1663_v33 = vpop.f32.mrf.mxu2  ;;  %3407 = vmatpush.msra.mxu0 %v8657_v61  ;;  %v8630_v61 = vld [vmem:[%s17230_s1 + $0xbf8] sm:$0xff] }
 0x281   : > { %v1728_v41 = vpop.f32.mrf.mxu3  ;;  %3077 = vmatpush.msra.mxu3 %v8630_v61  ;;  %v8685_v61 = vld [vmem:[%s17230_s1 + $0xdb0] sm:$0xff] }
 0x282   : > { %v1729_v42 = vadd.f32 %v1728_v41, %v1663_v33  ;;  %v11940_v31 = vpop.f32.mrf.mxu0 }
 0x283   : > { %17583 = vst [vmem:[#allocation123_spill] sm:$0xff] %v11940_v31  ;;  %v11942_v4 = vpop.f32.mrf.mxu1  ;;  %v2653_v31 = vld [vmem:[#allocation3 + $0xe8] sm:$0xff] }
 0x284   : > { %17584 = vst [vmem:[#allocation124_spill] sm:$0xff] %v11942_v4  ;;  %v11945_v16 = vadd.f32 %v1729_v42, %v11525_v23  ;;  %v8689_v23 = vld [vmem:[%s17230_s1 + $0xdd0] sm:$0xff] }
 0x285   : > { %2188 = vmatmul.f32.gmra.mxu2 %v11518_v43  ;;  %2417 = vmatmul.f32.gmra.mxu0 %v11948_v0  ;;  %v2651_v4 = vld [vmem:[#allocation3 + $0x30] sm:$0xfe] }
 0x286   : > { %2253 = vmatmul.f32.gmra.mxu3 %v11523_v46  ;;  %2482 = vmatmul.f32.gmra.mxu1 %v11952_v6 }
 0x287   : > { %3472 = vmatpush.msra.mxu1 %v8689_v23  ;;  %v17587_v23 = vld [vmem:[#allocation109_spill] sm:$0xff] }
 0x288   : > { %v1666_v43 = vpop.f32.mrf.mxu2 }
 0x289   : > { %v1731_v33 = vpop.f32.mrf.mxu3 }
 0x28a   : > { %v1732_v41 = vadd.f32 %v1731_v33, %v1666_v43  ;;  %v11961_v42 = vpop.f32.mrf.mxu0  ;;  %v17588_v43 = vld [vmem:[#allocation110_spill] sm:$0xff]  ;;  %v2784_v33 = vrot.slane %v2651_v4, 1 }
 0x28b   : > { %17585 = vst [vmem:[#allocation125_spill] sm:$0xff] %v11961_v42  ;;  %v11963_v46 = vpop.f32.mrf.mxu1  ;;  %v2787_v42 = vrot.slane %v2652_v26, 1  ;;  %v8596_v26 = vld [vmem:[%s17230_s1 + $0xae8] sm:$0xff] }
 0x28c   : > { %17586 = vst [vmem:[#allocation126_spill] sm:$0xff] %v11963_v46  ;;  %v11966_v51 = vadd.f32 %v1732_v41, %v11549_v12  ;;  %v2785_v12 = vrot.slane %v2653_v31, 1  ;;  %v8655_v41 = vld [vmem:[%s17230_s1 + $0xcc0] sm:$0xff]  ;;  %3013 = vmatpush.msra.mxu2 %v8596_v26 }
 0x28d   : > { %2191 = vmatmul.f32.gmra.mxu2 %v11542_v8  ;;  %2420 = vmatmul.f32.gmra.mxu0 %v17587_v23  ;;  %v8687_v46 = vld [vmem:[%s17230_s1 + $0xdc0] sm:$0xff]  ;;  %v11992_v53 = vsel %vm1378_vm1, %v2787_v42, %v2788_v59  ;;  %v8653_v42 = vld [vmem:[%s17230_s1 + $0xcb0] sm:$0xff] }
 0x28e   : > { %2256 = vmatmul.f32.gmra.mxu3 %v11547_v15  ;;  %2485 = vmatmul.f32.gmra.mxu1 %v17588_v43  ;;  %v11987_v31 = vsel %vm1378_vm1, %v2784_v33, %v2785_v12  ;;  %v2792_v33 = vrot.slane %v11999_v2, 1 }
 0x28f   : > { %3408 = vmatpush.msra.mxu0 %v8655_v41  ;;  %3473 = vmatpush.msra.mxu1 %v8687_v46  ;;  %v8628_v46 = vld [vmem:[%s17230_s1 + $0xbe8] sm:$0xff] }
 0x290   : > { %v1669_v8 = vpop.f32.mrf.mxu2  ;;  %3078 = vmatpush.msra.mxu3 %v8628_v46  ;;  %v12027_v21 = vsel %vm1378_vm1, %v2788_v59, %v2792_v33  ;;  %v12034_v46 = vld [vmem:[#allocation3 + $0x18] sm:$0xff]  ;;  %v8651_v59 = vld [vmem:[%s17230_s1 + $0xca0] sm:$0xff] }
 0x291   : > { %v1734_v15 = vpop.f32.mrf.mxu3  ;;  %3409 = vmatpush.msra.mxu0 %v8653_v42  ;;  %3474 = vmatpush.msra.mxu1 %v8685_v61  ;;  %v8594_v42 = vld [vmem:[%s17230_s1 + $0xad8] sm:$0xff]  ;;  %v8683_v61 = vld [vmem:[%s17230_s1 + $0xda0] sm:$0xff] }
 0x292   : > { %v1735_v23 = vadd.f32 %v1734_v15, %v1669_v8  ;;  %v11984_v43 = vpop.f32.mrf.mxu0  ;;  %3014 = vmatpush.msra.mxu2 %v8594_v42 }
 0x293   : > { %17589 = vst [vmem:[#allocation109_spill] sm:$0xff] %v11984_v43  ;;  %v11989_v4 = vpop.f32.mrf.mxu1  ;;  %3410 = vmatpush.msra.mxu0 %v8651_v59  ;;  %3475 = vmatpush.msra.mxu1 %v8683_v61  ;;  %v8592_v59 = vld [vmem:[%s17230_s1 + $0xac8] sm:$0xff] }
 0x294   : > { %17590 = vst [vmem:[#allocation110_spill] sm:$0xff] %v11989_v4  ;;  %v11997_v10 = vadd.f32 %v1735_v23, %v11573_v40  ;;  %v2790_v40 = vrot.slane %v11994_v38, 1  ;;  %v9404_v61 = vld [vmem:[#allocation3 + $0x68] sm:$0xff]  ;;  %3015 = vmatpush.msra.mxu2 %v8592_v59 }
 0x295   : > { %2505 = vmatmul.f32.vlgmr.msrb.gmra.mxu2 %v11582_v11  ;;  %2898 = vmatmul.f32.vlgmr.msrb.gmra.mxu0 %v11987_v31 }
 0x296   : > { %2570 = vmatmul.f32.vlgmr.msrb.gmra.mxu3 %v11586_v1  ;;  %2963 = vmatmul.f32.vlgmr.msrb.gmra.mxu1 %v11992_v53  ;;  %v12022_v15 = vsel %vm1378_vm1, %v2785_v12, %v2790_v40  ;;  %v8626_v12 = vld [vmem:[%s17230_s1 + $0xbd8] sm:$0xff] }
 0x297   : > { %3079 = vmatpush.msra.mxu3 %v8626_v12  ;;  %v12069_v12 = vld [vmem:[#allocation3 + $0x150] sm:$0xff] }
 0x298   : > { %v2147_v11 = vpop.f32.mrf.mxu2 }
 0x299   : > { %v2212_v1 = vpop.f32.mrf.mxu3 }
 0x29a   : > { %v2213_v41 = vadd.f32 %v2212_v1, %v2147_v11  ;;  %v12019_v8 = vpop.f32.mrf.mxu0  ;;  %v2796_v11 = vrot.slane %v12034_v46, 1 }
 0x29b   : > { %17591 = vst [vmem:[#allocation127_spill] sm:$0xff] %v12019_v8  ;;  %v12024_v23 = vpop.f32.mrf.mxu1 }
 0x29c   : > { %17592 = vst [vmem:[#allocation128_spill] sm:$0xff] %v12024_v23  ;;  %v12032_v26 = vadd.f32 %v2213_v41, %v11600_v50  ;;  %v2794_v50 = vrot.slane %v12029_v7, 1  ;;  %v12062_v18 = vsel %vm1378_vm1, %v2792_v33, %v2796_v11  ;;  %v9405_v33 = vld [vmem:[#allocation3] sm:$0xff] }
 0x29d   : > { %2508 = vmatmul.f32.gmra.mxu2 %v11609_v19  ;;  %2901 = vmatmul.f32.gmra.mxu0 %v12022_v15 }
 0x29e   : > { %2573 = vmatmul.f32.gmra.mxu3 %v11613_v35  ;;  %2966 = vmatmul.f32.gmra.mxu1 %v12027_v21  ;;  %v12057_v23 = vsel %vm1378_vm1, %v2790_v40, %v2794_v50  ;;  %v8624_v40 = vld [vmem:[%s17230_s1 + $0xbc8] sm:$0xff] }
 0x29f   : > { %3080 = vmatpush.msra.mxu3 %v8624_v40  ;;  %v12102_v40 = vld [vmem:[#allocation3 + $0x158] sm:$0xff] }
 0x2a0   : > { %v2150_v19 = vpop.f32.mrf.mxu2 }
 0x2a1   : > { %v2215_v35 = vpop.f32.mrf.mxu3 }
 0x2a2   : > { %v2216_v1 = vadd.f32 %v2215_v35, %v2150_v19  ;;  %v12054_v41 = vpop.f32.mrf.mxu0  ;;  %v8649_v19 = vld [vmem:[%s17230_s1 + $0xc90] sm:$0xff] }
 0x2a3   : > { %17593 = vst [vmem:[#allocation129_spill] sm:$0xff] %v12054_v41  ;;  %v12059_v8 = vpop.f32.mrf.mxu1  ;;  %v8681_v35 = vld [vmem:[%s17230_s1 + $0xd90] sm:$0xff]  ;;  %3411 = vmatpush.msra.mxu0 %v8649_v19  ;;  %v8590_v19 = vld [vmem:[%s17230_s1 + $0xab8] sm:$0xff] }
 0x2a4   : > { %17594 = vst [vmem:[#allocation130_spill] sm:$0xff] %v12059_v8  ;;  %v12067_v42 = vadd.f32 %v2216_v1, %v11627_v48  ;;  %v2798_v48 = vrot.slane %v12064_v36, 1  ;;  %v2800_v1 = vrot.slane %v12069_v12, 1  ;;  %3476 = vmatpush.msra.mxu1 %v8681_v35  ;;  %v9406_v35 = vld [vmem:[#allocation3 + $0x148] sm:$0xff]  ;;  %3016 = vmatpush.msra.mxu2 %v8590_v19 }
 0x2a5   : > { %2511 = vmatmul.f32.gmra.mxu2 %v9404_v61  ;;  %2904 = vmatmul.f32.gmra.mxu0 %v12057_v23 }
 0x2a6   : > { %2576 = vmatmul.f32.gmra.mxu3 %v9405_v33  ;;  %2969 = vmatmul.f32.gmra.mxu1 %v12062_v18  ;;  %v12090_v4 = vsel %vm1378_vm1, %v2794_v50, %v2798_v48  ;;  %v12095_v17 = vsel %vm1378_vm1, %v2796_v11, %v2800_v1  ;;  %v8622_v50 = vld [vmem:[%s17230_s1 + $0xbb8] sm:$0xff] }
 0x2a7   : > { %17596 = vst [vmem:[#allocation132_spill] sm:$0xff] %v12090_v4  ;;  %v9407_v11 = vld [vmem:[#allocation3 + $0x18] sm:$0xff]  ;;  %3081 = vmatpush.msra.mxu3 %v8622_v50  ;;  %v12135_v50 = vld [vmem:[#allocation3 + $0xe0] sm:$0xff] }
 0x2a8   : > { %v2153_v61 = vpop.f32.mrf.mxu2  ;;  %17598 = vst [vmem:[#allocation134_spill] sm:$0xff] %v12095_v17 }
 0x2a9   : > { %v2218_v33 = vpop.f32.mrf.mxu3 }
 0x2aa   : > { %v2219_v8 = vadd.f32 %v2218_v33, %v2153_v61  ;;  %v12087_v41 = vpop.f32.mrf.mxu0  ;;  %v8679_v61 = vld [vmem:[%s17230_s1 + $0xd80] sm:$0xff]  ;;  %v2804_v33 = vrot.slane %v12102_v40, 1 }
 0x2ab   : > { %17595 = vst [vmem:[#allocation131_spill] sm:$0xff] %v12087_v41  ;;  %v12092_v43 = vpop.f32.mrf.mxu1  ;;  %3477 = vmatpush.msra.mxu1 %v8679_v61  ;;  %v9408_v61 = vld [vmem:[#allocation3 + $0x28] sm:$0xff] }
 0x2ac   : > { %17597 = vst [vmem:[#allocation133_spill] sm:$0xff] %v12092_v43  ;;  %v12100_v59 = vadd.f32 %v2219_v8, %v11650_v56  ;;  %v2802_v56 = vrot.slane %v12097_v63, 1  ;;  %v8647_v8 = vld [vmem:[%s17230_s1 + $0xc80] sm:$0xff]  ;;  %v12130_v63 = vld [vmem:[#allocation3 + $0x128] sm:$0xff] }
 0x2ad   : > { %2514 = vmatmul.f32.gmra.mxu2 %v9406_v35  ;;  %2907 = vmatmul.f32.gmra.mxu0 %v12090_v4  ;;  %17605 = vst [vmem:[#allocation141_spill] sm:$0xff] %v12130_v63 }
 0x2ae   : > { %17600 = vst [vmem:[#allocation136_spill] sm:$0xff] %v12100_v59  ;;  %2579 = vmatmul.f32.gmra.mxu3 %v9407_v11  ;;  %2972 = vmatmul.f32.gmra.mxu1 %v12095_v17  ;;  %v12123_v17 = vsel %vm1378_vm1, %v2798_v48, %v2802_v56  ;;  %v12128_v59 = vsel %vm1378_vm1, %v2800_v1, %v2804_v33  ;;  %v8620_v48 = vld [vmem:[%s17230_s1 + $0xba8] sm:$0xff]  ;;  %v9409_v1 = vld [vmem:[#allocation3 + $0x150] sm:$0xff] }
 0x2af   : > { %3412 = vmatpush.msra.mxu0 %v8647_v8  ;;  %17602 = vst [vmem:[#allocation138_spill] sm:$0xff] %v12123_v17  ;;  %v8588_v8 = vld [vmem:[%s17230_s1 + $0xaa8] sm:$0xff]  ;;  %3082 = vmatpush.msra.mxu3 %v8620_v48  ;;  %v12168_v48 = vld [vmem:[#allocation3 + $0x20] sm:$0xff] }
 0x2b0   : > { %v2156_v35 = vpop.f32.mrf.mxu2  ;;  %17604 = vst [vmem:[#allocation140_spill] sm:$0xff] %v12128_v59  ;;  %3017 = vmatpush.msra.mxu2 %v8588_v8 }
 0x2b1   : > { %v2221_v11 = vpop.f32.mrf.mxu3 }
 0x2b2   : > { %v2222_v43 = vadd.f32 %v2221_v11, %v2156_v35  ;;  %v12120_v41 = vpop.f32.mrf.mxu0  ;;  %v8677_v35 = vld [vmem:[%s17230_s1 + $0xd70] sm:$0xff]  ;;  %v2808_v11 = vrot.slane %v12135_v50, 1 }
 0x2b3   : > { %17601 = vst [vmem:[#allocation137_spill] sm:$0xff] %v12120_v41  ;;  %v12125_v4 = vpop.f32.mrf.mxu1  ;;  %3478 = vmatpush.msra.mxu1 %v8677_v35  ;;  %v2812_v35 = vrot.slane %v12168_v48, 1 }
 0x2b4   : > { %17603 = vst [vmem:[#allocation139_spill] sm:$0xff] %v12125_v4  ;;  %v12133_v19 = vadd.f32 %v2222_v43, %v11673_v3  ;;  %v2806_v3 = vrot.slane %v12130_v63, 1  ;;  %v8645_v43 = vld [vmem:[%s17230_s1 + $0xc70] sm:$0xff]  ;;  %v12163_v63 = vld [vmem:[#allocation3 + $0x80] sm:$0xff] }
 0x2b5   : > { %2517 = vmatmul.f32.gmra.mxu2 %v9408_v61  ;;  %2910 = vmatmul.f32.gmra.mxu0 %v12123_v17 }
 0x2b6   : > { %17606 = vst [vmem:[#allocation142_spill] sm:$0xff] %v12133_v19  ;;  %2582 = vmatmul.f32.gmra.mxu3 %v9409_v1  ;;  %2975 = vmatmul.f32.gmra.mxu1 %v12128_v59  ;;  %v12156_v59 = vsel %vm1378_vm1, %v2802_v56, %v2806_v3  ;;  %v12161_v19 = vsel %vm1378_vm1, %v2804_v33, %v2808_v11  ;;  %v8618_v56 = vld [vmem:[%s17230_s1 + $0xb98] sm:$0xff]  ;;  %v8675_v33 = vld [vmem:[%s17230_s1 + $0xd60] sm:$0xff] }
 0x2b7   : > { %3413 = vmatpush.msra.mxu0 %v8645_v43  ;;  %17608 = vst [vmem:[#allocation144_spill] sm:$0xff] %v12156_v59  ;;  %v8586_v43 = vld [vmem:[%s17230_s1 + $0xa98] sm:$0xff]  ;;  %3083 = vmatpush.msra.mxu3 %v8618_v56  ;;  %v12203_v56 = vld [vmem:[#allocation3 + $0x50] sm:$0xff] }
 0x2b8   : > { %v2159_v61 = vpop.f32.mrf.mxu2  ;;  %17610 = vst [vmem:[#allocation146_spill] sm:$0xff] %v12161_v19  ;;  %3018 = vmatpush.msra.mxu2 %v8586_v43  ;;  %3479 = vmatpush.msra.mxu1 %v8675_v33  ;;  %v8673_v33 = vld [vmem:[%s17230_s1 + $0xd50] sm:$0xff] }
 0x2b9   : > { %v2224_v1 = vpop.f32.mrf.mxu3 }
 0x2ba   : > { %v2225_v4 = vadd.f32 %v2224_v1, %v2159_v61  ;;  %v12153_v41 = vpop.f32.mrf.mxu0  ;;  %3480 = vmatpush.msra.mxu1 %v8673_v33  ;;  %v8671_v33 = vld [vmem:[%s17230_s1 + $0xd40] sm:$0xff] }
 0x2bb   : > { %17607 = vst [vmem:[#allocation143_spill] sm:$0xff] %v12153_v41  ;;  %v12158_v17 = vpop.f32.mrf.mxu1 }
 0x2bc   : > { %17609 = vst [vmem:[#allocation145_spill] sm:$0xff] %v12158_v17  ;;  %v12166_v8 = vadd.f32 %v2225_v4, %v11696_v37  ;;  %v2810_v37 = vrot.slane %v12163_v63, 1  ;;  %v8643_v4 = vld [vmem:[%s17230_s1 + $0xc60] sm:$0xff]  ;;  %3481 = vmatpush.msra.mxu1 %v8671_v33  ;;  %v8669_v33 = vld [vmem:[%s17230_s1 + $0xd30] sm:$0xff] }
 0x2bd   : > { %2520 = vmatmul.f32.gmra.mxu2 %v11705_v22  ;;  %2913 = vmatmul.f32.gmra.mxu0 %v12156_v59  ;;  %v12198_v59 = vld [vmem:[#allocation3 + $0x70] sm:$0xff] }
 0x2be   : > { %2585 = vmatmul.f32.gmra.mxu3 %v11709_v45  ;;  %2978 = vmatmul.f32.gmra.mxu1 %v12161_v19  ;;  %v12191_v17 = vsel %vm1378_vm1, %v2806_v3, %v2810_v37  ;;  %v12196_v19 = vsel %vm1378_vm1, %v2808_v11, %v2812_v35  ;;  %v8616_v3 = vld [vmem:[%s17230_s1 + $0xb88] sm:$0xff]  ;;  %v8641_v11 = vld [vmem:[%s17230_s1 + $0xc50] sm:$0xff] }
 0x2bf   : > { %3414 = vmatpush.msra.mxu0 %v8643_v4  ;;  %17612 = vst [vmem:[#allocation148_spill] sm:$0xff] %v12191_v17  ;;  %v8584_v4 = vld [vmem:[%s17230_s1 + $0xa88] sm:$0xff]  ;;  %3084 = vmatpush.msra.mxu3 %v8616_v3  ;;  %v12238_v3 = vld [vmem:[#allocation3 + $0x118] sm:$0xff] }
 0x2c0   : > { %v2162_v22 = vpop.f32.mrf.mxu2  ;;  %17614 = vst [vmem:[#allocation150_spill] sm:$0xff] %v12196_v19  ;;  %3019 = vmatpush.msra.mxu2 %v8584_v4  ;;  %3482 = vmatpush.msra.mxu1 %v8669_v33  ;;  %v8667_v33 = vld [vmem:[%s17230_s1 + $0xd20] sm:$0xff] }
 0x2c1   : > { %v2227_v45 = vpop.f32.mrf.mxu3  ;;  %3415 = vmatpush.msra.mxu0 %v8641_v11  ;;  %v8582_v11 = vld [vmem:[%s17230_s1 + $0xa78] sm:$0xff] }
 0x2c2   : > { %v2228_v61 = vadd.f32 %v2227_v45, %v2162_v22  ;;  %v12188_v1 = vpop.f32.mrf.mxu0  ;;  %v2816_v22 = vrot.slane %v12203_v56, 1  ;;  %3020 = vmatpush.msra.mxu2 %v8582_v11  ;;  %3483 = vmatpush.msra.mxu1 %v8667_v33  ;;  %v8665_v33 = vld [vmem:[%s17230_s1 + $0xd10] sm:$0xff] }
 0x2c3   : > { %17611 = vst [vmem:[#allocation147_spill] sm:$0xff] %v12188_v1  ;;  %v12193_v41 = vpop.f32.mrf.mxu1 }
 0x2c4   : > { %17613 = vst [vmem:[#allocation149_spill] sm:$0xff] %v12193_v41  ;;  %v12201_v43 = vadd.f32 %v2228_v61, %v11723_v30  ;;  %v2814_v30 = vrot.slane %v12198_v59, 1  ;;  %3484 = vmatpush.msra.mxu1 %v8665_v33  ;;  %v8663_v33 = vld [vmem:[%s17230_s1 + $0xd00] sm:$0xff] }
 0x2c5   : > { %2523 = vmatmul.f32.gmra.mxu2 %v11732_v57  ;;  %2916 = vmatmul.f32.gmra.mxu0 %v12191_v17  ;;  %v12233_v17 = vld [vmem:[#allocation3 + $0x88] sm:$0xff] }
 0x2c6   : > { %2588 = vmatmul.f32.gmra.mxu3 %v11736_v52  ;;  %2981 = vmatmul.f32.gmra.mxu1 %v12196_v19  ;;  %v12226_v41 = vsel %vm1378_vm1, %v2810_v37, %v2814_v30  ;;  %v12231_v19 = vsel %vm1378_vm1, %v2812_v35, %v2816_v22  ;;  %v8614_v37 = vld [vmem:[%s17230_s1 + $0xb78] sm:$0xff]  ;;  %v8639_v35 = vld [vmem:[%s17230_s1 + $0xc40] sm:$0xff] }
 0x2c7   : > { %17616 = vst [vmem:[#allocation152_spill] sm:$0xff] %v12226_v41  ;;  %3085 = vmatpush.msra.mxu3 %v8614_v37  ;;  %3416 = vmatpush.msra.mxu0 %v8639_v35  ;;  %v12273_v37 = vld [vmem:[#allocation3 + $0x108] sm:$0xff] }
 0x2c8   : > { %v2165_v57 = vpop.f32.mrf.mxu2  ;;  %17618 = vst [vmem:[#allocation154_spill] sm:$0xff] %v12231_v19  ;;  %v8580_v35 = vld [vmem:[%s17230_s1 + $0xa68] sm:$0xff]  ;;  %3485 = vmatpush.msra.mxu1 %v8663_v33 }
 0x2c9   : > { %v2230_v52 = vpop.f32.mrf.mxu3  ;;  %3021 = vmatpush.msra.mxu2 %v8580_v35 }
 0x2ca   : > { %v2231_v45 = vadd.f32 %v2230_v52, %v2165_v57  ;;  %v12223_v61 = vpop.f32.mrf.mxu0  ;;  %v2820_v57 = vrot.slane %v12238_v3, 1 }
 0x2cb   : > { %17615 = vst [vmem:[#allocation151_spill] sm:$0xff] %v12223_v61  ;;  %v12228_v1 = vpop.f32.mrf.mxu1 }
 0x2cc   : > { %17617 = vst [vmem:[#allocation153_spill] sm:$0xff] %v12228_v1  ;;  %v12236_v4 = vadd.f32 %v2231_v45, %v11750_v62  ;;  %v2818_v62 = vrot.slane %v12233_v17, 1 }
 0x2cd   : > { %2526 = vmatmul.f32.gmra.mxu2 %v11759_v47  ;;  %2919 = vmatmul.f32.gmra.mxu0 %v12226_v41  ;;  %v12268_v41 = vld [vmem:[#allocation3 + $0x130] sm:$0xff] }
 0x2ce   : > { %2591 = vmatmul.f32.gmra.mxu3 %v11763_v39  ;;  %2984 = vmatmul.f32.gmra.mxu1 %v12231_v19  ;;  %v12261_v1 = vsel %vm1378_vm1, %v2814_v30, %v2818_v62  ;;  %v12266_v19 = vsel %vm1378_vm1, %v2816_v22, %v2820_v57  ;;  %v8612_v30 = vld [vmem:[%s17230_s1 + $0xb68] sm:$0xff]  ;;  %v8637_v22 = vld [vmem:[%s17230_s1 + $0xc30] sm:$0xff] }
 0x2cf   : > { %17620 = vst [vmem:[#allocation156_spill] sm:$0xff] %v12261_v1  ;;  %3086 = vmatpush.msra.mxu3 %v8612_v30  ;;  %3417 = vmatpush.msra.mxu0 %v8637_v22  ;;  %v12308_v30 = vld [vmem:[#allocation3 + $0xb8] sm:$0xff] }
 0x2d0   : > { %v2168_v47 = vpop.f32.mrf.mxu2  ;;  %17622 = vst [vmem:[#allocation158_spill] sm:$0xff] %v12266_v19  ;;  %v8578_v22 = vld [vmem:[%s17230_s1 + $0xa58] sm:$0xff] }
 0x2d1   : > { %v2233_v39 = vpop.f32.mrf.mxu3  ;;  %3022 = vmatpush.msra.mxu2 %v8578_v22 }
 0x2d2   : > { %v2234_v52 = vadd.f32 %v2233_v39, %v2168_v47  ;;  %v12258_v45 = vpop.f32.mrf.mxu0  ;;  %v2824_v47 = vrot.slane %v12273_v37, 1 }
 0x2d3   : > { %17619 = vst [vmem:[#allocation155_spill] sm:$0xff] %v12258_v45  ;;  %v12263_v61 = vpop.f32.mrf.mxu1 }
 0x2d4   : > { %17621 = vst [vmem:[#allocation157_spill] sm:$0xff] %v12263_v61  ;;  %v12271_v11 = vadd.f32 %v2234_v52, %v11777_v20  ;;  %v2822_v20 = vrot.slane %v12268_v41, 1 }
 0x2d5   : > { %2529 = vmatmul.f32.gmra.mxu2 %v11786_v32  ;;  %2922 = vmatmul.f32.gmra.mxu0 %v12261_v1  ;;  %v12303_v1 = vld [vmem:[#allocation3 + $0xa8] sm:$0xff] }
 0x2d6   : > { %2594 = vmatmul.f32.gmra.mxu3 %v11790_v49  ;;  %2987 = vmatmul.f32.gmra.mxu1 %v12266_v19  ;;  %v12296_v61 = vsel %vm1378_vm1, %v2818_v62, %v2822_v20  ;;  %v12301_v19 = vsel %vm1378_vm1, %v2820_v57, %v2824_v47  ;;  %v8610_v62 = vld [vmem:[%s17230_s1 + $0xb58] sm:$0xff]  ;;  %v8635_v57 = vld [vmem:[%s17230_s1 + $0xc20] sm:$0xff] }
 0x2d7   : > { %17624 = vst [vmem:[#allocation160_spill] sm:$0xff] %v12296_v61  ;;  %3087 = vmatpush.msra.mxu3 %v8610_v62  ;;  %3418 = vmatpush.msra.mxu0 %v8635_v57  ;;  %v12343_v62 = vld [vmem:[#allocation3 + $0x90] sm:$0xff]  ;;  %v8576_v57 = vld [vmem:[%s17230_s1 + $0xa48] sm:$0xff] }
 0x2d8   : > { %v2171_v32 = vpop.f32.mrf.mxu2  ;;  %17626 = vst [vmem:[#allocation162_spill] sm:$0xff] %v12301_v19  ;;  %3023 = vmatpush.msra.mxu2 %v8576_v57 }
 0x2d9   : > { %v2236_v49 = vpop.f32.mrf.mxu3 }
 0x2da   : > { %v2237_v39 = vadd.f32 %v2236_v49, %v2171_v32  ;;  %v12293_v52 = vpop.f32.mrf.mxu0  ;;  %v2828_v32 = vrot.slane %v12308_v30, 1 }
 0x2db   : > { %17623 = vst [vmem:[#allocation159_spill] sm:$0xff] %v12293_v52  ;;  %v12298_v45 = vpop.f32.mrf.mxu1 }
 0x2dc   : > { %17625 = vst [vmem:[#allocation161_spill] sm:$0xff] %v12298_v45  ;;  %v12306_v35 = vadd.f32 %v2237_v39, %v11804_v55  ;;  %v2826_v55 = vrot.slane %v12303_v1, 1 }
 0x2dd   : > { %2532 = vmatmul.f32.gmra.mxu2 %v11813_v44  ;;  %2925 = vmatmul.f32.gmra.mxu0 %v12296_v61  ;;  %v12338_v61 = vld [vmem:[#allocation3 + $0xc8] sm:$0xff] }
 0x2de   : > { %2597 = vmatmul.f32.gmra.mxu3 %v11817_v14  ;;  %2990 = vmatmul.f32.gmra.mxu1 %v12301_v19  ;;  %v12331_v45 = vsel %vm1378_vm1, %v2822_v20, %v2826_v55  ;;  %v12336_v19 = vsel %vm1378_vm1, %v2824_v47, %v2828_v32  ;;  %v8608_v20 = vld [vmem:[%s17230_s1 + $0xb48] sm:$0xff]  ;;  %v8633_v47 = vld [vmem:[%s17230_s1 + $0xc10] sm:$0xff] }
 0x2df   : > { %17628 = vst [vmem:[#allocation164_spill] sm:$0xff] %v12331_v45  ;;  %3088 = vmatpush.msra.mxu3 %v8608_v20  ;;  %3419 = vmatpush.msra.mxu0 %v8633_v47  ;;  %v12378_v20 = vld [vmem:[#allocation3 + $0x10] sm:$0xff]  ;;  %v8574_v47 = vld [vmem:[%s17230_s1 + $0xa38] sm:$0xff] }
 0x2e0   : > { %v2174_v44 = vpop.f32.mrf.mxu2  ;;  %17630 = vst [vmem:[#allocation166_spill] sm:$0xff] %v12336_v19  ;;  %3024 = vmatpush.msra.mxu2 %v8574_v47 }
 0x2e1   : > { %v2239_v14 = vpop.f32.mrf.mxu3 }
 0x2e2   : > { %v2240_v49 = vadd.f32 %v2239_v14, %v2174_v44  ;;  %v12328_v39 = vpop.f32.mrf.mxu0  ;;  %v2832_v44 = vrot.slane %v12343_v62, 1 }
 0x2e3   : > { %17627 = vst [vmem:[#allocation163_spill] sm:$0xff] %v12328_v39  ;;  %v12333_v52 = vpop.f32.mrf.mxu1 }
 0x2e4   : > { %17629 = vst [vmem:[#allocation165_spill] sm:$0xff] %v12333_v52  ;;  %v12341_v22 = vadd.f32 %v2240_v49, %v11831_v54  ;;  %v2830_v54 = vrot.slane %v12338_v61, 1 }
 0x2e5   : > { %2535 = vmatmul.f32.gmra.mxu2 %v11840_v34  ;;  %2928 = vmatmul.f32.gmra.mxu0 %v12331_v45  ;;  %v12373_v45 = vld [vmem:[#allocation3 + $0x140] sm:$0xff] }
 0x2e6   : > { %2600 = vmatmul.f32.gmra.mxu3 %v11844_v5  ;;  %2993 = vmatmul.f32.gmra.mxu1 %v12336_v19  ;;  %v12366_v52 = vsel %vm1378_vm1, %v2826_v55, %v2830_v54  ;;  %v12371_v19 = vsel %vm1378_vm1, %v2828_v32, %v2832_v44  ;;  %v8606_v55 = vld [vmem:[%s17230_s1 + $0xb38] sm:$0xff]  ;;  %v8631_v32 = vld [vmem:[%s17230_s1 + $0xc00] sm:$0xff] }
 0x2e7   : > { %17633 = vst [vmem:[#allocation169_spill] sm:$0xff] %v12371_v19  ;;  %3089 = vmatpush.msra.mxu3 %v8606_v55  ;;  %3420 = vmatpush.msra.mxu0 %v8631_v32  ;;  %v8570_v55 = vld [vmem:[%s17230_s1 + $0xa18] sm:$0xff] }
 0x2e8   : > { %v2177_v34 = vpop.f32.mrf.mxu2  ;;  %v8602_v32 = vld [vmem:[%s17230_s1 + $0xb18] sm:$0xff] }
 0x2e9   : > { %v2242_v5 = vpop.f32.mrf.mxu3 }
 0x2ea   : > { %v2243_v14 = vadd.f32 %v2242_v5, %v2177_v34  ;;  %v12363_v49 = vpop.f32.mrf.mxu0  ;;  %v2836_v34 = vrot.slane %v12378_v20, 1  ;;  %v8604_v5 = vld [vmem:[%s17230_s1 + $0xb28] sm:$0xff] }
 0x2eb   : > { %17631 = vst [vmem:[#allocation167_spill] sm:$0xff] %v12363_v49  ;;  %v12368_v39 = vpop.f32.mrf.mxu1  ;;  %3090 = vmatpush.msra.mxu3 %v8604_v5  ;;  %v8568_v5 = vld [vmem:[%s17230_s1 + $0xa08] sm:$0xff] }
 0x2ec   : > { %17632 = vst [vmem:[#allocation168_spill] sm:$0xff] %v12368_v39  ;;  %v12376_v57 = vadd.f32 %v2243_v14, %v11858_v27  ;;  %v2834_v27 = vrot.slane %v12373_v45, 1 }
 0x2ed   : > { %2538 = vmatmul.f32.gmra.mxu2 %v11867_v28  ;;  %2931 = vmatmul.f32.gmra.mxu0 %v12366_v52 }
 0x2ee   : > { %2603 = vmatmul.f32.gmra.mxu3 %v11871_v60  ;;  %2996 = vmatmul.f32.gmra.mxu1 %v12371_v19  ;;  %v8572_v60 = vld [vmem:[%s17230_s1 + $0xa28] sm:$0xff]  ;;  %v12407_v47 = vsel %vm1378_vm1, %v2830_v54, %v2834_v27  ;;  %v12418_v19 = vsel %vm1378_vm1, %v2832_v44, %v2836_v34  ;;  %v8757_v44 = vld [vmem:[%s17230_s1 + $0xff0] sm:$0xff] }
 0x2ef   : > { %3025 = vmatpush.msra.mxu2 %v8572_v60  ;;  %17635 = vst [vmem:[#allocation171_spill] sm:$0xff] %v12407_v47  ;;  %v12420_v60 = vld [vmem:[#allocation3 + $0x138] sm:$0xff]  ;;  %3091 = vmatpush.msra.mxu3 %v8602_v32 }
 0x2f0   : > { %v2180_v28 = vpop.f32.mrf.mxu2  ;;  %17637 = vst [vmem:[#allocation173_spill] sm:$0xff] %v12418_v19  ;;  %3829 = vmatpush.msrb.mxu1 %v8757_v44 }
 0x2f1   : > { %v2245_v14 = vpop.f32.mrf.mxu3  ;;  %3026 = vmatpush.msra.mxu2 %v8570_v55 }
 0x2f2   : > { %v2246_v39 = vadd.f32 %v2245_v14, %v2180_v28  ;;  %v12404_v49 = vpop.f32.mrf.mxu0  ;;  %v12425_v28 = vld [vmem:[#allocation3 + $0x78] sm:$0xff]  ;;  %v8600_v14 = vld [vmem:[%s17230_s1 + $0xb08] sm:$0xff] }
 0x2f3   : > { %17634 = vst [vmem:[#allocation170_spill] sm:$0xff] %v12404_v49  ;;  %v12415_v33 = vpop.f32.mrf.mxu1  ;;  %v2840_v55 = vrot.slane %v12425_v28, 1  ;;  %3027 = vmatpush.msra.mxu2 %v8568_v5  ;;  %3092 = vmatpush.msra.mxu3 %v8600_v14  ;;  %v12460_v14 = vld [vmem:[#allocation3 + $0x120] sm:$0xff] }
 0x2f4   : > { %17636 = vst [vmem:[#allocation172_spill] sm:$0xff] %v12415_v33  ;;  %v12423_v54 = vadd.f32 %v2246_v39, %v11897_v29  ;;  %v2838_v29 = vrot.slane %v12420_v60, 1  ;;  %v8725_v39 = vld [vmem:[%s17230_s1 + $0xef0] sm:$0xff] }
 0x2f5   : > { %2541 = vmatmul.f32.gmra.mxu2 %v11906_v24  ;;  %2934 = vmatmul.f32.gmra.mxu0 %v12407_v47  ;;  %v12453_v47 = vsel %vm1378_vm1, %v2836_v34, %v2840_v55  ;;  %v8723_v34 = vld [vmem:[%s17230_s1 + $0xee0] sm:$0xff] }
 0x2f6   : > { %17638 = vst [vmem:[#allocation174_spill] sm:$0xff] %v12423_v54  ;;  %2606 = vmatmul.f32.gmra.mxu3 %v11910_v58  ;;  %2999 = vmatmul.f32.gmra.mxu1 %v12418_v19  ;;  %v12448_v49 = vsel %vm1378_vm1, %v2834_v27, %v2838_v29  ;;  %v12455_v54 = vld [vmem:[#allocation3 + $0xa0] sm:$0xff] }
 0x2f7   : > { %3764 = vmatpush.msrb.mxu0 %v8725_v39  ;;  %17640 = vst [vmem:[#allocation176_spill] sm:$0xff] %v12448_v49  ;;  %v2842_v27 = vrot.slane %v12455_v54, 1  ;;  %v2844_v39 = vrot.slane %v12460_v14, 1 }
 0x2f8   : > { %v2183_v24 = vpop.f32.mrf.mxu2  ;;  %17642 = vst [vmem:[#allocation178_spill] sm:$0xff] %v12453_v47 }
 0x2f9   : > { %v2248_v58 = vpop.f32.mrf.mxu3  ;;  %3765 = vmatpush.msrb.mxu0 %v8723_v34  ;;  %v8721_v34 = vld [vmem:[%s17230_s1 + $0xed0] sm:$0xff] }
 0x2fa   : > { %v2249_v32 = vadd.f32 %v2248_v58, %v2183_v24  ;;  %v12445_v33 = vpop.f32.mrf.mxu0  ;;  %v12477_v58 = vsel %vm1378_vm1, %v2838_v29, %v2842_v27 }
 0x2fb   : > { %17639 = vst [vmem:[#allocation175_spill] sm:$0xff] %v12445_v33  ;;  %v12450_v19 = vpop.f32.mrf.mxu1  ;;  %v2683_v33 = vld [vmem:[#allocation3 + $0xd8] sm:$0x1]  ;;  %3766 = vmatpush.msrb.mxu0 %v8721_v34 }
 0x2fc   : > { %17641 = vst [vmem:[#allocation177_spill] sm:$0xff] %v12450_v19  ;;  %v12458_v5 = vadd.f32 %v2249_v32, %v11924_v9  ;;  %v8755_v9 = vld [vmem:[%s17230_s1 + $0xfe0] sm:$0xff]  ;;  %v12482_v19 = vsel %vm1378_vm1, %v2840_v55, %v2844_v39  ;;  %v2846_v29 = vrot.slane %v2683_v33, 1  ;;  %v8753_v55 = vld [vmem:[%s17230_s1 + $0xfd0] sm:$0xff]  ;;  %v8662_v34 = vld [vmem:[%s17230_s1 + $0xcf8] sm:$0xff] }
 0x2fd   : > { %2544 = vmatmul.f32.gmra.mxu2 %v11927_v13  ;;  %2937 = vmatmul.f32.gmra.mxu0 %v12448_v49  ;;  %v2684_v49 = vld [vmem:[#allocation3 + $0xf8] sm:$0x1] }
 0x2fe   : > { %2609 = vmatmul.f32.gmra.mxu3 %v11931_v25  ;;  %3002 = vmatmul.f32.gmra.mxu1 %v12453_v47 }
 0x2ff   : > { %3830 = vmatpush.msrb.mxu1 %v8755_v9  ;;  %3535 = vmatpush.msrb.mxu2 %v8662_v34  ;;  %v8692_v34 = vld [vmem:[%s17230_s1 + $0xde8] sm:$0xff] }
 0x300   : > { %v2186_v13 = vpop.f32.mrf.mxu2 }
 0x301   : > { %v2251_v44 = vpop.f32.mrf.mxu3  ;;  %3831 = vmatpush.msrb.mxu1 %v8753_v55  ;;  %v8694_v55 = vld [vmem:[%s17230_s1 + $0xdf8] sm:$0xff] }
 0x302   : > { %v2252_v24 = vadd.f32 %v2251_v44, %v2186_v13  ;;  %v12474_v25 = vpop.f32.mrf.mxu0  ;;  %3600 = vmatpush.msrb.mxu3 %v8694_v55  ;;  %v3313_v55 = vrot.slane %v12029_v7, 7 }
 0x303   : > { %17643 = vst [vmem:[#allocation179_spill] sm:$0xff] %v12474_v25  ;;  %v12479_v32 = vpop.f32.mrf.mxu1 }
 0x304   : > { %17644 = vst [vmem:[#allocation180_spill] sm:$0xff] %v12479_v32  ;;  %v12485_v47 = vadd.f32 %v2252_v24, %v11945_v16  ;;  %v2848_v16 = vrot.slane %v2684_v49, 1  ;;  %v3174_v32 = vld [vmem:[#allocation3 + $0xe8] sm:$0x80]  ;;  %3601 = vmatpush.msrb.mxu3 %v8692_v34  ;;  %v3319_v34 = vrot.slane %v12069_v12, 7 }
 0x305   : > { %2547 = vmatmul.f32.gmra.mxu2 %v11948_v0  ;;  %2940 = vmatmul.f32.gmra.mxu0 %v12477_v58  ;;  %v3175_v49 = vld [vmem:[#allocation3 + $0x48] sm:$0x80] }
 0x306   : > { %2612 = vmatmul.f32.gmra.mxu3 %v11952_v6  ;;  %3005 = vmatmul.f32.gmra.mxu1 %v12482_v19  ;;  %v12500_v6 = vsel %vm1378_vm1, %v2842_v27, %v2846_v29  ;;  %v12505_v24 = vsel %vm1378_vm1, %v2844_v39, %v2848_v16  ;;  %v9410_v27 = vld [vmem:[#allocation3 + $0xa0] sm:$0xff]  ;;  %v3307_v39 = vrot.slane %v3174_v32, 7  ;;  %v8656_v12 = vld [vmem:[%s17230_s1 + $0xcc8] sm:$0xff] }
 0x307   : > { %17647 = vst [vmem:[#allocation183_spill] sm:$0xff] %v12505_v24  ;;  %v9411_v29 = vld [vmem:[#allocation3 + $0x120] sm:$0xff] }
 0x308   : > { %v2189_v9 = vpop.f32.mrf.mxu2  ;;  %v8719_v16 = vld [vmem:[%s17230_s1 + $0xec0] sm:$0xff] }
 0x309   : > { %v2254_v0 = vpop.f32.mrf.mxu3  ;;  %3767 = vmatpush.msrb.mxu0 %v8719_v16  ;;  %v3315_v16 = vrot.slane %v12034_v46, 7  ;;  %v8658_v46 = vld [vmem:[%s17230_s1 + $0xcd8] sm:$0xff] }
 0x30a   : > { %v2255_v13 = vadd.f32 %v2254_v0, %v2189_v9  ;;  %v12497_v44 = vpop.f32.mrf.mxu0  ;;  %v8751_v9 = vld [vmem:[%s17230_s1 + $0xfc0] sm:$0xff]  ;;  %v3310_v0 = vrot.slane %v3175_v49, 7 }
 0x30b   : > { %17645 = vst [vmem:[#allocation181_spill] sm:$0xff] %v12497_v44  ;;  %v12502_v33 = vpop.f32.mrf.mxu1  ;;  %3832 = vmatpush.msrb.mxu1 %v8751_v9 }
 0x30c   : > { %17646 = vst [vmem:[#allocation182_spill] sm:$0xff] %v12502_v33  ;;  %v12508_v25 = vadd.f32 %v2255_v13, %v11966_v51  ;;  %v3308_v51 = vrot.slane %v11994_v38, 7  ;;  %v3311_v13 = vrot.slane %v11999_v2, 7  ;;  %v8660_v2 = vld [vmem:[%s17230_s1 + $0xce8] sm:$0xff] }
 0x30d   : > { %2550 = vmatmul.f32.gmra.mxu2 %v9410_v27  ;;  %2943 = vmatmul.f32.gmra.mxu0 %v12500_v6 }
 0x30e   : > { %2615 = vmatmul.f32.gmra.mxu3 %v9411_v29  ;;  %3008 = vmatmul.f32.gmra.mxu1 %v12505_v24  ;;  %v12529_v38 = vsel %vm495_vm0, %v3307_v39, %v3308_v51  ;;  %v12534_v24 = vsel %vm495_vm0, %v3310_v0, %v3311_v13  ;;  %v8749_v39 = vld [vmem:[%s17230_s1 + $0xfb0] sm:$0xff]  ;;  %v12560_v7 = vsel %vm495_vm0, %v3308_v51, %v3313_v55  ;;  %v3317_v51 = vrot.slane %v12064_v36, 7 }
 0x30f   : > { %3536 = vmatpush.msrb.mxu2 %v8660_v2  ;;  %3833 = vmatpush.msrb.mxu1 %v8749_v39  ;;  %v8690_v2 = vld [vmem:[%s17230_s1 + $0xdd8] sm:$0xff] }
 0x310   : > { %v2192_v27 = vpop.f32.mrf.mxu2  ;;  %3602 = vmatpush.msrb.mxu3 %v8690_v2  ;;  %v12591_v36 = vsel %vm495_vm0, %v3313_v55, %v3317_v51  ;;  %v17654_v55 = vld [vmem:[#allocation135_spill] sm:$0xff]  ;;  %v8745_v2 = vld [vmem:[%s17230_s1 + $0xf90] sm:$0xff] }
 0x311   : > { %v2257_v29 = vpop.f32.mrf.mxu3  ;;  %3537 = vmatpush.msrb.mxu2 %v8658_v46  ;;  %v8688_v46 = vld [vmem:[%s17230_s1 + $0xdc8] sm:$0xff] }
 0x312   : > { %v2258_v32 = vadd.f32 %v2257_v29, %v2192_v27  ;;  %v12526_v33 = vpop.f32.mrf.mxu0  ;;  %v12565_v29 = vsel %vm495_vm0, %v3311_v13, %v3315_v16  ;;  %v8747_v13 = vld [vmem:[%s17230_s1 + $0xfa0] sm:$0xff]  ;;  %3603 = vmatpush.msrb.mxu3 %v8688_v46 }
 0x313   : > { %17648 = vst [vmem:[#allocation184_spill] sm:$0xff] %v12526_v33  ;;  %v12531_v44 = vpop.f32.mrf.mxu1  ;;  %3834 = vmatpush.msrb.mxu1 %v8747_v13  ;;  %3538 = vmatpush.msrb.mxu2 %v8656_v12  ;;  %v8686_v12 = vld [vmem:[%s17230_s1 + $0xdb8] sm:$0xff]  ;;  %v17658_v46 = vld [vmem:[#allocation132_spill] sm:$0xff] }
 0x314   : > { %17649 = vst [vmem:[#allocation185_spill] sm:$0xff] %v12531_v44  ;;  %v12537_v49 = vadd.f32 %v2258_v32, %v11997_v10  ;;  %v8717_v10 = vld [vmem:[%s17230_s1 + $0xeb0] sm:$0xff]  ;;  %3604 = vmatpush.msrb.mxu3 %v8686_v12  ;;  %v3206_v44 = vld [vmem:[#allocation3 + $0x58] sm:$0x7f] }
 0x315   : > { %3028 = vmatmul.f32.vlgmr.msra.gmra.mxu2 %v11987_v31  ;;  %3421 = vmatmul.f32.vlgmr.msra.gmra.mxu0 %v12529_v38  ;;  %v17664_v12 = vld [vmem:[#allocation138_spill] sm:$0xff] }
 0x316   : > { %3093 = vmatmul.f32.vlgmr.msra.gmra.mxu3 %v11992_v53  ;;  %3486 = vmatmul.f32.vlgmr.msra.gmra.mxu1 %v12534_v24 }
 0x317   : > { %3768 = vmatpush.msrb.mxu0 %v8717_v10  ;;  %3835 = vmatpush.msrb.mxu1 %v8745_v2  ;;  %v8743_v2 = vld [vmem:[%s17230_s1 + $0xf80] sm:$0xff] }
 0x318   : > { %v2506_v31 = vpop.f32.mrf.mxu2 }
 0x319   : > { %v2571_v53 = vpop.f32.mrf.mxu3  ;;  %3836 = vmatpush.msrb.mxu1 %v8743_v2  ;;  %v3331_v2 = vrot.slane %v12168_v48, 7  ;;  %v8650_v48 = vld [vmem:[%s17230_s1 + $0xc98] sm:$0xff] }
 0x31a   : > { %v2572_v9 = vadd.f32 %v2571_v53, %v2506_v31  ;;  %v12557_v0 = vpop.f32.mrf.mxu0  ;;  %v12596_v53 = vsel %vm495_vm0, %v3315_v16, %v3319_v34  ;;  %v3321_v16 = vrot.slane %v17654_v55, 7 }
 0x31b   : > { %17650 = vst [vmem:[#allocation186_spill] sm:$0xff] %v12557_v0  ;;  %v12562_v27 = vpop.f32.mrf.mxu1 }
 0x31c   : > { %17651 = vst [vmem:[#allocation187_spill] sm:$0xff] %v12562_v27  ;;  %v12568_v32 = vadd.f32 %v2572_v9, %v12032_v26  ;;  %v8715_v26 = vld [vmem:[%s17230_s1 + $0xea0] sm:$0xff]  ;;  %v17663_v27 = vld [vmem:[#allocation142_spill] sm:$0xff] }
 0x31d   : > { %3031 = vmatmul.f32.gmra.mxu2 %v12022_v15  ;;  %3424 = vmatmul.f32.gmra.mxu0 %v12560_v7 }
 0x31e   : > { %3096 = vmatmul.f32.gmra.mxu3 %v12027_v21  ;;  %3489 = vmatmul.f32.gmra.mxu1 %v12565_v29 }
 0x31f   : > { %3769 = vmatpush.msrb.mxu0 %v8715_v26  ;;  %v3323_v26 = vrot.slane %v12102_v40, 7  ;;  %v8654_v40 = vld [vmem:[%s17230_s1 + $0xcb8] sm:$0xff] }
 0x320   : > { %v2509_v15 = vpop.f32.mrf.mxu2  ;;  %3539 = vmatpush.msrb.mxu2 %v8654_v40  ;;  %v8684_v40 = vld [vmem:[%s17230_s1 + $0xda8] sm:$0xff] }
 0x321   : > { %v2574_v21 = vpop.f32.mrf.mxu3  ;;  %v12627_v55 = vsel %vm495_vm0, %v3319_v34, %v3323_v26  ;;  %v17660_v34 = vld [vmem:[#allocation141_spill] sm:$0xff]  ;;  %3605 = vmatpush.msrb.mxu3 %v8684_v40  ;;  %v17668_v40 = vld [vmem:[#allocation144_spill] sm:$0xff] }
 0x322   : > { %v2575_v10 = vadd.f32 %v2574_v21, %v2509_v15  ;;  %v12588_v39 = vpop.f32.mrf.mxu0  ;;  %v12622_v21 = vsel %vm495_vm0, %v3317_v51, %v3321_v16  ;;  %v17659_v51 = vld [vmem:[#allocation134_spill] sm:$0xff] }
 0x323   : > { %17652 = vst [vmem:[#allocation188_spill] sm:$0xff] %v12588_v39  ;;  %v12593_v31 = vpop.f32.mrf.mxu1 }
 0x324   : > { %17653 = vst [vmem:[#allocation189_spill] sm:$0xff] %v12593_v31  ;;  %v12599_v9 = vadd.f32 %v2575_v10, %v12067_v42  ;;  %v8713_v42 = vld [vmem:[%s17230_s1 + $0xe90] sm:$0xff]  ;;  %v17657_v31 = vld [vmem:[#allocation136_spill] sm:$0xff] }
 0x325   : > { %3034 = vmatmul.f32.gmra.mxu2 %v12057_v23  ;;  %3427 = vmatmul.f32.gmra.mxu0 %v12591_v36 }
 0x326   : > { %3099 = vmatmul.f32.gmra.mxu3 %v12062_v18  ;;  %3492 = vmatmul.f32.gmra.mxu1 %v12596_v53 }
 0x327   : > { %3770 = vmatpush.msrb.mxu0 %v8713_v42  ;;  %v3325_v42 = vrot.slane %v17660_v34, 7 }
 0x328   : > { %v2512_v23 = vpop.f32.mrf.mxu2 }
 0x329   : > { %v2577_v18 = vpop.f32.mrf.mxu3  ;;  %v12653_v34 = vsel %vm495_vm0, %v3321_v16, %v3325_v42  ;;  %v17665_v16 = vld [vmem:[#allocation140_spill] sm:$0xff] }
 0x32a   : > { %v2578_v13 = vadd.f32 %v2577_v18, %v2512_v23  ;;  %v12619_v15 = vpop.f32.mrf.mxu0  ;;  %v3327_v23 = vrot.slane %v12135_v50, 7  ;;  %v8652_v50 = vld [vmem:[%s17230_s1 + $0xca8] sm:$0xff] }
 0x32b   : > { %17655 = vst [vmem:[#allocation135_spill] sm:$0xff] %v12619_v15  ;;  %v12624_v10 = vpop.f32.mrf.mxu1  ;;  %3540 = vmatpush.msrb.mxu2 %v8652_v50  ;;  %v8682_v50 = vld [vmem:[%s17230_s1 + $0xd98] sm:$0xff] }
 0x32c   : > { %17656 = vst [vmem:[#allocation190_spill] sm:$0xff] %v12624_v10  ;;  %v12630_v39 = vadd.f32 %v2578_v13, %v17657_v31  ;;  %v8711_v31 = vld [vmem:[%s17230_s1 + $0xe80] sm:$0xff]  ;;  %v12658_v15 = vsel %vm495_vm0, %v3323_v26, %v3327_v23  ;;  %v3329_v26 = vrot.slane %v12163_v63, 7  ;;  %3606 = vmatpush.msrb.mxu3 %v8682_v50 }
 0x32d   : > { %3037 = vmatmul.f32.gmra.mxu2 %v17658_v46  ;;  %3430 = vmatmul.f32.gmra.mxu0 %v12622_v21  ;;  %v17672_v50 = vld [vmem:[#allocation148_spill] sm:$0xff] }
 0x32e   : > { %3102 = vmatmul.f32.gmra.mxu3 %v17659_v51  ;;  %3495 = vmatmul.f32.gmra.mxu1 %v12627_v55  ;;  %v12684_v63 = vsel %vm495_vm0, %v3325_v42, %v3329_v26  ;;  %v17669_v42 = vld [vmem:[#allocation146_spill] sm:$0xff] }
 0x32f   : > { %3771 = vmatpush.msrb.mxu0 %v8711_v31  ;;  %v8741_v31 = vld [vmem:[%s17230_s1 + $0xf70] sm:$0xff]  ;;  %3541 = vmatpush.msrb.mxu2 %v8650_v48  ;;  %v8680_v48 = vld [vmem:[%s17230_s1 + $0xd88] sm:$0xff] }
 0x330   : > { %v2515_v18 = vpop.f32.mrf.mxu2  ;;  %3837 = vmatpush.msrb.mxu1 %v8741_v31  ;;  %v3335_v31 = vrot.slane %v12203_v56, 7  ;;  %v8648_v56 = vld [vmem:[%s17230_s1 + $0xc88] sm:$0xff]  ;;  %3607 = vmatpush.msrb.mxu3 %v8680_v48  ;;  %v17676_v48 = vld [vmem:[#allocation152_spill] sm:$0xff] }
 0x331   : > { %v2580_v13 = vpop.f32.mrf.mxu3  ;;  %3542 = vmatpush.msrb.mxu2 %v8648_v56  ;;  %v8678_v56 = vld [vmem:[%s17230_s1 + $0xd78] sm:$0xff] }
 0x332   : > { %v2581_v46 = vadd.f32 %v2580_v13, %v2515_v18  ;;  %v12650_v51 = vpop.f32.mrf.mxu0  ;;  %3608 = vmatpush.msrb.mxu3 %v8678_v56  ;;  %v17680_v56 = vld [vmem:[#allocation156_spill] sm:$0xff] }
 0x333   : > { %17661 = vst [vmem:[#allocation136_spill] sm:$0xff] %v12650_v51  ;;  %v12655_v10 = vpop.f32.mrf.mxu1 }
 0x334   : > { %17662 = vst [vmem:[#allocation132_spill] sm:$0xff] %v12655_v10  ;;  %v12661_v0 = vadd.f32 %v2581_v46, %v17663_v27  ;;  %v8709_v27 = vld [vmem:[%s17230_s1 + $0xe70] sm:$0xff]  ;;  %v12689_v10 = vsel %vm495_vm0, %v3327_v23, %v3331_v2  ;;  %v3333_v23 = vrot.slane %v12198_v59, 7 }
 0x335   : > { %3040 = vmatmul.f32.gmra.mxu2 %v17664_v12  ;;  %3433 = vmatmul.f32.gmra.mxu0 %v12653_v34 }
 0x336   : > { %3105 = vmatmul.f32.gmra.mxu3 %v17665_v16  ;;  %3498 = vmatmul.f32.gmra.mxu1 %v12658_v15  ;;  %v12715_v59 = vsel %vm495_vm0, %v3329_v26, %v3333_v23  ;;  %v17673_v26 = vld [vmem:[#allocation150_spill] sm:$0xff] }
 0x337   : > { %3772 = vmatpush.msrb.mxu0 %v8709_v27  ;;  %v8739_v27 = vld [vmem:[%s17230_s1 + $0xf60] sm:$0xff] }
 0x338   : > { %v2518_v18 = vpop.f32.mrf.mxu2  ;;  %3838 = vmatpush.msrb.mxu1 %v8739_v27  ;;  %v3339_v27 = vrot.slane %v12238_v3, 7  ;;  %v8646_v3 = vld [vmem:[%s17230_s1 + $0xc78] sm:$0xff] }
 0x339   : > { %v2583_v13 = vpop.f32.mrf.mxu3  ;;  %3543 = vmatpush.msrb.mxu2 %v8646_v3  ;;  %v8676_v3 = vld [vmem:[%s17230_s1 + $0xd68] sm:$0xff] }
 0x33a   : > { %v2584_v46 = vadd.f32 %v2583_v13, %v2518_v18  ;;  %v12681_v12 = vpop.f32.mrf.mxu0  ;;  %3609 = vmatpush.msrb.mxu3 %v8676_v3  ;;  %v17684_v3 = vld [vmem:[#allocation160_spill] sm:$0xff] }
 0x33b   : > { %17666 = vst [vmem:[#allocation134_spill] sm:$0xff] %v12681_v12  ;;  %v12686_v16 = vpop.f32.mrf.mxu1 }
 0x33c   : > { %17667 = vst [vmem:[#allocation141_spill] sm:$0xff] %v12686_v16  ;;  %v12692_v51 = vadd.f32 %v2584_v46, %v12166_v8  ;;  %v8707_v8 = vld [vmem:[%s17230_s1 + $0xe60] sm:$0xff]  ;;  %v12720_v16 = vsel %vm495_vm0, %v3331_v2, %v3335_v31  ;;  %v3337_v2 = vrot.slane %v12233_v17, 7 }
 0x33d   : > { %3043 = vmatmul.f32.gmra.mxu2 %v17668_v40  ;;  %3436 = vmatmul.f32.gmra.mxu0 %v12684_v63 }
 0x33e   : > { %3108 = vmatmul.f32.gmra.mxu3 %v17669_v42  ;;  %3501 = vmatmul.f32.gmra.mxu1 %v12689_v10  ;;  %v12746_v17 = vsel %vm495_vm0, %v3333_v23, %v3337_v2  ;;  %v17677_v23 = vld [vmem:[#allocation154_spill] sm:$0xff] }
 0x33f   : > { %3773 = vmatpush.msrb.mxu0 %v8707_v8  ;;  %v8737_v8 = vld [vmem:[%s17230_s1 + $0xf50] sm:$0xff] }
 0x340   : > { %v2521_v18 = vpop.f32.mrf.mxu2  ;;  %3839 = vmatpush.msrb.mxu1 %v8737_v8  ;;  %v3343_v8 = vrot.slane %v12273_v37, 7  ;;  %v8644_v37 = vld [vmem:[%s17230_s1 + $0xc68] sm:$0xff] }
 0x341   : > { %v2586_v13 = vpop.f32.mrf.mxu3  ;;  %3544 = vmatpush.msrb.mxu2 %v8644_v37  ;;  %v8674_v37 = vld [vmem:[%s17230_s1 + $0xd58] sm:$0xff] }
 0x342   : > { %v2587_v46 = vadd.f32 %v2586_v13, %v2521_v18  ;;  %v12712_v40 = vpop.f32.mrf.mxu0  ;;  %3610 = vmatpush.msrb.mxu3 %v8674_v37  ;;  %v17688_v37 = vld [vmem:[#allocation164_spill] sm:$0xff] }
 0x343   : > { %17670 = vst [vmem:[#allocation142_spill] sm:$0xff] %v12712_v40  ;;  %v12717_v42 = vpop.f32.mrf.mxu1 }
 0x344   : > { %17671 = vst [vmem:[#allocation138_spill] sm:$0xff] %v12717_v42  ;;  %v12723_v12 = vadd.f32 %v2587_v46, %v12201_v43  ;;  %v8705_v43 = vld [vmem:[%s17230_s1 + $0xe50] sm:$0xff]  ;;  %v12751_v42 = vsel %vm495_vm0, %v3335_v31, %v3339_v27  ;;  %v3341_v31 = vrot.slane %v12268_v41, 7 }
 0x345   : > { %3046 = vmatmul.f32.gmra.mxu2 %v17672_v50  ;;  %3439 = vmatmul.f32.gmra.mxu0 %v12715_v59 }
 0x346   : > { %3111 = vmatmul.f32.gmra.mxu3 %v17673_v26  ;;  %3504 = vmatmul.f32.gmra.mxu1 %v12720_v16  ;;  %v12777_v41 = vsel %vm495_vm0, %v3337_v2, %v3341_v31  ;;  %v17681_v2 = vld [vmem:[#allocation158_spill] sm:$0xff] }
 0x347   : > { %3774 = vmatpush.msrb.mxu0 %v8705_v43  ;;  %v8735_v43 = vld [vmem:[%s17230_s1 + $0xf40] sm:$0xff] }
 0x348   : > { %v2524_v18 = vpop.f32.mrf.mxu2  ;;  %3840 = vmatpush.msrb.mxu1 %v8735_v43  ;;  %v3347_v43 = vrot.slane %v12308_v30, 7  ;;  %v8642_v30 = vld [vmem:[%s17230_s1 + $0xc58] sm:$0xff] }
 0x349   : > { %v2589_v13 = vpop.f32.mrf.mxu3  ;;  %3545 = vmatpush.msrb.mxu2 %v8642_v30  ;;  %v8672_v30 = vld [vmem:[%s17230_s1 + $0xd48] sm:$0xff] }
 0x34a   : > { %v2590_v46 = vadd.f32 %v2589_v13, %v2524_v18  ;;  %v12743_v50 = vpop.f32.mrf.mxu0  ;;  %3611 = vmatpush.msrb.mxu3 %v8672_v30  ;;  %v8727_v30 = vld [vmem:[%s17230_s1 + $0xf00] sm:$0xff] }
 0x34b   : > { %17674 = vst [vmem:[#allocation140_spill] sm:$0xff] %v12743_v50  ;;  %v12748_v26 = vpop.f32.mrf.mxu1 }
 0x34c   : > { %17675 = vst [vmem:[#allocation144_spill] sm:$0xff] %v12748_v26  ;;  %v12754_v40 = vadd.f32 %v2590_v46, %v12236_v4  ;;  %v8703_v4 = vld [vmem:[%s17230_s1 + $0xe40] sm:$0xff]  ;;  %v12782_v26 = vsel %vm495_vm0, %v3339_v27, %v3343_v8  ;;  %v3345_v27 = vrot.slane %v12303_v1, 7 }
 0x34d   : > { %3049 = vmatmul.f32.gmra.mxu2 %v17676_v48  ;;  %3442 = vmatmul.f32.gmra.mxu0 %v12746_v17 }
 0x34e   : > { %3114 = vmatmul.f32.gmra.mxu3 %v17677_v23  ;;  %3507 = vmatmul.f32.gmra.mxu1 %v12751_v42  ;;  %v12808_v1 = vsel %vm495_vm0, %v3341_v31, %v3345_v27  ;;  %v17685_v31 = vld [vmem:[#allocation162_spill] sm:$0xff] }
 0x34f   : > { %3775 = vmatpush.msrb.mxu0 %v8703_v4  ;;  %v8733_v4 = vld [vmem:[%s17230_s1 + $0xf30] sm:$0xff] }
 0x350   : > { %v2527_v18 = vpop.f32.mrf.mxu2  ;;  %3841 = vmatpush.msrb.mxu1 %v8733_v4  ;;  %v3351_v4 = vrot.slane %v12343_v62, 7  ;;  %v8640_v62 = vld [vmem:[%s17230_s1 + $0xc48] sm:$0xff] }
 0x351   : > { %v2592_v13 = vpop.f32.mrf.mxu3  ;;  %3546 = vmatpush.msrb.mxu2 %v8640_v62  ;;  %v8670_v62 = vld [vmem:[%s17230_s1 + $0xd38] sm:$0xff] }
 0x352   : > { %v2593_v46 = vadd.f32 %v2592_v13, %v2527_v18  ;;  %v12774_v48 = vpop.f32.mrf.mxu0  ;;  %3612 = vmatpush.msrb.mxu3 %v8670_v62  ;;  %v8666_v62 = vld [vmem:[%s17230_s1 + $0xd18] sm:$0xff] }
 0x353   : > { %17678 = vst [vmem:[#allocation146_spill] sm:$0xff] %v12774_v48  ;;  %v12779_v23 = vpop.f32.mrf.mxu1 }
 0x354   : > { %17679 = vst [vmem:[#allocation148_spill] sm:$0xff] %v12779_v23  ;;  %v12785_v50 = vadd.f32 %v2593_v46, %v12271_v11  ;;  %v8701_v11 = vld [vmem:[%s17230_s1 + $0xe30] sm:$0xff]  ;;  %v12813_v23 = vsel %vm495_vm0, %v3343_v8, %v3347_v43  ;;  %v3349_v8 = vrot.slane %v12338_v61, 7 }
 0x355   : > { %3052 = vmatmul.f32.gmra.mxu2 %v17680_v56  ;;  %3445 = vmatmul.f32.gmra.mxu0 %v12777_v41 }
 0x356   : > { %3117 = vmatmul.f32.gmra.mxu3 %v17681_v2  ;;  %3510 = vmatmul.f32.gmra.mxu1 %v12782_v26  ;;  %v12839_v61 = vsel %vm495_vm0, %v3345_v27, %v3349_v8  ;;  %v17689_v27 = vld [vmem:[#allocation166_spill] sm:$0xff] }
 0x357   : > { %3776 = vmatpush.msrb.mxu0 %v8701_v11  ;;  %v8731_v11 = vld [vmem:[%s17230_s1 + $0xf20] sm:$0xff] }
 0x358   : > { %v2530_v18 = vpop.f32.mrf.mxu2  ;;  %3842 = vmatpush.msrb.mxu1 %v8731_v11  ;;  %v3355_v11 = vrot.slane %v12378_v20, 7  ;;  %v8638_v20 = vld [vmem:[%s17230_s1 + $0xc38] sm:$0xff] }
 0x359   : > { %v2595_v13 = vpop.f32.mrf.mxu3  ;;  %3547 = vmatpush.msrb.mxu2 %v8638_v20  ;;  %v8634_v20 = vld [vmem:[%s17230_s1 + $0xc18] sm:$0xff] }
 0x35a   : > { %v2596_v46 = vadd.f32 %v2595_v13, %v2530_v18  ;;  %v12805_v56 = vpop.f32.mrf.mxu0 }
 0x35b   : > { %17682 = vst [vmem:[#allocation150_spill] sm:$0xff] %v12805_v56  ;;  %v12810_v2 = vpop.f32.mrf.mxu1 }
 0x35c   : > { %17683 = vst [vmem:[#allocation152_spill] sm:$0xff] %v12810_v2  ;;  %v12816_v48 = vadd.f32 %v2596_v46, %v12306_v35  ;;  %v8699_v35 = vld [vmem:[%s17230_s1 + $0xe20] sm:$0xff]  ;;  %v12844_v2 = vsel %vm495_vm0, %v3347_v43, %v3351_v4  ;;  %v3353_v43 = vrot.slane %v12373_v45, 7 }
 0x35d   : > { %3055 = vmatmul.f32.gmra.mxu2 %v17684_v3  ;;  %3448 = vmatmul.f32.gmra.mxu0 %v12808_v1 }
 0x35e   : > { %3120 = vmatmul.f32.gmra.mxu3 %v17685_v31  ;;  %3513 = vmatmul.f32.gmra.mxu1 %v12813_v23  ;;  %v12870_v45 = vsel %vm495_vm0, %v3349_v8, %v3353_v43  ;;  %v17692_v8 = vld [vmem:[#allocation169_spill] sm:$0xff] }
 0x35f   : > { %3777 = vmatpush.msrb.mxu0 %v8699_v35  ;;  %v8729_v35 = vld [vmem:[%s17230_s1 + $0xf10] sm:$0xff] }
 0x360   : > { %v2533_v18 = vpop.f32.mrf.mxu2  ;;  %3843 = vmatpush.msrb.mxu1 %v8729_v35  ;;  %v8636_v35 = vld [vmem:[%s17230_s1 + $0xc28] sm:$0xff] }
 0x361   : > { %v2598_v13 = vpop.f32.mrf.mxu3  ;;  %3548 = vmatpush.msrb.mxu2 %v8636_v35  ;;  %v8664_v35 = vld [vmem:[%s17230_s1 + $0xd08] sm:$0xff] }
 0x362   : > { %v2599_v46 = vadd.f32 %v2598_v13, %v2533_v18  ;;  %v12836_v3 = vpop.f32.mrf.mxu0  ;;  %3844 = vmatpush.msrb.mxu1 %v8727_v30  ;;  %v17695_v30 = vld [vmem:[#allocation174_spill] sm:$0xff] }
 0x363   : > { %17686 = vst [vmem:[#allocation154_spill] sm:$0xff] %v12836_v3  ;;  %v12841_v31 = vpop.f32.mrf.mxu1  ;;  %3549 = vmatpush.msrb.mxu2 %v8634_v20  ;;  %v8821_v20 = vld [vmem:[%s17230_s1 + $0x11f0] sm:$0xff] }
 0x364   : > { %17687 = vst [vmem:[#allocation156_spill] sm:$0xff] %v12841_v31  ;;  %v12847_v56 = vadd.f32 %v2599_v46, %v12341_v22  ;;  %v8697_v22 = vld [vmem:[%s17230_s1 + $0xe10] sm:$0xff]  ;;  %v12875_v31 = vsel %vm495_vm0, %v3351_v4, %v3355_v11  ;;  %v3357_v4 = vrot.slane %v12420_v60, 7  ;;  %v8668_v60 = vld [vmem:[%s17230_s1 + $0xd28] sm:$0xff]  ;;  %4352 = vmatpush.msra.mxu1 %v8821_v20 }
 0x365   : > { %3058 = vmatmul.f32.gmra.mxu2 %v17688_v37  ;;  %3451 = vmatmul.f32.gmra.mxu0 %v12839_v61 }
 0x366   : > { %3123 = vmatmul.f32.gmra.mxu3 %v17689_v27  ;;  %3516 = vmatmul.f32.gmra.mxu1 %v12844_v2 }
 0x367   : > { %3778 = vmatpush.msrb.mxu0 %v8697_v22  ;;  %v3359_v22 = vrot.slane %v12425_v28, 7  ;;  %3613 = vmatpush.msrb.mxu3 %v8668_v60  ;;  %v12907_v28 = vsel %vm495_vm0, %v3353_v43, %v3357_v4  ;;  %v8632_v43 = vld [vmem:[%s17230_s1 + $0xc08] sm:$0xff]  ;;  %v17696_v60 = vld [vmem:[#allocation171_spill] sm:$0xff] }
 0x368   : > { %v2536_v18 = vpop.f32.mrf.mxu2  ;;  %3550 = vmatpush.msrb.mxu2 %v8632_v43  ;;  %v12956_v43 = vld [vmem:[#allocation3 + $0xf8] sm:$0xff] }
 0x369   : > { %v2601_v13 = vpop.f32.mrf.mxu3  ;;  %3614 = vmatpush.msrb.mxu3 %v8666_v62  ;;  %v3363_v62 = vrot.slane %v12460_v14, 7  ;;  %17700 = vst [vmem:[#allocation174_spill] sm:$0xff] %v12956_v43  ;;  %v3367_v20 = vrot.slane %v12956_v43, 7  ;;  %v3207_v43 = vld [vmem:[#allocation3 + $0x60] sm:$0x7f] }
 0x36a   : > { %v2602_v46 = vadd.f32 %v2601_v13, %v2536_v18  ;;  %v12867_v37 = vpop.f32.mrf.mxu0 }
 0x36b   : > { %17690 = vst [vmem:[#allocation158_spill] sm:$0xff] %v12867_v37  ;;  %v12872_v27 = vpop.f32.mrf.mxu1  ;;  %3615 = vmatpush.msrb.mxu3 %v8664_v35  ;;  %v12951_v37 = vld [vmem:[#allocation3 + $0xd8] sm:$0xff]  ;;  %v17701_v35 = vld [vmem:[#allocation176_spill] sm:$0xff] }
 0x36c   : > { %17691 = vst [vmem:[#allocation160_spill] sm:$0xff] %v12872_v27  ;;  %v12878_v3 = vadd.f32 %v2602_v46, %v12376_v57  ;;  %v8695_v57 = vld [vmem:[%s17230_s1 + $0xe00] sm:$0xff]  ;;  %v12949_v27 = vsel %vm495_vm0, %v3359_v22, %v3363_v62 }
 0x36d   : > { %3061 = vmatmul.f32.gmra.mxu2 %v12366_v52  ;;  %3454 = vmatmul.f32.gmra.mxu0 %v12870_v45 }
 0x36e   : > { %3126 = vmatmul.f32.gmra.mxu3 %v17692_v8  ;;  %3519 = vmatmul.f32.gmra.mxu1 %v12875_v31 }
 0x36f   : > { %3779 = vmatpush.msrb.mxu0 %v8695_v57  ;;  %v12918_v57 = vsel %vm495_vm0, %v3355_v11, %v3359_v22  ;;  %v3361_v11 = vrot.slane %v12455_v54, 7  ;;  %v8787_v22 = vld [vmem:[%s17230_s1 + $0x10e0] sm:$0xff] }
 0x370   : > { %v2539_v52 = vpop.f32.mrf.mxu2 }
 0x371   : > { %v2604_v18 = vpop.f32.mrf.mxu3  ;;  %v12944_v54 = vsel %vm495_vm0, %v3357_v4, %v3361_v11  ;;  %v3365_v4 = vrot.slane %v12951_v37, 7 }
 0x372   : > { %v2605_v13 = vadd.f32 %v2604_v18, %v2539_v52  ;;  %v12904_v46 = vpop.f32.mrf.mxu0  ;;  %v17697_v18 = vld [vmem:[#allocation173_spill] sm:$0xff] }
 0x373   : > { %17693 = vst [vmem:[#allocation162_spill] sm:$0xff] %v12904_v46  ;;  %v12915_v8 = vpop.f32.mrf.mxu1 }
 0x374   : > { %17694 = vst [vmem:[#allocation164_spill] sm:$0xff] %v12915_v8  ;;  %v12921_v52 = vadd.f32 %v2605_v13, %v17695_v30  ;;  %v8789_v13 = vld [vmem:[%s17230_s1 + $0x10f0] sm:$0xff] }
 0x375   : > { %3064 = vmatmul.f32.gmra.mxu2 %v17696_v60  ;;  %3457 = vmatmul.f32.gmra.mxu0 %v12907_v28 }
 0x376   : > { %3129 = vmatmul.f32.gmra.mxu3 %v17697_v18  ;;  %3522 = vmatmul.f32.gmra.mxu1 %v12918_v57 }
 0x377   : > { %4287 = vmatpush.msra.mxu0 %v8789_v13  ;;  %v17702_v13 = vld [vmem:[#allocation178_spill] sm:$0xff] }
 0x378   : > { %v2542_v30 = vpop.f32.mrf.mxu2 }
 0x379   : > { %v2607_v60 = vpop.f32.mrf.mxu3  ;;  %4288 = vmatpush.msra.mxu0 %v8787_v22  ;;  %v8785_v22 = vld [vmem:[%s17230_s1 + $0x10d0] sm:$0xff] }
 0x37a   : > { %v2608_v18 = vadd.f32 %v2607_v60, %v2542_v30  ;;  %v12941_v8 = vpop.f32.mrf.mxu0 }
 0x37b   : > { %17698 = vst [vmem:[#allocation166_spill] sm:$0xff] %v12941_v8  ;;  %v12946_v46 = vpop.f32.mrf.mxu1  ;;  %v12978_v8 = vsel %vm495_vm0, %v3363_v62, %v3367_v20  ;;  %v8817_v62 = vld [vmem:[%s17230_s1 + $0x11d0] sm:$0xff]  ;;  %4289 = vmatpush.msra.mxu0 %v8785_v22  ;;  %v8758_v22 = vld [vmem:[%s17230_s1 + $0xff8] sm:$0xff] }
 0x37c   : > { %17699 = vst [vmem:[#allocation169_spill] sm:$0xff] %v12946_v46  ;;  %v12954_v14 = vadd.f32 %v2608_v18, %v12458_v5  ;;  %v8819_v5 = vld [vmem:[%s17230_s1 + $0x11e0] sm:$0xff]  ;;  %3959 = vmatpush.msra.mxu3 %v8758_v22  ;;  %v13036_v22 = vld [vmem:[#allocation3 + $0x68] sm:$0xff] }
 0x37d   : > { %3067 = vmatmul.f32.gmra.mxu2 %v17701_v35  ;;  %3460 = vmatmul.f32.gmra.mxu0 %v12944_v54 }
 0x37e   : > { %3132 = vmatmul.f32.gmra.mxu3 %v17702_v13  ;;  %3525 = vmatmul.f32.gmra.mxu1 %v12949_v27  ;;  %v12973_v13 = vsel %vm495_vm0, %v3361_v11, %v3365_v4  ;;  %v3369_v11 = vrot.slane %v3206_v44, 7 }
 0x37f   : > { %4353 = vmatpush.msra.mxu1 %v8819_v5 }
 0x380   : > { %v2545_v30 = vpop.f32.mrf.mxu2 }
 0x381   : > { %v2610_v60 = vpop.f32.mrf.mxu3  ;;  %4354 = vmatpush.msra.mxu1 %v8817_v62 }
 0x382   : > { %v2611_v18 = vadd.f32 %v2610_v60, %v2545_v30  ;;  %v12970_v35 = vpop.f32.mrf.mxu0 }
 0x383   : > { %17703 = vst [vmem:[#allocation171_spill] sm:$0xff] %v12970_v35  ;;  %v12975_v46 = vpop.f32.mrf.mxu1  ;;  %v8720_v35 = vld [vmem:[%s17230_s1 + $0xec8] sm:$0xff] }
 0x384   : > { %17704 = vst [vmem:[#allocation173_spill] sm:$0xff] %v12975_v46  ;;  %v12981_v33 = vadd.f32 %v2611_v18, %v12485_v47  ;;  %v3371_v47 = vrot.slane %v3207_v43, 7  ;;  %v8726_v43 = vld [vmem:[%s17230_s1 + $0xef8] sm:$0xff] }
 0x385   : > { %3070 = vmatmul.f32.gmra.mxu2 %v12477_v58  ;;  %3463 = vmatmul.f32.gmra.mxu0 %v12973_v13 }
 0x386   : > { %3135 = vmatmul.f32.gmra.mxu3 %v12482_v19  ;;  %3528 = vmatmul.f32.gmra.mxu1 %v12978_v8  ;;  %v12996_v19 = vsel %vm495_vm0, %v3365_v4, %v3369_v11  ;;  %v13001_v18 = vsel %vm495_vm0, %v3367_v20, %v3371_v47  ;;  %v17707_v4 = vld [vmem:[#allocation183_spill] sm:$0xff]  ;;  %v8815_v20 = vld [vmem:[%s17230_s1 + $0x11c0] sm:$0xff] }
 0x387   : > { %3894 = vmatpush.msra.mxu2 %v8726_v43  ;;  %4355 = vmatpush.msra.mxu1 %v8815_v20  ;;  %v8756_v43 = vld [vmem:[%s17230_s1 + $0xfe8] sm:$0xff] }
 0x388   : > { %v2548_v5 = vpop.f32.mrf.mxu2  ;;  %3960 = vmatpush.msra.mxu3 %v8756_v43  ;;  %v13063_v43 = vld [vmem:[#allocation3 + $0x148] sm:$0xff] }
 0x389   : > { %v2613_v58 = vpop.f32.mrf.mxu3 }
 0x38a   : > { %v2614_v30 = vadd.f32 %v2613_v58, %v2548_v5  ;;  %v12993_v60 = vpop.f32.mrf.mxu0 }
 0x38b   : > { %17705 = vst [vmem:[#allocation176_spill] sm:$0xff] %v12993_v60  ;;  %v12998_v44 = vpop.f32.mrf.mxu1 }
 0x38c   : > { %17706 = vst [vmem:[#allocation178_spill] sm:$0xff] %v12998_v44  ;;  %v13004_v46 = vadd.f32 %v2614_v30, %v12508_v25  ;;  %v8783_v25 = vld [vmem:[%s17230_s1 + $0x10c0] sm:$0xff]  ;;  %v8724_v30 = vld [vmem:[%s17230_s1 + $0xee8] sm:$0xff]  ;;  %v8722_v44 = vld [vmem:[%s17230_s1 + $0xed8] sm:$0xff] }
 0x38d   : > { %3073 = vmatmul.f32.gmra.mxu2 %v12500_v6  ;;  %3466 = vmatmul.f32.gmra.mxu0 %v12996_v19 }
 0x38e   : > { %3138 = vmatmul.f32.gmra.mxu3 %v17707_v4  ;;  %3531 = vmatmul.f32.gmra.mxu1 %v13001_v18  ;;  %v13040_v4 = vld [vmem:[#allocation3] sm:$0xff] }
 0x38f   : > { %4290 = vmatpush.msra.mxu0 %v8783_v25  ;;  %v8813_v25 = vld [vmem:[%s17230_s1 + $0x11b0] sm:$0xff]  ;;  %3895 = vmatpush.msra.mxu2 %v8724_v30  ;;  %v8754_v30 = vld [vmem:[%s17230_s1 + $0xfd8] sm:$0xff] }
 0x390   : > { %v2551_v11 = vpop.f32.mrf.mxu2  ;;  %4356 = vmatpush.msra.mxu1 %v8813_v25  ;;  %v8811_v25 = vld [vmem:[%s17230_s1 + $0x11a0] sm:$0xff]  ;;  %3961 = vmatpush.msra.mxu3 %v8754_v30  ;;  %v13090_v30 = vld [vmem:[#allocation3 + $0x28] sm:$0xff] }
 0x391   : > { %v2616_v6 = vpop.f32.mrf.mxu3  ;;  %3896 = vmatpush.msra.mxu2 %v8722_v44  ;;  %v8752_v44 = vld [vmem:[%s17230_s1 + $0xfc8] sm:$0xff] }
 0x392   : > { %v2617_v62 = vadd.f32 %v2616_v6, %v2551_v11  ;;  %v13022_v47 = vpop.f32.mrf.mxu0  ;;  %4357 = vmatpush.msra.mxu1 %v8811_v25  ;;  %v8809_v25 = vld [vmem:[%s17230_s1 + $0x1190] sm:$0xff]  ;;  %3962 = vmatpush.msra.mxu3 %v8752_v44 }
 0x393   : > { %17708 = vst [vmem:[#allocation183_spill] sm:$0xff] %v13022_v47  ;;  %v13024_v5 = vpop.f32.mrf.mxu1  ;;  %3897 = vmatpush.msra.mxu2 %v8720_v35  ;;  %v8750_v35 = vld [vmem:[%s17230_s1 + $0xfb8] sm:$0xff]  ;;  %v13117_v44 = vld [vmem:[#allocation3 + $0x110] sm:$0xff]  ;;  %v4060_v47 = vld [vmem:[#allocation3 + $0x28] sm:$0xff] }
 0x394   : > { %17709 = vst [vmem:[#allocation191_spill] sm:$0xff] %v13024_v5  ;;  %v13027_v58 = vadd.f32 %v2617_v62, %v12537_v49  ;;  %v8781_v49 = vld [vmem:[%s17230_s1 + $0x10b0] sm:$0xff]  ;;  %4358 = vmatpush.msra.mxu1 %v8809_v25  ;;  %v8807_v25 = vld [vmem:[%s17230_s1 + $0x1180] sm:$0xff]  ;;  %3963 = vmatpush.msra.mxu3 %v8750_v35  ;;  %v13144_v35 = vld [vmem:[#allocation3 + $0x128] sm:$0xff] }
 0x395   : > { %3551 = vmatmul.f32.vlgmr.msrb.gmra.mxu2 %v12529_v38  ;;  %3780 = vmatmul.f32.vlgmr.msrb.gmra.mxu0 %v13036_v22 }
 0x396   : > { %3616 = vmatmul.f32.vlgmr.msrb.gmra.mxu3 %v12534_v24  ;;  %3845 = vmatmul.f32.vlgmr.msrb.gmra.mxu1 %v13040_v4 }
 0x397   : > { %4291 = vmatpush.msra.mxu0 %v8781_v49  ;;  %v13067_v49 = vld [vmem:[#allocation3 + $0x18] sm:$0xff]  ;;  %4359 = vmatpush.msra.mxu1 %v8807_v25  ;;  %v8805_v25 = vld [vmem:[%s17230_s1 + $0x1170] sm:$0xff] }
 0x398   : > { %v3029_v38 = vpop.f32.mrf.mxu2 }
 0x399   : > { %v3094_v20 = vpop.f32.mrf.mxu3  ;;  %4360 = vmatpush.msra.mxu1 %v8805_v25  ;;  %v8803_v25 = vld [vmem:[%s17230_s1 + $0x1160] sm:$0xff] }
 0x39a   : > { %v3095_v11 = vadd.f32 %v3094_v20, %v3029_v38  ;;  %v13049_v24 = vpop.f32.mrf.mxu0 }
 0x39b   : > { %17710 = vst [vmem:[#allocation192_spill] sm:$0xff] %v13049_v24  ;;  %v13051_v6 = vpop.f32.mrf.mxu1  ;;  %4361 = vmatpush.msra.mxu1 %v8803_v25  ;;  %v8801_v25 = vld [vmem:[%s17230_s1 + $0x1150] sm:$0xff] }
 0x39c   : > { %17711 = vst [vmem:[#allocation193_spill] sm:$0xff] %v13051_v6  ;;  %v13054_v62 = vadd.f32 %v3095_v11, %v12568_v32  ;;  %v8779_v32 = vld [vmem:[%s17230_s1 + $0x10a0] sm:$0xff] }
 0x39d   : > { %3554 = vmatmul.f32.gmra.mxu2 %v12560_v7  ;;  %3783 = vmatmul.f32.gmra.mxu0 %v13063_v43 }
 0x39e   : > { %3619 = vmatmul.f32.gmra.mxu3 %v12565_v29  ;;  %3848 = vmatmul.f32.gmra.mxu1 %v13067_v49 }
 0x39f   : > { %4292 = vmatpush.msra.mxu0 %v8779_v32  ;;  %v13094_v32 = vld [vmem:[#allocation3 + $0x150] sm:$0xff]  ;;  %4362 = vmatpush.msra.mxu1 %v8801_v25  ;;  %v8799_v25 = vld [vmem:[%s17230_s1 + $0x1140] sm:$0xff] }
 0x3a0   : > { %v3032_v7 = vpop.f32.mrf.mxu2 }
 0x3a1   : > { %v3097_v38 = vpop.f32.mrf.mxu3  ;;  %4363 = vmatpush.msra.mxu1 %v8799_v25  ;;  %v8797_v25 = vld [vmem:[%s17230_s1 + $0x1130] sm:$0xff] }
 0x3a2   : > { %v3098_v20 = vadd.f32 %v3097_v38, %v3032_v7  ;;  %v13076_v29 = vpop.f32.mrf.mxu0 }
 0x3a3   : > { %17712 = vst [vmem:[#allocation194_spill] sm:$0xff] %v13076_v29  ;;  %v13078_v11 = vpop.f32.mrf.mxu1  ;;  %v8718_v29 = vld [vmem:[%s17230_s1 + $0xeb8] sm:$0xff]  ;;  %4364 = vmatpush.msra.mxu1 %v8797_v25  ;;  %v8795_v25 = vld [vmem:[%s17230_s1 + $0x1120] sm:$0xff] }
 0x3a4   : > { %17713 = vst [vmem:[#allocation195_spill] sm:$0xff] %v13078_v11  ;;  %v13081_v60 = vadd.f32 %v3098_v20, %v12599_v9  ;;  %v8777_v9 = vld [vmem:[%s17230_s1 + $0x1090] sm:$0xff]  ;;  %3898 = vmatpush.msra.mxu2 %v8718_v29  ;;  %v8748_v29 = vld [vmem:[%s17230_s1 + $0xfa8] sm:$0xff] }
 0x3a5   : > { %3557 = vmatmul.f32.gmra.mxu2 %v12591_v36  ;;  %3786 = vmatmul.f32.gmra.mxu0 %v13090_v30 }
 0x3a6   : > { %3622 = vmatmul.f32.gmra.mxu3 %v12596_v53  ;;  %3851 = vmatmul.f32.gmra.mxu1 %v13094_v32 }
 0x3a7   : > { %4293 = vmatpush.msra.mxu0 %v8777_v9  ;;  %v13121_v9 = vld [vmem:[#allocation3 + $0x158] sm:$0xff]  ;;  %3964 = vmatpush.msra.mxu3 %v8748_v29  ;;  %v13171_v29 = vld [vmem:[#allocation3 + $0x80] sm:$0xff] }
 0x3a8   : > { %v3035_v36 = vpop.f32.mrf.mxu2  ;;  %4365 = vmatpush.msra.mxu1 %v8795_v25  ;;  %v8793_v25 = vld [vmem:[%s17230_s1 + $0x1110] sm:$0xff] }
 0x3a9   : > { %v3100_v7 = vpop.f32.mrf.mxu3 }
 0x3aa   : > { %v3101_v38 = vadd.f32 %v3100_v7, %v3035_v36  ;;  %v13103_v53 = vpop.f32.mrf.mxu0  ;;  %4366 = vmatpush.msra.mxu1 %v8793_v25  ;;  %v8791_v25 = vld [vmem:[%s17230_s1 + $0x1100] sm:$0xff] }
 0x3ab   : > { %17714 = vst [vmem:[#allocation196_spill] sm:$0xff] %v13103_v53  ;;  %v13105_v20 = vpop.f32.mrf.mxu1  ;;  %v8716_v53 = vld [vmem:[%s17230_s1 + $0xea8] sm:$0xff] }
 0x3ac   : > { %17715 = vst [vmem:[#allocation197_spill] sm:$0xff] %v13105_v20  ;;  %v13108_v11 = vadd.f32 %v3101_v38, %v12630_v39  ;;  %v8775_v39 = vld [vmem:[%s17230_s1 + $0x1080] sm:$0xff]  ;;  %3899 = vmatpush.msra.mxu2 %v8716_v53  ;;  %v8746_v53 = vld [vmem:[%s17230_s1 + $0xf98] sm:$0xff]  ;;  %4367 = vmatpush.msra.mxu1 %v8791_v25 }
 0x3ad   : > { %3560 = vmatmul.f32.gmra.mxu2 %v12622_v21  ;;  %3789 = vmatmul.f32.gmra.mxu0 %v13117_v44 }
 0x3ae   : > { %3625 = vmatmul.f32.gmra.mxu3 %v12627_v55  ;;  %3854 = vmatmul.f32.gmra.mxu1 %v13121_v9 }
 0x3af   : > { %4294 = vmatpush.msra.mxu0 %v8775_v39  ;;  %v13148_v39 = vld [vmem:[#allocation3 + $0xe0] sm:$0xff]  ;;  %3965 = vmatpush.msra.mxu3 %v8746_v53  ;;  %v13198_v53 = vld [vmem:[#allocation3 + $0x70] sm:$0xff] }
 0x3b0   : > { %v3038_v21 = vpop.f32.mrf.mxu2 }
 0x3b1   : > { %v3103_v36 = vpop.f32.mrf.mxu3 }
 0x3b2   : > { %v3104_v7 = vadd.f32 %v3103_v36, %v3038_v21  ;;  %v13130_v55 = vpop.f32.mrf.mxu0 }
 0x3b3   : > { %17716 = vst [vmem:[#allocation198_spill] sm:$0xff] %v13130_v55  ;;  %v13132_v38 = vpop.f32.mrf.mxu1  ;;  %v8714_v55 = vld [vmem:[%s17230_s1 + $0xe98] sm:$0xff] }
 0x3b4   : > { %17717 = vst [vmem:[#allocation199_spill] sm:$0xff] %v13132_v38  ;;  %v13135_v20 = vadd.f32 %v3104_v7, %v12661_v0  ;;  %v8773_v0 = vld [vmem:[%s17230_s1 + $0x1070] sm:$0xff]  ;;  %3900 = vmatpush.msra.mxu2 %v8714_v55  ;;  %v8744_v55 = vld [vmem:[%s17230_s1 + $0xf88] sm:$0xff] }
 0x3b5   : > { %3563 = vmatmul.f32.gmra.mxu2 %v12653_v34  ;;  %3792 = vmatmul.f32.gmra.mxu0 %v13144_v35 }
 0x3b6   : > { %3628 = vmatmul.f32.gmra.mxu3 %v12658_v15  ;;  %3857 = vmatmul.f32.gmra.mxu1 %v13148_v39 }
 0x3b7   : > { %4295 = vmatpush.msra.mxu0 %v8773_v0  ;;  %v13175_v0 = vld [vmem:[#allocation3 + $0x20] sm:$0xff]  ;;  %3966 = vmatpush.msra.mxu3 %v8744_v55  ;;  %v13225_v55 = vld [vmem:[#allocation3 + $0x88] sm:$0xff] }
 0x3b8   : > { %v3041_v34 = vpop.f32.mrf.mxu2 }
 0x3b9   : > { %v3106_v21 = vpop.f32.mrf.mxu3 }
 0x3ba   : > { %v3107_v36 = vadd.f32 %v3106_v21, %v3041_v34  ;;  %v13157_v15 = vpop.f32.mrf.mxu0 }
 0x3bb   : > { %17718 = vst [vmem:[#allocation200_spill] sm:$0xff] %v13157_v15  ;;  %v13159_v7 = vpop.f32.mrf.mxu1  ;;  %v8712_v15 = vld [vmem:[%s17230_s1 + $0xe88] sm:$0xff] }
 0x3bc   : > { %17719 = vst [vmem:[#allocation201_spill] sm:$0xff] %v13159_v7  ;;  %v13162_v38 = vadd.f32 %v3107_v36, %v12692_v51  ;;  %v8771_v51 = vld [vmem:[%s17230_s1 + $0x1060] sm:$0xff]  ;;  %3901 = vmatpush.msra.mxu2 %v8712_v15  ;;  %v8742_v15 = vld [vmem:[%s17230_s1 + $0xf78] sm:$0xff] }
 0x3bd   : > { %3566 = vmatmul.f32.gmra.mxu2 %v12684_v63  ;;  %3795 = vmatmul.f32.gmra.mxu0 %v13171_v29 }
 0x3be   : > { %3631 = vmatmul.f32.gmra.mxu3 %v12689_v10  ;;  %3860 = vmatmul.f32.gmra.mxu1 %v13175_v0 }
 0x3bf   : > { %4296 = vmatpush.msra.mxu0 %v8771_v51  ;;  %v13202_v51 = vld [vmem:[#allocation3 + $0x50] sm:$0xff]  ;;  %3967 = vmatpush.msra.mxu3 %v8742_v15 }
 0x3c0   : > { %v3044_v63 = vpop.f32.mrf.mxu2  ;;  %v13252_v15 = vld [vmem:[#allocation3 + $0x130] sm:$0xff] }
 0x3c1   : > { %v3109_v34 = vpop.f32.mrf.mxu3 }
 0x3c2   : > { %v3110_v21 = vadd.f32 %v3109_v34, %v3044_v63  ;;  %v13184_v10 = vpop.f32.mrf.mxu0 }
 0x3c3   : > { %17720 = vst [vmem:[#allocation202_spill] sm:$0xff] %v13184_v10  ;;  %v13186_v36 = vpop.f32.mrf.mxu1  ;;  %v8710_v10 = vld [vmem:[%s17230_s1 + $0xe78] sm:$0xff] }
 0x3c4   : > { %17721 = vst [vmem:[#allocation203_spill] sm:$0xff] %v13186_v36  ;;  %v13189_v7 = vadd.f32 %v3110_v21, %v12723_v12  ;;  %v8769_v12 = vld [vmem:[%s17230_s1 + $0x1050] sm:$0xff]  ;;  %3902 = vmatpush.msra.mxu2 %v8710_v10  ;;  %v8740_v10 = vld [vmem:[%s17230_s1 + $0xf68] sm:$0xff] }
 0x3c5   : > { %3569 = vmatmul.f32.gmra.mxu2 %v12715_v59  ;;  %3798 = vmatmul.f32.gmra.mxu0 %v13198_v53 }
 0x3c6   : > { %3634 = vmatmul.f32.gmra.mxu3 %v12720_v16  ;;  %3863 = vmatmul.f32.gmra.mxu1 %v13202_v51 }
 0x3c7   : > { %4297 = vmatpush.msra.mxu0 %v8769_v12  ;;  %v13229_v12 = vld [vmem:[#allocation3 + $0x118] sm:$0xff]  ;;  %3968 = vmatpush.msra.mxu3 %v8740_v10  ;;  %v13279_v10 = vld [vmem:[#allocation3 + $0xa8] sm:$0xff] }
 0x3c8   : > { %v3047_v59 = vpop.f32.mrf.mxu2 }
 0x3c9   : > { %v3112_v63 = vpop.f32.mrf.mxu3 }
 0x3ca   : > { %v3113_v34 = vadd.f32 %v3112_v63, %v3047_v59  ;;  %v13211_v16 = vpop.f32.mrf.mxu0 }
 0x3cb   : > { %17722 = vst [vmem:[#allocation204_spill] sm:$0xff] %v13211_v16  ;;  %v13213_v21 = vpop.f32.mrf.mxu1  ;;  %v8708_v16 = vld [vmem:[%s17230_s1 + $0xe68] sm:$0xff] }
 0x3cc   : > { %17723 = vst [vmem:[#allocation205_spill] sm:$0xff] %v13213_v21  ;;  %v13216_v36 = vadd.f32 %v3113_v34, %v12754_v40  ;;  %v8767_v40 = vld [vmem:[%s17230_s1 + $0x1040] sm:$0xff]  ;;  %3903 = vmatpush.msra.mxu2 %v8708_v16  ;;  %v8738_v16 = vld [vmem:[%s17230_s1 + $0xf58] sm:$0xff] }
 0x3cd   : > { %3572 = vmatmul.f32.gmra.mxu2 %v12746_v17  ;;  %3801 = vmatmul.f32.gmra.mxu0 %v13225_v55 }
 0x3ce   : > { %3637 = vmatmul.f32.gmra.mxu3 %v12751_v42  ;;  %3866 = vmatmul.f32.gmra.mxu1 %v13229_v12 }
 0x3cf   : > { %4298 = vmatpush.msra.mxu0 %v8767_v40  ;;  %v13256_v40 = vld [vmem:[#allocation3 + $0x108] sm:$0xff]  ;;  %3969 = vmatpush.msra.mxu3 %v8738_v16 }
 0x3d0   : > { %v3050_v17 = vpop.f32.mrf.mxu2  ;;  %v13306_v16 = vld [vmem:[#allocation3 + $0xc8] sm:$0xff] }
 0x3d1   : > { %v3115_v59 = vpop.f32.mrf.mxu3 }
 0x3d2   : > { %v3116_v63 = vadd.f32 %v3115_v59, %v3050_v17  ;;  %v13238_v42 = vpop.f32.mrf.mxu0 }
 0x3d3   : > { %17724 = vst [vmem:[#allocation206_spill] sm:$0xff] %v13238_v42  ;;  %v13240_v34 = vpop.f32.mrf.mxu1  ;;  %v8706_v42 = vld [vmem:[%s17230_s1 + $0xe58] sm:$0xff] }
 0x3d4   : > { %17725 = vst [vmem:[#allocation207_spill] sm:$0xff] %v13240_v34  ;;  %v13243_v21 = vadd.f32 %v3116_v63, %v12785_v50  ;;  %v8765_v50 = vld [vmem:[%s17230_s1 + $0x1030] sm:$0xff]  ;;  %3904 = vmatpush.msra.mxu2 %v8706_v42  ;;  %v8736_v42 = vld [vmem:[%s17230_s1 + $0xf48] sm:$0xff] }
 0x3d5   : > { %3575 = vmatmul.f32.gmra.mxu2 %v12777_v41  ;;  %3804 = vmatmul.f32.gmra.mxu0 %v13252_v15 }
 0x3d6   : > { %3640 = vmatmul.f32.gmra.mxu3 %v12782_v26  ;;  %3869 = vmatmul.f32.gmra.mxu1 %v13256_v40 }
 0x3d7   : > { %4299 = vmatpush.msra.mxu0 %v8765_v50  ;;  %v13283_v50 = vld [vmem:[#allocation3 + $0xb8] sm:$0xff]  ;;  %3970 = vmatpush.msra.mxu3 %v8736_v42  ;;  %v13333_v42 = vld [vmem:[#allocation3 + $0x140] sm:$0xff] }
 0x3d8   : > { %v3053_v41 = vpop.f32.mrf.mxu2 }
 0x3d9   : > { %v3118_v17 = vpop.f32.mrf.mxu3 }
 0x3da   : > { %v3119_v59 = vadd.f32 %v3118_v17, %v3053_v41  ;;  %v13265_v26 = vpop.f32.mrf.mxu0 }
 0x3db   : > { %17726 = vst [vmem:[#allocation208_spill] sm:$0xff] %v13265_v26  ;;  %v13267_v63 = vpop.f32.mrf.mxu1  ;;  %v8704_v26 = vld [vmem:[%s17230_s1 + $0xe48] sm:$0xff] }
 0x3dc   : > { %17727 = vst [vmem:[#allocation209_spill] sm:$0xff] %v13267_v63  ;;  %v13270_v34 = vadd.f32 %v3119_v59, %v12816_v48  ;;  %v8763_v48 = vld [vmem:[%s17230_s1 + $0x1020] sm:$0xff]  ;;  %3905 = vmatpush.msra.mxu2 %v8704_v26  ;;  %v8734_v26 = vld [vmem:[%s17230_s1 + $0xf38] sm:$0xff] }
 0x3dd   : > { %3578 = vmatmul.f32.gmra.mxu2 %v12808_v1  ;;  %3807 = vmatmul.f32.gmra.mxu0 %v13279_v10 }
 0x3de   : > { %3643 = vmatmul.f32.gmra.mxu3 %v12813_v23  ;;  %3872 = vmatmul.f32.gmra.mxu1 %v13283_v50 }
 0x3df   : > { %4300 = vmatpush.msra.mxu0 %v8763_v48  ;;  %v13310_v48 = vld [vmem:[#allocation3 + $0x90] sm:$0xff]  ;;  %3971 = vmatpush.msra.mxu3 %v8734_v26  ;;  %v8730_v26 = vld [vmem:[%s17230_s1 + $0xf18] sm:$0xff] }
 0x3e0   : > { %v3056_v1 = vpop.f32.mrf.mxu2 }
 0x3e1   : > { %v3121_v41 = vpop.f32.mrf.mxu3 }
 0x3e2   : > { %v3122_v17 = vadd.f32 %v3121_v41, %v3056_v1  ;;  %v13292_v23 = vpop.f32.mrf.mxu0 }
 0x3e3   : > { %17728 = vst [vmem:[#allocation210_spill] sm:$0xff] %v13292_v23  ;;  %v13294_v59 = vpop.f32.mrf.mxu1  ;;  %v8702_v23 = vld [vmem:[%s17230_s1 + $0xe38] sm:$0xff] }
 0x3e4   : > { %17729 = vst [vmem:[#allocation211_spill] sm:$0xff] %v13294_v59  ;;  %v13297_v63 = vadd.f32 %v3122_v17, %v12847_v56  ;;  %v8761_v56 = vld [vmem:[%s17230_s1 + $0x1010] sm:$0xff]  ;;  %3906 = vmatpush.msra.mxu2 %v8702_v23  ;;  %v8698_v23 = vld [vmem:[%s17230_s1 + $0xe18] sm:$0xff] }
 0x3e5   : > { %3581 = vmatmul.f32.gmra.mxu2 %v12839_v61  ;;  %3810 = vmatmul.f32.gmra.mxu0 %v13306_v16 }
 0x3e6   : > { %3646 = vmatmul.f32.gmra.mxu3 %v12844_v2  ;;  %3875 = vmatmul.f32.gmra.mxu1 %v13310_v48 }
 0x3e7   : > { %4301 = vmatpush.msra.mxu0 %v8761_v56  ;;  %v13337_v56 = vld [vmem:[#allocation3 + $0x10] sm:$0xff] }
 0x3e8   : > { %v3059_v61 = vpop.f32.mrf.mxu2 }
 0x3e9   : > { %v3124_v1 = vpop.f32.mrf.mxu3 }
 0x3ea   : > { %v3125_v41 = vadd.f32 %v3124_v1, %v3059_v61  ;;  %v13319_v2 = vpop.f32.mrf.mxu0  ;;  %v8732_v61 = vld [vmem:[%s17230_s1 + $0xf28] sm:$0xff] }
 0x3eb   : > { %17730 = vst [vmem:[#allocation212_spill] sm:$0xff] %v13319_v2  ;;  %v13321_v17 = vpop.f32.mrf.mxu1  ;;  %3972 = vmatpush.msra.mxu3 %v8732_v61  ;;  %v13372_v61 = vld [vmem:[#allocation3 + $0x138] sm:$0xff] }
 0x3ec   : > { %17731 = vst [vmem:[#allocation213_spill] sm:$0xff] %v13321_v17  ;;  %v13324_v59 = vadd.f32 %v3125_v41, %v12878_v3  ;;  %v8759_v3 = vld [vmem:[%s17230_s1 + $0x1000] sm:$0xff] }
 0x3ed   : > { %3584 = vmatmul.f32.gmra.mxu2 %v12870_v45  ;;  %3813 = vmatmul.f32.gmra.mxu0 %v13333_v42 }
 0x3ee   : > { %3649 = vmatmul.f32.gmra.mxu3 %v12875_v31  ;;  %3878 = vmatmul.f32.gmra.mxu1 %v13337_v56  ;;  %v8700_v31 = vld [vmem:[%s17230_s1 + $0xe28] sm:$0xff] }
 0x3ef   : > { %4302 = vmatpush.msra.mxu0 %v8759_v3  ;;  %3907 = vmatpush.msra.mxu2 %v8700_v31  ;;  %v8728_v31 = vld [vmem:[%s17230_s1 + $0xf08] sm:$0xff] }
 0x3f0   : > { %v3062_v45 = vpop.f32.mrf.mxu2  ;;  %3973 = vmatpush.msra.mxu3 %v8730_v26 }
 0x3f1   : > { %v3127_v1 = vpop.f32.mrf.mxu3  ;;  %3908 = vmatpush.msra.mxu2 %v8698_v23 }
 0x3f2   : > { %v3128_v41 = vadd.f32 %v3127_v1, %v3062_v45  ;;  %v13352_v17 = vpop.f32.mrf.mxu0  ;;  %v8696_v45 = vld [vmem:[%s17230_s1 + $0xe08] sm:$0xff]  ;;  %v13376_v1 = vld [vmem:[#allocation3 + $0x78] sm:$0xff]  ;;  %3974 = vmatpush.msra.mxu3 %v8728_v31 }
 0x3f3   : > { %17732 = vst [vmem:[#allocation214_spill] sm:$0xff] %v13352_v17  ;;  %v13360_v3 = vpop.f32.mrf.mxu1  ;;  %3909 = vmatpush.msra.mxu2 %v8696_v45  ;;  %v13387_v17 = vld [vmem:[#allocation3 + $0xa0] sm:$0xff] }
 0x3f4   : > { %17733 = vst [vmem:[#allocation215_spill] sm:$0xff] %v13360_v3  ;;  %v13363_v25 = vadd.f32 %v3128_v41, %v12921_v52 }
 0x3f5   : > { %3587 = vmatmul.f32.gmra.mxu2 %v12907_v28  ;;  %3816 = vmatmul.f32.gmra.mxu0 %v13372_v61 }
 0x3f6   : > { %3652 = vmatmul.f32.gmra.mxu3 %v12918_v57  ;;  %3881 = vmatmul.f32.gmra.mxu1 %v13376_v1  ;;  %v13391_v57 = vld [vmem:[#allocation3 + $0x120] sm:$0xff] }
 0x3f8   : > { %v3065_v52 = vpop.f32.mrf.mxu2 }
 0x3f9   : > { %v3130_v41 = vpop.f32.mrf.mxu3 }
 0x3fa   : > { %v3131_v23 = vadd.f32 %v3130_v41, %v3065_v52  ;;  %v13379_v26 = vpop.f32.mrf.mxu0 }
 0x3fb   : > { %17734 = vst [vmem:[#allocation216_spill] sm:$0xff] %v13379_v26  ;;  %v13381_v3 = vpop.f32.mrf.mxu1 }
 0x3fc   : > { %17735 = vst [vmem:[#allocation217_spill] sm:$0xff] %v13381_v3  ;;  %v13384_v28 = vadd.f32 %v3131_v23, %v12954_v14 }
 0x3fd   : > { %3590 = vmatmul.f32.gmra.mxu2 %v12944_v54  ;;  %3819 = vmatmul.f32.gmra.mxu0 %v13387_v17 }
 0x3fe   : > { %3655 = vmatmul.f32.gmra.mxu3 %v12949_v27  ;;  %3884 = vmatmul.f32.gmra.mxu1 %v13391_v57  ;;  %v17738_v27 = vld [vmem:[#allocation174_spill] sm:$0xff] }
 0x400   : > { %v3068_v45 = vpop.f32.mrf.mxu2 }
 0x401   : > { %v3133_v31 = vpop.f32.mrf.mxu3 }
 0x402   : > { %v3134_v52 = vadd.f32 %v3133_v31, %v3068_v45  ;;  %v13394_v41 = vpop.f32.mrf.mxu0  ;;  %v13407_v45 = vld [vmem:[#allocation3 + $0x58] sm:$0xff]  ;;  %v13409_v31 = vld [vmem:[#allocation3 + $0x60] sm:$0xff] }
 0x403   : > { %17736 = vst [vmem:[#allocation218_spill] sm:$0xff] %v13394_v41  ;;  %v13396_v3 = vpop.f32.mrf.mxu1 }
 0x404   : > { %17737 = vst [vmem:[#allocation219_spill] sm:$0xff] %v13396_v3  ;;  %v13399_v14 = vadd.f32 %v3134_v52, %v12981_v33  ;;  %v4056_v33 = vld [vmem:[#allocation3 + $0x68] sm:$0xfe] }
 0x405   : > { %3593 = vmatmul.f32.gmra.mxu2 %v12973_v13  ;;  %3822 = vmatmul.f32.gmra.mxu0 %v12951_v37  ;;  %v4058_v52 = vld [vmem:[#allocation3 + $0x148] sm:$0xff]  ;;  %v4057_v13 = vld [vmem:[#allocation3] sm:$0xfe] }
 0x406   : > { %3658 = vmatmul.f32.gmra.mxu3 %v12978_v8  ;;  %3887 = vmatmul.f32.gmra.mxu1 %v17738_v27  ;;  %v4059_v8 = vld [vmem:[#allocation3 + $0x18] sm:$0xff] }
 0x407   : > { %v8790_v27 = vld [vmem:[%s17230_s1 + $0x10f8] sm:$0xff] }
 0x408   : > { %v3071_v54 = vpop.f32.mrf.mxu2  ;;  %4417 = vmatpush.msrb.mxu2 %v8790_v27 }
 0x409   : > { %v3136_v23 = vpop.f32.mrf.mxu3 }
 0x40a   : > { %v3137_v26 = vadd.f32 %v3136_v23, %v3071_v54  ;;  %v13405_v2 = vpop.f32.mrf.mxu0  ;;  %v8822_v54 = vld [vmem:[%s17230_s1 + $0x11f8] sm:$0xff]  ;;  %v4189_v23 = vrot.slane %v4056_v33, 1 }
 0x40b   : > { %17739 = vst [vmem:[#allocation174_spill] sm:$0xff] %v13405_v2  ;;  %v13411_v3 = vpop.f32.mrf.mxu1  ;;  %4482 = vmatpush.msrb.mxu3 %v8822_v54 }
 0x40c   : > { %17740 = vst [vmem:[#allocation220_spill] sm:$0xff] %v13411_v3  ;;  %v13414_v37 = vadd.f32 %v3137_v26, %v13004_v46  ;;  %v4190_v46 = vrot.slane %v4058_v52, 1  ;;  %v4192_v26 = vrot.slane %v4057_v13, 1  ;;  %v4193_v3 = vrot.slane %v4059_v8, 1  ;;  %v4061_v52 = vld [vmem:[#allocation3 + $0x150] sm:$0xff]  ;;  %v8788_v13 = vld [vmem:[%s17230_s1 + $0x10e8] sm:$0xff] }
 0x40d   : > { %3596 = vmatmul.f32.gmra.mxu2 %v12996_v19  ;;  %3825 = vmatmul.f32.gmra.mxu0 %v13407_v45  ;;  %v4197_v8 = vrot.slane %v4061_v52, 1  ;;  %v4063_v52 = vld [vmem:[#allocation3 + $0x158] sm:$0xff] }
 0x40e   : > { %3661 = vmatmul.f32.gmra.mxu3 %v13001_v18  ;;  %3890 = vmatmul.f32.gmra.mxu1 %v13409_v31  ;;  %v13429_v5 = vsel %vm1378_vm1, %v4189_v23, %v4190_v46  ;;  %v13434_v18 = vsel %vm1378_vm1, %v4192_v26, %v4193_v3 }
 0x40f   : > { %17741 = vst [vmem:[#allocation221_spill] sm:$0xff] %v13429_v5  ;;  %4418 = vmatpush.msrb.mxu2 %v8788_v13  ;;  %v8786_v13 = vld [vmem:[%s17230_s1 + $0x10d8] sm:$0xff] }
 0x410   : > { %v3074_v2 = vpop.f32.mrf.mxu2  ;;  %17742 = vst [vmem:[#allocation222_spill] sm:$0xff] %v13434_v18 }
 0x411   : > { %v3139_v41 = vpop.f32.mrf.mxu3  ;;  %4419 = vmatpush.msrb.mxu2 %v8786_v13  ;;  %v8784_v13 = vld [vmem:[%s17230_s1 + $0x10c8] sm:$0xff] }
 0x412   : > { %v3140_v6 = vadd.f32 %v3139_v41, %v3074_v2  ;;  %v13426_v24 = vpop.f32.mrf.mxu0  ;;  %v8820_v2 = vld [vmem:[%s17230_s1 + $0x11e8] sm:$0xff]  ;;  %v5272_v41 = vld [vmem:[%s17232_s3 + $0x78] sm:$0xff] }
 0x413   : > { %v13431_v19 = vpop.f32.mrf.mxu1  ;;  %4483 = vmatpush.msrb.mxu3 %v8820_v2  ;;  %5421 = vmatpush.msrb.mxu0 %v5272_v41  ;;  %v8818_v2 = vld [vmem:[%s17230_s1 + $0x11d8] sm:$0xff]  ;;  %v4201_v41 = vrot.slane %v4063_v52, 1  ;;  %v4065_v52 = vld [vmem:[#allocation3 + $0xe0] sm:$0xff] }
 0x414   : > { %v13437_v33 = vadd.f32 %v3140_v6, %v13027_v58  ;;  %v5288_v58 = vld [vmem:[%s17232_s3 + $0xf8] sm:$0xff]  ;;  %v4195_v6 = vrot.slane %v4060_v47, 1  ;;  %4420 = vmatpush.msrb.mxu2 %v8784_v13 }
 0x415   : > { %3910 = vmatmul.f32.vlgmr.msra.gmra.mxu2 %v13036_v22  ;;  %4303 = vmatmul.f32.vlgmr.msra.gmra.mxu0 %v13429_v5  ;;  %v8782_v13 = vld [vmem:[%s17230_s1 + $0x10b8] sm:$0xff] }
 0x416   : > { %3975 = vmatmul.f32.vlgmr.msra.gmra.mxu3 %v13040_v4  ;;  %4368 = vmatmul.f32.vlgmr.msra.gmra.mxu1 %v13434_v18  ;;  %v13458_v26 = vsel %vm1378_vm1, %v4190_v46, %v4195_v6  ;;  %v13463_v4 = vsel %vm1378_vm1, %v4193_v3, %v4197_v8  ;;  %v4062_v18 = vld [vmem:[#allocation3 + $0x110] sm:$0xff] }
 0x417   : > { %5486 = vmatpush.msrb.mxu1 %v5288_v58  ;;  %17743 = vst [vmem:[#allocation223_spill] sm:$0xff] %v13458_v26  ;;  %v5271_v3 = vld [vmem:[%s17232_s3 + $0x70] sm:$0xff]  ;;  %v4199_v46 = vrot.slane %v4062_v18, 1  ;;  %4484 = vmatpush.msrb.mxu3 %v8818_v2  ;;  %v8816_v2 = vld [vmem:[%s17230_s1 + $0x11c8] sm:$0xff] }
 0x418   : > { %v3552_v27 = vpop.f32.mrf.mxu2  ;;  %17744 = vst [vmem:[#allocation224_spill] sm:$0xff] %v13463_v4  ;;  %5422 = vmatpush.msrb.mxu0 %v5271_v3  ;;  %v4205_v3 = vrot.slane %v4065_v52, 1  ;;  %v4067_v52 = vld [vmem:[#allocation3 + $0x20] sm:$0xff]  ;;  %4421 = vmatpush.msrb.mxu2 %v8782_v13  ;;  %v8780_v13 = vld [vmem:[%s17230_s1 + $0x10a8] sm:$0xff] }
 0x419   : > { %v3617_v22 = vpop.f32.mrf.mxu3  ;;  %4485 = vmatpush.msrb.mxu3 %v8816_v2  ;;  %v8814_v2 = vld [vmem:[%s17230_s1 + $0x11b8] sm:$0xff] }
 0x41a   : > { %v3618_v54 = vadd.f32 %v3617_v22, %v3552_v27  ;;  %v13455_v23 = vpop.f32.mrf.mxu0  ;;  %4422 = vmatpush.msrb.mxu2 %v8780_v13  ;;  %v8778_v13 = vld [vmem:[%s17230_s1 + $0x1098] sm:$0xff] }
 0x41b   : > { %v13460_v5 = vpop.f32.mrf.mxu1  ;;  %4486 = vmatpush.msrb.mxu3 %v8814_v2  ;;  %v8812_v2 = vld [vmem:[%s17230_s1 + $0x11a8] sm:$0xff] }
 0x41c   : > { %v13466_v47 = vadd.f32 %v3618_v54, %v13054_v62  ;;  %v5287_v62 = vld [vmem:[%s17232_s3 + $0xf0] sm:$0xff]  ;;  %v13487_v54 = vsel %vm1378_vm1, %v4195_v6, %v4199_v46  ;;  %v5270_v6 = vld [vmem:[%s17232_s3 + $0x68] sm:$0xff]  ;;  %4423 = vmatpush.msrb.mxu2 %v8778_v13 }
 0x41d   : > { %3913 = vmatmul.f32.gmra.mxu2 %v13063_v43  ;;  %4306 = vmatmul.f32.gmra.mxu0 %v13458_v26  ;;  %17745 = vst [vmem:[#allocation225_spill] sm:$0xff] %v13487_v54  ;;  %v8776_v13 = vld [vmem:[%s17230_s1 + $0x1088] sm:$0xff] }
 0x41e   : > { %3978 = vmatmul.f32.gmra.mxu3 %v13067_v49  ;;  %4371 = vmatmul.f32.gmra.mxu1 %v13463_v4  ;;  %v13492_v49 = vsel %vm1378_vm1, %v4197_v8, %v4201_v41  ;;  %v4064_v4 = vld [vmem:[#allocation3 + $0x128] sm:$0xff] }
 0x41f   : > { %5487 = vmatpush.msrb.mxu1 %v5287_v62  ;;  %17746 = vst [vmem:[#allocation226_spill] sm:$0xff] %v13492_v49  ;;  %v4203_v8 = vrot.slane %v4064_v4, 1  ;;  %5423 = vmatpush.msrb.mxu0 %v5270_v6  ;;  %v4209_v6 = vrot.slane %v4067_v52, 1  ;;  %v4069_v52 = vld [vmem:[#allocation3 + $0x50] sm:$0xff] }
 0x420   : > { %v3555_v58 = vpop.f32.mrf.mxu2  ;;  %4487 = vmatpush.msrb.mxu3 %v8812_v2  ;;  %v8810_v2 = vld [vmem:[%s17230_s1 + $0x1198] sm:$0xff]  ;;  %4424 = vmatpush.msrb.mxu2 %v8776_v13 }
 0x421   : > { %v3620_v43 = vpop.f32.mrf.mxu3  ;;  %v8774_v13 = vld [vmem:[%s17230_s1 + $0x1078] sm:$0xff] }
 0x422   : > { %v3621_v27 = vadd.f32 %v3620_v43, %v3555_v58  ;;  %v13484_v22 = vpop.f32.mrf.mxu0  ;;  %4488 = vmatpush.msrb.mxu3 %v8810_v2  ;;  %v8808_v2 = vld [vmem:[%s17230_s1 + $0x1188] sm:$0xff]  ;;  %4425 = vmatpush.msrb.mxu2 %v8774_v13 }
 0x423   : > { %v13489_v26 = vpop.f32.mrf.mxu1  ;;  %v8772_v13 = vld [vmem:[%s17230_s1 + $0x1068] sm:$0xff] }
 0x424   : > { %v13495_v18 = vadd.f32 %v3621_v27, %v13081_v60  ;;  %v5286_v60 = vld [vmem:[%s17232_s3 + $0xe8] sm:$0xff]  ;;  %v13516_v27 = vsel %vm1378_vm1, %v4199_v46, %v4203_v8  ;;  %v5269_v46 = vld [vmem:[%s17232_s3 + $0x60] sm:$0xff]  ;;  %4489 = vmatpush.msrb.mxu3 %v8808_v2  ;;  %v8806_v2 = vld [vmem:[%s17230_s1 + $0x1178] sm:$0xff]  ;;  %4426 = vmatpush.msrb.mxu2 %v8772_v13 }
 0x425   : > { %3916 = vmatmul.f32.gmra.mxu2 %v13090_v30  ;;  %4309 = vmatmul.f32.gmra.mxu0 %v13487_v54  ;;  %17747 = vst [vmem:[#allocation227_spill] sm:$0xff] %v13516_v27  ;;  %v8770_v13 = vld [vmem:[%s17230_s1 + $0x1058] sm:$0xff] }
 0x426   : > { %3981 = vmatmul.f32.gmra.mxu3 %v13094_v32  ;;  %4374 = vmatmul.f32.gmra.mxu1 %v13492_v49  ;;  %v13521_v32 = vsel %vm1378_vm1, %v4201_v41, %v4205_v3  ;;  %v4066_v49 = vld [vmem:[#allocation3 + $0x80] sm:$0xff] }
 0x427   : > { %5488 = vmatpush.msrb.mxu1 %v5286_v60  ;;  %17748 = vst [vmem:[#allocation228_spill] sm:$0xff] %v13521_v32  ;;  %v4207_v41 = vrot.slane %v4066_v49, 1  ;;  %5424 = vmatpush.msrb.mxu0 %v5269_v46  ;;  %v4213_v46 = vrot.slane %v4069_v52, 1  ;;  %v4071_v52 = vld [vmem:[#allocation3 + $0x118] sm:$0xff] }
 0x428   : > { %v3558_v62 = vpop.f32.mrf.mxu2  ;;  %4490 = vmatpush.msrb.mxu3 %v8806_v2  ;;  %v8804_v2 = vld [vmem:[%s17230_s1 + $0x1168] sm:$0xff]  ;;  %4427 = vmatpush.msrb.mxu2 %v8770_v13 }
 0x429   : > { %v3623_v30 = vpop.f32.mrf.mxu3  ;;  %v8768_v13 = vld [vmem:[%s17230_s1 + $0x1048] sm:$0xff] }
 0x42a   : > { %v3624_v58 = vadd.f32 %v3623_v30, %v3558_v62  ;;  %v13513_v43 = vpop.f32.mrf.mxu0  ;;  %4491 = vmatpush.msrb.mxu3 %v8804_v2  ;;  %v8802_v2 = vld [vmem:[%s17230_s1 + $0x1158] sm:$0xff]  ;;  %4428 = vmatpush.msrb.mxu2 %v8768_v13 }
 0x42b   : > { %v13518_v54 = vpop.f32.mrf.mxu1  ;;  %v8766_v13 = vld [vmem:[%s17230_s1 + $0x1038] sm:$0xff] }
 0x42c   : > { %v13524_v4 = vadd.f32 %v3624_v58, %v13108_v11  ;;  %v5285_v11 = vld [vmem:[%s17232_s3 + $0xe0] sm:$0xff]  ;;  %v13545_v58 = vsel %vm1378_vm1, %v4203_v8, %v4207_v41  ;;  %v5268_v8 = vld [vmem:[%s17232_s3 + $0x58] sm:$0xff]  ;;  %4492 = vmatpush.msrb.mxu3 %v8802_v2  ;;  %v8800_v2 = vld [vmem:[%s17230_s1 + $0x1148] sm:$0xff]  ;;  %4429 = vmatpush.msrb.mxu2 %v8766_v13 }
 0x42d   : > { %3919 = vmatmul.f32.gmra.mxu2 %v13117_v44  ;;  %4312 = vmatmul.f32.gmra.mxu0 %v13516_v27  ;;  %v17790_v13 = vld [vmem:[#allocation22_spill] sm:$0xff] }
 0x42e   : > { %3984 = vmatmul.f32.gmra.mxu3 %v13121_v9  ;;  %4377 = vmatmul.f32.gmra.mxu1 %v13521_v32  ;;  %v13550_v9 = vsel %vm1378_vm1, %v4205_v3, %v4209_v6  ;;  %v4068_v32 = vld [vmem:[#allocation3 + $0x70] sm:$0xff] }
 0x42f   : > { %5489 = vmatpush.msrb.mxu1 %v5285_v11  ;;  %17749 = vst [vmem:[#allocation229_spill] sm:$0xff] %v13550_v9  ;;  %v4211_v3 = vrot.slane %v4068_v32, 1  ;;  %5425 = vmatpush.msrb.mxu0 %v5268_v8  ;;  %v4217_v8 = vrot.slane %v4071_v52, 1  ;;  %v4073_v52 = vld [vmem:[#allocation3 + $0x108] sm:$0xff] }
 0x430   : > { %v3561_v60 = vpop.f32.mrf.mxu2  ;;  %4493 = vmatpush.msrb.mxu3 %v8800_v2  ;;  %v17788_v2 = vld [vmem:[#allocation19_spill] sm:$0xff] }
 0x431   : > { %v3626_v44 = vpop.f32.mrf.mxu3 }
 0x432   : > { %v3627_v62 = vadd.f32 %v3626_v44, %v3561_v60  ;;  %v13542_v30 = vpop.f32.mrf.mxu0 }
 0x433   : > { %v13547_v27 = vpop.f32.mrf.mxu1 }
 0x434   : > { %v13553_v49 = vadd.f32 %v3627_v62, %v13135_v20  ;;  %v5284_v20 = vld [vmem:[%s17232_s3 + $0xd8] sm:$0xff]  ;;  %v13574_v62 = vsel %vm1378_vm1, %v4207_v41, %v4211_v3  ;;  %v5267_v41 = vld [vmem:[%s17232_s3 + $0x50] sm:$0xff] }
 0x435   : > { %3922 = vmatmul.f32.gmra.mxu2 %v13144_v35  ;;  %4315 = vmatmul.f32.gmra.mxu0 %v13545_v58  ;;  %17751 = vst [vmem:[#allocation231_spill] sm:$0xff] %v13574_v62 }
 0x436   : > { %17750 = vst [vmem:[#allocation230_spill] sm:$0xff] %v13553_v49  ;;  %3987 = vmatmul.f32.gmra.mxu3 %v13148_v39  ;;  %4380 = vmatmul.f32.gmra.mxu1 %v13550_v9  ;;  %v13579_v39 = vsel %vm1378_vm1, %v4209_v6, %v4213_v46  ;;  %v4070_v9 = vld [vmem:[#allocation3 + $0x88] sm:$0xff] }
 0x437   : > { %5490 = vmatpush.msrb.mxu1 %v5284_v20  ;;  %17753 = vst [vmem:[#allocation233_spill] sm:$0xff] %v13579_v39  ;;  %v4215_v6 = vrot.slane %v4070_v9, 1  ;;  %5426 = vmatpush.msrb.mxu0 %v5267_v41  ;;  %v4221_v41 = vrot.slane %v4073_v52, 1  ;;  %v4075_v52 = vld [vmem:[#allocation3 + $0xb8] sm:$0xff] }
 0x438   : > { %v3564_v11 = vpop.f32.mrf.mxu2 }
 0x439   : > { %v3629_v35 = vpop.f32.mrf.mxu3 }
 0x43a   : > { %v3630_v60 = vadd.f32 %v3629_v35, %v3564_v11  ;;  %v13571_v44 = vpop.f32.mrf.mxu0 }
 0x43b   : > { %v13576_v49 = vpop.f32.mrf.mxu1 }
 0x43c   : > { %17752 = vst [vmem:[#allocation232_spill] sm:$0xff] %v13576_v49  ;;  %v13582_v32 = vadd.f32 %v3630_v60, %v13162_v38  ;;  %v5283_v38 = vld [vmem:[%s17232_s3 + $0xd0] sm:$0xff]  ;;  %v13603_v60 = vsel %vm1378_vm1, %v4211_v3, %v4215_v6  ;;  %v5266_v3 = vld [vmem:[%s17232_s3 + $0x48] sm:$0xff]  ;;  %v9440_v49 = vld [vmem:[#allocation3 + $0xd8] sm:$0xff] }
 0x43d   : > { %3925 = vmatmul.f32.gmra.mxu2 %v13171_v29  ;;  %4318 = vmatmul.f32.gmra.mxu0 %v13574_v62  ;;  %17756 = vst [vmem:[#allocation236_spill] sm:$0xff] %v13603_v60 }
 0x43e   : > { %17754 = vst [vmem:[#allocation234_spill] sm:$0xff] %v13582_v32  ;;  %3990 = vmatmul.f32.gmra.mxu3 %v13175_v0  ;;  %4383 = vmatmul.f32.gmra.mxu1 %v13579_v39  ;;  %v13608_v0 = vsel %vm1378_vm1, %v4213_v46, %v4217_v8  ;;  %v4072_v39 = vld [vmem:[#allocation3 + $0x130] sm:$0xff] }
 0x43f   : > { %5491 = vmatpush.msrb.mxu1 %v5283_v38  ;;  %17758 = vst [vmem:[#allocation238_spill] sm:$0xff] %v13608_v0  ;;  %v4219_v46 = vrot.slane %v4072_v39, 1  ;;  %5427 = vmatpush.msrb.mxu0 %v5266_v3  ;;  %v4225_v3 = vrot.slane %v4075_v52, 1  ;;  %v4077_v52 = vld [vmem:[#allocation3 + $0x90] sm:$0xff] }
 0x440   : > { %v3567_v20 = vpop.f32.mrf.mxu2 }
 0x441   : > { %v3632_v29 = vpop.f32.mrf.mxu3 }
 0x442   : > { %v3633_v11 = vadd.f32 %v3632_v29, %v3567_v20  ;;  %v13600_v35 = vpop.f32.mrf.mxu0 }
 0x443   : > { %17755 = vst [vmem:[#allocation235_spill] sm:$0xff] %v13600_v35  ;;  %v13605_v62 = vpop.f32.mrf.mxu1  ;;  %v17846_v35 = vld [vmem:[#allocation77_spill] sm:$0xff] }
 0x444   : > { %17757 = vst [vmem:[#allocation237_spill] sm:$0xff] %v13605_v62  ;;  %v13611_v9 = vadd.f32 %v3633_v11, %v13189_v7  ;;  %v5282_v7 = vld [vmem:[%s17232_s3 + $0xc8] sm:$0xff]  ;;  %v13632_v11 = vsel %vm1378_vm1, %v4215_v6, %v4219_v46  ;;  %v5265_v6 = vld [vmem:[%s17232_s3 + $0x40] sm:$0xff]  ;;  %v17845_v62 = vld [vmem:[#allocation75_spill] sm:$0xff] }
 0x445   : > { %3928 = vmatmul.f32.gmra.mxu2 %v13198_v53  ;;  %4321 = vmatmul.f32.gmra.mxu0 %v13603_v60  ;;  %17761 = vst [vmem:[#allocation241_spill] sm:$0xff] %v13632_v11 }
 0x446   : > { %17759 = vst [vmem:[#allocation239_spill] sm:$0xff] %v13611_v9  ;;  %3993 = vmatmul.f32.gmra.mxu3 %v13202_v51  ;;  %4386 = vmatmul.f32.gmra.mxu1 %v13608_v0  ;;  %v13637_v51 = vsel %vm1378_vm1, %v4217_v8, %v4221_v41  ;;  %v4074_v0 = vld [vmem:[#allocation3 + $0xa8] sm:$0xff] }
 0x447   : > { %5492 = vmatpush.msrb.mxu1 %v5282_v7  ;;  %17763 = vst [vmem:[#allocation243_spill] sm:$0xff] %v13637_v51  ;;  %v4223_v8 = vrot.slane %v4074_v0, 1  ;;  %5428 = vmatpush.msrb.mxu0 %v5265_v6  ;;  %v4229_v6 = vrot.slane %v4077_v52, 1  ;;  %v4079_v52 = vld [vmem:[#allocation3 + $0x10] sm:$0xff]  ;;  %v17842_v9 = vld [vmem:[#allocation69_spill] sm:$0xff] }
 0x448   : > { %v3570_v38 = vpop.f32.mrf.mxu2 }
 0x449   : > { %v3635_v53 = vpop.f32.mrf.mxu3 }
 0x44a   : > { %v3636_v20 = vadd.f32 %v3635_v53, %v3570_v38  ;;  %v13629_v29 = vpop.f32.mrf.mxu0 }
 0x44b   : > { %17760 = vst [vmem:[#allocation240_spill] sm:$0xff] %v13629_v29  ;;  %v13634_v60 = vpop.f32.mrf.mxu1  ;;  %v17833_v29 = vld [vmem:[#allocation51_spill] sm:$0xff] }
 0x44c   : > { %17762 = vst [vmem:[#allocation242_spill] sm:$0xff] %v13634_v60  ;;  %v13640_v39 = vadd.f32 %v3636_v20, %v13216_v36  ;;  %v5281_v36 = vld [vmem:[%s17232_s3 + $0xc0] sm:$0xff]  ;;  %v13661_v20 = vsel %vm1378_vm1, %v4219_v46, %v4223_v8  ;;  %v5264_v46 = vld [vmem:[%s17232_s3 + $0x38] sm:$0xff]  ;;  %v17832_v60 = vld [vmem:[#allocation49_spill] sm:$0xff] }
 0x44d   : > { %3931 = vmatmul.f32.gmra.mxu2 %v13225_v55  ;;  %4324 = vmatmul.f32.gmra.mxu0 %v13632_v11  ;;  %17766 = vst [vmem:[#allocation246_spill] sm:$0xff] %v13661_v20 }
 0x44e   : > { %17764 = vst [vmem:[#allocation244_spill] sm:$0xff] %v13640_v39  ;;  %3996 = vmatmul.f32.gmra.mxu3 %v13229_v12  ;;  %4389 = vmatmul.f32.gmra.mxu1 %v13637_v51  ;;  %v13666_v12 = vsel %vm1378_vm1, %v4221_v41, %v4225_v3  ;;  %v4076_v51 = vld [vmem:[#allocation3 + $0xc8] sm:$0xff]  ;;  %v17818_v39 = vld [vmem:[#allocation38_spill] sm:$0xff] }
 0x44f   : > { %5493 = vmatpush.msrb.mxu1 %v5281_v36  ;;  %17768 = vst [vmem:[#allocation248_spill] sm:$0xff] %v13666_v12  ;;  %v4227_v41 = vrot.slane %v4076_v51, 1  ;;  %5429 = vmatpush.msrb.mxu0 %v5264_v46  ;;  %v4233_v46 = vrot.slane %v4079_v52, 1  ;;  %v4081_v52 = vld [vmem:[#allocation3 + $0x78] sm:$0xff] }
 0x450   : > { %v3573_v7 = vpop.f32.mrf.mxu2 }
 0x451   : > { %v3638_v55 = vpop.f32.mrf.mxu3 }
 0x452   : > { %v3639_v38 = vadd.f32 %v3638_v55, %v3573_v7  ;;  %v13658_v53 = vpop.f32.mrf.mxu0 }
 0x453   : > { %17765 = vst [vmem:[#allocation245_spill] sm:$0xff] %v13658_v53  ;;  %v13663_v11 = vpop.f32.mrf.mxu1 }
 0x454   : > { %17767 = vst [vmem:[#allocation247_spill] sm:$0xff] %v13663_v11  ;;  %v13669_v0 = vadd.f32 %v3639_v38, %v13243_v21  ;;  %v5280_v21 = vld [vmem:[%s17232_s3 + $0xb8] sm:$0xff]  ;;  %v13690_v38 = vsel %vm1378_vm1, %v4223_v8, %v4227_v41  ;;  %v5263_v8 = vld [vmem:[%s17232_s3 + $0x30] sm:$0xff] }
 0x455   : > { %3934 = vmatmul.f32.gmra.mxu2 %v13252_v15  ;;  %4327 = vmatmul.f32.gmra.mxu0 %v13661_v20  ;;  %17771 = vst [vmem:[#allocation251_spill] sm:$0xff] %v13690_v38 }
 0x456   : > { %17769 = vst [vmem:[#allocation249_spill] sm:$0xff] %v13669_v0  ;;  %3999 = vmatmul.f32.gmra.mxu3 %v13256_v40  ;;  %4392 = vmatmul.f32.gmra.mxu1 %v13666_v12  ;;  %v13695_v40 = vsel %vm1378_vm1, %v4225_v3, %v4229_v6  ;;  %v4078_v12 = vld [vmem:[#allocation3 + $0x140] sm:$0xff]  ;;  %v17807_v0 = vld [vmem:[#allocation9_spill] sm:$0xff] }
 0x457   : > { %5494 = vmatpush.msrb.mxu1 %v5280_v21  ;;  %17773 = vst [vmem:[#allocation253_spill] sm:$0xff] %v13695_v40  ;;  %v4231_v3 = vrot.slane %v4078_v12, 1  ;;  %5430 = vmatpush.msrb.mxu0 %v5263_v8  ;;  %v4237_v8 = vrot.slane %v4081_v52, 1  ;;  %v13760_v52 = vld [vmem:[#allocation3 + $0x120] sm:$0xff] }
 0x458   : > { %v3576_v36 = vpop.f32.mrf.mxu2 }
 0x459   : > { %v3641_v15 = vpop.f32.mrf.mxu3 }
 0x45a   : > { %v3642_v7 = vadd.f32 %v3641_v15, %v3576_v36  ;;  %v13687_v55 = vpop.f32.mrf.mxu0 }
 0x45b   : > { %17770 = vst [vmem:[#allocation250_spill] sm:$0xff] %v13687_v55  ;;  %v13692_v20 = vpop.f32.mrf.mxu1  ;;  %v17810_v55 = vld [vmem:[#allocation32_spill] sm:$0xff] }
 0x45c   : > { %17772 = vst [vmem:[#allocation252_spill] sm:$0xff] %v13692_v20  ;;  %v13698_v51 = vadd.f32 %v3642_v7, %v13270_v34  ;;  %v5279_v34 = vld [vmem:[%s17232_s3 + $0xb0] sm:$0xff]  ;;  %v13719_v7 = vsel %vm1378_vm1, %v4227_v41, %v4231_v3  ;;  %v5262_v41 = vld [vmem:[%s17232_s3 + $0x28] sm:$0xff]  ;;  %v17808_v20 = vld [vmem:[#allocation11_spill] sm:$0xff] }
 0x45d   : > { %3937 = vmatmul.f32.gmra.mxu2 %v13279_v10  ;;  %4330 = vmatmul.f32.gmra.mxu0 %v13690_v38  ;;  %17776 = vst [vmem:[#allocation256_spill] sm:$0xff] %v13719_v7 }
 0x45e   : > { %17774 = vst [vmem:[#allocation254_spill] sm:$0xff] %v13698_v51  ;;  %4002 = vmatmul.f32.gmra.mxu3 %v13283_v50  ;;  %4395 = vmatmul.f32.gmra.mxu1 %v13695_v40  ;;  %v13724_v50 = vsel %vm1378_vm1, %v4229_v6, %v4233_v46  ;;  %v4080_v40 = vld [vmem:[#allocation3 + $0x138] sm:$0xff] }
 0x45f   : > { %5495 = vmatpush.msrb.mxu1 %v5279_v34  ;;  %17778 = vst [vmem:[#allocation258_spill] sm:$0xff] %v13724_v50  ;;  %v4235_v6 = vrot.slane %v4080_v40, 1  ;;  %5431 = vmatpush.msrb.mxu0 %v5262_v41  ;;  %v17789_v41 = vld [vmem:[#allocation21_spill] sm:$0xff] }
 0x460   : > { %v3579_v21 = vpop.f32.mrf.mxu2 }
 0x461   : > { %v3644_v10 = vpop.f32.mrf.mxu3 }
 0x462   : > { %v3645_v36 = vadd.f32 %v3644_v10, %v3579_v21  ;;  %v13716_v15 = vpop.f32.mrf.mxu0 }
 0x463   : > { %17775 = vst [vmem:[#allocation255_spill] sm:$0xff] %v13716_v15  ;;  %v13721_v38 = vpop.f32.mrf.mxu1 }
 0x464   : > { %17777 = vst [vmem:[#allocation257_spill] sm:$0xff] %v13721_v38  ;;  %v13727_v12 = vadd.f32 %v3645_v36, %v13297_v63  ;;  %v5278_v63 = vld [vmem:[%s17232_s3 + $0xa8] sm:$0xff]  ;;  %v13748_v36 = vsel %vm1378_vm1, %v4231_v3, %v4235_v6  ;;  %v8798_v3 = vld [vmem:[%s17230_s1 + $0x1138] sm:$0xff] }
 0x465   : > { %3940 = vmatmul.f32.gmra.mxu2 %v13306_v16  ;;  %4333 = vmatmul.f32.gmra.mxu0 %v13719_v7  ;;  %17781 = vst [vmem:[#allocation261_spill] sm:$0xff] %v13748_v36 }
 0x466   : > { %17779 = vst [vmem:[#allocation259_spill] sm:$0xff] %v13727_v12  ;;  %4005 = vmatmul.f32.gmra.mxu3 %v13310_v48  ;;  %4398 = vmatmul.f32.gmra.mxu1 %v13724_v50  ;;  %v13753_v48 = vsel %vm1378_vm1, %v4233_v46, %v4237_v8  ;;  %v13755_v50 = vld [vmem:[#allocation3 + $0xa0] sm:$0xff] }
 0x467   : > { %5496 = vmatpush.msrb.mxu1 %v5278_v63  ;;  %17783 = vst [vmem:[#allocation263_spill] sm:$0xff] %v13753_v48  ;;  %v5261_v46 = vld [vmem:[%s17232_s3 + $0x20] sm:$0xff]  ;;  %4494 = vmatpush.msrb.mxu3 %v8798_v3  ;;  %v8764_v63 = vld [vmem:[%s17230_s1 + $0x1028] sm:$0xff]  ;;  %v683_v3 = vadd.f32 %v17790_v13, %v17789_v41  ;;  %v17803_v13 = vrot.slane %v13760_v52, 1 }
 0x468   : > { %v3582_v34 = vpop.f32.mrf.mxu2  ;;  %5432 = vmatpush.msrb.mxu0 %v5261_v46  ;;  %4430 = vmatpush.msrb.mxu2 %v8764_v63  ;;  %v17791_v46 = vld [vmem:[#allocation24_spill] sm:$0xff] }
 0x469   : > { %v3647_v16 = vpop.f32.mrf.mxu3  ;;  %v17798_v41 = vld [vmem:[#allocation12_spill] sm:$0xff] }
 0x46a   : > { %v3648_v21 = vadd.f32 %v3647_v16, %v3582_v34  ;;  %v13745_v10 = vpop.f32.mrf.mxu0  ;;  %v8796_v34 = vld [vmem:[%s17230_s1 + $0x1128] sm:$0xff]  ;;  %v17786_v16 = vld [vmem:[#allocation16_spill] sm:$0xff] }
 0x46b   : > { %17780 = vst [vmem:[#allocation260_spill] sm:$0xff] %v13745_v10  ;;  %v13750_v7 = vpop.f32.mrf.mxu1  ;;  %4495 = vmatpush.msrb.mxu3 %v8796_v34  ;;  %v17794_v10 = vld [vmem:[#allocation28_spill] sm:$0xff] }
 0x46c   : > { %17782 = vst [vmem:[#allocation262_spill] sm:$0xff] %v13750_v7  ;;  %v13758_v40 = vadd.f32 %v3648_v21, %v13324_v59  ;;  %v5277_v59 = vld [vmem:[%s17232_s3 + $0xa0] sm:$0xff]  ;;  %v17793_v7 = vld [vmem:[#allocation27_spill] sm:$0xff] }
 0x46d   : > { %3943 = vmatmul.f32.gmra.mxu2 %v13333_v42  ;;  %4336 = vmatmul.f32.gmra.mxu0 %v13748_v36  ;;  %v689_v38 = vadd.f32 %v17794_v10, %v17793_v7  ;;  %v17799_v63 = vld [vmem:[#allocation4_spill] sm:$0xff]  ;;  %v17800_v7 = vld [vmem:[#allocation5_spill] sm:$0xff]  ;;  %v17801_v10 = vld [vmem:[#allocation6_spill] sm:$0xff] }
 0x46e   : > { %17784 = vst [vmem:[#allocation264_spill] sm:$0xff] %v13758_v40  ;;  %4008 = vmatmul.f32.gmra.mxu3 %v13337_v56  ;;  %4401 = vmatmul.f32.gmra.mxu1 %v13753_v48  ;;  %v17785_v56 = vld [vmem:[#allocation15_spill] sm:$0xff]  ;;  %v17787_v48 = vld [vmem:[#allocation18_spill] sm:$0xff]  ;;  %v692_v34 = vadd.f32 %v17799_v63, %v17798_v41  ;;  %v1036_v41 = vadd.f32 %v17808_v20, %v17807_v0  ;;  %v8792_v20 = vld [vmem:[%s17230_s1 + $0x1108] sm:$0xff] }
 0x46f   : > { %5497 = vmatpush.msrb.mxu1 %v5277_v59  ;;  %v677_v21 = vadd.f32 %v17786_v16, %v17785_v56  ;;  %v680_v36 = vadd.f32 %v17788_v2, %v17787_v48  ;;  %v17792_v59 = vld [vmem:[#allocation25_spill] sm:$0xff]  ;;  %v17796_v56 = vrot.slane %v13755_v50, 1  ;;  %v8762_v48 = vld [vmem:[%s17230_s1 + $0x1018] sm:$0xff] }
 0x470   : > { %v3585_v42 = vpop.f32.mrf.mxu2  ;;  %v686_v12 = vadd.f32 %v17792_v59, %v17791_v46  ;;  %v8794_v2 = vld [vmem:[%s17230_s1 + $0x1118] sm:$0xff]  ;;  %4431 = vmatpush.msrb.mxu2 %v8762_v48 }
 0x471   : > { %v3650_v40 = vpop.f32.mrf.mxu3  ;;  %v13801_v16 = vsel %vm1378_vm1, %v4235_v6, %v17796_v56  ;;  %v13818_v6 = vsel %vm1378_vm1, %v4237_v8, %v17803_v13  ;;  %v13820_v46 = vld [vmem:[#allocation3 + $0xd8] sm:$0xff]  ;;  %4496 = vmatpush.msrb.mxu3 %v8794_v2  ;;  %v17806_v56 = vld [vmem:[#allocation8_spill] sm:$0xff]  ;;  %v17812_v2 = vld [vmem:[#allocation17_spill] sm:$0xff] }
 0x472   : > { %v3651_v15 = vadd.f32 %v3650_v40, %v3585_v42  ;;  %v13796_v51 = vpop.f32.mrf.mxu0  ;;  %17797 = vst [vmem:[#allocation16_spill] sm:$0xff] %v13801_v16  ;;  %v695_v40 = vadd.f32 %v17801_v10, %v17800_v7  ;;  %v17805_v59 = vld [vmem:[#allocation7_spill] sm:$0xff]  ;;  %v854_v13 = vadd.f32 %v677_v21, %v17812_v2  ;;  %v856_v0 = vadd.f32 %v680_v36, %v17812_v2 }
 0x473   : > { %17795 = vst [vmem:[#allocation15_spill] sm:$0xff] %v13796_v51  ;;  %v13813_v42 = vpop.f32.mrf.mxu1  ;;  %v698_v51 = vadd.f32 %v17806_v56, %v17805_v59  ;;  %v17809_v63 = vld [vmem:[#allocation31_spill] sm:$0xff]  ;;  %v862_v21 = vadd.f32 %v689_v38, %v17812_v2  ;;  %v864_v59 = vadd.f32 %v692_v34, %v17812_v2  ;;  %4497 = vmatpush.msrb.mxu3 %v8792_v20  ;;  %v17816_v34 = vld [vmem:[#allocation36_spill] sm:$0xff] }
 0x474   : > { %17802 = vst [vmem:[#allocation18_spill] sm:$0xff] %v13813_v42  ;;  %v1039_v7 = vadd.f32 %v17810_v55, %v17809_v63  ;;  %v13829_v10 = vadd.f32 %v3651_v15, %v13363_v25  ;;  %v13831_v42 = vld [vmem:[#allocation3 + $0xf8] sm:$0xff]  ;;  %v8760_v25 = vld [vmem:[%s17230_s1 + $0x1008] sm:$0xff]  ;;  %v858_v55 = vadd.f32 %v683_v3, %v17812_v2  ;;  %v860_v15 = vadd.f32 %v686_v12, %v17812_v2 }
 0x475   : > { %17804 = vst [vmem:[#allocation19_spill] sm:$0xff] %v13818_v6  ;;  %v5260_v8 = vld [vmem:[%s17232_s3 + $0x18] sm:$0xff]  ;;  %3946 = vmatmul.f32.gmra.mxu2 %v13372_v61  ;;  %4339 = vmatmul.f32.gmra.mxu0 %v13801_v16  ;;  %v4243_v61 = vrot.slane %v13820_v46, 1  ;;  %v866_v56 = vadd.f32 %v695_v40, %v17812_v2  ;;  %v868_v36 = vadd.f32 %v698_v51, %v17812_v2  ;;  %v17813_v46 = vld [vmem:[#allocation33_spill] sm:$0xff]  ;;  %v17822_v2 = vld [vmem:[#allocation42_spill] sm:$0xff] }
 0x476   : > { %17811 = vst [vmem:[#allocation21_spill] sm:$0xff] %v13829_v10  ;;  %v5276_v48 = vld [vmem:[%s17232_s3 + $0x98] sm:$0xff]  ;;  %4011 = vmatmul.f32.gmra.mxu3 %v13376_v1  ;;  %4404 = vmatmul.f32.gmra.mxu1 %v13818_v6  ;;  %v13859_v3 = vadd.f32 %v1036_v41, %v854_v13  ;;  %v13861_v12 = vadd.f32 %v1039_v7, %v856_v0  ;;  %v17814_v6 = vld [vmem:[#allocation34_spill] sm:$0xff]  ;;  %v17817_v40 = vld [vmem:[#allocation37_spill] sm:$0xff] }
 0x477   : > { %5433 = vmatpush.msrb.mxu0 %v5260_v8  ;;  %5498 = vmatpush.msrb.mxu1 %v5276_v48  ;;  %v1042_v38 = vadd.f32 %v17814_v6, %v17813_v46  ;;  %v17815_v16 = vld [vmem:[#allocation35_spill] sm:$0xff]  ;;  %v1048_v63 = vadd.f32 %v17818_v39, %v17817_v40  ;;  %v17820_v48 = vld [vmem:[#allocation40_spill] sm:$0xff]  ;;  %v17821_v41 = vld [vmem:[#allocation41_spill] sm:$0xff]  ;;  %v17826_v6 = vrot.slane %v13755_v50, 1 }
 0x478   : > { %v3588_v1 = vpop.f32.mrf.mxu2  ;;  %4432 = vmatpush.msrb.mxu2 %v8760_v25  ;;  %v1045_v10 = vadd.f32 %v17816_v34, %v17815_v16  ;;  %v17819_v8 = vld [vmem:[#allocation39_spill] sm:$0xff]  ;;  %v1054_v7 = vadd.f32 %v17822_v2, %v17821_v41  ;;  %v17824_v0 = vld [vmem:[#allocation44_spill] sm:$0xff]  ;;  %v17828_v46 = vld [vmem:[#allocation45_spill] sm:$0xff]  ;;  %v1066_v41 = vadd.f32 %v17833_v29, %v17832_v60 }
 0x479   : > { %v1051_v11 = vadd.f32 %v17820_v48, %v17819_v8  ;;  %v3653_v51 = vpop.f32.mrf.mxu3  ;;  %v17823_v13 = vld [vmem:[#allocation43_spill] sm:$0xff]  ;;  %v13880_v16 = vsel %vm1378_vm1, %v17826_v6, %v4243_v61  ;;  %v17829_v39 = vld [vmem:[#allocation46_spill] sm:$0xff]  ;;  %v17831_v8 = vld [vmem:[#allocation48_spill] sm:$0xff]  ;;  %v1217_v29 = vadd.f32 %v1042_v38, %v858_v55 }
 0x47a   : > { %v1057_v25 = vadd.f32 %v17824_v0, %v17823_v13  ;;  %v3654_v20 = vadd.f32 %v3653_v51, %v3588_v1  ;;  %v13875_v53 = vpop.f32.mrf.mxu0  ;;  %17827 = vst [vmem:[#allocation24_spill] sm:$0xff] %v13880_v16  ;;  %v1060_v34 = vadd.f32 %v17829_v39, %v17828_v46  ;;  %v17830_v40 = vld [vmem:[#allocation47_spill] sm:$0xff]  ;;  %v17835_v1 = vrot.slane %v13831_v42, 1  ;;  %v17839_v0 = vld [vmem:[#allocation57_spill] sm:$0xff]  ;;  %v17841_v46 = vld [vmem:[#allocation64_spill] sm:$0xff] }
 0x47b   : > { %17825 = vst [vmem:[#allocation22_spill] sm:$0xff] %v13875_v53  ;;  %v1063_v48 = vadd.f32 %v17831_v8, %v17830_v40  ;;  %v13888_v2 = vpop.f32.mrf.mxu1  ;;  %v17836_v51 = vrot.slane %v13760_v52, 1  ;;  %v17838_v13 = vld [vmem:[#allocation55_spill] sm:$0xff]  ;;  %v17840_v53 = vld [vmem:[#allocation62_spill] sm:$0xff]  ;;  %v1078_v52 = vadd.f32 %v17846_v35, %v17845_v62  ;;  %v17850_v38 = vld [vmem:[#allocation29_spill] sm:$0xff] }
 0x47c   : > { %17834 = vst [vmem:[#allocation25_spill] sm:$0xff] %v13888_v2  ;;  %v1069_v6 = vadd.f32 %v17839_v0, %v17838_v13  ;;  %v1072_v39 = vadd.f32 %v17841_v46, %v17840_v53  ;;  %v17843_v40 = vld [vmem:[#allocation71_spill] sm:$0xff]  ;;  %v13904_v60 = vadd.f32 %v3654_v20, %v13384_v28  ;;  %v1219_v2 = vadd.f32 %v1045_v10, %v860_v15  ;;  %v17847_v53 = vld [vmem:[#allocation20_spill] sm:$0xff]  ;;  %v17849_v35 = vld [vmem:[#allocation26_spill] sm:$0xff] }
 0x47d   : > { %v13895_v50 = vsel %vm1378_vm1, %v17836_v51, %v17835_v1  ;;  %v1075_v8 = vadd.f32 %v17843_v40, %v17842_v9  ;;  %3949 = vmatmul.f32.gmra.mxu2 %v13387_v17  ;;  %4342 = vmatmul.f32.gmra.mxu0 %v13880_v16  ;;  %v1221_v1 = vadd.f32 %v1048_v63, %v862_v21  ;;  %v17326_v9 = vrot.slane %v13407_v45, 1  ;;  %v17848_v10 = vld [vmem:[#allocation23_spill] sm:$0xff]  ;;  %v17855_v20 = vld [vmem:[#allocation81_spill] sm:$0xff]  ;;  %v17857_v0 = vld [vmem:[#allocation84_spill] sm:$0xff] }
 0x47e   : > { %17837 = vst [vmem:[#allocation27_spill] sm:$0xff] %v13895_v50  ;;  %v1223_v51 = vadd.f32 %v1051_v11, %v864_v59  ;;  %v1225_v13 = vadd.f32 %v1054_v7, %v866_v56  ;;  %4014 = vmatmul.f32.gmra.mxu3 %v13391_v57  ;;  %4407 = vmatmul.f32.gmra.mxu1 %v13895_v50  ;;  %v17851_v11 = vld [vmem:[#allocation13_spill] sm:$0xff]  ;;  %v17852_v57 = vld [vmem:[#allocation14_spill] sm:$0xff] }
 0x47f   : > { %17844 = vst [vmem:[#allocation28_spill] sm:$0xff] %v13904_v60  ;;  %v1227_v28 = vadd.f32 %v1057_v25, %v868_v36  ;;  %v1229_v55 = vadd.f32 %v1060_v34, %v17847_v53  ;;  %v1231_v15 = vadd.f32 %v1063_v48, %v17848_v10  ;;  %v13917_v17 = vadd.f32 %v1066_v41, %v17849_v35  ;;  %v17853_v36 = vld [vmem:[#allocation10_spill] sm:$0xff]  ;;  %v17854_v25 = vld [vmem:[#allocation79_spill] sm:$0xff]  ;;  %v17858_v46 = vld [vmem:[#allocation85_spill] sm:$0xff] }
 0x480   : > { %v13920_v21 = vadd.f32 %v1069_v6, %v17850_v38  ;;  %v13923_v59 = vadd.f32 %v1072_v39, %v17851_v11  ;;  %v13926_v56 = vadd.f32 %v1075_v8, %v17852_v57  ;;  %v3591_v63 = vpop.f32.mrf.mxu2  ;;  %v13929_v7 = vadd.f32 %v1078_v52, %v17853_v36  ;;  %v17856_v48 = vld [vmem:[#allocation83_spill] sm:$0xff]  ;;  %v17859_v40 = vld [vmem:[#allocation86_spill] sm:$0xff]  ;;  %v17860_v10 = vld [vmem:[#allocation89_spill] sm:$0xff] }
 0x481   : > { %v1081_v34 = vadd.f32 %v17855_v20, %v17854_v25  ;;  %v1560_v41 = vadd.f32 %v17857_v0, %v17856_v48  ;;  %v1563_v6 = vadd.f32 %v17859_v40, %v17858_v46  ;;  %v3656_v53 = vpop.f32.mrf.mxu3  ;;  %v17861_v39 = vld [vmem:[#allocation90_spill] sm:$0xff]  ;;  %v17862_v38 = vld [vmem:[#allocation93_spill] sm:$0xff]  ;;  %v13946_v52 = vsel %vm1378_vm1, %v4243_v61, %v17326_v9  ;;  %v17865_v36 = vld [vmem:[#allocation96_spill] sm:$0xff] }
 0x482   : > { %v1566_v35 = vadd.f32 %v17861_v39, %v17860_v10  ;;  %v17863_v8 = vld [vmem:[#allocation94_spill] sm:$0xff]  ;;  %v3657_v57 = vadd.f32 %v3656_v53, %v3591_v63  ;;  %v13941_v62 = vpop.f32.mrf.mxu0  ;;  %v17866_v25 = vld [vmem:[#allocation97_spill] sm:$0xff]  ;;  %v17868_v0 = vld [vmem:[#allocation99_spill] sm:$0xff]  ;;  %v17872_v63 = vrot.slane %v13409_v31, 1  ;;  %v17873_v53 = vrot.slane %v13831_v42, 1 }
 0x483   : > { %v1569_v11 = vadd.f32 %v17863_v8, %v17862_v38  ;;  %17864 = vst [vmem:[#allocation12_spill] sm:$0xff] %v13941_v62  ;;  %v1572_v20 = vadd.f32 %v17866_v25, %v17865_v36  ;;  %v17867_v48 = vld [vmem:[#allocation98_spill] sm:$0xff]  ;;  %v17869_v40 = vld [vmem:[#allocation100_spill] sm:$0xff]  ;;  %v17870_v50 = vld [vmem:[#allocation101_spill] sm:$0xff]  ;;  %v13954_v39 = vpop.f32.mrf.mxu1  ;;  %v1737_v60 = vadd.f32 %v1560_v41, %v13859_v3 }
 0x484   : > { %v1575_v46 = vadd.f32 %v17868_v0, %v17867_v48  ;;  %v1578_v10 = vadd.f32 %v17870_v50, %v17869_v40  ;;  %17871 = vst [vmem:[#allocation4_spill] sm:$0xff] %v13954_v39  ;;  %v13961_v38 = vsel %vm1378_vm1, %v17873_v53, %v17872_v63  ;;  %v4088_v61 = vld [vmem:[#allocation3 + $0x38] sm:$0x1]  ;;  %v5259_v8 = vld [vmem:[%s17232_s3 + $0x10] sm:$0xff]  ;;  %v17877_v0 = vld [vmem:[#allocation104_spill] sm:$0xff]  ;;  %v13974_v42 = vadd.f32 %v3657_v57, %v13399_v14 }
 0x485   : > { %17874 = vst [vmem:[#allocation5_spill] sm:$0xff] %v13961_v38  ;;  %v5275_v36 = vld [vmem:[%s17232_s3 + $0x90] sm:$0xff]  ;;  %v17876_v50 = vld [vmem:[#allocation103_spill] sm:$0xff]  ;;  %v17878_v40 = vld [vmem:[#allocation105_spill] sm:$0xff]  ;;  %5434 = vmatpush.msrb.mxu0 %v5259_v8  ;;  %3952 = vmatmul.f32.gmra.mxu2 %v9440_v49  ;;  %v13990_v8 = vadd.f32 %v1566_v35, %v1217_v29  ;;  %v4251_v49 = vrot.slane %v4088_v61, 1 }
 0x486   : > { %v17875_v25 = vld [vmem:[#allocation102_spill] sm:$0xff]  ;;  %v1584_v9 = vadd.f32 %v17878_v40, %v17877_v0  ;;  %5499 = vmatpush.msrb.mxu1 %v5275_v36  ;;  %v17881_v62 = vld [vmem:[#allocation107_spill] sm:$0xff]  ;;  %4345 = vmatmul.f32.gmra.mxu0 %v13946_v52  ;;  %v5258_v14 = vld [vmem:[%s17232_s3 + $0x8] sm:$0xff] }
 0x487   : > { %v1581_v48 = vadd.f32 %v17876_v50, %v17875_v25  ;;  %v4089_v63 = vld [vmem:[#allocation3 + $0xd0] sm:$0x1]  ;;  %v5274_v57 = vld [vmem:[%s17232_s3 + $0x88] sm:$0xff]  ;;  %v17882_v3 = vld [vmem:[#allocation108_spill] sm:$0xff]  ;;  %4410 = vmatmul.f32.gmra.mxu1 %v13961_v38  ;;  %v13997_v25 = vadd.f32 %v1572_v20, %v1221_v1  ;;  %v13999_v50 = vadd.f32 %v1575_v46, %v1223_v51  ;;  %5435 = vmatpush.msrb.mxu0 %v5258_v14 }
 0x488   : > { %v17879_v53 = vld [vmem:[#allocation30_spill] sm:$0xff]  ;;  %v17883_v41 = vld [vmem:[#allocation111_spill] sm:$0xff]  ;;  %v4253_v0 = vrot.slane %v4089_v63, 1  ;;  %5500 = vmatpush.msrb.mxu1 %v5274_v57  ;;  %v17884_v35 = vld [vmem:[#allocation65_spill] sm:$0xff] }
 0x489   : > { %v13977_v16 = vadd.f32 %v1081_v34, %v17879_v53  ;;  %v17880_v39 = vld [vmem:[#allocation106_spill] sm:$0xff]  ;;  %v1739_v34 = vadd.f32 %v1563_v6, %v13861_v12  ;;  %v1590_v36 = vadd.f32 %v17883_v41, %v17882_v3  ;;  %v14001_v12 = vadd.f32 %v1578_v10, %v1225_v13  ;;  %v17885_v40 = vld [vmem:[#allocation73_spill] sm:$0xff]  ;;  %v3594_v3 = vpop.f32.mrf.mxu2  ;;  %v5273_v1 = vld [vmem:[%s17232_s3 + $0x80] sm:$0xff]  ;;  %v3659_v46 = vpop.f32.mrf.mxu3 }
 0x48a   : > { %v1587_v32 = vadd.f32 %v17881_v62, %v17880_v39  ;;  %v9441_v62 = vld [vmem:[#allocation3 + $0xf8] sm:$0xff]  ;;  %v13995_v39 = vadd.f32 %v1569_v11, %v1219_v2  ;;  %v14003_v29 = vadd.f32 %v1581_v48, %v1227_v28  ;;  %v14005_v6 = vadd.f32 %v1584_v9, %v1229_v55  ;;  %v5257_v2 = vld [vmem:[%s17232_s3] sm:$0xff]  ;;  %v17889_v9 = vld [vmem:[#allocation54_spill] sm:$0xff]  ;;  %5501 = vmatpush.msrb.mxu1 %v5273_v1  ;;  %v14026_v57 = vpop.f32.mrf.mxu0 }
 0x48b   : > { %4017 = vmatmul.f32.gmra.mxu3 %v9441_v62  ;;  %v2083_v53 = vadd.f32 %v17885_v40, %v17884_v35  ;;  %v17886_v13 = vld [vmem:[#allocation52_spill] sm:$0xff]  ;;  %v17887_v11 = vld [vmem:[#allocation59_spill] sm:$0xff]  ;;  %5436 = vmatpush.msrb.mxu0 %v5257_v2  ;;  %v14022_v10 = vadd.f32 %v1590_v36, %v13917_v17  ;;  %v17890_v61 = vld [vmem:[#allocation109_spill] sm:$0xff]  ;;  %v3660_v14 = vadd.f32 %v3659_v46, %v3594_v3  ;;  %v17900_v3 = vrot.slane %v13409_v31, 1 }
 0x48c   : > { %v14015_v51 = vadd.f32 %v1587_v32, %v1231_v15  ;;  %v1593_v28 = vadd.f32 %v17887_v11, %v17886_v13  ;;  %v17888_v20 = vld [vmem:[#allocation60_spill] sm:$0xff]  ;;  %v17891_v48 = vld [vmem:[#allocation110_spill] sm:$0xff]  ;;  %v17892_v32 = vrot.slane %v13407_v45, 1  ;;  %v17897_v2 = vld [vmem:[#allocation67_spill] sm:$0xff]  ;;  %v14039_v11 = vpop.f32.mrf.mxu1 }
 0x48d   : > { %v1596_v55 = vadd.f32 %v17889_v9, %v17888_v20  ;;  %v2442_v63 = vadd.f32 %v17891_v48, %v17890_v61  ;;  %v17894_v41 = vld [vmem:[#allocation56_spill] sm:$0xff]  ;;  %v17895_v62 = vld [vmem:[#allocation58_spill] sm:$0xff]  ;;  %v17898_v13 = vld [vmem:[#allocation61_spill] sm:$0xff]  ;;  %v14044_v20 = vsel %vm1378_vm1, %v17900_v3, %v4253_v0  ;;  %3955 = vmatmul.f32.gmra.mxu2 %v13407_v45 }
 0x48e   : > { %v14031_v15 = vsel %vm1378_vm1, %v17892_v32, %v4251_v49  ;;  %v1599_v35 = vadd.f32 %v17895_v62, %v17894_v41  ;;  %v17896_v40 = vld [vmem:[#allocation66_spill] sm:$0xff]  ;;  %v17899_v17 = vld [vmem:[#allocation63_spill] sm:$0xff]  ;;  %17901 = vst [vmem:[#allocation7_spill] sm:$0xff] %v14044_v20  ;;  %v5223_v9 = vld [vmem:[#allocation3 + $0xc0] sm:$0x80]  ;;  %v2260_v49 = vadd.f32 %v2083_v53, %v1737_v60  ;;  %v14058_v38 = vadd.f32 %v1593_v28, %v13920_v21 }
 0x48f   : > { %17893 = vst [vmem:[#allocation6_spill] sm:$0xff] %v14031_v15  ;;  %v1602_v1 = vadd.f32 %v17897_v2, %v17896_v40  ;;  %v1605_v36 = vadd.f32 %v17899_v17, %v17898_v13  ;;  %v14046_v46 = vld [vmem:[#allocation3 + $0x98] sm:$0xff]  ;;  %v17902_v61 = vld [vmem:[#allocation68_spill] sm:$0xff]  ;;  %v17903_v48 = vld [vmem:[#allocation70_spill] sm:$0xff]  ;;  %v14053_v2 = vadd.f32 %v3660_v14, %v13414_v37  ;;  %v14061_v0 = vadd.f32 %v1596_v55, %v13923_v59 }
 0x490   : > { %v2086_v32 = vadd.f32 %v17903_v48, %v17902_v61  ;;  %v17904_v41 = vld [vmem:[#allocation184_spill] sm:$0xff]  ;;  %v17905_v62 = vld [vmem:[#allocation185_spill] sm:$0xff]  ;;  %v14055_v17 = vld [vmem:[#allocation3 + $0xf0] sm:$0xff]  ;;  %4348 = vmatmul.f32.gmra.mxu0 %v14031_v15  ;;  %v2619_v61 = vadd.f32 %v2442_v63, %v2260_v49  ;;  %4413 = vmatmul.f32.gmra.mxu1 %v14044_v20  ;;  %v5323_v21 = vrot.slane %v5223_v9, 7  ;;  %v5324_v28 = vrot.slane %v14046_v46, 7 }
 0x491   : > { %v2965_v40 = vadd.f32 %v17905_v62, %v17904_v41  ;;  %17906 = vst [vmem:[#allocation8_spill] sm:$0xff] %v14053_v2  ;;  %v5224_v13 = vld [vmem:[#allocation3 + $0x40] sm:$0x80]  ;;  %v17908_v60 = vld [vmem:[#allocation50_spill] sm:$0xff]  ;;  %v17909_v48 = vld [vmem:[#allocation183_spill] sm:$0xff]  ;;  %v14073_v59 = vadd.f32 %v1599_v35, %v13926_v56  ;;  %v14076_v55 = vadd.f32 %v1602_v1, %v13929_v7  ;;  %v5327_v41 = vrot.slane %v14055_v17, 7  ;;  %v3597_v9 = vpop.f32.mrf.mxu2 }
 0x492   : > { %v17907_v3 = vld [vmem:[#allocation72_spill] sm:$0xff]  ;;  %v17910_v37 = vld [vmem:[#allocation191_spill] sm:$0xff]  ;;  %v5326_v45 = vrot.slane %v5224_v13, 7  ;;  %v14080_v63 = vadd.f32 %v1605_v36, %v13977_v16  ;;  %v2262_v49 = vadd.f32 %v2086_v32, %v1739_v34  ;;  %v17911_v56 = vld [vmem:[#allocation53_spill] sm:$0xff]  ;;  %v3662_v16 = vpop.f32.mrf.mxu3 }
 0x493   : > { %v2089_v53 = vadd.f32 %v17908_v60, %v17907_v3  ;;  %v3488_v14 = vadd.f32 %v17910_v37, %v17909_v48  ;;  %4020 = vmatmul.f32.gmra.mxu3 %v13409_v31  ;;  %v3142_v62 = vadd.f32 %v2965_v40, %v2619_v61  ;;  %v3847_v31 = vadd.f32 %v13431_v19, %v13426_v24  ;;  %v17912_v35 = vld [vmem:[#allocation74_spill] sm:$0xff]  ;;  %v17913_v7 = vld [vmem:[#allocation76_spill] sm:$0xff]  ;;  %v17917_v36 = vld [vmem:[#allocation127_spill] sm:$0xff]  ;;  %v4304_v24 = vpop.f32.mrf.mxu0 }
 0x494   : > { %v2092_v3 = vadd.f32 %v17912_v35, %v17911_v56  ;;  %v17914_v1 = vld [vmem:[#allocation78_spill] sm:$0xff]  ;;  %v17915_v60 = vld [vmem:[#allocation80_spill] sm:$0xff]  ;;  %v3663_v61 = vadd.f32 %v3662_v16, %v3597_v9  ;;  %v5325_v19 = vsel %vm495_vm0, %v5323_v21, %v5324_v28  ;;  %v17921_v20 = vld [vmem:[#allocation91_spill] sm:$0xff]  ;;  %v4369_v2 = vpop.f32.mrf.mxu1 }
 0x495   : > { %v14085_v46 = vadd.f32 %v2089_v53, %v13990_v8  ;;  %v2095_v13 = vadd.f32 %v17914_v1, %v17913_v7  ;;  %v17916_v17 = vld [vmem:[#allocation82_spill] sm:$0xff]  ;;  %v17918_v34 = vld [vmem:[#allocation128_spill] sm:$0xff]  ;;  %v3665_v40 = vadd.f32 %v3488_v14, %v3142_v62  ;;  %v17919_v8 = vld [vmem:[#allocation87_spill] sm:$0xff]  ;;  %v4370_v16 = vadd.f32 %v4369_v2, %v4304_v24 }
 0x496   : > { %v2098_v48 = vadd.f32 %v17916_v17, %v17915_v60  ;;  %v2445_v32 = vadd.f32 %v17918_v34, %v17917_v36  ;;  %v17920_v53 = vld [vmem:[#allocation88_spill] sm:$0xff]  ;;  %v17923_v15 = vld [vmem:[#allocation95_spill] sm:$0xff]  ;;  %v5328_v60 = vsel %vm495_vm0, %v5326_v45, %v5327_v41  ;;  %v17925_v36 = vld [vmem:[#allocation186_spill] sm:$0xff]  ;;  %v14108_v21 = vadd.f32 %v3663_v61, %v13437_v33 }
 0x497   : > { %v2101_v37 = vadd.f32 %v17920_v53, %v17919_v8  ;;  %v17922_v56 = vld [vmem:[#allocation92_spill] sm:$0xff]  ;;  %v17926_v14 = vld [vmem:[#allocation187_spill] sm:$0xff]  ;;  %v4024_v9 = vadd.f32 %v3847_v31, %v3665_v40  ;;  %v14110_v34 = vld [vmem:[#allocation3 + $0x8] sm:$0xff] }
 0x498   : > { %v2104_v35 = vadd.f32 %v17922_v56, %v17921_v20  ;;  %v17924_v7 = vld [vmem:[#allocation112_spill] sm:$0xff]  ;;  %v2968_v62 = vadd.f32 %v17926_v14, %v17925_v36  ;;  %v14113_v20 = vadd.f32 %v2092_v3, %v13995_v39  ;;  %v14119_v45 = vadd.f32 %v2098_v48, %v13999_v50  ;;  %v17927_v8 = vld [vmem:[#allocation221_spill] sm:$0xff]  ;;  %5437 = vmatmul.f32.vlgmr.msrb.gmra.mxu0 %v5325_v19  ;;  %v17930_v2 = vld [vmem:[#allocation222_spill] sm:$0xff] }
 0x499   : > { %v2107_v1 = vadd.f32 %v17924_v7, %v17923_v15  ;;  %v14103_v17 = vld [vmem:[#allocation3 + $0x100] sm:$0xff]  ;;  %v14116_v15 = vadd.f32 %v2095_v13, %v13997_v25  ;;  %4433 = vmatmul.f32.vlgmr.msrb.gmra.mxu2 %v17927_v8  ;;  %v2621_v53 = vadd.f32 %v2445_v32, %v2262_v49  ;;  %v17929_v40 = vld [vmem:[#allocation193_spill] sm:$0xff]  ;;  %v4547_v61 = vadd.f32 %v4370_v16, %v4024_v9  ;;  %v17932_v48 = vld [vmem:[#allocation114_spill] sm:$0xff]  ;;  %v3911_v7 = vpop.f32.mrf.mxu2 }
 0x49a   : > { %v17928_v31 = vld [vmem:[#allocation192_spill] sm:$0xff]  ;;  %5502 = vmatmul.f32.vlgmr.msrb.gmra.mxu1 %v5328_v60  ;;  %v5329_v39 = vrot.slane %v14103_v17, 7  ;;  %v14127_v3 = vadd.f32 %v2101_v37, %v14001_v12  ;;  %v14130_v25 = vadd.f32 %v2104_v35, %v14003_v29  ;;  %v5331_v49 = vrot.slane %v14110_v34, 7  ;;  %v17931_v13 = vld [vmem:[#allocation113_spill] sm:$0xff]  ;;  %v17933_v60 = vld [vmem:[#allocation115_spill] sm:$0xff]  ;;  %v3976_v8 = vpop.f32.mrf.mxu3 }
 0x49b   : > { %v3491_v33 = vadd.f32 %v17929_v40, %v17928_v31  ;;  %4498 = vmatmul.f32.vlgmr.msrb.gmra.mxu3 %v17930_v2  ;;  %v14133_v50 = vadd.f32 %v2107_v1, %v14005_v6  ;;  %v2110_v32 = vadd.f32 %v17932_v48, %v17931_v13  ;;  %v3144_v24 = vadd.f32 %v2968_v62, %v2621_v53  ;;  %v17934_v12 = vld [vmem:[#allocation116_spill] sm:$0xff]  ;;  %v17935_v17 = vld [vmem:[#allocation117_spill] sm:$0xff]  ;;  %v17936_v29 = vld [vmem:[#allocation118_spill] sm:$0xff]  ;;  %v4307_v53 = vpop.f32.mrf.mxu0 }
 0x49c   : > { %v3850_v19 = vadd.f32 %v13460_v5, %v13455_v23  ;;  %v8823_v56 = vmul.f32 -1.442695, %v4547_v61  ;;  %v2113_v37 = vadd.f32 %v17934_v12, %v17933_v60  ;;  %v2116_v35 = vadd.f32 %v17936_v29, %v17935_v17  ;;  %v17937_v36 = vld [vmem:[#allocation119_spill] sm:$0xff]  ;;  %v17938_v6 = vld [vmem:[#allocation120_spill] sm:$0xff]  ;;  %v17939_v14 = vld [vmem:[#allocation129_spill] sm:$0xff]  ;;  %v4372_v29 = vpop.f32.mrf.mxu1 }
 0x49d   : > { %v2119_v1 = vadd.f32 %v17938_v6, %v17937_v36  ;;  %v17940_v9 = vld [vmem:[#allocation130_spill] sm:$0xff]  ;;  %v3667_v31 = vadd.f32 %v3491_v33, %v3144_v24  ;;  %v3977_v62 = vadd.f32 %v3976_v8, %v3911_v7  ;;  %v5330_v5 = vsel %vm495_vm0, %v5324_v28, %v5329_v39  ;;  %v17941_v23 = vld [vmem:[#allocation121_spill] sm:$0xff]  ;;  %v17943_v2 = vld [vmem:[#allocation123_spill] sm:$0xff] }
 0x49e   : > { %v2448_v16 = vadd.f32 %v17940_v9, %v17939_v14  ;;  %9187 = vpow2.f32 %v8823_v56  ;;  %v17942_v40 = vld [vmem:[#allocation122_spill] sm:$0xff]  ;;  %v17944_v13 = vld [vmem:[#allocation124_spill] sm:$0xff]  ;;  %v17945_v60 = vld [vmem:[#allocation125_spill] sm:$0xff]  ;;  %v5332_v36 = vsel %vm495_vm0, %v5327_v41, %v5331_v49  ;;  %v4373_v14 = vadd.f32 %v4372_v29, %v4307_v53 }
 0x49f   : > { %v2122_v61 = vadd.f32 %v17942_v40, %v17941_v23  ;;  %v2125_v48 = vadd.f32 %v17944_v13, %v17943_v2  ;;  %v17946_v12 = vld [vmem:[#allocation126_spill] sm:$0xff]  ;;  %v17947_v24 = vld [vmem:[#allocation188_spill] sm:$0xff]  ;;  %v17948_v56 = vld [vmem:[#allocation189_spill] sm:$0xff]  ;;  %v4026_v28 = vadd.f32 %v3850_v19, %v3667_v31  ;;  %v14163_v6 = vadd.f32 %v3977_v62, %v13466_v47 }
 0x4a0   : > { %v2128_v17 = vadd.f32 %v17946_v12, %v17945_v60  ;;  %v14158_v33 = vld [vmem:[#allocation3 + $0x30] sm:$0xff]  ;;  %v2971_v7 = vadd.f32 %v17948_v56, %v17947_v24  ;;  %v14166_v9 = vadd.f32 %v2110_v32, %v14015_v51  ;;  %v14169_v8 = vadd.f32 %v2113_v37, %v14022_v10  ;;  %v17949_v41 = vld [vmem:[#allocation223_spill] sm:$0xff]  ;;  %5440 = vmatmul.f32.gmra.mxu0 %v5330_v5  ;;  %v17952_v62 = vld [vmem:[#allocation224_spill] sm:$0xff] }
 0x4a1   : > { %v14172_v23 = vadd.f32 %v2116_v35, %v14058_v38  ;;  %4436 = vmatmul.f32.gmra.mxu2 %v17949_v41  ;;  %v2623_v40 = vadd.f32 %v2448_v16, %v14085_v46  ;;  %v17950_v2 = vld [vmem:[#allocation194_spill] sm:$0xff]  ;;  %v17951_v19 = vld [vmem:[#allocation195_spill] sm:$0xff]  ;;  %v4549_v47 = vadd.f32 %v4373_v14, %v4026_v28  ;;  %v5333_v51 = vrot.slane %v14158_v33, 7  ;;  %v17954_v46 = vld [vmem:[#allocation133_spill] sm:$0xff] }
 0x4a2   : > { %v3494_v31 = vadd.f32 %v17951_v19, %v17950_v2  ;;  %5505 = vmatmul.f32.gmra.mxu1 %v5332_v36  ;;  %v14181_v10 = vadd.f32 %v2119_v1, %v14061_v0  ;;  %v14184_v38 = vadd.f32 %v2122_v61, %v14073_v59  ;;  %v14187_v32 = vadd.f32 %v2125_v48, %v14076_v55  ;;  %v17953_v37 = vld [vmem:[#allocation131_spill] sm:$0xff]  ;;  %v3914_v0 = vpop.f32.mrf.mxu2  ;;  %v17955_v1 = vld [vmem:[#allocation137_spill] sm:$0xff]  ;;  %v3979_v28 = vpop.f32.mrf.mxu3  ;;  %v17964_v19 = vld [vmem:[#allocation190_spill] sm:$0xff] }
 0x4a3   : > { %4501 = vmatmul.f32.gmra.mxu3 %v17952_v62  ;;  %v2451_v35 = vadd.f32 %v17954_v46, %v17953_v37  ;;  %v14192_v53 = vadd.f32 %v2128_v17, %v14080_v63  ;;  %v3146_v5 = vadd.f32 %v2971_v7, %v2623_v40  ;;  %v3853_v13 = vadd.f32 %v13489_v26, %v13484_v22  ;;  %v17956_v12 = vld [vmem:[#allocation139_spill] sm:$0xff]  ;;  %v17958_v29 = vld [vmem:[#allocation145_spill] sm:$0xff]  ;;  %v4310_v7 = vpop.f32.mrf.mxu0  ;;  %v8917_v34 = vld [vmem:[%s17232_s3 + $0x2f0] sm:$0xff] }
 0x4a4   : > { %v9188_v16 = vpop.eup %9187  ;;  %v8824_v60 = vmul.f32 -1.442695, %v4549_v47  ;;  %v2454_v59 = vadd.f32 %v17956_v12, %v17955_v1  ;;  %v17957_v61 = vld [vmem:[#allocation143_spill] sm:$0xff]  ;;  %v17960_v36 = vld [vmem:[#allocation149_spill] sm:$0xff]  ;;  %v3980_v17 = vadd.f32 %v3979_v28, %v3914_v0  ;;  %v5334_v26 = vsel %vm495_vm0, %v5329_v39, %v5333_v51  ;;  %v4375_v62 = vpop.f32.mrf.mxu1  ;;  %v17969_v12 = vld [vmem:[#allocation196_spill] sm:$0xff] }
 0x4a5   : > { %v2457_v55 = vadd.f32 %v17958_v29, %v17957_v61  ;;  %v17959_v48 = vld [vmem:[#allocation147_spill] sm:$0xff]  ;;  %v14202_v56 = vadd.f32 1.0, %v9188_v16  ;;  %v3669_v63 = vadd.f32 %v3494_v31, %v3146_v5  ;;  %v2625_v22 = vadd.f32 %v2451_v35, %v14113_v20  ;;  %v17962_v41 = vld [vmem:[#allocation153_spill] sm:$0xff]  ;;  %v17972_v28 = vld [vmem:[#allocation226_spill] sm:$0xff] }
 0x4a6   : > { %v2460_v24 = vadd.f32 %v17960_v36, %v17959_v48  ;;  %9189 = vpow2.f32 %v8824_v60  ;;  %v17961_v14 = vld [vmem:[#allocation151_spill] sm:$0xff]  ;;  %v14213_v37 = vld [vmem:[#allocation3 + $0xe8] sm:$0xff]  ;;  %v14218_v60 = vadd.f32 %v3980_v17, %v13495_v18  ;;  %v4376_v39 = vadd.f32 %v4375_v62, %v4310_v7 }
 0x4a7   : > { %v2463_v40 = vadd.f32 %v17962_v41, %v17961_v14  ;;  %v17963_v2 = vld [vmem:[#allocation135_spill] sm:$0xff]  ;;  %9191 = vrcp.f32 %v14202_v56  ;;  %v17966_v46 = vld [vmem:[#allocation157_spill] sm:$0xff]  ;;  %v4028_v5 = vadd.f32 %v3853_v13, %v3669_v63  ;;  %v2627_v20 = vadd.f32 %v2454_v59, %v14116_v15 }
 0x4a8   : > { %v2974_v47 = vadd.f32 %v17964_v19, %v17963_v2  ;;  %v17965_v31 = vld [vmem:[#allocation155_spill] sm:$0xff]  ;;  %v17968_v0 = vld [vmem:[#allocation161_spill] sm:$0xff]  ;;  %5443 = vmatmul.f32.gmra.mxu0 %v5334_v26  ;;  %v14227_v36 = vadd.f32 %v2457_v55, %v14119_v45  ;;  %v14230_v13 = vadd.f32 %v2460_v24, %v14127_v3  ;;  %v5337_v63 = vrot.slane %v14213_v37, 7  ;;  %v17976_v26 = vld [vmem:[#allocation168_spill] sm:$0xff] }
 0x4a9   : > { %v2466_v16 = vadd.f32 %v17966_v46, %v17965_v31  ;;  %v17967_v35 = vld [vmem:[#allocation159_spill] sm:$0xff]  ;;  %v17970_v61 = vld [vmem:[#allocation197_spill] sm:$0xff]  ;;  %v4551_v18 = vadd.f32 %v4376_v39, %v4028_v5  ;;  %v14245_v41 = vadd.f32 %v2463_v40, %v14130_v25  ;;  %v3856_v19 = vadd.f32 %v13518_v54, %v13513_v43 }
 0x4aa   : > { %v2469_v1 = vadd.f32 %v17968_v0, %v17967_v35  ;;  %v3497_v29 = vadd.f32 %v17970_v61, %v17969_v12  ;;  %v17971_v48 = vld [vmem:[#allocation225_spill] sm:$0xff]  ;;  %v8870_v15 = vld [vmem:[%s17232_s3 + $0x178] sm:$0xff]  ;;  %v3148_v24 = vadd.f32 %v2974_v47, %v2625_v22  ;;  %v3917_v31 = vpop.f32.mrf.mxu2  ;;  %v17977_v22 = vld [vmem:[#allocation170_spill] sm:$0xff]  ;;  %v3982_v25 = vpop.f32.mrf.mxu3  ;;  %v5338_v43 = vsel %vm495_vm0, %v5333_v51, %v5337_v63 }
 0x4ab   : > { %4439 = vmatmul.f32.gmra.mxu2 %v17971_v48  ;;  %4504 = vmatmul.f32.gmra.mxu3 %v17972_v28  ;;  %v8886_v59 = vld [vmem:[%s17232_s3 + $0x1f8] sm:$0xff]  ;;  %v17974_v7 = vld [vmem:[#allocation165_spill] sm:$0xff]  ;;  %v14248_v2 = vadd.f32 %v2466_v16, %v14133_v50  ;;  %v8825_v62 = vmul.f32 -1.442695, %v4551_v18  ;;  %v17978_v47 = vld [vmem:[#allocation172_spill] sm:$0xff]  ;;  %v3983_v40 = vadd.f32 %v3982_v25, %v3917_v31  ;;  %v4313_v54 = vpop.f32.mrf.mxu0  ;;  %vm4648_vm3 = vweird.f32 %v14202_v56 }
 0x4ac   : > { %v17973_v17 = vld [vmem:[#allocation163_spill] sm:$0xff]  ;;  %5602 = vmatpush.msra.mxu2 %v8870_v15  ;;  %5667 = vmatpush.msra.mxu3 %v8886_v59  ;;  %v9190_v14 = vpop.eup %9189  ;;  %v14255_v5 = vadd.f32 %v2469_v1, %v14166_v9  ;;  %v2478_v39 = vadd.f32 %v17978_v47, %v17977_v22  ;;  %v3671_v35 = vadd.f32 %v3497_v29, %v3148_v24  ;;  %v17979_v1 = vld [vmem:[#allocation136_spill] sm:$0xff]  ;;  %v4378_v29 = vpop.f32.mrf.mxu1  ;;  %v14277_v48 = vld [vmem:[#allocation3 + $0x68] sm:$0xff] }
 0x4ad   : > { %v2472_v45 = vadd.f32 %v17974_v7, %v17973_v17  ;;  %v17975_v55 = vld [vmem:[#allocation167_spill] sm:$0xff]  ;;  %v14252_v46 = vpop.eup %9191  ;;  %v14259_v0 = vadd.f32 1.0, %v9190_v14  ;;  %9193 = vpow2.f32 %v8825_v62  ;;  %v17980_v12 = vld [vmem:[#allocation132_spill] sm:$0xff]  ;;  %v14280_v33 = vadd.f32 %v3983_v40, %v13524_v4  ;;  %v17981_v15 = vld [vmem:[#allocation198_spill] sm:$0xff] }
 0x4ae   : > { %v2475_v3 = vadd.f32 %v17976_v26, %v17975_v55  ;;  %v4644_v50 = vmul.f32 %v14252_v46, %v14202_v56  ;;  %v2977_v61 = vadd.f32 %v17980_v12, %v17979_v1  ;;  %v4030_v18 = vadd.f32 %v3856_v19, %v3671_v35  ;;  %v17984_v26 = vld [vmem:[#allocation228_spill] sm:$0xff]  ;;  %v8902_v24 = vld [vmem:[%s17232_s3 + $0x278] sm:$0xff]  ;;  %v17986_v62 = vld [vmem:[#allocation177_spill] sm:$0xff] }
 0x4af   : > { %v14269_v9 = vadd.f32 %v2472_v45, %v14169_v8  ;;  %9195 = vrcp.f32 %v14259_v0  ;;  %v4379_v51 = vadd.f32 %v4378_v29, %v4313_v54  ;;  %v14283_v8 = vadd.f32 %v2478_v39, %v14181_v10  ;;  %v17983_v45 = vld [vmem:[#allocation227_spill] sm:$0xff]  ;;  %v8869_v10 = vld [vmem:[%s17232_s3 + $0x170] sm:$0xff]  ;;  %v17988_v39 = vld [vmem:[#allocation141_spill] sm:$0xff]  ;;  %5947 = vmatpush.msra.mxu0 %v8902_v24 }
 0x4b0   : > { %v14272_v16 = vadd.f32 %v2475_v3, %v14172_v23  ;;  %v4645_v28 = vsub.f32 1.0, %v4644_v50  ;;  %v17982_v23 = vld [vmem:[#allocation199_spill] sm:$0xff]  ;;  %v4652_v17 = vand.u32 2147483647, %v14202_v56  ;;  %v4654_v7 = vand.u32 2147483648, %v14202_v56  ;;  %5446 = vmatmul.f32.gmra.mxu0 %v5338_v43  ;;  %v8885_v3 = vld [vmem:[%s17232_s3 + $0x1f0] sm:$0xff]  ;;  %5603 = vmatpush.msra.mxu2 %v8869_v10 }
 0x4b1   : > { %v3500_v59 = vadd.f32 %v17982_v23, %v17981_v15  ;;  %vm4649_vm2 = vweird.f32 %v14252_v46  ;;  %v4553_v4 = vadd.f32 %v4379_v51, %v4030_v18  ;;  %v5341_v14 = vrot.slane %v14277_v48, 7  ;;  %v17985_v19 = vld [vmem:[#allocation175_spill] sm:$0xff]  ;;  %v17987_v47 = vld [vmem:[#allocation134_spill] sm:$0xff]  ;;  %5668 = vmatpush.msra.mxu3 %v8885_v3  ;;  %v14328_v51 = vld [vmem:[#allocation3 + $0x148] sm:$0xff] }
 0x4b2   : > { %v4646_v55 = vmul.f32 %v14252_v46, %v4645_v28  ;;  %v2481_v31 = vadd.f32 %v17986_v62, %v17985_v19  ;;  %v3150_v22 = vadd.f32 %v2977_v61, %v2627_v20  ;;  %v2980_v35 = vadd.f32 %v17988_v39, %v17987_v47  ;;  %v8918_v25 = vld [vmem:[%s17232_s3 + $0x2f8] sm:$0xff]  ;;  %v3920_v1 = vpop.f32.mrf.mxu2  ;;  %vm4650_vm4 = vmor %vm4648_vm3, %vm4649_vm2  ;;  %v3985_v18 = vpop.f32.mrf.mxu3  ;;  %v17989_v23 = vld [vmem:[#allocation200_spill] sm:$0xff] }
 0x4b3   : > { %4442 = vmatmul.f32.gmra.mxu2 %v17983_v45  ;;  %4507 = vmatmul.f32.gmra.mxu3 %v17984_v26  ;;  %v9194_v50 = vpop.eup %9193  ;;  %v3859_v40 = vadd.f32 %v13547_v27, %v13542_v30  ;;  %v8826_v43 = vmul.f32 -1.442695, %v4553_v4  ;;  %vm4653_vm5 = vcmp.eq.f32.partialorder %v4652_v17, 8.507059e+37  ;;  %v4655_v61 = vor.u32 1.1754944e-38, %v4654_v7  ;;  %v4316_v56 = vpop.f32.mrf.mxu0  ;;  %v17992_v19 = vld [vmem:[#allocation230_spill] sm:$0xff] }
 0x4b4   : > { %v4647_v54 = vadd.f32 %v14252_v46, %v4646_v55  ;;  %6012 = vmatpush.msra.mxu1 %v8918_v25  ;;  %v3673_v12 = vadd.f32 %v3500_v59, %v3150_v22  ;;  %v14318_v29 = vadd.f32 1.0, %v9194_v50  ;;  %v5342_v28 = vsel %vm495_vm0, %v5337_v63, %v5341_v14  ;;  %v17990_v59 = vld [vmem:[#allocation201_spill] sm:$0xff]  ;;  %v14334_v55 = vld [vmem:[#allocation3 + $0xb0] sm:$0xff] }
 0x4b5   : > { %v14314_v20 = vpop.eup %9195  ;;  %9197 = vpow2.f32 %v8826_v43  ;;  %v3152_v15 = vadd.f32 %v2980_v35, %v14227_v36  ;;  %v3503_v17 = vadd.f32 %v17990_v59, %v17989_v23  ;;  %17991 = vst [vmem:[#allocation9_spill] sm:$0xff] %v14334_v55  ;;  %v3986_v26 = vadd.f32 %v3985_v18, %v3920_v1  ;;  %v17993_v22 = vld [vmem:[#allocation229_spill] sm:$0xff]  ;;  %v17995_v35 = vld [vmem:[#allocation138_spill] sm:$0xff]  ;;  %v17996_v43 = vld [vmem:[#allocation232_spill] sm:$0xff] }
 0x4b6   : > { %v4651_v27 = vsel %vm4650_vm4, %v14252_v46, %v4647_v54  ;;  %v4659_v30 = vmul.f32 %v14314_v20, %v14259_v0  ;;  %9199 = vrcp.f32 %v14318_v29  ;;  %v4381_v46 = vpop.f32.mrf.mxu1  ;;  %v4032_v45 = vadd.f32 %v3859_v40, %v3673_v12  ;;  %v8868_v18 = vld [vmem:[%s17232_s3 + $0x168] sm:$0xff]  ;;  %6013 = vmatpush.msra.mxu1 %v8917_v34  ;;  %v8883_v34 = vld [vmem:[%s17232_s3 + $0x1e0] sm:$0xff] }
 0x4b7   : > { %v4656_v7 = vsel %vm4653_vm5, %v4655_v61, %v4651_v27  ;;  %v4667_v63 = vand.u32 2147483647, %v14259_v0  ;;  %v4669_v10 = vand.u32 2147483648, %v14259_v0  ;;  %v4382_v36 = vadd.f32 %v4381_v46, %v4316_v56  ;;  %5604 = vmatpush.msra.mxu2 %v8868_v18  ;;  %v17999_v46 = vld [vmem:[#allocation140_spill] sm:$0xff]  ;;  %v18008_v27 = vld [vmem:[#allocation237_spill] sm:$0xff] }
 0x4b8   : > { %v14337_v4 = vmul.f32 %v14334_v55, %v4656_v7  ;;  %v4660_v37 = vsub.f32 1.0, %v4659_v30  ;;  %5449 = vmatmul.f32.gmra.mxu0 %v5342_v28  ;;  %v5345_v3 = vrot.slane %v14328_v51, 7  ;;  %vm4664_vm6 = vweird.f32 %v14314_v20 }
 0x4b9   : > { %v14347_v62 = vadd.f32 %v3986_v26, %v17992_v19  ;;  %v14352_v39 = vadd.f32 %v2481_v31, %v14184_v38  ;;  %v3675_v50 = vadd.f32 %v3503_v17, %v3152_v15  ;;  %v4555_v40 = vadd.f32 %v4382_v36, %v4032_v45  ;;  %v8884_v38 = vld [vmem:[%s17232_s3 + $0x1e8] sm:$0xff]  ;;  %v8901_v31 = vld [vmem:[%s17232_s3 + $0x270] sm:$0xff]  ;;  %v18000_v45 = vld [vmem:[#allocation144_spill] sm:$0xff] }
 0x4ba   : > { %5203 = vst [vmem:[#allocation3 + $0xb0] sm:$0xff] %v14337_v4  ;;  %v4661_v24 = vmul.f32 %v14314_v20, %v4660_v37  ;;  %v5335_v47 = vrot.slane %v14337_v4, 7  ;;  %v3862_v1 = vadd.f32 %v17996_v43, %v13571_v44  ;;  %vm4663_vm7 = vweird.f32 %v14259_v0  ;;  %v3923_v61 = vpop.f32.mrf.mxu2  ;;  %v3988_v15 = vpop.f32.mrf.mxu3  ;;  %5669 = vmatpush.msra.mxu3 %v8884_v38  ;;  %5948 = vmatpush.msra.mxu0 %v8901_v31  ;;  %v18001_v26 = vld [vmem:[#allocation202_spill] sm:$0xff] }
 0x4bb   : > { %4445 = vmatmul.f32.gmra.mxu2 %v13545_v58  ;;  %4510 = vmatmul.f32.gmra.mxu3 %v17993_v22  ;;  %v17994_v58 = vld [vmem:[#allocation142_spill] sm:$0xff]  ;;  %v9198_v54 = vpop.eup %9197  ;;  %vm14378_vm8 = vmor %vm4663_vm7, %vm4664_vm6  ;;  %v4670_v30 = vor.u32 1.1754944e-38, %v4669_v10  ;;  %v8827_v28 = vmul.f32 -1.442695, %v4555_v40  ;;  %vm4668_vm9 = vcmp.eq.f32.partialorder %v4667_v63, 8.507059e+37  ;;  %v3989_v17 = vadd.f32 %v3988_v15, %v3923_v61  ;;  %v4319_v7 = vpop.f32.mrf.mxu0  ;;  %v18002_v10 = vld [vmem:[#allocation203_spill] sm:$0xff] }
 0x4bc   : > { %v2983_v25 = vadd.f32 %v17995_v35, %v17994_v58  ;;  %v4662_v12 = vadd.f32 %v14314_v20, %v4661_v24  ;;  %v5336_v44 = vsel %vm495_vm0, %v5331_v49, %v5335_v47  ;;  %v14374_v0 = vpop.eup %9199  ;;  %v14382_v56 = vadd.f32 1.0, %v9198_v54  ;;  %v14404_v24 = vld [vmem:[#allocation3 + $0x48] sm:$0xff]  ;;  %v18004_v40 = vld [vmem:[#allocation234_spill] sm:$0xff]  ;;  %v8867_v15 = vld [vmem:[%s17232_s3 + $0x160] sm:$0xff]  ;;  %5670 = vmatpush.msra.mxu3 %v8883_v34 }
 0x4bd   : > { %v5346_v49 = vsel %vm495_vm0, %v5341_v14, %v5345_v3  ;;  %v4674_v59 = vmul.f32 %v14374_v0, %v14318_v29  ;;  %v2986_v37 = vadd.f32 %v18000_v45, %v17999_v46  ;;  %v3506_v48 = vadd.f32 %v18002_v10, %v18001_v26  ;;  %5508 = vmatmul.f32.gmra.mxu1 %v5336_v44  ;;  %v18007_v44 = vld [vmem:[#allocation235_spill] sm:$0xff]  ;;  %v18016_v34 = vld [vmem:[#allocation238_spill] sm:$0xff] }
 0x4be   : > { %v4666_v23 = vsel %vm14378_vm8, %v14314_v20, %v4662_v12  ;;  %9201 = vrcp.f32 %v14382_v56  ;;  %v4384_v14 = vpop.f32.mrf.mxu1  ;;  %v14402_v20 = vld [vmem:[#allocation3 + $0x28] sm:$0xff]  ;;  %v4034_v63 = vadd.f32 %v3862_v1, %v3675_v50  ;;  %18003 = vst [vmem:[#allocation11_spill] sm:$0xff] %v14404_v24  ;;  %v4682_v58 = vand.u32 2147483647, %v14318_v29  ;;  %v18005_v12 = vld [vmem:[#allocation231_spill] sm:$0xff]  ;;  %5605 = vmatpush.msra.mxu2 %v8867_v15 }
 0x4bf   : > { %v4671_v36 = vsel %vm4668_vm9, %v4670_v30, %v4666_v23  ;;  %v4675_v22 = vsub.f32 1.0, %v4674_v59  ;;  %9203 = vpow2.f32 %v8827_v28  ;;  %v4684_v35 = vand.u32 2147483648, %v14318_v29  ;;  %v18006_v1 = vld [vmem:[#allocation233_spill] sm:$0xff] }
 0x4c0   : > { %v14407_v19 = vmul.f32 %v14404_v24, %v4671_v36  ;;  %v14412_v54 = vadd.f32 %v3989_v17, %v18004_v40  ;;  %v4385_v43 = vadd.f32 %v4384_v14, %v4319_v7  ;;  %5452 = vmatmul.f32.gmra.mxu0 %v5346_v49  ;;  %vm4679_vm10 = vweird.f32 %v14374_v0  ;;  %v8900_v49 = vld [vmem:[%s17232_s3 + $0x268] sm:$0xff] }
 0x4c1   : > { %v4676_v50 = vmul.f32 %v14374_v0, %v4675_v22  ;;  %v5349_v18 = vrot.slane %v14402_v20, 7  ;;  %v3154_v38 = vadd.f32 %v2983_v25, %v14230_v13  ;;  %v14423_v31 = vadd.f32 %v2986_v37, %v14245_v41  ;;  %v18009_v13 = vld [vmem:[#allocation146_spill] sm:$0xff]  ;;  %v18010_v25 = vld [vmem:[#allocation148_spill] sm:$0xff]  ;;  %v8916_v17 = vld [vmem:[%s17232_s3 + $0x2e8] sm:$0xff]  ;;  %5949 = vmatpush.msra.mxu0 %v8900_v49 }
 0x4c2   : > { %5204 = vst [vmem:[#allocation3 + $0x48] sm:$0xff] %v14407_v19  ;;  %v5339_v61 = vrot.slane %v14407_v19, 7  ;;  %v3865_v30 = vadd.f32 %v18008_v27, %v18007_v44  ;;  %v4557_v28 = vadd.f32 %v4385_v43, %v4034_v63  ;;  %v2989_v41 = vadd.f32 %v18010_v25, %v18009_v13  ;;  %v3926_v59 = vpop.f32.mrf.mxu2  ;;  %v3991_v10 = vpop.f32.mrf.mxu3  ;;  %6014 = vmatpush.msra.mxu1 %v8916_v17  ;;  %v14466_v22 = vld [vmem:[#allocation3 + $0x110] sm:$0xff]  ;;  %v18015_v27 = vld [vmem:[#allocation236_spill] sm:$0xff]  ;;  %v8866_v49 = vld [vmem:[%s17232_s3 + $0x158] sm:$0xff] }
 0x4c3   : > { %4448 = vmatmul.f32.gmra.mxu2 %v18005_v12  ;;  %4513 = vmatmul.f32.gmra.mxu3 %v18006_v1  ;;  %v4677_v23 = vadd.f32 %v14374_v0, %v4676_v50  ;;  %vm4678_vm11 = vweird.f32 %v14318_v29  ;;  %v3677_v45 = vadd.f32 %v3506_v48, %v3154_v38  ;;  %vm4683_vm13 = vcmp.eq.f32.partialorder %v4682_v58, 8.507059e+37  ;;  %v4322_v14 = vpop.f32.mrf.mxu0  ;;  %v18014_v1 = vld [vmem:[#allocation239_spill] sm:$0xff]  ;;  %v8899_v25 = vld [vmem:[%s17232_s3 + $0x260] sm:$0xff]  ;;  %v18017_v17 = vld [vmem:[#allocation150_spill] sm:$0xff] }
 0x4c4   : > { %v5340_v7 = vsel %vm495_vm0, %v5335_v47, %v5339_v61  ;;  %v14448_v46 = vpop.eup %9201  ;;  %vm14452_vm12 = vmor %vm4678_vm11, %vm4679_vm10  ;;  %v4685_v37 = vor.u32 1.1754944e-38, %v4684_v35  ;;  %v8828_v26 = vmul.f32 -1.442695, %v4557_v28  ;;  %v3992_v48 = vadd.f32 %v3991_v10, %v3926_v59  ;;  %v8882_v13 = vld [vmem:[%s17232_s3 + $0x1d8] sm:$0xff]  ;;  %v18019_v29 = vld [vmem:[#allocation204_spill] sm:$0xff]  ;;  %5606 = vmatpush.msra.mxu2 %v8866_v49  ;;  %5950 = vmatpush.msra.mxu0 %v8899_v25 }
 0x4c5   : > { %v9204_v36 = vpop.eup %9203  ;;  %v4681_v4 = vsel %vm14452_vm12, %v14374_v0, %v4677_v23  ;;  %v4689_v47 = vmul.f32 %v14448_v46, %v14382_v56  ;;  %v5350_v63 = vsel %vm495_vm0, %v5345_v3, %v5349_v18  ;;  %v4036_v58 = vadd.f32 %v3865_v30, %v3677_v45  ;;  %5511 = vmatmul.f32.gmra.mxu1 %v5340_v7  ;;  %v14470_v0 = vld [vmem:[#allocation3] sm:$0xff] }
 0x4c6   : > { %v4686_v35 = vsel %vm4683_vm13, %v4685_v37, %v4681_v4  ;;  %v14468_v40 = vadd.f32 1.0, %v9204_v36  ;;  %9205 = vpow2.f32 %v8828_v26  ;;  %v4387_v43 = vpop.f32.mrf.mxu1  ;;  %18013 = vst [vmem:[#allocation31_spill] sm:$0xff] %v14470_v0  ;;  %v14476_v38 = vadd.f32 %v3992_v48, %v18014_v1  ;;  %v18018_v7 = vld [vmem:[#allocation152_spill] sm:$0xff]  ;;  %v18020_v37 = vld [vmem:[#allocation205_spill] sm:$0xff]  ;;  %5671 = vmatpush.msra.mxu3 %v8882_v13  ;;  %v14538_v13 = vld [vmem:[#allocation3 + $0x18] sm:$0xff] }
 0x4c7   : > { %v14473_v12 = vmul.f32 %v14470_v0, %v4686_v35  ;;  %v4690_v50 = vsub.f32 1.0, %v4689_v47  ;;  %v4388_v51 = vadd.f32 %v4387_v43, %v4322_v14  ;;  %v4697_v3 = vand.u32 2147483647, %v14382_v56  ;;  %v8915_v10 = vld [vmem:[%s17232_s3 + $0x2e0] sm:$0xff]  ;;  %v18022_v14 = vld [vmem:[#allocation242_spill] sm:$0xff]  ;;  %18027 = vst [vmem:[#allocation32_spill] sm:$0xff] %v14538_v13 }
 0x4c8   : > { %v4699_v44 = vand.u32 2147483648, %v14382_v56  ;;  %9207 = vrcp.f32 %v14468_v40  ;;  %5455 = vmatmul.f32.gmra.mxu0 %v5350_v63  ;;  %v5353_v30 = vrot.slane %v14466_v22, 7  ;;  %vm4694_vm14 = vweird.f32 %v14448_v46  ;;  %6015 = vmatpush.msra.mxu1 %v8915_v10  ;;  %v18021_v48 = vld [vmem:[#allocation240_spill] sm:$0xff] }
 0x4c9   : > { %5205 = vst [vmem:[#allocation3] sm:$0xff] %v14473_v12  ;;  %v4691_v28 = vmul.f32 %v14448_v46, %v4690_v50  ;;  %v4559_v15 = vadd.f32 %v4388_v51, %v4036_v58  ;;  %v5343_v23 = vrot.slane %v14473_v12, 7  ;;  %v3158_v59 = vadd.f32 %v2989_v41, %v14248_v2 }
 0x4ca   : > { %v2992_v45 = vadd.f32 %v18018_v7, %v18017_v17  ;;  %v3509_v26 = vadd.f32 %v18020_v37, %v18019_v29  ;;  %vm4693_vm15 = vweird.f32 %v14382_v56  ;;  %v3929_v47 = vpop.f32.mrf.mxu2  ;;  %v3868_v63 = vadd.f32 %v18022_v14, %v18021_v48  ;;  %v3994_v56 = vpop.f32.mrf.mxu3  ;;  %v18028_v17 = vld [vmem:[#allocation245_spill] sm:$0xff]  ;;  %v18029_v7 = vld [vmem:[#allocation247_spill] sm:$0xff]  ;;  %v18030_v29 = vld [vmem:[#allocation244_spill] sm:$0xff] }
 0x4cb   : > { %4451 = vmatmul.f32.gmra.mxu2 %v18015_v27  ;;  %4516 = vmatmul.f32.gmra.mxu3 %v18016_v34  ;;  %v4692_v36 = vadd.f32 %v14448_v46, %v4691_v28  ;;  %v8829_v4 = vmul.f32 -1.442695, %v4559_v15  ;;  %v5344_v2 = vsel %vm495_vm0, %v5339_v61, %v5343_v23  ;;  %vm4695_vm2 = vmor %vm4693_vm15, %vm4694_vm14  ;;  %vm4698_vm3 = vcmp.eq.f32.partialorder %v4697_v3, 8.507059e+37  ;;  %v4325_v50 = vpop.f32.mrf.mxu0  ;;  %v18024_v27 = vld [vmem:[#allocation207_spill] sm:$0xff]  ;;  %v18026_v34 = vld [vmem:[#allocation156_spill] sm:$0xff] }
 0x4cc   : > { %v9206_v41 = vpop.eup %9205  ;;  %v4700_v58 = vor.u32 1.1754944e-38, %v4699_v44  ;;  %v5354_v35 = vsel %vm495_vm0, %v5349_v18, %v5353_v30  ;;  %v3995_v61 = vadd.f32 %v3994_v56, %v3929_v47  ;;  %v14527_v51 = vadd.f32 %v2992_v45, %v14255_v5  ;;  %v18023_v44 = vld [vmem:[#allocation206_spill] sm:$0xff]  ;;  %v14532_v18 = vld [vmem:[#allocation3 + $0x128] sm:$0xff]  ;;  %v18033_v48 = vld [vmem:[#allocation208_spill] sm:$0xff] }
 0x4cd   : > { %v4696_v19 = vsel %vm4695_vm2, %v14448_v46, %v4692_v36  ;;  %v14522_v43 = vadd.f32 1.0, %v9206_v41  ;;  %9209 = vpow2.f32 %v8829_v4  ;;  %v3679_v3 = vadd.f32 %v3509_v26, %v14423_v31  ;;  %5514 = vmatmul.f32.gmra.mxu1 %v5344_v2  ;;  %v18025_v46 = vld [vmem:[#allocation154_spill] sm:$0xff]  ;;  %v18031_v26 = vld [vmem:[#allocation241_spill] sm:$0xff]  ;;  %v18032_v4 = vld [vmem:[#allocation243_spill] sm:$0xff] }
 0x4ce   : > { %v14524_v1 = vpop.eup %9207  ;;  %v3512_v28 = vadd.f32 %v18024_v27, %v18023_v44  ;;  %v4701_v20 = vsel %vm4698_vm3, %v4700_v58, %v4696_v19  ;;  %v4390_v15 = vpop.f32.mrf.mxu1  ;;  %v14536_v49 = vadd.f32 %v18026_v34, %v18025_v46  ;;  %v3871_v45 = vadd.f32 %v18029_v7, %v18028_v17  ;;  %v18034_v14 = vld [vmem:[#allocation209_spill] sm:$0xff]  ;;  %v8898_v44 = vld [vmem:[%s17232_s3 + $0x258] sm:$0xff] }
 0x4cf   : > { %v14541_v25 = vmul.f32 %v14538_v13, %v4701_v20  ;;  %v4704_v5 = vmul.f32 %v14524_v1, %v14468_v40  ;;  %9211 = vrcp.f32 %v14522_v43  ;;  %v4038_v31 = vadd.f32 %v3868_v63, %v3679_v3  ;;  %v8865_v3 = vld [vmem:[%s17232_s3 + $0x150] sm:$0xff]  ;;  %5951 = vmatpush.msra.mxu0 %v8898_v44  ;;  %v18042_v44 = vld [vmem:[#allocation248_spill] sm:$0xff] }
 0x4d0   : > { %v14549_v37 = vadd.f32 %v3995_v61, %v18030_v29  ;;  %5458 = vmatmul.f32.gmra.mxu0 %v5354_v35  ;;  %v4391_v36 = vadd.f32 %v4390_v15, %v4325_v50  ;;  %v5357_v2 = vrot.slane %v14532_v18, 7  ;;  %v3681_v41 = vadd.f32 %v3512_v28, %v3158_v59  ;;  %v8881_v59 = vld [vmem:[%s17232_s3 + $0x1d0] sm:$0xff]  ;;  %v18036_v15 = vld [vmem:[#allocation252_spill] sm:$0xff]  ;;  %5607 = vmatpush.msra.mxu2 %v8865_v3 }
 0x4d1   : > { %5206 = vst [vmem:[#allocation3 + $0x18] sm:$0xff] %v14541_v25  ;;  %v4705_v10 = vsub.f32 1.0, %v4704_v5  ;;  %v5347_v47 = vrot.slane %v14541_v25, 7  ;;  %v3515_v63 = vadd.f32 %v18034_v14, %v18033_v48  ;;  %v4712_v58 = vand.u32 2147483647, %v14468_v40  ;;  %v18035_v20 = vld [vmem:[#allocation250_spill] sm:$0xff]  ;;  %5672 = vmatpush.msra.mxu3 %v8881_v59 }
 0x4d2   : > { %v4714_v56 = vand.u32 2147483648, %v14468_v40  ;;  %vm4709_vm4 = vweird.f32 %v14524_v1  ;;  %v4561_v61 = vadd.f32 %v4391_v36, %v4038_v31  ;;  %v3932_v50 = vpop.f32.mrf.mxu2  ;;  %v4040_v28 = vadd.f32 %v3871_v45, %v3681_v41  ;;  %v3997_v5 = vpop.f32.mrf.mxu3  ;;  %v8914_v31 = vld [vmem:[%s17232_s3 + $0x2d8] sm:$0xff]  ;;  %v14597_v36 = vld [vmem:[#allocation3 + $0x80] sm:$0xff]  ;;  %v18037_v14 = vld [vmem:[#allocation249_spill] sm:$0xff] }
 0x4d3   : > { %4454 = vmatmul.f32.gmra.mxu2 %v18031_v26  ;;  %4519 = vmatmul.f32.gmra.mxu3 %v18032_v4  ;;  %v9210_v19 = vpop.eup %9209  ;;  %v4706_v35 = vmul.f32 %v14524_v1, %v4705_v10  ;;  %v5348_v27 = vsel %vm495_vm0, %v5343_v23, %v5347_v47  ;;  %v3874_v46 = vadd.f32 %v18036_v15, %v18035_v20  ;;  %vm4708_vm5 = vweird.f32 %v14468_v40  ;;  %v4328_v45 = vpop.f32.mrf.mxu0  ;;  %v14611_v3 = vld [vmem:[#allocation3 + $0x150] sm:$0xff]  ;;  %v18043_v20 = vld [vmem:[#allocation181_spill] sm:$0xff]  ;;  %v15340_v13 = vld [vmem:[#allocation3 + $0x80] sm:$0xff] }
 0x4d4   : > { %v14579_v34 = vadd.f32 1.0, %v9210_v19  ;;  %v8830_v23 = vmul.f32 -1.442695, %v4561_v61  ;;  %v3998_v7 = vadd.f32 %v3997_v5, %v3932_v50  ;;  %6016 = vmatpush.msra.mxu1 %v8914_v31  ;;  %v5358_v40 = vsel %vm495_vm0, %v5353_v30, %v5357_v2  ;;  %vm4710_vm6 = vmor %vm4708_vm5, %vm4709_vm4  ;;  %v18038_v19 = vld [vmem:[#allocation246_spill] sm:$0xff]  ;;  %v18040_v61 = vld [vmem:[#allocation180_spill] sm:$0xff]  ;;  %18041 = vst [vmem:[#allocation17_spill] sm:$0xff] %v14611_v3 }
 0x4d5   : > { %v14584_v17 = vpop.eup %9211  ;;  %v4707_v12 = vadd.f32 %v14524_v1, %v4706_v35  ;;  %vm4713_vm7 = vcmp.eq.f32.partialorder %v4712_v58, 8.507059e+37  ;;  %v4715_v29 = vor.u32 1.1754944e-38, %v4714_v56  ;;  %5517 = vmatmul.f32.gmra.mxu1 %v5348_v27  ;;  %v4727_v22 = vand.u32 2147483647, %v14522_v43  ;;  %v18039_v35 = vld [vmem:[#allocation179_spill] sm:$0xff]  ;;  %v18044_v15 = vld [vmem:[#allocation182_spill] sm:$0xff] }
 0x4d6   : > { %v4719_v26 = vmul.f32 %v14584_v17, %v14522_v43  ;;  %9213 = vrcp.f32 %v14579_v34  ;;  %v4393_v10 = vpop.f32.mrf.mxu1  ;;  %v4729_v30 = vand.u32 2147483648, %v14522_v43  ;;  %v14603_v58 = vadd.f32 %v3998_v7, %v18037_v14 }
 0x4d7   : > { %v4711_v4 = vsel %vm4710_vm6, %v14524_v1, %v4707_v12  ;;  %9215 = vpow2.f32 %v8830_v23  ;;  %v4394_v56 = vadd.f32 %v4393_v10, %v4328_v45  ;;  %v14608_v50 = vadd.f32 %v18040_v61, %v18039_v35  ;;  %v8897_v23 = vld [vmem:[%s17232_s3 + $0x250] sm:$0xff] }
 0x4d8   : > { %v4716_v41 = vsel %vm4713_vm7, %v4715_v29, %v4711_v4  ;;  %v4720_v48 = vsub.f32 1.0, %v4719_v26  ;;  %5461 = vmatmul.f32.gmra.mxu0 %v5358_v40  ;;  %v3683_v1 = vadd.f32 %v3515_v63, %v14527_v51  ;;  %v5361_v27 = vrot.slane %v14597_v36, 7  ;;  %v8864_v51 = vld [vmem:[%s17232_s3 + $0x148] sm:$0xff]  ;;  %v8913_v40 = vld [vmem:[%s17232_s3 + $0x2d0] sm:$0xff] }
 0x4d9   : > { %v14614_v59 = vmul.f32 %v14611_v3, %v4716_v41  ;;  %v14620_v5 = vadd.f32 %v18044_v15, %v18043_v20  ;;  %vm4724_vm8 = vweird.f32 %v14584_v17  ;;  %v4563_v12 = vadd.f32 %v4394_v56, %v4040_v28  ;;  %v8880_v63 = vld [vmem:[%s17232_s3 + $0x1c8] sm:$0xff]  ;;  %5608 = vmatpush.msra.mxu2 %v8864_v51  ;;  %5952 = vmatpush.msra.mxu0 %v8897_v23  ;;  %v18049_v15 = vld [vmem:[#allocation251_spill] sm:$0xff]  ;;  %v18051_v51 = vld [vmem:[#allocation160_spill] sm:$0xff] }
 0x4da   : > { %v4721_v31 = vmul.f32 %v14584_v17, %v4720_v48  ;;  %v14635_v7 = vadd.f32 %v14536_v49, %v14269_v9  ;;  %v4042_v45 = vadd.f32 %v3874_v46, %v3683_v1  ;;  %vm4723_vm9 = vweird.f32 %v14522_v43  ;;  %v3935_v28 = vpop.f32.mrf.mxu2  ;;  %5673 = vmatpush.msra.mxu3 %v8880_v63  ;;  %v4000_v4 = vpop.f32.mrf.mxu3  ;;  %6017 = vmatpush.msra.mxu1 %v8913_v40  ;;  %v18052_v40 = vld [vmem:[#allocation253_spill] sm:$0xff]  ;;  %v8879_v9 = vld [vmem:[%s17232_s3 + $0x1c0] sm:$0xff] }
 0x4db   : > { %4457 = vmatmul.f32.gmra.mxu2 %v18038_v19  ;;  %4522 = vmatmul.f32.gmra.mxu3 %v18042_v44  ;;  %5207 = vst [vmem:[#allocation3 + $0x150] sm:$0xff] %v14614_v59  ;;  %v5351_v29 = vrot.slane %v14614_v59, 7  ;;  %vm14646_vm10 = vcmp.eq.f32.partialorder %v4727_v22, 8.507059e+37  ;;  %v4730_v49 = vor.u32 1.1754944e-38, %v4729_v30  ;;  %v8831_v46 = vmul.f32 -1.442695, %v4563_v12  ;;  %vm4725_vm11 = vmor %vm4723_vm9, %vm4724_vm8  ;;  %v4331_v56 = vpop.f32.mrf.mxu0 }
 0x4dc   : > { %v14643_v26 = vpop.eup %9213  ;;  %v4722_v10 = vadd.f32 %v14584_v17, %v4721_v31  ;;  %v4001_v14 = vadd.f32 %v4000_v4, %v3935_v28  ;;  %v5362_v30 = vsel %vm495_vm0, %v5357_v2, %v5361_v27  ;;  %v14664_v19 = vld [vmem:[#allocation3 + $0x70] sm:$0xff]  ;;  %v4742_v35 = vand.u32 2147483647, %v14579_v34  ;;  %v14675_v2 = vld [vmem:[#allocation3 + $0x158] sm:$0xff]  ;;  %v18054_v4 = vld [vmem:[#allocation164_spill] sm:$0xff]  ;;  %5674 = vmatpush.msra.mxu3 %v8879_v9 }
 0x4dd   : > { %v9216_v41 = vpop.eup %9215  ;;  %v4734_v48 = vmul.f32 %v14643_v26, %v14579_v34  ;;  %v5352_v22 = vsel %vm495_vm0, %v5347_v47, %v5351_v29  ;;  %9217 = vpow2.f32 %v8831_v46  ;;  %v18047_v59 = vld [vmem:[#allocation254_spill] sm:$0xff]  ;;  %18048 = vst [vmem:[#allocation33_spill] sm:$0xff] %v14675_v2  ;;  %v5365_v31 = vrot.slane %v14664_v19, 7  ;;  %v18061_v9 = vld [vmem:[#allocation212_spill] sm:$0xff] }
 0x4de   : > { %v4726_v43 = vsel %vm4725_vm11, %v14584_v17, %v4722_v10  ;;  %v14668_v61 = vadd.f32 1.0, %v9216_v41  ;;  %v4396_v1 = vpop.f32.mrf.mxu1  ;;  %5520 = vmatmul.f32.gmra.mxu1 %v5352_v22  ;;  %v14673_v44 = vadd.f32 %v4001_v14, %v18047_v59  ;;  %v4744_v17 = vand.u32 2147483648, %v14579_v34  ;;  %v18050_v12 = vld [vmem:[#allocation158_spill] sm:$0xff]  ;;  %v8863_v10 = vld [vmem:[%s17232_s3 + $0x140] sm:$0xff]  ;;  %v18056_v14 = vld [vmem:[#allocation211_spill] sm:$0xff] }
 0x4df   : > { %v4731_v25 = vsel %vm14646_vm10, %v4730_v49, %v4726_v43  ;;  %v4735_v47 = vsub.f32 1.0, %v4734_v48  ;;  %v4397_v18 = vadd.f32 %v4396_v1, %v4331_v56  ;;  %v2998_v63 = vadd.f32 %v18051_v51, %v18050_v12  ;;  %v8896_v49 = vld [vmem:[%s17232_s3 + $0x248] sm:$0xff]  ;;  %v18053_v46 = vld [vmem:[#allocation162_spill] sm:$0xff]  ;;  %5609 = vmatpush.msra.mxu2 %v8863_v10 }
 0x4e0   : > { %v14678_v20 = vmul.f32 %v14675_v2, %v4731_v25  ;;  %9219 = vrcp.f32 %v14668_v61  ;;  %5464 = vmatmul.f32.gmra.mxu0 %v5362_v30  ;;  %vm4739_vm12 = vweird.f32 %v14643_v26  ;;  %v3001_v41 = vadd.f32 %v18054_v4, %v18053_v46  ;;  %v18055_v48 = vld [vmem:[#allocation210_spill] sm:$0xff]  ;;  %v8912_v56 = vld [vmem:[%s17232_s3 + $0x2c8] sm:$0xff]  ;;  %v18057_v30 = vld [vmem:[#allocation255_spill] sm:$0xff] }
 0x4e1   : > { %v4736_v23 = vmul.f32 %v14643_v26, %v4735_v47  ;;  %v4565_v28 = vadd.f32 %v4397_v18, %v4042_v45  ;;  %v3518_v45 = vadd.f32 %v18056_v14, %v18055_v48  ;;  %v18058_v43 = vld [vmem:[#allocation257_spill] sm:$0xff]  ;;  %vm4738_vm13 = vweird.f32 %v14579_v34  ;;  %5953 = vmatpush.msra.mxu0 %v8896_v49  ;;  %6018 = vmatpush.msra.mxu1 %v8912_v56  ;;  %v14739_v48 = vld [vmem:[#allocation3 + $0xe0] sm:$0xff]  ;;  %v14806_v19 = vld [vmem:[#allocation3 + $0x130] sm:$0xff] }
 0x4e2   : > { %5208 = vst [vmem:[#allocation3 + $0x158] sm:$0xff] %v14678_v20  ;;  %v5355_v22 = vrot.slane %v14678_v20, 7  ;;  %v3877_v1 = vadd.f32 %v18058_v43, %v18057_v30  ;;  %v3938_v59 = vpop.f32.mrf.mxu2  ;;  %vm14713_vm14 = vmor %vm4738_vm13, %vm4739_vm12  ;;  %vm4743_vm15 = vcmp.eq.f32.partialorder %v4742_v35, 8.507059e+37  ;;  %v4745_v20 = vor.u32 1.1754944e-38, %v4744_v17  ;;  %v4003_v12 = vpop.f32.mrf.mxu3  ;;  %v18062_v49 = vld [vmem:[#allocation213_spill] sm:$0xff]  ;;  %v18066_v30 = vld [vmem:[#allocation259_spill] sm:$0xff] }
 0x4e3   : > { %4460 = vmatmul.f32.gmra.mxu2 %v18049_v15  ;;  %4525 = vmatmul.f32.gmra.mxu3 %v18052_v40  ;;  %v4737_v25 = vadd.f32 %v14643_v26, %v4736_v23  ;;  %v8832_v47 = vmul.f32 -1.442695, %v4565_v28  ;;  %v9218_v18 = vpop.eup %9217  ;;  %v5366_v34 = vsel %vm495_vm0, %v5361_v27, %v5365_v31  ;;  %v4004_v40 = vadd.f32 %v4003_v12, %v3938_v59  ;;  %v4334_v10 = vpop.f32.mrf.mxu0  ;;  %v14734_v4 = vld [vmem:[#allocation3 + $0x88] sm:$0xff] }
 0x4e4   : > { %v5356_v51 = vsel %vm495_vm0, %v5351_v29, %v5355_v22  ;;  %v14726_v28 = vadd.f32 1.0, %v9218_v18  ;;  %v3164_v17 = vadd.f32 %v2998_v63, %v14272_v16  ;;  %v3685_v29 = vadd.f32 %v3518_v45, %v14635_v7  ;;  %18063 = vst [vmem:[#allocation34_spill] sm:$0xff] %v14739_v48  ;;  %v18064_v63 = vld [vmem:[#allocation260_spill] sm:$0xff]  ;;  %v18065_v45 = vld [vmem:[#allocation262_spill] sm:$0xff] }
 0x4e5   : > { %v4741_v23 = vsel %vm14713_vm14, %v14643_v26, %v4737_v25  ;;  %9221 = vpow2.f32 %v8832_v47  ;;  %v3521_v36 = vadd.f32 %v18062_v49, %v18061_v9  ;;  %v14737_v26 = vadd.f32 %v3001_v41, %v14283_v8  ;;  %v18067_v25 = vld [vmem:[#allocation256_spill] sm:$0xff]  ;;  %v18068_v47 = vld [vmem:[#allocation258_spill] sm:$0xff]  ;;  %v8862_v9 = vld [vmem:[%s17232_s3 + $0x138] sm:$0xff] }
 0x4e6   : > { %v14728_v35 = vpop.eup %9219  ;;  %v4746_v46 = vsel %vm4743_vm15, %v4745_v20, %v4741_v23  ;;  %v4399_v27 = vpop.f32.mrf.mxu1  ;;  %5523 = vmatmul.f32.gmra.mxu1 %v5356_v51  ;;  %9223 = vrcp.f32 %v14726_v28  ;;  %v4044_v7 = vadd.f32 %v3877_v1, %v3685_v29  ;;  %v3880_v56 = vadd.f32 %v18065_v45, %v18064_v63  ;;  %v18069_v51 = vld [vmem:[#allocation214_spill] sm:$0xff]  ;;  %v8895_v49 = vld [vmem:[%s17232_s3 + $0x240] sm:$0xff]  ;;  %5610 = vmatpush.msra.mxu2 %v8862_v9 }
 0x4e7   : > { %v14742_v14 = vmul.f32 %v14739_v48, %v4746_v46  ;;  %v4749_v16 = vmul.f32 %v14728_v35, %v14668_v61  ;;  %v14750_v43 = vadd.f32 %v4004_v40, %v18066_v30  ;;  %v4400_v41 = vadd.f32 %v4399_v27, %v4334_v10  ;;  %v18071_v27 = vld [vmem:[#allocation15_spill] sm:$0xff]  ;;  %v8911_v30 = vld [vmem:[%s17232_s3 + $0x2c0] sm:$0xff]  ;;  %5954 = vmatpush.msra.mxu0 %v8895_v49 }
 0x4e8   : > { %5467 = vmatmul.f32.gmra.mxu0 %v5366_v34  ;;  %v5369_v18 = vrot.slane %v14734_v4, 7  ;;  %v3687_v1 = vadd.f32 %v3521_v36, %v3164_v17  ;;  %vm4754_vm2 = vweird.f32 %v14728_v35  ;;  %v4757_v15 = vand.u32 2147483647, %v14668_v61  ;;  %v18070_v34 = vld [vmem:[#allocation215_spill] sm:$0xff]  ;;  %6019 = vmatpush.msra.mxu1 %v8911_v30  ;;  %v18075_v9 = vld [vmem:[#allocation264_spill] sm:$0xff]  ;;  %v8857_v4 = vld [vmem:[%s17232_s3 + $0x110] sm:$0xff] }
 0x4e9   : > { %5209 = vst [vmem:[#allocation3 + $0xe0] sm:$0xff] %v14742_v14  ;;  %v4750_v8 = vsub.f32 1.0, %v4749_v16  ;;  %v5359_v59 = vrot.slane %v14742_v14, 7  ;;  %v4759_v20 = vand.u32 2147483648, %v14668_v61  ;;  %v3524_v23 = vadd.f32 %v18070_v34, %v18069_v51  ;;  %v8878_v17 = vld [vmem:[%s17232_s3 + $0x1b8] sm:$0xff]  ;;  %v18072_v16 = vld [vmem:[#allocation18_spill] sm:$0xff] }
 0x4ea   : > { %v4567_v10 = vadd.f32 %v4400_v41, %v4044_v7  ;;  %v3941_v29 = vpop.f32.mrf.mxu2  ;;  %v4046_v46 = vadd.f32 %v3880_v56, %v3687_v1  ;;  %v3883_v7 = vadd.f32 %v18072_v16, %v18071_v27  ;;  %vm4753_vm3 = vweird.f32 %v14668_v61  ;;  %v4006_v45 = vpop.f32.mrf.mxu3  ;;  %5675 = vmatpush.msra.mxu3 %v8878_v17  ;;  %v8861_v34 = vld [vmem:[%s17232_s3 + $0x130] sm:$0xff]  ;;  %v8860_v27 = vld [vmem:[%s17232_s3 + $0x128] sm:$0xff]  ;;  %v14828_v30 = vld [vmem:[#allocation3 + $0x20] sm:$0xff] }
 0x4eb   : > { %4463 = vmatmul.f32.gmra.mxu2 %v18067_v25  ;;  %4528 = vmatmul.f32.gmra.mxu3 %v18068_v47  ;;  %v9222_v12 = vpop.eup %9221  ;;  %v4751_v40 = vmul.f32 %v14728_v35, %v4750_v8  ;;  %v5360_v36 = vsel %vm495_vm0, %v5355_v22, %v5359_v59  ;;  %vm14788_vm4 = vmor %vm4753_vm3, %vm4754_vm2  ;;  %v4007_v56 = vadd.f32 %v4006_v45, %v3941_v29  ;;  %v4337_v41 = vpop.f32.mrf.mxu0  ;;  %vm4758_vm5 = vcmp.eq.f32.partialorder %v4757_v15, 8.507059e+37  ;;  %v18078_v22 = vld [vmem:[#allocation263_spill] sm:$0xff] }
 0x4ec   : > { %v14778_v63 = vadd.f32 1.0, %v9222_v12  ;;  %v14783_v25 = vpop.eup %9223  ;;  %v8833_v61 = vmul.f32 -1.442695, %v4567_v10  ;;  %v5370_v47 = vsel %vm495_vm0, %v5365_v31, %v5369_v18  ;;  %v4760_v1 = vor.u32 1.1754944e-38, %v4759_v20  ;;  %5611 = vmatpush.msra.mxu2 %v8861_v34  ;;  %18077 = vst [vmem:[#allocation35_spill] sm:$0xff] %v14828_v30 }
 0x4ed   : > { %v4752_v8 = vadd.f32 %v14728_v35, %v4751_v40  ;;  %v4764_v12 = vmul.f32 %v14783_v25, %v14726_v28  ;;  %v8877_v40 = vld [vmem:[%s17232_s3 + $0x1b0] sm:$0xff]  ;;  %v4772_v15 = vand.u32 2147483647, %v14726_v28  ;;  %v4774_v20 = vand.u32 2147483648, %v14726_v28 }
 0x4ee   : > { %9225 = vrcp.f32 %v14778_v63  ;;  %v4402_v51 = vpop.f32.mrf.mxu1  ;;  %5526 = vmatmul.f32.gmra.mxu1 %v5360_v36  ;;  %5676 = vmatpush.msra.mxu3 %v8877_v40  ;;  %v14814_v17 = vadd.f32 %v4007_v56, %v18075_v9  ;;  %v18076_v36 = vld [vmem:[#allocation261_spill] sm:$0xff]  ;;  %v14825_v16 = vadd.f32 %v14608_v50, %v14187_v32  ;;  %v3689_v45 = vadd.f32 %v3524_v23, %v14737_v26  ;;  %v8894_v50 = vld [vmem:[%s17232_s3 + $0x238] sm:$0xff]  ;;  %v8859_v23 = vld [vmem:[%s17232_s3 + $0x120] sm:$0xff] }
 0x4ef   : > { %v4756_v31 = vsel %vm14788_vm4, %v14728_v35, %v4752_v8  ;;  %9227 = vpow2.f32 %v8833_v61  ;;  %v4765_v29 = vsub.f32 1.0, %v4764_v12  ;;  %v4403_v49 = vadd.f32 %v4402_v51, %v4337_v41  ;;  %v8876_v35 = vld [vmem:[%s17232_s3 + $0x1a8] sm:$0xff]  ;;  %5612 = vmatpush.msra.mxu2 %v8860_v27  ;;  %v8910_v26 = vld [vmem:[%s17232_s3 + $0x2b8] sm:$0xff]  ;;  %5955 = vmatpush.msra.mxu0 %v8894_v50  ;;  %v8875_v51 = vld [vmem:[%s17232_s3 + $0x1a0] sm:$0xff] }
 0x4f0   : > { %v4761_v10 = vsel %vm4758_vm5, %v4760_v1, %v4756_v31  ;;  %5470 = vmatmul.f32.gmra.mxu0 %v5370_v47  ;;  %v5373_v61 = vrot.slane %v14806_v19, 7  ;;  %v14837_v56 = vadd.f32 %v14620_v5, %v14192_v53  ;;  %vm4769_vm6 = vweird.f32 %v14783_v25  ;;  %5677 = vmatpush.msra.mxu3 %v8876_v35  ;;  %v18079_v53 = vld [vmem:[#allocation166_spill] sm:$0xff]  ;;  %v18080_v5 = vld [vmem:[#allocation169_spill] sm:$0xff]  ;;  %v8858_v9 = vld [vmem:[%s17232_s3 + $0x118] sm:$0xff] }
 0x4f1   : > { %v14831_v8 = vmul.f32 %v14828_v30, %v4761_v10  ;;  %v4766_v41 = vmul.f32 %v14783_v25, %v4765_v29  ;;  %v4569_v32 = vadd.f32 %v4403_v49, %v4046_v46  ;;  %v3004_v47 = vadd.f32 %v18080_v5, %v18079_v53  ;;  %6020 = vmatpush.msra.mxu1 %v8910_v26  ;;  %v8874_v49 = vld [vmem:[%s17232_s3 + $0x198] sm:$0xff]  ;;  %v18085_v26 = vld [vmem:[#allocation21_spill] sm:$0xff]  ;;  %v14907_v53 = vld [vmem:[#allocation3 + $0x50] sm:$0xff] }
 0x4f2   : > { %v4048_v1 = vadd.f32 %v3883_v7, %v3689_v45  ;;  %vm4768_vm7 = vweird.f32 %v14726_v28  ;;  %v3944_v46 = vpop.f32.mrf.mxu2  ;;  %vm14861_vm8 = vcmp.eq.f32.partialorder %v4772_v15, 8.507059e+37  ;;  %v4775_v7 = vor.u32 1.1754944e-38, %v4774_v20  ;;  %v4009_v29 = vpop.f32.mrf.mxu3  ;;  %5613 = vmatpush.msra.mxu2 %v8859_v23  ;;  %5678 = vmatpush.msra.mxu3 %v8875_v51  ;;  %18086 = vst [vmem:[#allocation36_spill] sm:$0xff] %v14907_v53  ;;  %v18087_v51 = vld [vmem:[#allocation16_spill] sm:$0xff]  ;;  %v8856_v31 = vld [vmem:[%s17232_s3 + $0x108] sm:$0xff]  ;;  %v8909_v15 = vld [vmem:[%s17232_s3 + $0x2b0] sm:$0xff] }
 0x4f3   : > { %4466 = vmatmul.f32.gmra.mxu2 %v18076_v36  ;;  %4531 = vmatmul.f32.gmra.mxu3 %v18078_v22  ;;  %5210 = vst [vmem:[#allocation3 + $0x20] sm:$0xff] %v14831_v8  ;;  %v5363_v12 = vrot.slane %v14831_v8, 7  ;;  %v4767_v40 = vadd.f32 %v14783_v25, %v4766_v41  ;;  %v8834_v10 = vmul.f32 -1.442695, %v4569_v32  ;;  %vm14875_vm9 = vmor %vm4768_vm7, %vm4769_vm6  ;;  %v4010_v27 = vadd.f32 %v4009_v29, %v3944_v46  ;;  %v4340_v35 = vpop.f32.mrf.mxu0  ;;  %v14891_v22 = vld [vmem:[#allocation3 + $0xa8] sm:$0xff]  ;;  %v18101_v19 = vld [vmem:[#allocation218_spill] sm:$0xff] }
 0x4f4   : > { %v14858_v34 = vpop.eup %9225  ;;  %v5374_v28 = vsel %vm495_vm0, %v5369_v18, %v5373_v61  ;;  %v4787_v32 = vand.u32 2147483647, %v14778_v63  ;;  %5614 = vmatpush.msra.mxu2 %v8858_v9  ;;  %5679 = vmatpush.msra.mxu3 %v8874_v49  ;;  %v4789_v46 = vand.u32 2147483648, %v14778_v63  ;;  %v18088_v49 = vld [vmem:[#allocation19_spill] sm:$0xff]  ;;  %vm4783_vm11 = vweird.f32 %v14778_v63  ;;  %v15313_v30 = vld [vmem:[#allocation3 + $0x128] sm:$0xff] }
 0x4f5   : > { %v9228_v36 = vpop.eup %9227  ;;  %v4779_v20 = vmul.f32 %v14858_v34, %v14778_v63  ;;  %v5364_v45 = vsel %vm495_vm0, %v5359_v59, %v5363_v12  ;;  %v4771_v41 = vsel %vm14875_vm9, %v14783_v25, %v4767_v40  ;;  %9229 = vpow2.f32 %v8834_v10  ;;  %v8873_v40 = vld [vmem:[%s17232_s3 + $0x190] sm:$0xff]  ;;  %6021 = vmatpush.msra.mxu1 %v8909_v15 }
 0x4f6   : > { %v14897_v50 = vadd.f32 1.0, %v9228_v36  ;;  %v4405_v14 = vpop.f32.mrf.mxu1  ;;  %5529 = vmatmul.f32.gmra.mxu1 %v5364_v45  ;;  %v4776_v59 = vsel %vm14861_vm8, %v4775_v7, %v4771_v41  ;;  %v14905_v23 = vadd.f32 %v4010_v27, %v18085_v26  ;;  %v5377_v7 = vrot.slane %v14891_v22, 7  ;;  %v8893_v36 = vld [vmem:[%s17232_s3 + $0x230] sm:$0xff]  ;;  %5615 = vmatpush.msra.mxu2 %v8857_v4  ;;  %v18090_v27 = vld [vmem:[#allocation173_spill] sm:$0xff]  ;;  %v8855_v41 = vld [vmem:[%s17232_s3 + $0x100] sm:$0xff] }
 0x4f7   : > { %v4780_v18 = vsub.f32 1.0, %v4779_v20  ;;  %v4406_v25 = vadd.f32 %v4405_v14, %v4340_v35  ;;  %v14910_v5 = vmul.f32 %v14907_v53, %v4776_v59  ;;  %v3168_v10 = vadd.f32 %v3004_v47, %v14352_v39  ;;  %v18089_v20 = vld [vmem:[#allocation171_spill] sm:$0xff]  ;;  %v18091_v39 = vld [vmem:[#allocation216_spill] sm:$0xff]  ;;  %v18092_v47 = vld [vmem:[#allocation217_spill] sm:$0xff]  ;;  %5956 = vmatpush.msra.mxu0 %v8893_v36  ;;  %5680 = vmatpush.msra.mxu3 %v8873_v40 }
 0x4f8   : > { %9231 = vrcp.f32 %v14897_v50  ;;  %5473 = vmatmul.f32.gmra.mxu0 %v5374_v28  ;;  %vm4784_vm10 = vweird.f32 %v14858_v34  ;;  %v3007_v35 = vadd.f32 %v18090_v27, %v18089_v20  ;;  %v3527_v45 = vadd.f32 %v18092_v47, %v18091_v39  ;;  %v8872_v28 = vld [vmem:[%s17232_s3 + $0x188] sm:$0xff]  ;;  %v18093_v14 = vld [vmem:[#allocation22_spill] sm:$0xff]  ;;  %5616 = vmatpush.msra.mxu2 %v8856_v31  ;;  %v8871_v40 = vld [vmem:[%s17232_s3 + $0x180] sm:$0xff] }
 0x4f9   : > { %v4781_v29 = vmul.f32 %v14858_v34, %v4780_v18  ;;  %v4571_v9 = vadd.f32 %v4406_v25, %v4048_v1  ;;  %5211 = vst [vmem:[#allocation3 + $0x50] sm:$0xff] %v14910_v5  ;;  %v5367_v1 = vrot.slane %v14910_v5, 7  ;;  %v18094_v4 = vld [vmem:[#allocation25_spill] sm:$0xff]  ;;  %vm14950_vm12 = vmor %vm4783_vm11, %vm4784_vm10  ;;  %vm14954_vm13 = vcmp.eq.f32.partialorder %v4787_v32, 8.507059e+37  ;;  %5681 = vmatpush.msra.mxu3 %v8872_v28  ;;  %v18099_v27 = vld [vmem:[#allocation176_spill] sm:$0xff] }
 0x4fa   : > { %v3886_v59 = vadd.f32 %v18094_v4, %v18093_v14  ;;  %v3947_v25 = vpop.f32.mrf.mxu2  ;;  %v4790_v15 = vor.u32 1.1754944e-38, %v4789_v46  ;;  %v4012_v20 = vpop.f32.mrf.mxu3  ;;  %v5378_v31 = vsel %vm495_vm0, %v5373_v61, %v5377_v7  ;;  %5617 = vmatpush.msra.mxu2 %v8855_v41  ;;  %v18100_v39 = vld [vmem:[#allocation178_spill] sm:$0xff]  ;;  %v3691_v14 = vadd.f32 %v3527_v45, %v3168_v10  ;;  %v18102_v4 = vld [vmem:[#allocation219_spill] sm:$0xff] }
 0x4fb   : > { %4469 = vmatmul.f32.gmra.mxu2 %v18087_v51  ;;  %4534 = vmatmul.f32.gmra.mxu3 %v18088_v49  ;;  %v4782_v18 = vadd.f32 %v14858_v34, %v4781_v29  ;;  %v8835_v26 = vmul.f32 -1.442695, %v4571_v9  ;;  %v9230_v51 = vpop.eup %9229  ;;  %v5368_v63 = vsel %vm495_vm0, %v5363_v12, %v5367_v1  ;;  %v4013_v29 = vadd.f32 %v4012_v20, %v3947_v25  ;;  %v4343_v9 = vpop.f32.mrf.mxu0  ;;  %v14985_v28 = vld [vmem:[#allocation3 + $0x118] sm:$0xff]  ;;  %v18104_v25 = vld [vmem:[#allocation12_spill] sm:$0xff] }
 0x4fc   : > { %v14972_v46 = vadd.f32 1.0, %v9230_v51  ;;  %v3010_v47 = vadd.f32 %v18100_v39, %v18099_v27  ;;  %v3530_v61 = vadd.f32 %v18102_v4, %v18101_v19  ;;  %18103 = vst [vmem:[#allocation37_spill] sm:$0xff] %v14985_v28  ;;  %5682 = vmatpush.msra.mxu3 %v8871_v40  ;;  %v4050_v45 = vadd.f32 %v3886_v59, %v3691_v14  ;;  %v18105_v51 = vld [vmem:[#allocation4_spill] sm:$0xff] }
 0x4fd   : > { %v4786_v32 = vsel %vm14950_vm12, %v14858_v34, %v4782_v18  ;;  %9233 = vpow2.f32 %v8835_v26  ;;  %v14982_v18 = vld [vmem:[#allocation3 + $0xc8] sm:$0xff]  ;;  %v3170_v26 = vadd.f32 %v3007_v35, %v14825_v16  ;;  %v3889_v36 = vadd.f32 %v18105_v51, %v18104_v25 }
 0x4fe   : > { %v14974_v12 = vpop.eup %9231  ;;  %v4791_v49 = vsel %vm14954_vm13, %v4790_v15, %v4786_v32  ;;  %v4408_v34 = vpop.f32.mrf.mxu1  ;;  %5532 = vmatmul.f32.gmra.mxu1 %v5368_v63  ;;  %9235 = vrcp.f32 %v14972_v46  ;;  %v18106_v15 = vld [vmem:[#allocation28_spill] sm:$0xff]  ;;  %v18108_v32 = vld [vmem:[#allocation27_spill] sm:$0xff]  ;;  %v5381_v40 = vrot.slane %v14982_v18, 7  ;;  %v3172_v59 = vadd.f32 %v3010_v47, %v14837_v56  ;;  %v8908_v56 = vld [vmem:[%s17232_s3 + $0x2a8] sm:$0xff] }
 0x4ff   : > { %v14988_v41 = vmul.f32 %v14985_v28, %v4791_v49  ;;  %v4794_v10 = vmul.f32 %v14974_v12, %v14897_v50  ;;  %v14996_v20 = vadd.f32 %v4013_v29, %v18106_v15  ;;  %v18107_v63 = vld [vmem:[#allocation24_spill] sm:$0xff]  ;;  %v4409_v35 = vadd.f32 %v4408_v34, %v4343_v9  ;;  %v8892_v49 = vld [vmem:[%s17232_s3 + $0x228] sm:$0xff]  ;;  %6022 = vmatpush.msra.mxu1 %v8908_v56 }
 0x500   : > { %5476 = vmatmul.f32.gmra.mxu0 %v5378_v31  ;;  %v3693_v39 = vadd.f32 %v3530_v61, %v3170_v26  ;;  %v4802_v14 = vand.u32 2147483647, %v14897_v50  ;;  %v4804_v29 = vand.u32 2147483648, %v14897_v50  ;;  %vm4799_vm14 = vweird.f32 %v14974_v12  ;;  %v18109_v61 = vld [vmem:[#allocation174_spill] sm:$0xff]  ;;  %v18110_v34 = vld [vmem:[#allocation220_spill] sm:$0xff] }
 0x501   : > { %5212 = vst [vmem:[#allocation3 + $0x118] sm:$0xff] %v14988_v41  ;;  %v4795_v16 = vsub.f32 1.0, %v4794_v10  ;;  %v5371_v27 = vrot.slane %v14988_v41, 7  ;;  %v4573_v4 = vadd.f32 %v4409_v35, %v4050_v45  ;;  %v3533_v26 = vadd.f32 %v18110_v34, %v18109_v61  ;;  %5957 = vmatpush.msra.mxu0 %v8892_v49  ;;  %v5255_v34 = vld [vmem:[#allocation3 + $0x140] sm:$0x7f] }
 0x502   : > { %v3950_v9 = vpop.f32.mrf.mxu2  ;;  %v4052_v10 = vadd.f32 %v3889_v36, %v3693_v39  ;;  %vm4798_vm15 = vweird.f32 %v14897_v50  ;;  %v4015_v25 = vpop.f32.mrf.mxu3  ;;  %v3892_v50 = vadd.f32 %v14039_v11, %v14026_v57  ;;  %v4805_v36 = vor.u32 1.1754944e-38, %v4804_v29 }
 0x503   : > { %4472 = vmatmul.f32.gmra.mxu2 %v18107_v63  ;;  %4537 = vmatmul.f32.gmra.mxu3 %v18108_v32  ;;  %v9234_v19 = vpop.eup %9233  ;;  %v4796_v31 = vmul.f32 %v14974_v12, %v4795_v16  ;;  %v5372_v47 = vsel %vm495_vm0, %v5367_v1, %v5371_v27  ;;  %v8836_v63 = vmul.f32 -1.442695, %v4573_v4  ;;  %v4016_v16 = vadd.f32 %v4015_v25, %v3950_v9  ;;  %v4346_v35 = vpop.f32.mrf.mxu0  ;;  %vm4800_vm2 = vmor %vm4798_vm15, %vm4799_vm14  ;;  %v15040_v4 = vld [vmem:[#allocation3 + $0x108] sm:$0xff]  ;;  %v18118_v25 = vld [vmem:[#allocation7_spill] sm:$0xff] }
 0x504   : > { %v15020_v45 = vadd.f32 1.0, %v9234_v19  ;;  %v9236_v51 = vpop.eup %9235  ;;  %v5382_v1 = vsel %vm495_vm0, %v5377_v7, %v5381_v40  ;;  %vm4803_vm3 = vcmp.eq.f32.partialorder %v4802_v14, 8.507059e+37  ;;  %v4817_v22 = vand.u32 2147483647, %v14972_v46  ;;  %18111 = vst [vmem:[#allocation38_spill] sm:$0xff] %v15040_v4  ;;  %v18112_v14 = vld [vmem:[#allocation5_spill] sm:$0xff] }
 0x505   : > { %v4797_v15 = vadd.f32 %v14974_v12, %v4796_v31  ;;  %v4809_v32 = vmul.f32 %v9236_v51, %v14972_v46  ;;  %v15037_v57 = vadd.f32 %v4016_v16, %v13974_v42  ;;  %v3695_v29 = vadd.f32 %v3533_v26, %v3172_v59  ;;  %v8891_v42 = vld [vmem:[%s17232_s3 + $0x220] sm:$0xff] }
 0x506   : > { %9237 = vrcp.f32 %v15020_v45  ;;  %v4411_v39 = vpop.f32.mrf.mxu1  ;;  %5535 = vmatmul.f32.gmra.mxu1 %v5372_v47  ;;  %vm4814_vm4 = vweird.f32 %v9236_v51  ;;  %vm4813_vm5 = vweird.f32 %v14972_v46  ;;  %5958 = vmatpush.msra.mxu0 %v8891_v42  ;;  %vm15058_vm6 = vcmp.eq.f32.partialorder %v4817_v22, 8.507059e+37 }
 0x507   : > { %v4801_v19 = vsel %vm4800_vm2, %v14974_v12, %v4797_v15  ;;  %9239 = vpow2.f32 %v8836_v63  ;;  %v4810_v31 = vsub.f32 1.0, %v4809_v32  ;;  %v4412_v11 = vadd.f32 %v4411_v39, %v4346_v35  ;;  %vm4815_vm7 = vmor %vm4813_vm5, %vm4814_vm4 }
 0x508   : > { %v4806_v7 = vsel %vm4803_vm3, %v4805_v36, %v4801_v19  ;;  %5479 = vmatmul.f32.gmra.mxu0 %v5382_v1  ;;  %v4819_v12 = vand.u32 2147483648, %v14972_v46  ;;  %v4054_v59 = vadd.f32 %v3892_v50, %v3695_v29  ;;  %v5385_v16 = vrot.slane %v5255_v34, 7  ;;  %v18115_v29 = vld [vmem:[#allocation8_spill] sm:$0xff] }
 0x509   : > { %v15043_v9 = vmul.f32 %v15040_v4, %v4806_v7  ;;  %v4811_v49 = vmul.f32 %v9236_v51, %v4810_v31  ;;  %v4575_v56 = vadd.f32 %v4412_v11, %v4052_v10  ;;  %v4832_v19 = vand.u32 2147483647, %v15020_v45 }
 0x50a   : > { %v3953_v47 = vpop.f32.mrf.mxu2  ;;  %v4820_v46 = vor.u32 1.1754944e-38, %v4819_v12  ;;  %v4834_v42 = vand.u32 2147483648, %v15020_v45  ;;  %vm4828_vm9 = vweird.f32 %v15020_v45 }
 0x50b   : > { %4475 = vmatmul.f32.gmra.mxu2 %v13946_v52  ;;  %4540 = vmatmul.f32.gmra.mxu3 %v18112_v14  ;;  %v8907_v52 = vld [vmem:[%s17232_s3 + $0x2a0] sm:$0xff]  ;;  %5213 = vst [vmem:[#allocation3 + $0x108] sm:$0xff] %v15043_v9  ;;  %v5375_v61 = vrot.slane %v15043_v9, 7  ;;  %v4812_v10 = vadd.f32 %v9236_v51, %v4811_v49  ;;  %v8837_v15 = vmul.f32 -1.442695, %v4575_v56  ;;  %v15082_v49 = vld [vmem:[#allocation3 + $0xb8] sm:$0xff] }
 0x50c   : > { %6023 = vmatpush.msra.mxu1 %v8907_v52  ;;  %v15056_v26 = vpop.eup %9237  ;;  %18116 = vst [vmem:[#allocation39_spill] sm:$0xff] %v15082_v49  ;;  %v18117_v52 = vld [vmem:[#allocation6_spill] sm:$0xff]  ;;  %vm15120_vm11 = vcmp.eq.f32.partialorder %v4832_v19, 8.507059e+37  ;;  %v8887_v19 = vld [vmem:[%s17232_s3 + $0x200] sm:$0xff] }
 0x50d   : > { %v9240_v35 = vpop.eup %9239  ;;  %v4824_v1 = vmul.f32 %v15056_v26, %v15020_v45  ;;  %v4349_v36 = vpop.f32.mrf.mxu0  ;;  %v5376_v32 = vsel %vm495_vm0, %v5371_v27, %v5375_v61  ;;  %v4816_v39 = vsel %vm4815_vm7, %v9236_v51, %v4812_v10  ;;  %9241 = vpow2.f32 %v8837_v15  ;;  %v8890_v27 = vld [vmem:[%s17232_s3 + $0x218] sm:$0xff]  ;;  %v8889_v15 = vld [vmem:[%s17232_s3 + $0x210] sm:$0xff] }
 0x50e   : > { %v4018_v63 = vpop.f32.mrf.mxu3  ;;  %v15069_v22 = vadd.f32 1.0, %v9240_v35  ;;  %v4414_v7 = vpop.f32.mrf.mxu1  ;;  %5538 = vmatmul.f32.gmra.mxu1 %v5376_v32  ;;  %v4821_v31 = vsel %vm15058_vm6, %v4820_v46, %v4816_v39  ;;  %v8906_v51 = vld [vmem:[%s17232_s3 + $0x298] sm:$0xff]  ;;  %5959 = vmatpush.msra.mxu0 %v8890_v27  ;;  %vm4829_vm8 = vweird.f32 %v15056_v26  ;;  %v8888_v46 = vld [vmem:[%s17232_s3 + $0x208] sm:$0xff]  ;;  %v4835_v39 = vor.u32 1.1754944e-38, %v4834_v42 }
 0x50f   : > { %v4019_v50 = vadd.f32 %v4018_v63, %v3953_v47  ;;  %v4825_v11 = vsub.f32 1.0, %v4824_v1  ;;  %v4415_v14 = vadd.f32 %v4414_v7, %v4349_v36  ;;  %v15085_v56 = vmul.f32 %v15082_v49, %v4821_v31  ;;  %6024 = vmatpush.msra.mxu1 %v8906_v51  ;;  %v8905_v63 = vld [vmem:[%s17232_s3 + $0x290] sm:$0xff]  ;;  %v8904_v1 = vld [vmem:[%s17232_s3 + $0x288] sm:$0xff]  ;;  %vm15116_vm10 = vmor %vm4828_vm9, %vm4829_vm8 }
 0x510   : > { %9243 = vrcp.f32 %v15069_v22  ;;  %v5386_v47 = vsel %vm495_vm0, %v5381_v40, %v5385_v16  ;;  %5960 = vmatpush.msra.mxu0 %v8889_v15  ;;  %v4847_v32 = vand.u32 2147483647, %v15069_v22  ;;  %vm4843_vm13 = vweird.f32 %v15069_v22  ;;  %v15286_v49 = vld [vmem:[#allocation3 + $0x110] sm:$0xff] }
 0x511   : > { %v15074_v12 = vadd.f32 %v4019_v50, %v18115_v29  ;;  %v4826_v34 = vmul.f32 %v15056_v26, %v4825_v11  ;;  %v4577_v10 = vadd.f32 %v4415_v14, %v4054_v59  ;;  %5214 = vst [vmem:[#allocation3 + $0xb8] sm:$0xff] %v15085_v56  ;;  %v5379_v40 = vrot.slane %v15085_v56, 7  ;;  %6025 = vmatpush.msra.mxu1 %v8905_v63  ;;  %v15112_v50 = vld [vmem:[#allocation3 + $0x100] sm:$0xff]  ;;  %v5748_v11 = vld [vmem:[#allocation3 + $0x98] sm:$0xfe] }
 0x512   : > { %v3956_v35 = vpop.f32.mrf.mxu2  ;;  %5482 = vmatmul.f32.gmra.mxu0 %v5386_v47  ;;  %v5850_v29 = vrot.slane %v15112_v50, 1  ;;  %v9455_v63 = vld [vmem:[#allocation3 + $0x98] sm:$0xff]  ;;  %vm4848_vm15 = vcmp.eq.f32.partialorder %v4847_v32, 8.507059e+37  ;;  %v15178_v32 = vld [vmem:[#allocation3 + $0xe8] sm:$0xff] }
 0x513   : > { %4478 = vmatmul.f32.gmra.mxu2 %v18117_v52  ;;  %4543 = vmatmul.f32.gmra.mxu3 %v18118_v25  ;;  %v4827_v16 = vadd.f32 %v15056_v26, %v4826_v34  ;;  %v8838_v59 = vmul.f32 -1.442695, %v4577_v10  ;;  %v9242_v36 = vpop.eup %9241  ;;  %v5380_v31 = vsel %vm495_vm0, %v5375_v61, %v5379_v40  ;;  %v8903_v61 = vld [vmem:[%s17232_s3 + $0x280] sm:$0xff]  ;;  %v15141_v34 = vld [vmem:[#allocation3 + $0x90] sm:$0xff] }
 0x514   : > { %5961 = vmatpush.msra.mxu0 %v8888_v46  ;;  %v15129_v27 = vadd.f32 1.0, %v9242_v36  ;;  %6026 = vmatpush.msra.mxu1 %v8904_v1  ;;  %18123 = vst [vmem:[#allocation40_spill] sm:$0xff] %v15141_v34  ;;  %v4849_v1 = vand.u32 2147483648, %v15069_v22 }
 0x515   : > { %v4831_v14 = vsel %vm15116_vm10, %v15056_v26, %v4827_v16  ;;  %9245 = vpow2.f32 %v8838_v59  ;;  %v15137_v42 = vpop.f32.mrf.mxu0  ;;  %v5849_v26 = vrot.slane %v5748_v11, 1  ;;  %v9456_v59 = vld [vmem:[#allocation3 + $0xf0] sm:$0xff] }
 0x516   : > { %v4021_v7 = vpop.f32.mrf.mxu3  ;;  %v9244_v52 = vpop.eup %9243  ;;  %v4836_v47 = vsel %vm15120_vm11, %v4835_v39, %v4831_v14  ;;  %5541 = vmatmul.f32.gmra.mxu1 %v5380_v31  ;;  %5962 = vmatpush.msra.mxu0 %v8887_v19  ;;  %9247 = vrcp.f32 %v15129_v27  ;;  %v15159_v39 = vld [vmem:[#allocation3 + $0x30] sm:$0xff]  ;;  %vm4858_vm3 = vweird.f32 %v15129_v27 }
 0x517   : > { %v4022_v51 = vadd.f32 %v4021_v7, %v3956_v35  ;;  %v15144_v10 = vmul.f32 %v15141_v34, %v4836_v47  ;;  %v4839_v25 = vmul.f32 %v9244_v52, %v15069_v22  ;;  %6027 = vmatpush.msra.mxu1 %v8903_v61  ;;  %v5851_v46 = vsel %vm1378_vm1, %v5849_v26, %v5850_v29 }
 0x518   : > { %vm4844_vm12 = vweird.f32 %v9244_v52  ;;  %v5855_v11 = vrot.slane %v15159_v39, 1  ;;  %v4850_v47 = vor.u32 1.1754944e-38, %v4849_v1 }
 0x519   : > { %v15149_v15 = vadd.f32 %v4022_v51, %v14108_v21  ;;  %5215 = vst [vmem:[#allocation3 + $0x90] sm:$0xff] %v15144_v10  ;;  %v4840_v16 = vsub.f32 1.0, %v4839_v25  ;;  %v17331_v35 = vrot.slane %v15144_v10, 7  ;;  %vm4845_vm14 = vmor %vm4843_vm13, %vm4844_vm12 }
 0x51a   : > { %5963 = vmatmul.f32.vlgmr.msra.gmra.mxu0 %v5851_v46  ;;  %v5856_v22 = vsel %vm1378_vm1, %v5850_v29, %v5855_v11  ;;  %v15173_v46 = vld [vmem:[#allocation3 + $0x10] sm:$0xff] }
 0x51b   : > { %5618 = vmatmul.f32.vlgmr.msra.gmra.mxu2 %v9455_v63  ;;  %5683 = vmatmul.f32.vlgmr.msra.gmra.mxu3 %v9456_v59  ;;  %v9246_v50 = vpop.eup %9245  ;;  %v4841_v36 = vmul.f32 %v9244_v52, %v4840_v16  ;;  %v5384_v45 = vsel %vm495_vm0, %v5379_v40, %v17331_v35  ;;  %v9457_v59 = vld [vmem:[#allocation3 + $0x100] sm:$0xff]  ;;  %18125 = vst [vmem:[#allocation42_spill] sm:$0xff] %v15173_v46 }
 0x51c   : > { %v4434_v21 = vpop.f32.mrf.mxu2  ;;  %v15161_v7 = vadd.f32 1.0, %v9246_v50  ;;  %v9248_v14 = vpop.eup %9247  ;;  %v4864_v50 = vand.u32 2147483648, %v15129_v27 }
 0x51d   : > { %v4842_v51 = vadd.f32 %v9244_v52, %v4841_v36  ;;  %v15165_v61 = vpop.f32.mrf.mxu0  ;;  %v4854_v26 = vmul.f32 %v9248_v14, %v15129_v27  ;;  %v9459_v36 = vld [vmem:[#allocation3 + $0x8] sm:$0xff]  ;;  %vm4859_vm2 = vweird.f32 %v9248_v14 }
 0x51e   : > { %v4499_v31 = vpop.f32.mrf.mxu3  ;;  %9249 = vrcp.f32 %v15161_v7  ;;  %5544 = vmatmul.f32.gmra.mxu1 %v5384_v45  ;;  %vm4860_vm4 = vmor %vm4858_vm3, %vm4859_vm2  ;;  %vm4873_vm7 = vweird.f32 %v15161_v7 }
 0x51f   : > { %v4500_v19 = vadd.f32 %v4499_v31, %v4434_v21  ;;  %v4846_v40 = vsel %vm4845_vm14, %v9244_v52, %v4842_v51  ;;  %v4855_v16 = vsub.f32 1.0, %v4854_v26  ;;  %v4862_v52 = vand.u32 2147483647, %v15129_v27  ;;  %v8934_v27 = vld [vmem:[%s17232_s3 + $0x378] sm:$0xff] }
 0x520   : > { %v4851_v63 = vsel %vm4848_vm15, %v4850_v47, %v4846_v40  ;;  %v5859_v51 = vrot.slane %v15178_v32, 1  ;;  %6292 = vmatpush.msrb.mxu2 %v8934_v27  ;;  %v18128_v27 = vrot.slane %v15144_v10, 7 }
 0x521   : > { %v15170_v25 = vadd.f32 %v4500_v19, %v14163_v6  ;;  %v5200_v1 = vmul.f32 %v15173_v46, %v4851_v63  ;;  %v4856_v21 = vmul.f32 %v9248_v14, %v4855_v16  ;;  %v4865_v19 = vor.u32 1.1754944e-38, %v4864_v50  ;;  %v15194_v50 = vpop.f32.mrf.mxu1 }
 0x522   : > { %5966 = vmatmul.f32.gmra.mxu0 %v5856_v22  ;;  %vm4863_vm5 = vcmp.eq.f32.partialorder %v4862_v52, 8.507059e+37  ;;  %v9461_v52 = vld [vmem:[#allocation3 + $0x30] sm:$0xff] }
 0x523   : > { %18124 = vst [vmem:[#allocation41_spill] sm:$0xff] %v15170_v25  ;;  %5621 = vmatmul.f32.gmra.mxu2 %v9457_v59  ;;  %5686 = vmatmul.f32.gmra.mxu3 %v9459_v36  ;;  %v4857_v31 = vadd.f32 %v9248_v14, %v4856_v21  ;;  %v15196_v36 = vld [vmem:[#allocation3 + $0x78] sm:$0xff]  ;;  %v4879_v21 = vand.u32 2147483648, %v15161_v7 }
 0x524   : > { %5216 = vst [vmem:[#allocation3 + $0x10] sm:$0xff] %v5200_v1  ;;  %v4437_v6 = vpop.f32.mrf.mxu2  ;;  %v9250_v45 = vpop.eup %9249  ;;  %v8950_v1 = vld [vmem:[%s17232_s3 + $0x3f8] sm:$0xff] }
 0x525   : > { %v4869_v47 = vmul.f32 %v9250_v45, %v15161_v7  ;;  %v15183_v40 = vpop.f32.mrf.mxu0  ;;  %v4861_v63 = vsel %vm4860_vm4, %v9248_v14, %v4857_v31  ;;  %18127 = vst [vmem:[#allocation44_spill] sm:$0xff] %v15196_v36  ;;  %6357 = vmatpush.msrb.mxu3 %v8950_v1  ;;  %vm4874_vm6 = vweird.f32 %v9250_v45  ;;  %v4877_v31 = vand.u32 2147483647, %v15161_v7 }
 0x526   : > { %v4502_v29 = vpop.f32.mrf.mxu3  ;;  %v4866_v16 = vsel %vm4863_vm5, %v4865_v19, %v4861_v63  ;;  %vm4875_vm8 = vmor %vm4873_vm7, %vm4874_vm6  ;;  %v4880_v1 = vor.u32 1.1754944e-38, %v4879_v21 }
 0x527   : > { %v4503_v26 = vadd.f32 %v4502_v29, %v4437_v6  ;;  %v4870_v59 = vsub.f32 1.0, %v4869_v47  ;;  %v5201_v14 = vmul.f32 %v15196_v36, %v4866_v16  ;;  %v9462_v29 = vld [vmem:[#allocation3 + $0xb0] sm:$0xff]  ;;  %v15203_v16 = vld [vmem:[#allocation3 + $0x68] sm:$0xff]  ;;  %vm4878_vm9 = vcmp.eq.f32.partialorder %v4877_v31, 8.507059e+37 }
 0x528   : > { %v8949_v31 = vld [vmem:[%s17232_s3 + $0x3f0] sm:$0xff] }
 0x529   : > { %v15186_v22 = vadd.f32 %v4503_v26, %v14218_v60  ;;  %v5860_v60 = vsel %vm1378_vm1, %v5855_v11, %v5859_v51  ;;  %v4871_v6 = vmul.f32 %v9250_v45, %v4870_v59  ;;  %5217 = vst [vmem:[#allocation3 + $0x78] sm:$0xff] %v5201_v14  ;;  %v5749_v59 = vld [vmem:[#allocation3 + $0xf0] sm:$0xfe]  ;;  %6358 = vmatpush.msrb.mxu3 %v8949_v31 }
 0x52a   : > { %5969 = vmatmul.f32.gmra.mxu0 %v5860_v60  ;;  %v5751_v60 = vld [vmem:[#allocation3 + $0x8] sm:$0xff]  ;;  %v5852_v46 = vrot.slane %v5749_v59, 1 }
 0x52b   : > { %18126 = vst [vmem:[#allocation43_spill] sm:$0xff] %v15186_v22  ;;  %5624 = vmatmul.f32.gmra.mxu2 %v9461_v52  ;;  %5689 = vmatmul.f32.gmra.mxu3 %v9462_v29  ;;  %v5256_v19 = vld [vmem:[#allocation3 + $0x10] sm:$0x7f]  ;;  %v4872_v47 = vadd.f32 %v9250_v45, %v4871_v6  ;;  %v5863_v52 = vrot.slane %v15203_v16, 1 }
 0x52c   : > { %v5387_v63 = vrot.slane %v5256_v19, 7  ;;  %v15211_v19 = vld [vmem:[#allocation3 + $0x120] sm:$0xff] }
 0x52d   : > { %v4876_v35 = vsel %vm4875_vm8, %v9250_v45, %v4872_v47  ;;  %v15209_v6 = vpop.f32.mrf.mxu0  ;;  %18129 = vst [vmem:[#allocation45_spill] sm:$0xff] %v15211_v19  ;;  %v8933_v45 = vld [vmem:[%s17232_s3 + $0x370] sm:$0xff]  ;;  %v9464_v47 = vld [vmem:[#allocation3 + $0xe8] sm:$0xff] }
 0x52e   : > { %v4440_v26 = vpop.f32.mrf.mxu2  ;;  %v4505_v11 = vpop.f32.mrf.mxu3  ;;  %v5388_v14 = vsel %vm495_vm0, %v18128_v27, %v5387_v63  ;;  %v4881_v7 = vsel %vm4878_vm9, %v4880_v1, %v4876_v35  ;;  %v8966_v35 = vld [vmem:[%s17232_s3 + $0x478] sm:$0xff]  ;;  %v9465_v63 = vld [vmem:[#allocation3 + $0x48] sm:$0xff]  ;;  %v5853_v1 = vrot.slane %v5751_v60, 1  ;;  %6293 = vmatpush.msrb.mxu2 %v8933_v45 }
 0x52f   : > { %v4506_v29 = vadd.f32 %v4505_v11, %v4440_v26  ;;  %5547 = vmatmul.f32.gmra.mxu1 %v5388_v14  ;;  %v5202_v21 = vmul.f32 %v15211_v19, %v4881_v7  ;;  %v5864_v26 = vsel %vm1378_vm1, %v5859_v51, %v5863_v52  ;;  %v15230_v11 = vpop.f32.mrf.mxu1  ;;  %6473 = vmatpush.msrb.mxu0 %v8966_v35  ;;  %v15233_v27 = vld [vmem:[#allocation3 + $0x148] sm:$0xff]  ;;  %v8965_v35 = vld [vmem:[%s17232_s3 + $0x470] sm:$0xff] }
 0x530   : > { %v5867_v7 = vrot.slane %v15233_v27, 1  ;;  %v8932_v45 = vld [vmem:[%s17232_s3 + $0x368] sm:$0xff] }
 0x531   : > { %v15215_v36 = vadd.f32 %v4506_v29, %v14280_v33  ;;  %v8982_v33 = vld [vmem:[%s17232_s3 + $0x4f8] sm:$0xff]  ;;  %5218 = vst [vmem:[#allocation3 + $0x120] sm:$0xff] %v5202_v21  ;;  %v5854_v29 = vsel %vm1378_vm1, %v5852_v46, %v5853_v1  ;;  %v15238_v21 = vld [vmem:[#allocation3 + $0xb0] sm:$0xff]  ;;  %v8948_v46 = vld [vmem:[%s17232_s3 + $0x3e8] sm:$0xff]  ;;  %6294 = vmatpush.msrb.mxu2 %v8932_v45  ;;  %6474 = vmatpush.msrb.mxu0 %v8965_v35 }
 0x532   : > { %6538 = vmatpush.msrb.mxu1 %v8982_v33  ;;  %5972 = vmatmul.f32.gmra.mxu0 %v5864_v26  ;;  %v5868_v33 = vsel %vm1378_vm1, %v5863_v52, %v5867_v7  ;;  %v9467_v26 = vld [vmem:[#allocation3] sm:$0xff] }
 0x533   : > { %18130 = vst [vmem:[#allocation46_spill] sm:$0xff] %v15215_v36  ;;  %5627 = vmatmul.f32.gmra.mxu2 %v9464_v47  ;;  %5692 = vmatmul.f32.gmra.mxu3 %v9465_v63  ;;  %v9466_v47 = vld [vmem:[#allocation3 + $0x68] sm:$0xff]  ;;  %v5857_v63 = vrot.slane %v15238_v21, 1  ;;  %v8931_v35 = vld [vmem:[%s17232_s3 + $0x360] sm:$0xff] }
 0x534   : > { %6359 = vmatpush.msrb.mxu3 %v8948_v46  ;;  %6295 = vmatpush.msrb.mxu2 %v8931_v35 }
 0x535   : > { %v15236_v51 = vpop.f32.mrf.mxu0  ;;  %v5858_v19 = vsel %vm1378_vm1, %v5853_v1, %v5857_v63  ;;  %v8964_v1 = vld [vmem:[%s17232_s3 + $0x468] sm:$0xff] }
 0x536   : > { %v4443_v59 = vpop.f32.mrf.mxu2  ;;  %v4508_v14 = vpop.f32.mrf.mxu3  ;;  %6475 = vmatpush.msrb.mxu0 %v8964_v1  ;;  %v8930_v1 = vld [vmem:[%s17232_s3 + $0x358] sm:$0xff] }
 0x537   : > { %v4509_v31 = vadd.f32 %v4508_v14, %v4443_v59  ;;  %6028 = vmatmul.f32.vlgmr.msra.gmra.mxu1 %v5854_v29  ;;  %v15259_v14 = vld [vmem:[#allocation3 + $0x28] sm:$0xff]  ;;  %6296 = vmatpush.msrb.mxu2 %v8930_v1 }
 0x538   : > { %v5871_v46 = vrot.slane %v15259_v14, 1 }
 0x539   : > { %v15241_v60 = vadd.f32 %v4509_v31, %v14347_v62  ;;  %v8981_v62 = vld [vmem:[%s17232_s3 + $0x4f0] sm:$0xff] }
 0x53a   : > { %6539 = vmatpush.msrb.mxu1 %v8981_v62  ;;  %v15257_v29 = vpop.f32.mrf.mxu1  ;;  %5975 = vmatmul.f32.gmra.mxu0 %v5868_v33  ;;  %v8947_v62 = vld [vmem:[%s17232_s3 + $0x3e0] sm:$0xff]  ;;  %v9468_v33 = vld [vmem:[#allocation3 + $0x148] sm:$0xff] }
 0x53b   : > { %18131 = vst [vmem:[#allocation47_spill] sm:$0xff] %v15241_v60  ;;  %5630 = vmatmul.f32.gmra.mxu2 %v9466_v47  ;;  %5695 = vmatmul.f32.gmra.mxu3 %v9467_v26  ;;  %v15265_v26 = vld [vmem:[#allocation3 + $0x48] sm:$0xff] }
 0x53c   : > { %6360 = vmatpush.msrb.mxu3 %v8947_v62 }
 0x53d   : > { %v15263_v52 = vpop.f32.mrf.mxu0 }
 0x53e   : > { %v4446_v59 = vpop.f32.mrf.mxu2  ;;  %v4511_v31 = vpop.f32.mrf.mxu3 }
 0x53f   : > { %v4512_v47 = vadd.f32 %v4511_v31, %v4446_v59  ;;  %6031 = vmatmul.f32.gmra.mxu1 %v5858_v19  ;;  %v5872_v19 = vsel %vm1378_vm1, %v5867_v7, %v5871_v46  ;;  %v9469_v59 = vld [vmem:[#allocation3 + $0x18] sm:$0xff]  ;;  %v5861_v31 = vrot.slane %v15265_v26, 1 }
 0x541   : > { %v15268_v45 = vadd.f32 %v4512_v47, %v14412_v54  ;;  %v8980_v54 = vld [vmem:[%s17232_s3 + $0x4e8] sm:$0xff]  ;;  %v5862_v28 = vsel %vm1378_vm1, %v5857_v63, %v5861_v31  ;;  %v8963_v63 = vld [vmem:[%s17232_s3 + $0x460] sm:$0xff] }
 0x542   : > { %6540 = vmatpush.msrb.mxu1 %v8980_v54  ;;  %v15284_v34 = vpop.f32.mrf.mxu1  ;;  %5978 = vmatmul.f32.gmra.mxu0 %v5872_v19  ;;  %v8946_v54 = vld [vmem:[%s17232_s3 + $0x3d8] sm:$0xff]  ;;  %v9470_v19 = vld [vmem:[#allocation3 + $0x28] sm:$0xff] }
 0x543   : > { %18132 = vst [vmem:[#allocation48_spill] sm:$0xff] %v15268_v45  ;;  %5633 = vmatmul.f32.gmra.mxu2 %v9468_v33  ;;  %5698 = vmatmul.f32.gmra.mxu3 %v9469_v59  ;;  %v5875_v33 = vrot.slane %v15286_v49, 1  ;;  %v15292_v59 = vld [vmem:[#allocation3] sm:$0xff] }
 0x544   : > { %6361 = vmatpush.msrb.mxu3 %v8946_v54  ;;  %6476 = vmatpush.msrb.mxu0 %v8963_v63  ;;  %v8929_v63 = vld [vmem:[%s17232_s3 + $0x350] sm:$0xff] }
 0x545   : > { %v15290_v7 = vpop.f32.mrf.mxu0  ;;  %6297 = vmatpush.msrb.mxu2 %v8929_v63 }
 0x546   : > { %v4449_v47 = vpop.f32.mrf.mxu2  ;;  %v4514_v62 = vpop.f32.mrf.mxu3 }
 0x547   : > { %v4515_v4 = vadd.f32 %v4514_v62, %v4449_v47  ;;  %6034 = vmatmul.f32.gmra.mxu1 %v5862_v28  ;;  %v5876_v28 = vsel %vm1378_vm1, %v5871_v46, %v5875_v33  ;;  %v5865_v47 = vrot.slane %v15292_v59, 1 }
 0x549   : > { %v15295_v35 = vadd.f32 %v4515_v4, %v14476_v38  ;;  %v8979_v38 = vld [vmem:[%s17232_s3 + $0x4e0] sm:$0xff]  ;;  %v9471_v4 = vld [vmem:[#allocation3 + $0x150] sm:$0xff]  ;;  %v5866_v2 = vsel %vm1378_vm1, %v5861_v31, %v5865_v47  ;;  %v8962_v31 = vld [vmem:[%s17232_s3 + $0x458] sm:$0xff] }
 0x54a   : > { %6541 = vmatpush.msrb.mxu1 %v8979_v38  ;;  %v15311_v53 = vpop.f32.mrf.mxu1  ;;  %5981 = vmatmul.f32.gmra.mxu0 %v5876_v28  ;;  %v8945_v38 = vld [vmem:[%s17232_s3 + $0x3d0] sm:$0xff] }
 0x54b   : > { %18133 = vst [vmem:[#allocation49_spill] sm:$0xff] %v15295_v35  ;;  %5636 = vmatmul.f32.gmra.mxu2 %v9470_v19  ;;  %5701 = vmatmul.f32.gmra.mxu3 %v9471_v4  ;;  %v5879_v19 = vrot.slane %v15313_v30, 1  ;;  %v15319_v4 = vld [vmem:[#allocation3 + $0x18] sm:$0xff]  ;;  %v9472_v28 = vld [vmem:[#allocation3 + $0x110] sm:$0xff] }
 0x54c   : > { %6362 = vmatpush.msrb.mxu3 %v8945_v38  ;;  %6477 = vmatpush.msrb.mxu0 %v8962_v31  ;;  %v8928_v31 = vld [vmem:[%s17232_s3 + $0x348] sm:$0xff] }
 0x54d   : > { %v15317_v46 = vpop.f32.mrf.mxu0  ;;  %6298 = vmatpush.msrb.mxu2 %v8928_v31 }
 0x54e   : > { %v4452_v62 = vpop.f32.mrf.mxu2  ;;  %v4517_v54 = vpop.f32.mrf.mxu3 }
 0x54f   : > { %v4518_v48 = vadd.f32 %v4517_v54, %v4452_v62  ;;  %6037 = vmatmul.f32.gmra.mxu1 %v5866_v2  ;;  %v5880_v2 = vsel %vm1378_vm1, %v5875_v33, %v5879_v19  ;;  %v5869_v62 = vrot.slane %v15319_v4, 1 }
 0x551   : > { %v15322_v1 = vadd.f32 %v4518_v48, %v14549_v37  ;;  %v8978_v37 = vld [vmem:[%s17232_s3 + $0x4d8] sm:$0xff]  ;;  %v5870_v24 = vsel %vm1378_vm1, %v5865_v47, %v5869_v62  ;;  %v8961_v47 = vld [vmem:[%s17232_s3 + $0x450] sm:$0xff] }
 0x552   : > { %v9473_v48 = vld [vmem:[#allocation3 + $0x158] sm:$0xff]  ;;  %6542 = vmatpush.msrb.mxu1 %v8978_v37  ;;  %v15338_v3 = vpop.f32.mrf.mxu1  ;;  %5984 = vmatmul.f32.gmra.mxu0 %v5880_v2  ;;  %v8944_v37 = vld [vmem:[%s17232_s3 + $0x3c8] sm:$0xff] }
 0x553   : > { %18134 = vst [vmem:[#allocation51_spill] sm:$0xff] %v15322_v1  ;;  %5639 = vmatmul.f32.gmra.mxu2 %v9472_v28  ;;  %5704 = vmatmul.f32.gmra.mxu3 %v9473_v48  ;;  %v5883_v28 = vrot.slane %v15340_v13, 1  ;;  %v15346_v48 = vld [vmem:[#allocation3 + $0x150] sm:$0xff]  ;;  %v9474_v2 = vld [vmem:[#allocation3 + $0x128] sm:$0xff] }
 0x554   : > { %6363 = vmatpush.msrb.mxu3 %v8944_v37  ;;  %6478 = vmatpush.msrb.mxu0 %v8961_v47  ;;  %v15367_v1 = vld [vmem:[#allocation3 + $0x70] sm:$0xff]  ;;  %v8927_v47 = vld [vmem:[%s17232_s3 + $0x340] sm:$0xff] }
 0x555   : > { %v15344_v33 = vpop.f32.mrf.mxu0  ;;  %6299 = vmatpush.msrb.mxu2 %v8927_v47  ;;  %v8926_v47 = vld [vmem:[%s17232_s3 + $0x338] sm:$0xff] }
 0x556   : > { %v4455_v54 = vpop.f32.mrf.mxu2  ;;  %v4520_v38 = vpop.f32.mrf.mxu3 }
 0x557   : > { %v4521_v0 = vadd.f32 %v4520_v38, %v4455_v54  ;;  %6040 = vmatmul.f32.gmra.mxu1 %v5870_v24  ;;  %v8977_v24 = vld [vmem:[%s17232_s3 + $0x4d0] sm:$0xff]  ;;  %v5873_v54 = vrot.slane %v15346_v48, 1  ;;  %6300 = vmatpush.msrb.mxu2 %v8926_v47 }
 0x558   : > { %6543 = vmatpush.msrb.mxu1 %v8977_v24  ;;  %v8943_v24 = vld [vmem:[%s17232_s3 + $0x3c0] sm:$0xff]  ;;  %v8941_v47 = vld [vmem:[%s17232_s3 + $0x3b0] sm:$0xff] }
 0x559   : > { %v15349_v63 = vadd.f32 %v4521_v0, %v14603_v58  ;;  %v5884_v0 = vsel %vm1378_vm1, %v5879_v19, %v5883_v28  ;;  %v9475_v58 = vld [vmem:[#allocation3 + $0xe0] sm:$0xff]  ;;  %v5874_v35 = vsel %vm1378_vm1, %v5869_v62, %v5873_v54  ;;  %v8960_v62 = vld [vmem:[%s17232_s3 + $0x448] sm:$0xff]  ;;  %6364 = vmatpush.msrb.mxu3 %v8943_v24 }
 0x55a   : > { %5987 = vmatmul.f32.gmra.mxu0 %v5884_v0  ;;  %v9476_v0 = vld [vmem:[#allocation3 + $0x80] sm:$0xff] }
 0x55b   : > { %18135 = vst [vmem:[#allocation55_spill] sm:$0xff] %v15349_v63  ;;  %5642 = vmatmul.f32.gmra.mxu2 %v9474_v2  ;;  %5707 = vmatmul.f32.gmra.mxu3 %v9475_v58  ;;  %v15365_v63 = vpop.f32.mrf.mxu1  ;;  %v5887_v2 = vrot.slane %v15367_v1, 1  ;;  %v15373_v58 = vld [vmem:[#allocation3 + $0x158] sm:$0xff] }
 0x55c   : > { %6479 = vmatpush.msrb.mxu0 %v8960_v62  ;;  %v8942_v62 = vld [vmem:[%s17232_s3 + $0x3b8] sm:$0xff] }
 0x55d   : > { %v15371_v19 = vpop.f32.mrf.mxu0  ;;  %6365 = vmatpush.msrb.mxu3 %v8942_v62 }
 0x55e   : > { %v4458_v38 = vpop.f32.mrf.mxu2  ;;  %v4523_v37 = vpop.f32.mrf.mxu3 }
 0x55f   : > { %v4524_v55 = vadd.f32 %v4523_v37, %v4458_v38  ;;  %6043 = vmatmul.f32.gmra.mxu1 %v5874_v35  ;;  %v5877_v35 = vrot.slane %v15373_v58, 1  ;;  %6366 = vmatpush.msrb.mxu3 %v8941_v47  ;;  %v8938_v47 = vld [vmem:[%s17232_s3 + $0x398] sm:$0xff] }
 0x561   : > { %v15376_v31 = vadd.f32 %v4524_v55, %v14673_v44  ;;  %v8976_v55 = vld [vmem:[%s17232_s3 + $0x4c8] sm:$0xff]  ;;  %v5888_v44 = vsel %vm1378_vm1, %v5883_v28, %v5887_v2  ;;  %v5878_v60 = vsel %vm1378_vm1, %v5873_v54, %v5877_v35  ;;  %v15398_v28 = vld [vmem:[#allocation3 + $0xe0] sm:$0xff] }
 0x562   : > { %6544 = vmatpush.msrb.mxu1 %v8976_v55  ;;  %5990 = vmatmul.f32.gmra.mxu0 %v5888_v44  ;;  %v8959_v54 = vld [vmem:[%s17232_s3 + $0x440] sm:$0xff] }
 0x563   : > { %18136 = vst [vmem:[#allocation57_spill] sm:$0xff] %v15376_v31  ;;  %5645 = vmatmul.f32.gmra.mxu2 %v9476_v0  ;;  %5710 = vmatmul.f32.gmra.mxu3 %v14831_v8  ;;  %v15393_v37 = vpop.f32.mrf.mxu1  ;;  %v9477_v0 = vld [vmem:[#allocation3 + $0x88] sm:$0xff] }
 0x564   : > { %v5891_v24 = vrot.slane %v9477_v0, 1  ;;  %6480 = vmatpush.msrb.mxu0 %v8959_v54 }
 0x565   : > { %v15396_v36 = vpop.f32.mrf.mxu0 }
 0x566   : > { %v4461_v38 = vpop.f32.mrf.mxu2  ;;  %v4526_v31 = vpop.f32.mrf.mxu3 }
 0x567   : > { %v4527_v45 = vadd.f32 %v4526_v31, %v4461_v38  ;;  %6046 = vmatmul.f32.gmra.mxu1 %v5878_v60  ;;  %v9478_v31 = vld [vmem:[#allocation3 + $0x70] sm:$0xff]  ;;  %v5892_v60 = vsel %vm1378_vm1, %v5887_v2, %v5891_v24  ;;  %v15423_v2 = vld [vmem:[#allocation3 + $0x20] sm:$0xff] }
 0x569   : > { %v15401_v8 = vadd.f32 %v4527_v45, %v14750_v43  ;;  %v8975_v43 = vld [vmem:[%s17232_s3 + $0x4c0] sm:$0xff]  ;;  %v5881_v45 = vrot.slane %v15398_v28, 1 }
 0x56a   : > { %6545 = vmatpush.msrb.mxu1 %v8975_v43  ;;  %5993 = vmatmul.f32.gmra.mxu0 %v5892_v60  ;;  %v8924_v43 = vld [vmem:[%s17232_s3 + $0x328] sm:$0xff]  ;;  %v5885_v60 = vrot.slane %v15423_v2, 1 }
 0x56b   : > { %18137 = vst [vmem:[#allocation62_spill] sm:$0xff] %v15401_v8  ;;  %5648 = vmatmul.f32.gmra.mxu2 %v9478_v31  ;;  %5713 = vmatmul.f32.gmra.mxu3 %v14910_v5  ;;  %v15418_v44 = vpop.f32.mrf.mxu1  ;;  %v9479_v31 = vld [vmem:[#allocation3 + $0x130] sm:$0xff]  ;;  %v5882_v22 = vsel %vm1378_vm1, %v5877_v35, %v5881_v45  ;;  %v8958_v35 = vld [vmem:[%s17232_s3 + $0x438] sm:$0xff] }
 0x56c   : > { %v5895_v62 = vrot.slane %v9479_v31, 1  ;;  %v8925_v5 = vld [vmem:[%s17232_s3 + $0x330] sm:$0xff]  ;;  %6481 = vmatpush.msrb.mxu0 %v8958_v35  ;;  %v9480_v35 = vld [vmem:[#allocation3 + $0xa8] sm:$0xff] }
 0x56d   : > { %v15421_v25 = vpop.f32.mrf.mxu0  ;;  %6301 = vmatpush.msrb.mxu2 %v8925_v5 }
 0x56e   : > { %v4464_v55 = vpop.f32.mrf.mxu2  ;;  %v4529_v38 = vpop.f32.mrf.mxu3  ;;  %18138 = vst [vmem:[#allocation64_spill] sm:$0xff] %v15421_v25  ;;  %v8957_v25 = vld [vmem:[%s17232_s3 + $0x430] sm:$0xff] }
 0x56f   : > { %v4530_v8 = vadd.f32 %v4529_v38, %v4464_v55  ;;  %6049 = vmatmul.f32.gmra.mxu1 %v5882_v22  ;;  %v8974_v22 = vld [vmem:[%s17232_s3 + $0x4b8] sm:$0xff]  ;;  %6302 = vmatpush.msrb.mxu2 %v8924_v43  ;;  %v8939_v55 = vld [vmem:[%s17232_s3 + $0x3a0] sm:$0xff] }
 0x570   : > { %6546 = vmatpush.msrb.mxu1 %v8974_v22  ;;  %v5899_v22 = vrot.slane %v9480_v35, 1  ;;  %6482 = vmatpush.msrb.mxu0 %v8957_v25 }
 0x571   : > { %v15432_v54 = vadd.f32 %v4530_v8, %v14814_v17  ;;  %v8940_v17 = vld [vmem:[%s17232_s3 + $0x3a8] sm:$0xff]  ;;  %v5896_v8 = vsel %vm1378_vm1, %v5891_v24, %v5895_v62 }
 0x572   : > { %6367 = vmatpush.msrb.mxu3 %v8940_v17  ;;  %5996 = vmatmul.f32.gmra.mxu0 %v5896_v8  ;;  %v5886_v17 = vsel %vm1378_vm1, %v5881_v45, %v5885_v60  ;;  %v15466_v8 = vld [vmem:[#allocation3 + $0x50] sm:$0xff] }
 0x573   : > { %18139 = vst [vmem:[#allocation69_spill] sm:$0xff] %v15432_v54  ;;  %5651 = vmatmul.f32.gmra.mxu2 %v9477_v0  ;;  %5716 = vmatmul.f32.gmra.mxu3 %v14988_v41  ;;  %v8923_v0 = vld [vmem:[%s17232_s3 + $0x320] sm:$0xff]  ;;  %v15455_v5 = vpop.f32.mrf.mxu1  ;;  %v8922_v41 = vld [vmem:[%s17232_s3 + $0x318] sm:$0xff]  ;;  %v8973_v45 = vld [vmem:[%s17232_s3 + $0x4b0] sm:$0xff] }
 0x574   : > { %6303 = vmatpush.msrb.mxu2 %v8923_v0  ;;  %6368 = vmatpush.msrb.mxu3 %v8939_v55  ;;  %v8921_v0 = vld [vmem:[%s17232_s3 + $0x310] sm:$0xff] }
 0x575   : > { %v15464_v54 = vpop.f32.mrf.mxu0  ;;  %6547 = vmatpush.msrb.mxu1 %v8973_v45 }
 0x576   : > { %v4467_v38 = vpop.f32.mrf.mxu2  ;;  %v4532_v24 = vpop.f32.mrf.mxu3  ;;  %18140 = vst [vmem:[#allocation71_spill] sm:$0xff] %v15464_v54  ;;  %6304 = vmatpush.msrb.mxu2 %v8922_v41  ;;  %6369 = vmatpush.msrb.mxu3 %v8938_v47  ;;  %v8920_v41 = vld [vmem:[%s17232_s3 + $0x308] sm:$0xff] }
 0x577   : > { %v4533_v43 = vadd.f32 %v4532_v24, %v4467_v38  ;;  %6052 = vmatmul.f32.gmra.mxu1 %v5886_v17  ;;  %v8937_v38 = vld [vmem:[%s17232_s3 + $0x390] sm:$0xff]  ;;  %v5900_v24 = vsel %vm1378_vm1, %v5895_v62, %v5899_v22  ;;  %v8936_v47 = vld [vmem:[%s17232_s3 + $0x388] sm:$0xff]  ;;  %v8935_v62 = vld [vmem:[%s17232_s3 + $0x380] sm:$0xff]  ;;  %v5903_v17 = vrot.slane %v14982_v18, 1 }
 0x578   : > { %6305 = vmatpush.msrb.mxu2 %v8921_v0  ;;  %6370 = vmatpush.msrb.mxu3 %v8937_v38  ;;  %v15502_v38 = vld [vmem:[#allocation3 + $0x118] sm:$0xff]  ;;  %v8972_v18 = vld [vmem:[%s17232_s3 + $0x4a8] sm:$0xff] }
 0x579   : > { %v15472_v55 = vadd.f32 %v4533_v43, %v14905_v23  ;;  %v5889_v23 = vrot.slane %v15466_v8, 1  ;;  %6548 = vmatpush.msrb.mxu1 %v8972_v18  ;;  %v9481_v18 = vld [vmem:[#allocation3 + $0xc8] sm:$0xff] }
 0x57a   : > { %5999 = vmatmul.f32.gmra.mxu0 %v5900_v24  ;;  %6306 = vmatpush.msrb.mxu2 %v8920_v41  ;;  %v8956_v41 = vld [vmem:[%s17232_s3 + $0x428] sm:$0xff] }
 0x57b   : > { %18141 = vst [vmem:[#allocation75_spill] sm:$0xff] %v15472_v55  ;;  %5654 = vmatmul.f32.gmra.mxu2 %v9479_v31  ;;  %5719 = vmatmul.f32.gmra.mxu3 %v15043_v9  ;;  %v15492_v31 = vpop.f32.mrf.mxu1  ;;  %v8919_v9 = vld [vmem:[%s17232_s3 + $0x300] sm:$0xff]  ;;  %v5890_v0 = vsel %vm1378_vm1, %v5885_v60, %v5889_v23  ;;  %v5904_v60 = vsel %vm1378_vm1, %v5899_v22, %v5903_v17 }
 0x57c   : > { %6371 = vmatpush.msrb.mxu3 %v8936_v47  ;;  %6307 = vmatpush.msrb.mxu2 %v8919_v9  ;;  %v5893_v47 = vrot.slane %v15502_v38, 1  ;;  %v8955_v22 = vld [vmem:[%s17232_s3 + $0x420] sm:$0xff] }
 0x57d   : > { %v15504_v24 = vpop.f32.mrf.mxu0  ;;  %6483 = vmatpush.msrb.mxu0 %v8956_v41  ;;  %v8971_v41 = vld [vmem:[%s17232_s3 + $0x4a0] sm:$0xff] }
 0x57e   : > { %v4470_v43 = vpop.f32.mrf.mxu2  ;;  %v4535_v25 = vpop.f32.mrf.mxu3  ;;  %18142 = vst [vmem:[#allocation77_spill] sm:$0xff] %v15504_v24  ;;  %6372 = vmatpush.msrb.mxu3 %v8935_v62  ;;  %6549 = vmatpush.msrb.mxu1 %v8971_v41  ;;  %v8970_v41 = vld [vmem:[%s17232_s3 + $0x498] sm:$0xff] }
 0x57f   : > { %v4536_v45 = vadd.f32 %v4535_v25, %v4470_v43  ;;  %6055 = vmatmul.f32.gmra.mxu1 %v5890_v0  ;;  %v15518_v43 = vld [vmem:[#allocation3 + $0x140] sm:$0xff]  ;;  %v5894_v0 = vsel %vm1378_vm1, %v5889_v23, %v5893_v47  ;;  %6484 = vmatpush.msrb.mxu0 %v8955_v22  ;;  %v8998_v24 = vld [vmem:[%s17232_s3 + $0x578] sm:$0xff] }
 0x580   : > { %18144 = vst [vmem:[#allocation23_spill] sm:$0xff] %v15518_v43  ;;  %v5907_v25 = vrot.slane %v15518_v43, 1  ;;  %v6093_v22 = vld [vmem:[#allocation3 + $0x100] sm:$0x80]  ;;  %6550 = vmatpush.msrb.mxu1 %v8970_v41  ;;  %6818 = vmatpush.msra.mxu2 %v8998_v24 }
 0x581   : > { %v15507_v55 = vadd.f32 %v4536_v45, %v14996_v20  ;;  %v8951_v41 = vld [vmem:[%s17232_s3 + $0x400] sm:$0xff] }
 0x582   : > { %6002 = vmatmul.f32.gmra.mxu0 %v5904_v60  ;;  %v5908_v60 = vsel %vm1378_vm1, %v5903_v17, %v5907_v25  ;;  %v8967_v24 = vld [vmem:[%s17232_s3 + $0x480] sm:$0xff] }
 0x583   : > { %18143 = vst [vmem:[#allocation20_spill] sm:$0xff] %v15507_v55  ;;  %5657 = vmatmul.f32.gmra.mxu2 %v9480_v35  ;;  %5722 = vmatmul.f32.gmra.mxu3 %v15085_v56  ;;  %v15522_v62 = vpop.f32.mrf.mxu1  ;;  %v15524_v35 = vld [vmem:[#allocation3 + $0x108] sm:$0xff] }
 0x585   : > { %v15535_v23 = vpop.f32.mrf.mxu0 }
 0x586   : > { %v4473_v20 = vpop.f32.mrf.mxu2  ;;  %v4538_v9 = vpop.f32.mrf.mxu3  ;;  %18146 = vst [vmem:[#allocation29_spill] sm:$0xff] %v15535_v23 }
 0x587   : > { %v4539_v45 = vadd.f32 %v4538_v9, %v4473_v20  ;;  %6058 = vmatmul.f32.gmra.mxu1 %v5894_v0  ;;  %v5780_v9 = vld [vmem:[#allocation3 + $0x138] sm:$0x1] }
 0x588   : > { %v5911_v0 = vrot.slane %v5780_v9, 1 }
 0x589   : > { %v15527_v56 = vadd.f32 %v4539_v45, %v15037_v57  ;;  %v5897_v57 = vrot.slane %v15524_v35, 1 }
 0x58a   : > { %6005 = vmatmul.f32.gmra.mxu0 %v5908_v60 }
 0x58b   : > { %18145 = vst [vmem:[#allocation26_spill] sm:$0xff] %v15527_v56  ;;  %5660 = vmatmul.f32.gmra.mxu2 %v9481_v18  ;;  %5725 = vmatmul.f32.gmra.mxu3 %v15144_v10  ;;  %v5898_v55 = vsel %vm1378_vm1, %v5893_v47, %v5897_v57  ;;  %v15541_v18 = vld [vmem:[#allocation3 + $0xb8] sm:$0xff]  ;;  %v15546_v17 = vpop.f32.mrf.mxu1  ;;  %v15558_v47 = vld [vmem:[#allocation3 + $0x10] sm:$0xff] }
 0x58c   : > { %18148 = vst [vmem:[#allocation14_spill] sm:$0xff] %v15546_v17  ;;  %v8954_v10 = vld [vmem:[%s17232_s3 + $0x418] sm:$0xff]  ;;  %v5901_v9 = vrot.slane %v15541_v18, 1 }
 0x58d   : > { %6485 = vmatpush.msrb.mxu0 %v8954_v10  ;;  %v8952_v10 = vld [vmem:[%s17232_s3 + $0x408] sm:$0xff] }
 0x58e   : > { %v4476_v20 = vpop.f32.mrf.mxu2  ;;  %v4541_v45 = vpop.f32.mrf.mxu3  ;;  %v5902_v54 = vsel %vm1378_vm1, %v5897_v57, %v5901_v9  ;;  %v9030_v57 = vld [vmem:[%s17232_s3 + $0x678] sm:$0xff] }
 0x58f   : > { %v4542_v56 = vadd.f32 %v4541_v45, %v4476_v20  ;;  %6061 = vmatmul.f32.gmra.mxu1 %v5898_v55  ;;  %v8953_v55 = vld [vmem:[%s17232_s3 + $0x410] sm:$0xff]  ;;  %v15563_v60 = vpop.f32.mrf.mxu0  ;;  %v5912_v20 = vsel %vm1378_vm1, %v5907_v25, %v5911_v0  ;;  %v6194_v45 = vrot.slane %v6093_v22, 7  ;;  %v8968_v25 = vld [vmem:[%s17232_s3 + $0x488] sm:$0xff]  ;;  %v9014_v0 = vld [vmem:[%s17232_s3 + $0x5f8] sm:$0xff] }
 0x590   : > { %18149 = vst [vmem:[#allocation10_spill] sm:$0xff] %v15563_v60  ;;  %6486 = vmatpush.msrb.mxu0 %v8953_v55  ;;  %v6198_v55 = vrot.slane %v15238_v21, 7  ;;  %6883 = vmatpush.msra.mxu3 %v9014_v0  ;;  %v6200_v0 = vrot.slane %v15178_v32, 7 }
 0x591   : > { %v15544_v23 = vadd.f32 %v4542_v56, %v15074_v12  ;;  %v6094_v12 = vld [vmem:[#allocation3 + $0x8] sm:$0x80]  ;;  %v8969_v56 = vld [vmem:[%s17232_s3 + $0x490] sm:$0xff] }
 0x592   : > { %6551 = vmatpush.msrb.mxu1 %v8969_v56  ;;  %6008 = vmatmul.f32.gmra.mxu0 %v5912_v20  ;;  %v15590_v20 = vld [vmem:[#allocation3 + $0x90] sm:$0xff] }
 0x593   : > { %18147 = vst [vmem:[#allocation13_spill] sm:$0xff] %v15544_v23  ;;  %5663 = vmatmul.f32.gmra.mxu2 %v15518_v43  ;;  %5728 = vmatmul.f32.gmra.mxu3 %v15558_v47  ;;  %v6195_v23 = vrot.slane %v15159_v39, 7  ;;  %v6197_v43 = vrot.slane %v6094_v12, 7 }
 0x594   : > { %6487 = vmatpush.msrb.mxu0 %v8952_v10  ;;  %6552 = vmatpush.msrb.mxu1 %v8968_v25  ;;  %v8997_v10 = vld [vmem:[%s17232_s3 + $0x570] sm:$0xff]  ;;  %v5905_v25 = vrot.slane %v15590_v20, 1 }
 0x595   : > { %v6196_v56 = vsel %vm495_vm0, %v6194_v45, %v6195_v23  ;;  %6819 = vmatpush.msra.mxu2 %v8997_v10  ;;  %v9012_v10 = vld [vmem:[%s17232_s3 + $0x5e8] sm:$0xff] }
 0x596   : > { %v4479_v22 = vpop.f32.mrf.mxu2  ;;  %v4544_v60 = vpop.f32.mrf.mxu3  ;;  %6488 = vmatpush.msrb.mxu0 %v8951_v41  ;;  %6553 = vmatpush.msrb.mxu1 %v8967_v24  ;;  %v6202_v41 = vrot.slane %v15265_v26, 7 }
 0x597   : > { %v4545_v17 = vadd.f32 %v4544_v60, %v4479_v22  ;;  %6064 = vmatmul.f32.gmra.mxu1 %v5902_v54  ;;  %v9013_v60 = vld [vmem:[%s17232_s3 + $0x5f0] sm:$0xff]  ;;  %v6199_v54 = vsel %vm495_vm0, %v6197_v43, %v6198_v55  ;;  %v15605_v45 = vpop.f32.mrf.mxu0 }
 0x598   : > { %6884 = vmatpush.msra.mxu3 %v9013_v60  ;;  %7163 = vmatpush.msra.mxu0 %v9030_v57  ;;  %v6201_v60 = vsel %vm495_vm0, %v6195_v23, %v6200_v0  ;;  %v6203_v57 = vsel %vm495_vm0, %v6198_v55, %v6202_v41  ;;  %v9045_v23 = vld [vmem:[%s17232_s3 + $0x6f0] sm:$0xff] }
 0x599   : > { %v15593_v12 = vadd.f32 %v4545_v17, %v15149_v15  ;;  %v9046_v15 = vld [vmem:[%s17232_s3 + $0x6f8] sm:$0xff]  ;;  %v15610_v17 = vpop.f32.mrf.mxu1 }
 0x59a   : > { %18151 = vst [vmem:[#allocation81_spill] sm:$0xff] %v15610_v17  ;;  %7228 = vmatpush.msra.mxu1 %v9046_v15  ;;  %6489 = vmatmul.f32.vlgmr.msrb.gmra.mxu0 %v15159_v39  ;;  %v9029_v39 = vld [vmem:[%s17232_s3 + $0x670] sm:$0xff]  ;;  %v5781_v17 = vld [vmem:[#allocation3 + $0x78] sm:$0x1] }
 0x59b   : > { %18150 = vst [vmem:[#allocation79_spill] sm:$0xff] %v15593_v12  ;;  %6308 = vmatmul.f32.vlgmr.msrb.gmra.mxu2 %v6196_v56  ;;  %6373 = vmatmul.f32.vlgmr.msrb.gmra.mxu3 %v6199_v54  ;;  %v5906_v56 = vsel %vm1378_vm1, %v5901_v9, %v5905_v25  ;;  %v8996_v54 = vld [vmem:[%s17232_s3 + $0x568] sm:$0xff]  ;;  %v5909_v9 = vrot.slane %v15558_v47, 1 }
 0x59c   : > { %6885 = vmatpush.msra.mxu3 %v9012_v10  ;;  %6820 = vmatpush.msra.mxu2 %v8996_v54  ;;  %v8995_v54 = vld [vmem:[%s17232_s3 + $0x560] sm:$0xff] }
 0x59d   : > { %7164 = vmatpush.msra.mxu0 %v9029_v39  ;;  %7229 = vmatpush.msra.mxu1 %v9045_v23  ;;  %v5910_v12 = vsel %vm1378_vm1, %v5905_v25, %v5909_v9  ;;  %v9011_v39 = vld [vmem:[%s17232_s3 + $0x5e0] sm:$0xff] }
 0x59e   : > { %v5619_v22 = vpop.f32.mrf.mxu2  ;;  %v5684_v43 = vpop.f32.mrf.mxu3  ;;  %6886 = vmatpush.msra.mxu3 %v9011_v39  ;;  %6821 = vmatpush.msra.mxu2 %v8995_v54 }
 0x59f   : > { %v15616_v24 = vadd.f32 %v5684_v43, %v5619_v22  ;;  %6067 = vmatmul.f32.gmra.mxu1 %v5906_v56  ;;  %v15630_v15 = vpop.f32.mrf.mxu0  ;;  %v6204_v22 = vrot.slane %v15203_v16, 7 }
 0x5a1   : > { %v15637_v43 = vpop.f32.mrf.mxu1 }
 0x5a2   : > { %18152 = vst [vmem:[#allocation83_spill] sm:$0xff] %v15637_v43  ;;  %6492 = vmatmul.f32.gmra.mxu0 %v15178_v32  ;;  %v9028_v32 = vld [vmem:[%s17232_s3 + $0x668] sm:$0xff] }
 0x5a3   : > { %6311 = vmatmul.f32.gmra.mxu2 %v6201_v60  ;;  %6376 = vmatmul.f32.gmra.mxu3 %v6203_v57  ;;  %v6206_v60 = vrot.slane %v15292_v59, 7  ;;  %v6205_v57 = vsel %vm495_vm0, %v6200_v0, %v6204_v22  ;;  %v5510_v0 = vadd.f32 %v15257_v29, %v15183_v40  ;;  %v6210_v40 = vrot.slane %v15319_v4, 7 }
 0x5a4   : > { %7165 = vmatpush.msra.mxu0 %v9028_v32 }
 0x5a5   : > { %v6207_v23 = vsel %vm495_vm0, %v6202_v41, %v6206_v60  ;;  %v15666_v41 = vld [vmem:[%s17233_s4] ss:$0 sm:$0xff] }
 0x5a6   : > { %v5622_v56 = vpop.f32.mrf.mxu2  ;;  %v5687_v55 = vpop.f32.mrf.mxu3  ;;  %v5553_v29 = vadd.f32 %v15666_v41, %v5510_v0  ;;  %v6212_v0 = vrot.slane %v15259_v14, 7 }
 0x5a7   : > { %v15641_v10 = vadd.f32 %v5687_v55, %v5622_v56  ;;  %6070 = vmatmul.f32.gmra.mxu1 %v5910_v12  ;;  %v15655_v25 = vpop.f32.mrf.mxu0  ;;  %v9044_v12 = vld [vmem:[%s17232_s3 + $0x6e8] sm:$0xff]  ;;  %v5913_v56 = vrot.slane %v5781_v17, 1  ;;  %v6208_v55 = vrot.slane %v15233_v27, 7 }
 0x5a8   : > { %7230 = vmatpush.msra.mxu1 %v9044_v12 }
 0x5a9   : > { %v5914_v54 = vsel %vm1378_vm1, %v5909_v9, %v5913_v56  ;;  %v6209_v32 = vsel %vm495_vm0, %v6204_v22, %v6208_v55  ;;  %v9027_v9 = vld [vmem:[%s17232_s3 + $0x660] sm:$0xff]  ;;  %v6211_v22 = vsel %vm495_vm0, %v6206_v60, %v6210_v40 }
 0x5aa   : > { %6495 = vmatmul.f32.gmra.mxu0 %v15203_v16  ;;  %v8994_v16 = vld [vmem:[%s17232_s3 + $0x558] sm:$0xff] }
 0x5ab   : > { %6314 = vmatmul.f32.gmra.mxu2 %v6205_v57  ;;  %6379 = vmatmul.f32.gmra.mxu3 %v6207_v23  ;;  %v5504_v23 = vadd.f32 %v15194_v50, %v15137_v42  ;;  %v9043_v42 = vld [vmem:[%s17232_s3 + $0x6e0] sm:$0xff]  ;;  %v5513_v50 = vadd.f32 %v15284_v34, %v15209_v6 }
 0x5ac   : > { %v15668_v57 = vpop.f32.mrf.mxu1  ;;  %6822 = vmatpush.msra.mxu2 %v8994_v16  ;;  %7166 = vmatpush.msra.mxu0 %v9027_v9  ;;  %v5516_v9 = vadd.f32 %v15311_v53, %v15236_v51 }
 0x5ad   : > { %18153 = vst [vmem:[#allocation84_spill] sm:$0xff] %v15668_v57  ;;  %v9010_v57 = vld [vmem:[%s17232_s3 + $0x5d8] sm:$0xff]  ;;  %v5551_v56 = vadd.f32 %v15666_v41, %v5504_v23  ;;  %7231 = vmatpush.msra.mxu1 %v9043_v42  ;;  %v5554_v34 = vadd.f32 %v15666_v41, %v5513_v50  ;;  %v5507_v23 = vadd.f32 %v15230_v11, %v15165_v61 }
 0x5ae   : > { %v5625_v39 = vpop.f32.mrf.mxu2  ;;  %v5690_v43 = vpop.f32.mrf.mxu3  ;;  %6887 = vmatpush.msra.mxu3 %v9010_v57  ;;  %v5555_v53 = vadd.f32 %v15666_v41, %v5516_v9 }
 0x5af   : > { %v5691_v17 = vadd.f32 %v5690_v43, %v5625_v39  ;;  %6073 = vmatmul.f32.gmra.mxu1 %v5914_v54  ;;  %v15689_v43 = vpop.f32.mrf.mxu0  ;;  %v5732_v57 = vadd.f32 %v15616_v24, %v5551_v56  ;;  %v6214_v54 = vrot.slane %v15346_v48, 7  ;;  %v9009_v24 = vld [vmem:[%s17232_s3 + $0x5d0] sm:$0xff]  ;;  %v5552_v42 = vadd.f32 %v15666_v41, %v5507_v23 }
 0x5b0   : > { %6888 = vmatpush.msra.mxu3 %v9009_v24  ;;  %v6220_v23 = vrot.slane %v15313_v30, 7 }
 0x5b1   : > { %v15677_v12 = vadd.f32 %v5691_v17, %v5553_v29  ;;  %v6215_v61 = vsel %vm495_vm0, %v6210_v40, %v6214_v54  ;;  %v5733_v56 = vadd.f32 %v15641_v10, %v5552_v42  ;;  %v9025_v10 = vld [vmem:[%s17232_s3 + $0x650] sm:$0xff] }
 0x5b2   : > { %6498 = vmatmul.f32.gmra.mxu0 %v15233_v27 }
 0x5b3   : > { %6317 = vmatmul.f32.gmra.mxu2 %v6209_v32  ;;  %6382 = vmatmul.f32.gmra.mxu3 %v6211_v22  ;;  %v6213_v32 = vsel %vm495_vm0, %v6208_v55, %v6212_v0  ;;  %v9026_v55 = vld [vmem:[%s17232_s3 + $0x658] sm:$0xff]  ;;  %v6216_v22 = vrot.slane %v15286_v49, 7 }
 0x5b4   : > { %v6029_v39 = vpop.f32.mrf.mxu1  ;;  %7167 = vmatpush.msra.mxu0 %v9026_v55 }
 0x5b5   : > { %v6030_v29 = vadd.f32 %v6029_v39, %v15605_v45  ;;  %v8993_v45 = vld [vmem:[%s17232_s3 + $0x550] sm:$0xff] }
 0x5b6   : > { %v5628_v60 = vpop.f32.mrf.mxu2  ;;  %v5693_v17 = vpop.f32.mrf.mxu3  ;;  %6823 = vmatpush.msra.mxu2 %v8993_v45  ;;  %7168 = vmatpush.msra.mxu0 %v9025_v10  ;;  %v9023_v10 = vld [vmem:[%s17232_s3 + $0x640] sm:$0xff] }
 0x5b7   : > { %v5694_v6 = vadd.f32 %v5693_v17, %v5628_v60  ;;  %v15706_v16 = vadd.f32 %v6030_v29, %v5732_v57  ;;  %6554 = vmatmul.f32.vlgmr.msrb.gmra.mxu1 %v15238_v21  ;;  %v15721_v11 = vpop.f32.mrf.mxu0  ;;  %v9042_v21 = vld [vmem:[%s17232_s3 + $0x6d8] sm:$0xff]  ;;  %v6218_v57 = vrot.slane %v15373_v58, 7  ;;  %v6217_v29 = vsel %vm495_vm0, %v6212_v0, %v6216_v22 }
 0x5b8   : > { %7232 = vmatpush.msra.mxu1 %v9042_v21 }
 0x5b9   : > { %v15709_v27 = vadd.f32 %v5694_v6, %v5554_v34  ;;  %v6219_v0 = vsel %vm495_vm0, %v6214_v54, %v6218_v57 }
 0x5ba   : > { %6501 = vmatmul.f32.gmra.mxu0 %v15259_v14  ;;  %v8992_v14 = vld [vmem:[%s17232_s3 + $0x548] sm:$0xff] }
 0x5bb   : > { %6320 = vmatmul.f32.gmra.mxu2 %v6213_v32  ;;  %6385 = vmatmul.f32.gmra.mxu3 %v6215_v61  ;;  %v5519_v32 = vadd.f32 %v15338_v3, %v15263_v52  ;;  %v6222_v61 = vrot.slane %v15398_v28, 7  ;;  %v6221_v3 = vsel %vm495_vm0, %v6216_v22, %v6220_v23 }
 0x5bc   : > { %v6032_v50 = vpop.f32.mrf.mxu1  ;;  %6824 = vmatpush.msra.mxu2 %v8992_v14 }
 0x5bd   : > { %v6033_v39 = vadd.f32 %v6032_v50, %v15630_v15  ;;  %v9008_v15 = vld [vmem:[%s17232_s3 + $0x5c8] sm:$0xff]  ;;  %v5556_v21 = vadd.f32 %v15666_v41, %v5519_v32  ;;  %v6228_v32 = vrot.slane %v15367_v1, 7 }
 0x5be   : > { %v5631_v40 = vpop.f32.mrf.mxu2  ;;  %v5696_v60 = vpop.f32.mrf.mxu3  ;;  %6889 = vmatpush.msra.mxu3 %v9008_v15  ;;  %v9024_v50 = vld [vmem:[%s17232_s3 + $0x648] sm:$0xff] }
 0x5bf   : > { %v5697_v51 = vadd.f32 %v5696_v60, %v5631_v40  ;;  %v15736_v17 = vadd.f32 %v6033_v39, %v5733_v56  ;;  %6557 = vmatmul.f32.gmra.mxu1 %v15265_v26  ;;  %v15751_v6 = vpop.f32.mrf.mxu0  ;;  %v9041_v26 = vld [vmem:[%s17232_s3 + $0x6d0] sm:$0xff]  ;;  %v5522_v40 = vadd.f32 %v15365_v63, %v15290_v7  ;;  %v6224_v56 = vrot.slane %v15340_v13, 7  ;;  %7169 = vmatpush.msra.mxu0 %v9024_v50 }
 0x5c0   : > { %7233 = vmatpush.msra.mxu1 %v9041_v26  ;;  %v5525_v26 = vadd.f32 %v15393_v37, %v15317_v46  ;;  %v5528_v50 = vadd.f32 %v15418_v44, %v15344_v33 }
 0x5c1   : > { %v15739_v34 = vadd.f32 %v5697_v51, %v5555_v53  ;;  %v6226_v51 = vrot.slane %v15423_v2, 7  ;;  %v6225_v7 = vsel %vm495_vm0, %v6220_v23, %v6224_v56  ;;  %7170 = vmatpush.msra.mxu0 %v9023_v10  ;;  %v6229_v46 = vsel %vm495_vm0, %v6224_v56, %v6228_v32 }
 0x5c2   : > { %6504 = vmatmul.f32.gmra.mxu0 %v15286_v49  ;;  %v8991_v49 = vld [vmem:[%s17232_s3 + $0x540] sm:$0xff] }
 0x5c3   : > { %6323 = vmatmul.f32.gmra.mxu2 %v6217_v29  ;;  %6388 = vmatmul.f32.gmra.mxu3 %v6219_v0  ;;  %v5557_v29 = vadd.f32 %v15666_v41, %v5522_v40 }
 0x5c4   : > { %v6035_v45 = vpop.f32.mrf.mxu1  ;;  %6825 = vmatpush.msra.mxu2 %v8991_v49  ;;  %v9022_v49 = vld [vmem:[%s17232_s3 + $0x638] sm:$0xff] }
 0x5c5   : > { %v6036_v54 = vadd.f32 %v6035_v45, %v15655_v25  ;;  %v9007_v25 = vld [vmem:[%s17232_s3 + $0x5c0] sm:$0xff]  ;;  %7171 = vmatpush.msra.mxu0 %v9022_v49 }
 0x5c6   : > { %v5634_v24 = vpop.f32.mrf.mxu2  ;;  %v5699_v55 = vpop.f32.mrf.mxu3  ;;  %6890 = vmatpush.msra.mxu3 %v9007_v25  ;;  %v9038_v25 = vld [vmem:[%s17232_s3 + $0x6b8] sm:$0xff] }
 0x5c7   : > { %v5700_v9 = vadd.f32 %v5699_v55, %v5634_v24  ;;  %v15765_v52 = vadd.f32 %v6036_v54, %v15677_v12  ;;  %6560 = vmatmul.f32.gmra.mxu1 %v15292_v59  ;;  %v6223_v12 = vsel %vm495_vm0, %v6218_v57, %v6222_v61  ;;  %v15780_v22 = vpop.f32.mrf.mxu0  ;;  %v9040_v59 = vld [vmem:[%s17232_s3 + $0x6c8] sm:$0xff]  ;;  %v6230_v55 = vrot.slane %v15466_v8, 7 }
 0x5c8   : > { %7234 = vmatpush.msra.mxu1 %v9040_v59 }
 0x5c9   : > { %v15768_v42 = vadd.f32 %v5700_v9, %v5556_v21  ;;  %v15826_v9 = vld [vmem:[#allocation3 + $0x88] sm:$0xff] }
 0x5ca   : > { %6507 = vmatmul.f32.gmra.mxu0 %v15313_v30  ;;  %v8990_v30 = vld [vmem:[%s17232_s3 + $0x538] sm:$0xff] }
 0x5cb   : > { %6326 = vmatmul.f32.gmra.mxu2 %v6221_v3  ;;  %6391 = vmatmul.f32.gmra.mxu3 %v6223_v12  ;;  %v15848_v12 = vrot.slane %v15826_v9, 7 }
 0x5cc   : > { %v6038_v39 = vpop.f32.mrf.mxu1  ;;  %6826 = vmatpush.msra.mxu2 %v8990_v30  ;;  %v5531_v30 = vadd.f32 %v15455_v5, %v15371_v19 }
 0x5cd   : > { %v6039_v57 = vadd.f32 %v6038_v39, %v15689_v43  ;;  %v9006_v43 = vld [vmem:[%s17232_s3 + $0x5b8] sm:$0xff]  ;;  %v6233_v33 = vsel %vm495_vm0, %v6228_v32, %v15848_v12  ;;  %v6238_v32 = vrot.slane %v15524_v35, 7 }
 0x5ce   : > { %v5637_v60 = vpop.f32.mrf.mxu2  ;;  %v5702_v53 = vpop.f32.mrf.mxu3  ;;  %6891 = vmatpush.msra.mxu3 %v9006_v43 }
 0x5cf   : > { %v5703_v14 = vadd.f32 %v5702_v53, %v5637_v60  ;;  %v15794_v63 = vadd.f32 %v6039_v57, %v15709_v27  ;;  %6563 = vmatmul.f32.gmra.mxu1 %v15319_v4  ;;  %v6227_v27 = vsel %vm495_vm0, %v6222_v61, %v6226_v51  ;;  %v15809_v0 = vpop.f32.mrf.mxu0  ;;  %v9039_v4 = vld [vmem:[%s17232_s3 + $0x6c0] sm:$0xff]  ;;  %v5558_v61 = vadd.f32 %v15666_v41, %v5525_v26 }
 0x5d0   : > { %7235 = vmatpush.msra.mxu1 %v9039_v4  ;;  %v6234_v60 = vrot.slane %v15502_v38, 7  ;;  %v5559_v57 = vadd.f32 %v15666_v41, %v5528_v50  ;;  %v6242_v50 = vrot.slane %v15541_v18, 7 }
 0x5d1   : > { %v15797_v15 = vadd.f32 %v5703_v14, %v5557_v29  ;;  %v9021_v14 = vld [vmem:[%s17232_s3 + $0x630] sm:$0xff] }
 0x5d2   : > { %6510 = vmatmul.f32.gmra.mxu0 %v15340_v13  ;;  %v8989_v13 = vld [vmem:[%s17232_s3 + $0x530] sm:$0xff]  ;;  %7236 = vmatpush.msra.mxu1 %v9038_v25 }
 0x5d3   : > { %6329 = vmatmul.f32.gmra.mxu2 %v6225_v7  ;;  %6394 = vmatmul.f32.gmra.mxu3 %v6227_v27  ;;  %v9037_v7 = vld [vmem:[%s17232_s3 + $0x6b0] sm:$0xff] }
 0x5d4   : > { %v6041_v23 = vpop.f32.mrf.mxu1  ;;  %6827 = vmatpush.msra.mxu2 %v8989_v13  ;;  %7172 = vmatpush.msra.mxu0 %v9021_v14 }
 0x5d5   : > { %v6042_v24 = vadd.f32 %v6041_v23, %v15721_v11  ;;  %v9005_v11 = vld [vmem:[%s17232_s3 + $0x5b0] sm:$0xff]  ;;  %7237 = vmatpush.msra.mxu1 %v9037_v7  ;;  %v5560_v23 = vadd.f32 %v15666_v41, %v5531_v30 }
 0x5d6   : > { %v5640_v45 = vpop.f32.mrf.mxu2  ;;  %v5705_v54 = vpop.f32.mrf.mxu3  ;;  %6892 = vmatpush.msra.mxu3 %v9005_v11 }
 0x5d7   : > { %v5706_v21 = vadd.f32 %v5705_v54, %v5640_v45  ;;  %v15823_v37 = vadd.f32 %v6042_v24, %v15739_v34  ;;  %6566 = vmatmul.f32.gmra.mxu1 %v15346_v48  ;;  %v6231_v34 = vsel %vm495_vm0, %v6226_v51, %v6230_v55  ;;  %v15840_v48 = vpop.f32.mrf.mxu0  ;;  %v15860_v51 = vld [vmem:[#allocation3 + $0x130] sm:$0xff]  ;;  %v15897_v24 = vld [vmem:[#allocation3 + $0xa8] sm:$0xff] }
 0x5d8   : > { %v15882_v43 = vrot.slane %v15860_v51, 7  ;;  %v6240_v13 = vrot.slane %v15897_v24, 7 }
 0x5d9   : > { %v15828_v3 = vadd.f32 %v5706_v21, %v5558_v61  ;;  %v9020_v61 = vld [vmem:[%s17232_s3 + $0x628] sm:$0xff] }
 0x5da   : > { %6513 = vmatmul.f32.gmra.mxu0 %v15367_v1  ;;  %v8988_v1 = vld [vmem:[%s17232_s3 + $0x528] sm:$0xff]  ;;  %v15891_v19 = vsel %vm495_vm0, %v15848_v12, %v15882_v43 }
 0x5db   : > { %6332 = vmatmul.f32.gmra.mxu2 %v6229_v46  ;;  %6397 = vmatmul.f32.gmra.mxu3 %v6231_v34  ;;  %v9036_v21 = vld [vmem:[%s17232_s3 + $0x6a8] sm:$0xff]  ;;  %v5534_v46 = vadd.f32 %v15492_v31, %v15396_v36  ;;  %v6241_v36 = vsel %vm495_vm0, %v15882_v43, %v6240_v13 }
 0x5dc   : > { %v6044_v59 = vpop.f32.mrf.mxu1  ;;  %6828 = vmatpush.msra.mxu2 %v8988_v1  ;;  %7173 = vmatpush.msra.mxu0 %v9020_v61  ;;  %v18155_v61 = vld [vmem:[#allocation71_spill] sm:$0xff] }
 0x5dd   : > { %v6045_v56 = vadd.f32 %v6044_v59, %v15751_v6  ;;  %v9004_v6 = vld [vmem:[%s17232_s3 + $0x5a8] sm:$0xff]  ;;  %7238 = vmatpush.msra.mxu1 %v9036_v21  ;;  %v5561_v59 = vadd.f32 %v15666_v41, %v5534_v46  ;;  %v18157_v46 = vld [vmem:[#allocation23_spill] sm:$0xff] }
 0x5de   : > { %v5643_v40 = vpop.f32.mrf.mxu2  ;;  %v5708_v39 = vpop.f32.mrf.mxu3  ;;  %6893 = vmatpush.msra.mxu3 %v9004_v6 }
 0x5df   : > { %v5709_v53 = vadd.f32 %v5708_v39, %v5643_v40  ;;  %v15857_v44 = vadd.f32 %v6045_v56, %v15768_v42  ;;  %6569 = vmatmul.f32.gmra.mxu1 %v15373_v58  ;;  %v6235_v42 = vsel %vm495_vm0, %v6230_v55, %v6234_v60  ;;  %v15874_v58 = vpop.f32.mrf.mxu0  ;;  %v9003_v55 = vld [vmem:[%s17232_s3 + $0x5a0] sm:$0xff]  ;;  %v15930_v56 = vld [vmem:[#allocation3 + $0xc8] sm:$0xff] }
 0x5e0   : > { %6894 = vmatpush.msra.mxu3 %v9003_v55  ;;  %v6244_v6 = vrot.slane %v15930_v56, 7  ;;  %v8984_v55 = vld [vmem:[%s17232_s3 + $0x508] sm:$0xff] }
 0x5e1   : > { %v15862_v29 = vadd.f32 %v5709_v53, %v5559_v57  ;;  %v9019_v57 = vld [vmem:[%s17232_s3 + $0x620] sm:$0xff] }
 0x5e2   : > { %6516 = vmatmul.f32.gmra.mxu0 %v15826_v9  ;;  %v9035_v53 = vld [vmem:[%s17232_s3 + $0x6a0] sm:$0xff] }
 0x5e3   : > { %6335 = vmatmul.f32.gmra.mxu2 %v6233_v33  ;;  %6400 = vmatmul.f32.gmra.mxu3 %v6235_v42  ;;  %v18154_v33 = vld [vmem:[#allocation64_spill] sm:$0xff] }
 0x5e4   : > { %v6047_v10 = vpop.f32.mrf.mxu1  ;;  %v5537_v1 = vadd.f32 %v15522_v62, %v18154_v33  ;;  %7174 = vmatpush.msra.mxu0 %v9019_v57  ;;  %7239 = vmatpush.msra.mxu1 %v9035_v53  ;;  %v6245_v62 = vsel %vm495_vm0, %v6240_v13, %v6244_v6  ;;  %v6248_v13 = vrot.slane %v18157_v46, 7  ;;  %v16002_v53 = vld [vmem:[#allocation3 + $0x138] sm:$0xff] }
 0x5e5   : > { %v6048_v4 = vadd.f32 %v6047_v10, %v15780_v22  ;;  %v8987_v22 = vld [vmem:[%s17232_s3 + $0x520] sm:$0xff]  ;;  %v6246_v10 = vrot.slane %v15590_v20, 7 }
 0x5e6   : > { %v5646_v27 = vpop.f32.mrf.mxu2  ;;  %v5711_v26 = vpop.f32.mrf.mxu3  ;;  %6829 = vmatpush.msra.mxu2 %v8987_v22  ;;  %v6249_v57 = vsel %vm495_vm0, %v6244_v6, %v6248_v13 }
 0x5e7   : > { %v5712_v45 = vadd.f32 %v5711_v26, %v5646_v27  ;;  %v15894_v5 = vadd.f32 %v6048_v4, %v15797_v15  ;;  %6572 = vmatmul.f32.gmra.mxu1 %v15398_v28  ;;  %v6239_v28 = vsel %vm495_vm0, %v6234_v60, %v6238_v32  ;;  %v15912_v15 = vpop.f32.mrf.mxu0  ;;  %v9002_v60 = vld [vmem:[%s17232_s3 + $0x598] sm:$0xff]  ;;  %v5562_v27 = vadd.f32 %v15666_v41, %v5537_v1  ;;  %v9033_v1 = vld [vmem:[%s17232_s3 + $0x690] sm:$0xff] }
 0x5e8   : > { %6895 = vmatpush.msra.mxu3 %v9002_v60 }
 0x5e9   : > { %v15899_v54 = vadd.f32 %v5712_v45, %v5560_v23  ;;  %v8985_v23 = vld [vmem:[%s17232_s3 + $0x510] sm:$0xff]  ;;  %v9018_v45 = vld [vmem:[%s17232_s3 + $0x618] sm:$0xff] }
 0x5ea   : > { %6519 = vmatmul.f32.gmra.mxu0 %v15860_v51 }
 0x5eb   : > { %6338 = vmatmul.f32.gmra.mxu2 %v15891_v19  ;;  %6403 = vmatmul.f32.gmra.mxu3 %v6239_v28  ;;  %v18156_v28 = vld [vmem:[#allocation14_spill] sm:$0xff] }
 0x5ec   : > { %v6050_v11 = vpop.f32.mrf.mxu1  ;;  %v5540_v21 = vadd.f32 %v18156_v28, %v18155_v61  ;;  %7175 = vmatpush.msra.mxu0 %v9018_v45  ;;  %v9032_v28 = vld [vmem:[%s17232_s3 + $0x688] sm:$0xff] }
 0x5ed   : > { %v6051_v34 = vadd.f32 %v6050_v11, %v15809_v0  ;;  %v8986_v0 = vld [vmem:[%s17232_s3 + $0x518] sm:$0xff]  ;;  %v9000_v11 = vld [vmem:[%s17232_s3 + $0x588] sm:$0xff] }
 0x5ee   : > { %v5649_v49 = vpop.f32.mrf.mxu2  ;;  %v5714_v25 = vpop.f32.mrf.mxu3  ;;  %6830 = vmatpush.msra.mxu2 %v8986_v0  ;;  %v5563_v0 = vadd.f32 %v15666_v41, %v5540_v21 }
 0x5ef   : > { %v5715_v40 = vadd.f32 %v5714_v25, %v5649_v49  ;;  %v15927_v31 = vadd.f32 %v6051_v34, %v15828_v3  ;;  %6575 = vmatmul.f32.gmra.mxu1 %v15423_v2  ;;  %v6243_v3 = vsel %vm495_vm0, %v6238_v32, %v6242_v50  ;;  %v15944_v2 = vpop.f32.mrf.mxu0  ;;  %v8983_v49 = vld [vmem:[%s17232_s3 + $0x500] sm:$0xff] }
 0x5f0   : > { %6831 = vmatpush.msra.mxu2 %v8985_v23 }
 0x5f1   : > { %v15932_v39 = vadd.f32 %v5715_v40, %v5561_v59 }
 0x5f2   : > { %6522 = vmatmul.f32.gmra.mxu0 %v15897_v24  ;;  %6832 = vmatpush.msra.mxu2 %v8984_v55  ;;  %v6125_v55 = vld [vmem:[#allocation3 + $0xa0] sm:$0x7f] }
 0x5f3   : > { %6341 = vmatmul.f32.gmra.mxu2 %v6241_v36  ;;  %6406 = vmatmul.f32.gmra.mxu3 %v6243_v3  ;;  %v6250_v36 = vrot.slane %v15558_v47, 7 }
 0x5f4   : > { %v6053_v14 = vpop.f32.mrf.mxu1  ;;  %6833 = vmatpush.msra.mxu2 %v8983_v49  ;;  %v6126_v49 = vld [vmem:[#allocation3 + $0x120] sm:$0x7f] }
 0x5f5   : > { %v6054_v7 = vadd.f32 %v6053_v14, %v15840_v48  ;;  %v9001_v48 = vld [vmem:[%s17232_s3 + $0x590] sm:$0xff]  ;;  %v6251_v6 = vsel %vm495_vm0, %v6246_v10, %v6250_v36  ;;  %v18159_v14 = vld [vmem:[#allocation81_spill] sm:$0xff] }
 0x5f6   : > { %v5652_v42 = vpop.f32.mrf.mxu2  ;;  %v5717_v30 = vpop.f32.mrf.mxu3  ;;  %6896 = vmatpush.msra.mxu3 %v9001_v48 }
 0x5f7   : > { %v5718_v4 = vadd.f32 %v5717_v30, %v5652_v42  ;;  %v15958_v26 = vadd.f32 %v6054_v7, %v15862_v29  ;;  %6578 = vmatmul.f32.gmra.mxu1 %v15466_v8  ;;  %v6247_v29 = vsel %vm495_vm0, %v6242_v50, %v6246_v10  ;;  %v15973_v22 = vpop.f32.mrf.mxu0  ;;  %v9034_v8 = vld [vmem:[%s17232_s3 + $0x698] sm:$0xff]  ;;  %v8999_v50 = vld [vmem:[%s17232_s3 + $0x580] sm:$0xff]  ;;  %v6252_v7 = vrot.slane %v16002_v53, 7 }
 0x5f8   : > { %7240 = vmatpush.msra.mxu1 %v9034_v8  ;;  %6897 = vmatpush.msra.mxu3 %v9000_v11  ;;  %v16018_v30 = vld [vmem:[#allocation3 + $0x78] sm:$0xff]  ;;  %v6256_v11 = vrot.slane %v6125_v55, 7  ;;  %v6620_v55 = vld [vmem:[#allocation3 + $0xb0] sm:$0xfe] }
 0x5f9   : > { %v15961_v32 = vadd.f32 %v5718_v4, %v5562_v27  ;;  %v6254_v10 = vrot.slane %v16018_v30, 7 }
 0x5fa   : > { %6525 = vmatmul.f32.gmra.mxu0 %v15930_v56  ;;  %6898 = vmatpush.msra.mxu3 %v8999_v50 }
 0x5fb   : > { %6344 = vmatmul.f32.gmra.mxu2 %v6245_v62  ;;  %6409 = vmatmul.f32.gmra.mxu3 %v6247_v29  ;;  %v6253_v29 = vsel %vm495_vm0, %v6248_v13, %v6252_v7  ;;  %v6255_v21 = vsel %vm495_vm0, %v6250_v36, %v6254_v10  ;;  %v18161_v13 = vld [vmem:[#allocation83_spill] sm:$0xff] }
 0x5fc   : > { %v6056_v34 = vpop.f32.mrf.mxu1  ;;  %7241 = vmatpush.msra.mxu1 %v9033_v1  ;;  %v6621_v1 = vld [vmem:[#allocation3 + $0xe8] sm:$0xff] }
 0x5fd   : > { %v6057_v59 = vadd.f32 %v6056_v34, %v15874_v58  ;;  %v9017_v58 = vld [vmem:[%s17232_s3 + $0x610] sm:$0xff] }
 0x5fe   : > { %v5655_v25 = vpop.f32.mrf.mxu2  ;;  %v5720_v40 = vpop.f32.mrf.mxu3  ;;  %7176 = vmatpush.msra.mxu0 %v9017_v58  ;;  %7242 = vmatpush.msra.mxu1 %v9032_v28  ;;  %v6619_v58 = vld [vmem:[#allocation3 + $0x30] sm:$0xfe] }
 0x5ff   : > { %v5721_v60 = vadd.f32 %v5720_v40, %v5655_v25  ;;  %v15999_v3 = vadd.f32 %v6057_v59, %v15899_v54  ;;  %6581 = vmatmul.f32.gmra.mxu1 %v15502_v38  ;;  %v16013_v54 = vpop.f32.mrf.mxu0  ;;  %v18158_v38 = vld [vmem:[#allocation77_spill] sm:$0xff]  ;;  %v6258_v40 = vrot.slane %v6126_v49, 7  ;;  %v6723_v49 = vrot.slane %v6620_v55, 1 }
 0x600   : > { %v5543_v42 = vadd.f32 %v18159_v14, %v18158_v38  ;;  %v9031_v38 = vld [vmem:[%s17232_s3 + $0x680] sm:$0xff] }
 0x601   : > { %v16004_v33 = vadd.f32 %v5721_v60, %v5563_v0  ;;  %v6257_v60 = vsel %vm495_vm0, %v6252_v7, %v6256_v11  ;;  %v6259_v14 = vsel %vm495_vm0, %v6254_v10, %v6258_v40  ;;  %v9078_v7 = vld [vmem:[%s17232_s3 + $0x7f8] sm:$0xff]  ;;  %v6622_v10 = vld [vmem:[#allocation3 + $0x48] sm:$0xff]  ;;  %7243 = vmatpush.msra.mxu1 %v9031_v38 }
 0x602   : > { %6528 = vmatmul.f32.gmra.mxu0 %v18157_v46  ;;  %v5564_v48 = vadd.f32 %v15666_v41, %v5543_v42  ;;  %7409 = vmatpush.msrb.mxu3 %v9078_v7 }
 0x603   : > { %6347 = vmatmul.f32.gmra.mxu2 %v6249_v57  ;;  %6412 = vmatmul.f32.gmra.mxu3 %v6251_v6 }
 0x604   : > { %v6059_v27 = vpop.f32.mrf.mxu1 }
 0x605   : > { %v6060_v62 = vadd.f32 %v6059_v27, %v15912_v15  ;;  %v9016_v15 = vld [vmem:[%s17232_s3 + $0x608] sm:$0xff]  ;;  %v18162_v27 = vld [vmem:[#allocation10_spill] sm:$0xff] }
 0x606   : > { %v5658_v4 = vpop.f32.mrf.mxu2  ;;  %v5723_v23 = vpop.f32.mrf.mxu3  ;;  %7177 = vmatpush.msra.mxu0 %v9016_v15 }
 0x607   : > { %v5724_v45 = vadd.f32 %v5723_v23, %v5658_v4  ;;  %v16026_v8 = vadd.f32 %v6060_v62, %v15932_v39  ;;  %6584 = vmatmul.f32.gmra.mxu1 %v15524_v35  ;;  %v16038_v46 = vpop.f32.mrf.mxu0  ;;  %v18160_v39 = vld [vmem:[#allocation29_spill] sm:$0xff]  ;;  %v18163_v4 = vld [vmem:[#allocation84_spill] sm:$0xff]  ;;  %v6720_v23 = vrot.slane %v6619_v58, 1 }
 0x608   : > { %v5546_v35 = vadd.f32 %v18161_v13, %v18160_v39  ;;  %v5549_v62 = vadd.f32 %v18163_v4, %v18162_v27  ;;  %v16100_v58 = vld [vmem:[#allocation3] sm:$0xff] }
 0x609   : > { %v16029_v61 = vadd.f32 %v5724_v45, %v5564_v48  ;;  %v6721_v48 = vrot.slane %v6621_v1, 1  ;;  %v6728_v7 = vrot.slane %v16100_v58, 1 }
 0x60a   : > { %6531 = vmatmul.f32.gmra.mxu0 %v16002_v53  ;;  %v5565_v36 = vadd.f32 %v15666_v41, %v5546_v35  ;;  %v5566_v39 = vadd.f32 %v15666_v41, %v5549_v62  ;;  %v9061_v41 = vld [vmem:[%s17232_s3 + $0x770] sm:$0xff] }
 0x60b   : > { %6350 = vmatmul.f32.gmra.mxu2 %v6253_v29  ;;  %6415 = vmatmul.f32.gmra.mxu3 %v6255_v21  ;;  %v6724_v21 = vrot.slane %v6622_v10, 1  ;;  %v6722_v35 = vsel %vm1378_vm1, %v6720_v23, %v6721_v48  ;;  %v16110_v23 = vld [vmem:[#allocation3 + $0x148] sm:$0xff] }
 0x60c   : > { %v6062_v34 = vpop.f32.mrf.mxu1  ;;  %v6730_v55 = vrot.slane %v16110_v23, 1 }
 0x60d   : > { %v6063_v50 = vadd.f32 %v6062_v34, %v15944_v2  ;;  %v9015_v2 = vld [vmem:[%s17232_s3 + $0x600] sm:$0xff]  ;;  %v16079_v34 = vld [vmem:[#allocation3 + $0x68] sm:$0xff] }
 0x60e   : > { %v5661_v25 = vpop.f32.mrf.mxu2  ;;  %v5726_v59 = vpop.f32.mrf.mxu3  ;;  %7178 = vmatpush.msra.mxu0 %v9015_v2 }
 0x60f   : > { %v5727_v0 = vadd.f32 %v5726_v59, %v5661_v25  ;;  %v16047_v57 = vadd.f32 %v6063_v50, %v15961_v32  ;;  %6587 = vmatmul.f32.gmra.mxu1 %v15541_v18  ;;  %v16059_v42 = vpop.f32.mrf.mxu0  ;;  %v16061_v32 = vld [vmem:[#allocation3 + $0xa0] sm:$0xff]  ;;  %v9062_v18 = vld [vmem:[%s17232_s3 + $0x778] sm:$0xff]  ;;  %v6964_v50 = vld [vmem:[#allocation3 + $0xe8] sm:$0x80] }
 0x610   : > { %7344 = vmatpush.msrb.mxu2 %v9062_v18  ;;  %v9077_v59 = vld [vmem:[%s17232_s3 + $0x7f0] sm:$0xff]  ;;  %v7065_v40 = vrot.slane %v6964_v50, 7 }
 0x611   : > { %v16050_v6 = vadd.f32 %v5727_v0, %v5565_v36  ;;  %7410 = vmatpush.msrb.mxu3 %v9077_v59  ;;  %v9094_v36 = vld [vmem:[%s17232_s3 + $0x878] sm:$0xff] }
 0x612   : > { %6534 = vmatmul.f32.gmra.mxu0 %v16061_v32  ;;  %v9110_v0 = vld [vmem:[%s17232_s3 + $0x8f8] sm:$0xff]  ;;  %7345 = vmatpush.msrb.mxu2 %v9061_v41 }
 0x613   : > { %6353 = vmatmul.f32.gmra.mxu2 %v6257_v60  ;;  %6418 = vmatmul.f32.gmra.mxu3 %v6259_v14  ;;  %v6726_v60 = vrot.slane %v16079_v34, 1 }
 0x614   : > { %v6065_v45 = vpop.f32.mrf.mxu1  ;;  %7689 = vmatpush.msrb.mxu0 %v9094_v36  ;;  %7754 = vmatpush.msrb.mxu1 %v9110_v0  ;;  %v9075_v36 = vld [vmem:[%s17232_s3 + $0x7e0] sm:$0xff] }
 0x615   : > { %v6066_v15 = vadd.f32 %v6065_v45, %v15973_v22  ;;  %v7066_v22 = vrot.slane %v16079_v34, 7  ;;  %v6727_v4 = vsel %vm1378_vm1, %v6721_v48, %v6726_v60  ;;  %v7071_v45 = vrot.slane %v16110_v23, 7  ;;  %v9076_v48 = vld [vmem:[%s17232_s3 + $0x7e8] sm:$0xff] }
 0x616   : > { %v5664_v29 = vpop.f32.mrf.mxu2  ;;  %v5729_v28 = vpop.f32.mrf.mxu3  ;;  %7411 = vmatpush.msrb.mxu3 %v9076_v48  ;;  %v6731_v41 = vsel %vm1378_vm1, %v6726_v60, %v6730_v55  ;;  %v16169_v48 = vld [vmem:[#allocation3 + $0x120] sm:$0xff] }
 0x617   : > { %v5730_v13 = vadd.f32 %v5729_v28, %v5664_v29  ;;  %v16076_v11 = vadd.f32 %v6066_v15, %v16004_v33  ;;  %6590 = vmatmul.f32.gmra.mxu1 %v15590_v20  ;;  %v6725_v33 = vsel %vm1378_vm1, %v6723_v49, %v6724_v21  ;;  %v16091_v20 = vpop.f32.mrf.mxu0  ;;  %v7067_v1 = vsel %vm495_vm0, %v7065_v40, %v7066_v22  ;;  %v16132_v15 = vld [vmem:[#allocation3 + $0x18] sm:$0xff] }
 0x618   : > { %v7072_v28 = vsel %vm495_vm0, %v7066_v22, %v7071_v45  ;;  %v6732_v49 = vrot.slane %v16132_v15, 1  ;;  %v16142_v22 = vld [vmem:[#allocation3 + $0x28] sm:$0xff]  ;;  %7412 = vmatpush.msrb.mxu3 %v9075_v36 }
 0x619   : > { %v16081_v25 = vadd.f32 %v5730_v13, %v5566_v39  ;;  %v7075_v40 = vrot.slane %v16142_v22, 7 }
 0x61a   : > { %7179 = vmatmul.f32.vlgmr.msra.gmra.mxu0 %v7067_v1  ;;  %v6733_v0 = vsel %vm1378_vm1, %v6728_v7, %v6732_v49  ;;  %v6734_v1 = vrot.slane %v16142_v22, 1 }
 0x61b   : > { %6834 = vmatmul.f32.vlgmr.msra.gmra.mxu2 %v6722_v35  ;;  %6899 = vmatmul.f32.vlgmr.msra.gmra.mxu3 %v6725_v33 }
 0x61c   : > { %v6068_v2 = vpop.f32.mrf.mxu1 }
 0x61d   : > { %v6069_v14 = vadd.f32 %v6068_v2, %v16013_v54  ;;  %v9060_v54 = vld [vmem:[%s17232_s3 + $0x768] sm:$0xff]  ;;  %v16164_v2 = vld [vmem:[#allocation3 + $0x150] sm:$0xff] }
 0x61e   : > { %v6309_v38 = vpop.f32.mrf.mxu2  ;;  %v6374_v18 = vpop.f32.mrf.mxu3  ;;  %7346 = vmatpush.msrb.mxu2 %v9060_v54 }
 0x61f   : > { %v6375_v27 = vadd.f32 %v6374_v18, %v6309_v38  ;;  %v16107_v62 = vadd.f32 %v6069_v14, %v16029_v61  ;;  %6593 = vmatmul.f32.gmra.mxu1 %v15558_v47  ;;  %v9093_v61 = vld [vmem:[%s17232_s3 + $0x870] sm:$0xff]  ;;  %v6729_v47 = vsel %vm1378_vm1, %v6724_v21, %v6728_v7  ;;  %v16126_v29 = vpop.f32.mrf.mxu0  ;;  %v7076_v38 = vsel %vm495_vm0, %v7071_v45, %v7075_v40 }
 0x620   : > { %7690 = vmatpush.msrb.mxu0 %v9093_v61  ;;  %v6735_v61 = vsel %vm1378_vm1, %v6730_v55, %v6734_v1  ;;  %v16176_v45 = vld [vmem:[#allocation3 + $0x110] sm:$0xff]  ;;  %v9074_v55 = vld [vmem:[%s17232_s3 + $0x7d8] sm:$0xff] }
 0x621   : > { %v16113_v10 = vadd.f32 %v6375_v27, %v15706_v16  ;;  %v9109_v16 = vld [vmem:[%s17232_s3 + $0x8f0] sm:$0xff]  ;;  %7413 = vmatpush.msrb.mxu3 %v9074_v55  ;;  %v9106_v55 = vld [vmem:[%s17232_s3 + $0x8d8] sm:$0xff] }
 0x622   : > { %7755 = vmatpush.msrb.mxu1 %v9109_v16  ;;  %7182 = vmatmul.f32.gmra.mxu0 %v7072_v28  ;;  %v9058_v28 = vld [vmem:[%s17232_s3 + $0x758] sm:$0xff] }
 0x623   : > { %6837 = vmatmul.f32.gmra.mxu2 %v6727_v4  ;;  %6902 = vmatmul.f32.gmra.mxu3 %v6729_v47  ;;  %v6736_v4 = vrot.slane %v16164_v2, 1 }
 0x624   : > { %v6071_v39 = vpop.f32.mrf.mxu1 }
 0x625   : > { %v6072_v21 = vadd.f32 %v6071_v39, %v16038_v46  ;;  %v9059_v46 = vld [vmem:[%s17232_s3 + $0x760] sm:$0xff]  ;;  %v6737_v39 = vsel %vm1378_vm1, %v6732_v49, %v6736_v4 }
 0x626   : > { %v6312_v13 = vpop.f32.mrf.mxu2  ;;  %v6377_v35 = vpop.f32.mrf.mxu3  ;;  %7347 = vmatpush.msrb.mxu2 %v9059_v46 }
 0x627   : > { %v6378_v50 = vadd.f32 %v6377_v35, %v6312_v13  ;;  %v16139_v59 = vadd.f32 %v6072_v21, %v16050_v6  ;;  %6596 = vmatmul.f32.gmra.mxu1 %v16018_v30  ;;  %v9092_v6 = vld [vmem:[%s17232_s3 + $0x868] sm:$0xff]  ;;  %v16158_v60 = vpop.f32.mrf.mxu0  ;;  %v9107_v21 = vld [vmem:[%s17232_s3 + $0x8e0] sm:$0xff]  ;;  %v7069_v35 = vrot.slane %v16100_v58, 7 }
 0x628   : > { %7691 = vmatpush.msrb.mxu0 %v9092_v6  ;;  %v6965_v13 = vld [vmem:[#allocation3 + $0x48] sm:$0x80]  ;;  %7348 = vmatpush.msrb.mxu2 %v9058_v28  ;;  %v9073_v28 = vld [vmem:[%s17232_s3 + $0x7d0] sm:$0xff] }
 0x629   : > { %v16145_v33 = vadd.f32 %v6378_v50, %v15736_v17  ;;  %v9108_v17 = vld [vmem:[%s17232_s3 + $0x8e8] sm:$0xff]  ;;  %v16199_v50 = vrot.slane %v16176_v45, 1  ;;  %v7068_v6 = vrot.slane %v6965_v13, 7  ;;  %7414 = vmatpush.msrb.mxu3 %v9073_v28  ;;  %v16238_v13 = vld [vmem:[#allocation3 + $0xe0] sm:$0xff] }
 0x62a   : > { %7756 = vmatpush.msrb.mxu1 %v9108_v17  ;;  %7185 = vmatmul.f32.gmra.mxu0 %v7076_v38 }
 0x62b   : > { %6840 = vmatmul.f32.gmra.mxu2 %v6731_v41  ;;  %6905 = vmatmul.f32.gmra.mxu3 %v6733_v0  ;;  %v16201_v41 = vld [vmem:[#allocation3 + $0x158] sm:$0xff] }
 0x62c   : > { %v6074_v14 = vpop.f32.mrf.mxu1  ;;  %7757 = vmatpush.msrb.mxu1 %v9107_v21  ;;  %v16206_v38 = vrot.slane %v16201_v41, 1 }
 0x62d   : > { %v6075_v7 = vadd.f32 %v6074_v14, %v16059_v42  ;;  %v7079_v42 = vrot.slane %v16176_v45, 7 }
 0x62e   : > { %v6315_v18 = vpop.f32.mrf.mxu2  ;;  %v6380_v27 = vpop.f32.mrf.mxu3  ;;  %18164 = vst [vmem:[#allocation85_spill] sm:$0xff] %v16206_v38  ;;  %7758 = vmatpush.msrb.mxu1 %v9106_v55 }
 0x62f   : > { %v6381_v54 = vadd.f32 %v6380_v27, %v6315_v18  ;;  %v16173_v47 = vadd.f32 %v6075_v7, %v16081_v25  ;;  %6599 = vmatmul.f32.gmra.mxu1 %v16169_v48  ;;  %v9091_v25 = vld [vmem:[%s17232_s3 + $0x860] sm:$0xff]  ;;  %v7080_v46 = vsel %vm495_vm0, %v7075_v40, %v7079_v42  ;;  %v7070_v18 = vsel %vm495_vm0, %v7068_v6, %v7069_v35  ;;  %v16214_v27 = vld [vmem:[#allocation3 + $0x128] sm:$0xff] }
 0x630   : > { %7692 = vmatpush.msrb.mxu0 %v9091_v25  ;;  %v6739_v7 = vsel %vm1378_vm1, %v6734_v1, %v16199_v50  ;;  %v6741_v1 = vsel %vm1378_vm1, %v6736_v4, %v16206_v38  ;;  %v7073_v25 = vrot.slane %v16132_v15, 7  ;;  %v6744_v6 = vrot.slane %v16238_v13, 1 }
 0x631   : > { %v16179_v16 = vadd.f32 %v6381_v54, %v15765_v52  ;;  %v16192_v52 = vpop.f32.mrf.mxu0 }
 0x632   : > { %7188 = vmatmul.f32.gmra.mxu0 %v7080_v46 }
 0x633   : > { %6843 = vmatmul.f32.gmra.mxu2 %v6735_v61  ;;  %6908 = vmatmul.f32.gmra.mxu3 %v6737_v39  ;;  %v9057_v61 = vld [vmem:[%s17232_s3 + $0x750] sm:$0xff]  ;;  %v6742_v39 = vrot.slane %v16214_v27, 1 }
 0x634   : > { %v6555_v49 = vpop.f32.mrf.mxu1  ;;  %7349 = vmatpush.msrb.mxu2 %v9057_v61  ;;  %v9056_v61 = vld [vmem:[%s17232_s3 + $0x748] sm:$0xff] }
 0x635   : > { %v6556_v0 = vadd.f32 %v6555_v49, %v16091_v20  ;;  %v7083_v20 = vrot.slane %v16214_v27, 7 }
 0x636   : > { %v6318_v36 = vpop.f32.mrf.mxu2  ;;  %v6383_v17 = vpop.f32.mrf.mxu3  ;;  %7350 = vmatpush.msrb.mxu2 %v9056_v61 }
 0x637   : > { %v6384_v14 = vadd.f32 %v6383_v17, %v6318_v36  ;;  %v16212_v40 = vadd.f32 %v6556_v0, %v16113_v10  ;;  %7244 = vmatmul.f32.vlgmr.msra.gmra.mxu1 %v7070_v18  ;;  %v9090_v10 = vld [vmem:[%s17232_s3 + $0x858] sm:$0xff]  ;;  %v7084_v21 = vsel %vm495_vm0, %v7079_v42, %v7083_v20  ;;  %v7074_v17 = vsel %vm495_vm0, %v7069_v35, %v7073_v25  ;;  %v16251_v18 = vld [vmem:[#allocation3 + $0x80] sm:$0xff]  ;;  %v9072_v35 = vld [vmem:[%s17232_s3 + $0x7c8] sm:$0xff] }
 0x638   : > { %7693 = vmatpush.msrb.mxu0 %v9090_v10  ;;  %18165 = vst [vmem:[#allocation86_spill] sm:$0xff] %v16251_v18  ;;  %7415 = vmatpush.msrb.mxu3 %v9072_v35  ;;  %v9105_v10 = vld [vmem:[%s17232_s3 + $0x8d0] sm:$0xff]  ;;  %v6746_v55 = vrot.slane %v16251_v18, 1 }
 0x639   : > { %v16217_v54 = vadd.f32 %v6384_v14, %v15794_v63  ;;  %v16231_v63 = vpop.f32.mrf.mxu0  ;;  %v16246_v14 = vsel %vm1378_vm1, %v16199_v50, %v6742_v39  ;;  %7759 = vmatpush.msrb.mxu1 %v9105_v10  ;;  %v7081_v10 = vrot.slane %v16201_v41, 7 }
 0x63a   : > { %7191 = vmatmul.f32.gmra.mxu0 %v7084_v21  ;;  %v16279_v21 = vld [vmem:[#allocation3 + $0x20] sm:$0xff] }
 0x63b   : > { %6846 = vmatmul.f32.gmra.mxu2 %v6739_v7  ;;  %6911 = vmatmul.f32.gmra.mxu3 %v6741_v1  ;;  %v7077_v1 = vrot.slane %v16164_v2, 7 }
 0x63c   : > { %v6558_v4 = vpop.f32.mrf.mxu1 }
 0x63d   : > { %v6559_v49 = vadd.f32 %v6558_v4, %v16126_v29  ;;  %v7087_v29 = vrot.slane %v16251_v18, 7 }
 0x63e   : > { %v6321_v46 = vpop.f32.mrf.mxu2  ;;  %v6386_v36 = vpop.f32.mrf.mxu3 }
 0x63f   : > { %v6387_v0 = vadd.f32 %v6386_v36, %v6321_v46  ;;  %v16249_v42 = vadd.f32 %v6559_v49, %v16145_v33  ;;  %7247 = vmatmul.f32.gmra.mxu1 %v7074_v17  ;;  %v9089_v33 = vld [vmem:[%s17232_s3 + $0x850] sm:$0xff]  ;;  %v7088_v4 = vsel %vm495_vm0, %v7083_v20, %v7087_v29  ;;  %v6748_v17 = vrot.slane %v16279_v21, 1 }
 0x640   : > { %7694 = vmatpush.msrb.mxu0 %v9089_v33  ;;  %v16291_v20 = vld [vmem:[#allocation3 + $0x70] sm:$0xff]  ;;  %v9055_v33 = vld [vmem:[%s17232_s3 + $0x740] sm:$0xff] }
 0x641   : > { %v16254_v7 = vadd.f32 %v6387_v0, %v15823_v37  ;;  %v16269_v37 = vsel %vm1378_vm1, %v16206_v38, %v6744_v6  ;;  %v16271_v28 = vpop.f32.mrf.mxu0  ;;  %v16286_v38 = vsel %vm1378_vm1, %v6742_v39, %v6746_v55  ;;  %18168 = vst [vmem:[#allocation93_spill] sm:$0xff] %v16291_v20  ;;  %v16308_v39 = vsel %vm1378_vm1, %v6744_v6, %v6748_v17 }
 0x642   : > { %18166 = vst [vmem:[#allocation89_spill] sm:$0xff] %v16269_v37  ;;  %7194 = vmatmul.f32.gmra.mxu0 %v7088_v4  ;;  %v16318_v4 = vrot.slane %v16291_v20, 1  ;;  %7351 = vmatpush.msrb.mxu2 %v9055_v33 }
 0x643   : > { %6849 = vmatmul.f32.gmra.mxu2 %v16246_v14  ;;  %6914 = vmatmul.f32.gmra.mxu3 %v16269_v37  ;;  %v7078_v37 = vsel %vm495_vm0, %v7073_v25, %v7077_v1  ;;  %18167 = vst [vmem:[#allocation90_spill] sm:$0xff] %v16286_v38  ;;  %v9071_v25 = vld [vmem:[%s17232_s3 + $0x7c0] sm:$0xff] }
 0x644   : > { %v6561_v46 = vpop.f32.mrf.mxu1  ;;  %18169 = vst [vmem:[#allocation94_spill] sm:$0xff] %v16308_v39  ;;  %7416 = vmatpush.msrb.mxu3 %v9071_v25 }
 0x645   : > { %v6562_v36 = vadd.f32 %v6561_v46, %v16158_v60  ;;  %v7091_v60 = vrot.slane %v16291_v20, 7  ;;  %v16320_v46 = vld [vmem:[#allocation3 + $0x50] sm:$0xff]  ;;  %v16328_v20 = vsel %vm1378_vm1, %v6746_v55, %v16318_v4  ;;  %v9103_v55 = vld [vmem:[%s17232_s3 + $0x8c0] sm:$0xff] }
 0x646   : > { %v6324_v49 = vpop.f32.mrf.mxu2  ;;  %v6389_v0 = vpop.f32.mrf.mxu3  ;;  %v6752_v25 = vrot.slane %v16320_v46, 1 }
 0x647   : > { %v6390_v35 = vadd.f32 %v6389_v0, %v6324_v49  ;;  %v16289_v18 = vadd.f32 %v6562_v36, %v16179_v16  ;;  %7250 = vmatmul.f32.gmra.mxu1 %v7078_v37  ;;  %v9088_v16 = vld [vmem:[%s17232_s3 + $0x848] sm:$0xff]  ;;  %v7092_v49 = vsel %vm495_vm0, %v7087_v29, %v7091_v60 }
 0x648   : > { %v9104_v37 = vld [vmem:[%s17232_s3 + $0x8c8] sm:$0xff]  ;;  %7695 = vmatpush.msrb.mxu0 %v9088_v16  ;;  %v9070_v16 = vld [vmem:[%s17232_s3 + $0x7b8] sm:$0xff] }
 0x649   : > { %v16294_v61 = vadd.f32 %v6390_v35, %v15857_v44  ;;  %v16310_v44 = vpop.f32.mrf.mxu0  ;;  %7760 = vmatpush.msrb.mxu1 %v9104_v37  ;;  %7417 = vmatpush.msrb.mxu3 %v9070_v16  ;;  %v6754_v37 = vrot.slane %v15826_v9, 1 }
 0x64a   : > { %7197 = vmatmul.f32.gmra.mxu0 %v7092_v49  ;;  %v16359_v49 = vld [vmem:[#allocation3 + $0x118] sm:$0xff] }
 0x64b   : > { %6852 = vmatmul.f32.gmra.mxu2 %v16286_v38  ;;  %6917 = vmatmul.f32.gmra.mxu3 %v16308_v39  ;;  %v7082_v38 = vsel %vm495_vm0, %v7077_v1, %v7081_v10  ;;  %v9087_v1 = vld [vmem:[%s17232_s3 + $0x840] sm:$0xff]  ;;  %v6755_v16 = vsel %vm1378_vm1, %v16318_v4, %v6754_v37 }
 0x64c   : > { %v6564_v6 = vpop.f32.mrf.mxu1  ;;  %7696 = vmatpush.msrb.mxu0 %v9087_v1  ;;  %7761 = vmatpush.msrb.mxu1 %v9103_v55  ;;  %v9069_v1 = vld [vmem:[%s17232_s3 + $0x7b0] sm:$0xff]  ;;  %v7089_v55 = vrot.slane %v16279_v21, 7 }
 0x64d   : > { %v6565_v0 = vadd.f32 %v6564_v6, %v16192_v52  ;;  %v9054_v52 = vld [vmem:[%s17232_s3 + $0x738] sm:$0xff]  ;;  %7418 = vmatpush.msrb.mxu3 %v9069_v1 }
 0x64e   : > { %v6327_v36 = vpop.f32.mrf.mxu2  ;;  %v6392_v35 = vpop.f32.mrf.mxu3  ;;  %7352 = vmatpush.msrb.mxu2 %v9054_v52 }
 0x64f   : > { %v6393_v39 = vadd.f32 %v6392_v35, %v6327_v36  ;;  %v16331_v29 = vadd.f32 %v6565_v0, %v16217_v54  ;;  %7253 = vmatmul.f32.gmra.mxu1 %v7082_v38  ;;  %v16347_v54 = vsel %vm1378_vm1, %v6748_v17, %v6752_v25  ;;  %v6756_v36 = vrot.slane %v16359_v49, 1 }
 0x650   : > { %18170 = vst [vmem:[#allocation96_spill] sm:$0xff] %v16347_v54 }
 0x651   : > { %v16334_v33 = vadd.f32 %v6393_v39, %v15894_v5  ;;  %v16349_v38 = vpop.f32.mrf.mxu0  ;;  %v7096_v5 = vsel %vm495_vm0, %v7091_v60, %v15848_v12  ;;  %v7085_v39 = vrot.slane %v16238_v13, 7 }
 0x652   : > { %7200 = vmatmul.f32.gmra.mxu0 %v7096_v5 }
 0x653   : > { %6855 = vmatmul.f32.gmra.mxu2 %v16328_v20  ;;  %6920 = vmatmul.f32.gmra.mxu3 %v16347_v54  ;;  %v7086_v35 = vsel %vm495_vm0, %v7081_v10, %v7085_v39  ;;  %v9086_v10 = vld [vmem:[%s17232_s3 + $0x838] sm:$0xff]  ;;  %v7090_v1 = vsel %vm495_vm0, %v7085_v39, %v7089_v55 }
 0x654   : > { %v6567_v17 = vpop.f32.mrf.mxu1  ;;  %7697 = vmatpush.msrb.mxu0 %v9086_v10  ;;  %v16405_v10 = vld [vmem:[#allocation3 + $0xa8] sm:$0xff] }
 0x655   : > { %v6568_v12 = vadd.f32 %v6567_v17, %v16231_v63  ;;  %v9053_v63 = vld [vmem:[%s17232_s3 + $0x730] sm:$0xff]  ;;  %v6758_v17 = vrot.slane %v15860_v51, 1  ;;  %18172 = vst [vmem:[#allocation98_spill] sm:$0xff] %v16405_v10 }
 0x656   : > { %v6330_v6 = vpop.f32.mrf.mxu2  ;;  %v6395_v60 = vpop.f32.mrf.mxu3  ;;  %7353 = vmatpush.msrb.mxu2 %v9053_v63 }
 0x657   : > { %v6396_v0 = vadd.f32 %v6395_v60, %v6330_v6  ;;  %v16367_v9 = vadd.f32 %v6568_v12, %v16254_v7  ;;  %7256 = vmatmul.f32.gmra.mxu1 %v7086_v35  ;;  %v16382_v7 = vsel %vm1378_vm1, %v6752_v25, %v6756_v36  ;;  %v16392_v6 = vld [vmem:[#allocation3 + $0x108] sm:$0xff] }
 0x658   : > { %18171 = vst [vmem:[#allocation97_spill] sm:$0xff] %v16382_v7  ;;  %v6760_v35 = vrot.slane %v16392_v6, 1 }
 0x659   : > { %v16370_v52 = vadd.f32 %v6396_v0, %v15927_v31  ;;  %v16384_v5 = vpop.f32.mrf.mxu0  ;;  %v9102_v31 = vld [vmem:[%s17232_s3 + $0x8b8] sm:$0xff] }
 0x65a   : > { %7762 = vmatpush.msrb.mxu1 %v9102_v31  ;;  %7203 = vmatmul.f32.gmra.mxu0 %v15891_v19  ;;  %v9052_v19 = vld [vmem:[%s17232_s3 + $0x728] sm:$0xff]  ;;  %v16414_v39 = vsel %vm1378_vm1, %v6756_v36, %v6760_v35  ;;  %v9101_v31 = vld [vmem:[%s17232_s3 + $0x8b0] sm:$0xff]  ;;  %v6762_v36 = vrot.slane %v15897_v24, 1 }
 0x65b   : > { %6858 = vmatmul.f32.gmra.mxu2 %v6755_v16  ;;  %6923 = vmatmul.f32.gmra.mxu3 %v16382_v7  ;;  %v6759_v7 = vsel %vm1378_vm1, %v6754_v37, %v6758_v17  ;;  %18173 = vst [vmem:[#allocation99_spill] sm:$0xff] %v16414_v39  ;;  %v7103_v37 = vrot.slane %v16405_v10, 7 }
 0x65c   : > { %v6570_v25 = vpop.f32.mrf.mxu1  ;;  %7354 = vmatpush.msrb.mxu2 %v9052_v19  ;;  %7763 = vmatpush.msrb.mxu1 %v9101_v31  ;;  %v6763_v24 = vsel %vm1378_vm1, %v6758_v17, %v6762_v36  ;;  %v9067_v31 = vld [vmem:[%s17232_s3 + $0x7a0] sm:$0xff]  ;;  %v9100_v17 = vld [vmem:[%s17232_s3 + $0x8a8] sm:$0xff] }
 0x65d   : > { %v6571_v60 = vadd.f32 %v6570_v25, %v16271_v28  ;;  %v9068_v28 = vld [vmem:[%s17232_s3 + $0x7a8] sm:$0xff]  ;;  %v16428_v25 = vld [vmem:[#allocation3 + $0xb8] sm:$0xff] }
 0x65e   : > { %v6333_v12 = vpop.f32.mrf.mxu2  ;;  %v6398_v0 = vpop.f32.mrf.mxu3  ;;  %7419 = vmatpush.msrb.mxu3 %v9068_v28  ;;  %v6764_v28 = vrot.slane %v16428_v25, 1  ;;  %7764 = vmatpush.msrb.mxu1 %v9100_v17 }
 0x65f   : > { %v6399_v16 = vadd.f32 %v6398_v0, %v6333_v12  ;;  %v16400_v51 = vadd.f32 %v6571_v60, %v16294_v61  ;;  %7259 = vmatmul.f32.gmra.mxu1 %v7090_v1  ;;  %v7104_v12 = vsel %vm495_vm0, %v15882_v43, %v7103_v37 }
 0x660   : > { %7420 = vmatpush.msrb.mxu3 %v9067_v31 }
 0x661   : > { %v16403_v63 = vadd.f32 %v6399_v16, %v15958_v26  ;;  %v16416_v61 = vpop.f32.mrf.mxu0  ;;  %v9085_v26 = vld [vmem:[%s17232_s3 + $0x830] sm:$0xff] }
 0x662   : > { %7698 = vmatpush.msrb.mxu0 %v9085_v26  ;;  %v16442_v26 = vld [vmem:[#allocation3 + $0xc8] sm:$0xff] }
 0x663   : > { %6861 = vmatmul.f32.gmra.mxu2 %v6759_v7  ;;  %6926 = vmatmul.f32.gmra.mxu3 %v16414_v39  ;;  %v7093_v7 = vrot.slane %v16320_v46, 7  ;;  %18174 = vst [vmem:[#allocation100_spill] sm:$0xff] %v16442_v26 }
 0x664   : > { %v6573_v60 = vpop.f32.mrf.mxu1  ;;  %7206 = vmatmul.f32.gmra.mxu0 %v7104_v12  ;;  %v16465_v12 = vld [vmem:[#allocation3 + $0x90] sm:$0xff] }
 0x665   : > { %v6574_v16 = vadd.f32 %v6573_v60, %v16310_v44  ;;  %v7094_v54 = vsel %vm495_vm0, %v7089_v55, %v7093_v7  ;;  %v9051_v44 = vld [vmem:[%s17232_s3 + $0x720] sm:$0xff]  ;;  %v16451_v55 = vsel %vm1378_vm1, %v6760_v35, %v6764_v28  ;;  %v6766_v35 = vrot.slane %v15930_v56, 1 }
 0x666   : > { %v6336_v0 = vpop.f32.mrf.mxu2  ;;  %v6401_v1 = vpop.f32.mrf.mxu3  ;;  %18175 = vst [vmem:[#allocation101_spill] sm:$0xff] %v16451_v55  ;;  %7355 = vmatpush.msrb.mxu2 %v9051_v44  ;;  %v6768_v31 = vrot.slane %v16465_v12, 1 }
 0x667   : > { %v6402_v39 = vadd.f32 %v6401_v1, %v6336_v0  ;;  %v16437_v19 = vadd.f32 %v6574_v16, %v16334_v33  ;;  %7262 = vmatmul.f32.gmra.mxu1 %v7094_v54  ;;  %v7107_v54 = vrot.slane %v16442_v26, 7  ;;  %v6767_v56 = vsel %vm1378_vm1, %v6762_v36, %v6766_v35 }
 0x668   : > { %v16491_v36 = vsel %vm1378_vm1, %v6764_v28, %v6768_v31 }
 0x669   : > { %v16440_v43 = vadd.f32 %v6402_v39, %v15999_v3  ;;  %v16453_v33 = vpop.f32.mrf.mxu0  ;;  %v9084_v3 = vld [vmem:[%s17232_s3 + $0x828] sm:$0xff]  ;;  %v7097_v39 = vrot.slane %v16359_v49, 7  ;;  %v7108_v60 = vsel %vm495_vm0, %v7103_v37, %v7107_v54  ;;  %v16475_v37 = vld [vmem:[#allocation3 + $0x140] sm:$0xff]  ;;  %18177 = vst [vmem:[#allocation103_spill] sm:$0xff] %v16491_v36 }
 0x66a   : > { %7699 = vmatpush.msrb.mxu0 %v9084_v3  ;;  %18176 = vst [vmem:[#allocation102_spill] sm:$0xff] %v16475_v37  ;;  %v7111_v3 = vrot.slane %v16475_v37, 7  ;;  %v16501_v17 = vrot.slane %v16475_v37, 1 }
 0x66b   : > { %6864 = vmatmul.f32.gmra.mxu2 %v6763_v24  ;;  %6929 = vmatmul.f32.gmra.mxu3 %v16451_v55  ;;  %v7098_v26 = vsel %vm495_vm0, %v7093_v7, %v7097_v39  ;;  %v9066_v7 = vld [vmem:[%s17232_s3 + $0x798] sm:$0xff] }
 0x66c   : > { %v6576_v0 = vpop.f32.mrf.mxu1  ;;  %7209 = vmatmul.f32.gmra.mxu0 %v7108_v60  ;;  %7421 = vmatpush.msrb.mxu3 %v9066_v7  ;;  %v16503_v60 = vld [vmem:[#allocation3 + $0x10] sm:$0xff]  ;;  %v6771_v37 = vsel %vm1378_vm1, %v6766_v35, %v16501_v17 }
 0x66d   : > { %v6577_v1 = vadd.f32 %v6576_v0, %v16349_v38  ;;  %v9050_v38 = vld [vmem:[%s17232_s3 + $0x718] sm:$0xff]  ;;  %v7112_v0 = vsel %vm495_vm0, %v7107_v54, %v7111_v3 }
 0x66e   : > { %v6339_v16 = vpop.f32.mrf.mxu2  ;;  %v6404_v24 = vpop.f32.mrf.mxu3  ;;  %7356 = vmatpush.msrb.mxu2 %v9050_v38 }
 0x66f   : > { %v6405_v55 = vadd.f32 %v6404_v24, %v6339_v16  ;;  %v16473_v10 = vadd.f32 %v6577_v1, %v16370_v52  ;;  %7265 = vmatmul.f32.gmra.mxu1 %v7098_v26  ;;  %v9083_v52 = vld [vmem:[%s17232_s3 + $0x820] sm:$0xff] }
 0x670   : > { %v9099_v26 = vld [vmem:[%s17232_s3 + $0x8a0] sm:$0xff]  ;;  %7700 = vmatpush.msrb.mxu0 %v9083_v52  ;;  %v16519_v52 = vld [vmem:[#allocation3 + $0x138] sm:$0xff] }
 0x671   : > { %v16478_v44 = vadd.f32 %v6405_v55, %v16026_v8  ;;  %v16493_v8 = vpop.f32.mrf.mxu0  ;;  %v7101_v55 = vrot.slane %v16392_v6, 7  ;;  %7765 = vmatpush.msrb.mxu1 %v9099_v26  ;;  %18179 = vst [vmem:[#allocation105_spill] sm:$0xff] %v16519_v52  ;;  %v9098_v26 = vld [vmem:[%s17232_s3 + $0x898] sm:$0xff] }
 0x673   : > { %6867 = vmatmul.f32.gmra.mxu2 %v6767_v56  ;;  %6932 = vmatmul.f32.gmra.mxu3 %v16491_v36  ;;  %v16508_v56 = vrot.slane %v16503_v60, 1  ;;  %v7102_v36 = vsel %vm495_vm0, %v7097_v39, %v7101_v55  ;;  %v9065_v39 = vld [vmem:[%s17232_s3 + $0x790] sm:$0xff] }
 0x674   : > { %v6579_v28 = vpop.f32.mrf.mxu1  ;;  %7212 = vmatmul.f32.gmra.mxu0 %v7112_v0  ;;  %7422 = vmatpush.msrb.mxu3 %v9065_v39  ;;  %v6774_v0 = vrot.slane %v16002_v53, 1  ;;  %v9063_v53 = vld [vmem:[%s17232_s3 + $0x780] sm:$0xff] }
 0x675   : > { %v6580_v1 = vadd.f32 %v6579_v28, %v16384_v5  ;;  %18178 = vst [vmem:[#allocation104_spill] sm:$0xff] %v16508_v56  ;;  %v9049_v5 = vld [vmem:[%s17232_s3 + $0x710] sm:$0xff]  ;;  %v16529_v35 = vsel %vm1378_vm1, %v6768_v31, %v16508_v56  ;;  %v7105_v31 = vrot.slane %v16428_v25, 7  ;;  %v9064_v28 = vld [vmem:[%s17232_s3 + $0x788] sm:$0xff]  ;;  %7766 = vmatpush.msrb.mxu1 %v9098_v26 }
 0x676   : > { %v6342_v16 = vpop.f32.mrf.mxu2  ;;  %v6407_v24 = vpop.f32.mrf.mxu3  ;;  %18180 = vst [vmem:[#allocation30_spill] sm:$0xff] %v16529_v35  ;;  %7357 = vmatpush.msrb.mxu2 %v9049_v5  ;;  %7423 = vmatpush.msrb.mxu3 %v9064_v28  ;;  %v6775_v26 = vsel %vm1378_vm1, %v16501_v17, %v6774_v0 }
 0x677   : > { %v6408_v7 = vadd.f32 %v6407_v24, %v6342_v16  ;;  %v16514_v54 = vadd.f32 %v6580_v1, %v16403_v63  ;;  %7268 = vmatmul.f32.gmra.mxu1 %v7102_v36  ;;  %v9082_v36 = vld [vmem:[%s17232_s3 + $0x818] sm:$0xff]  ;;  %v9047_v1 = vld [vmem:[%s17232_s3 + $0x700] sm:$0xff] }
 0x678   : > { %7701 = vmatpush.msrb.mxu0 %v9082_v36  ;;  %v7106_v36 = vsel %vm495_vm0, %v7101_v55, %v7105_v31  ;;  %7424 = vmatpush.msrb.mxu3 %v9063_v53  ;;  %v9097_v55 = vld [vmem:[%s17232_s3 + $0x890] sm:$0xff] }
 0x679   : > { %v16517_v38 = vadd.f32 %v6408_v7, %v16047_v57  ;;  %v16531_v63 = vpop.f32.mrf.mxu0  ;;  %v7115_v57 = vrot.slane %v16519_v52, 7  ;;  %7767 = vmatpush.msrb.mxu1 %v9097_v55  ;;  %v16591_v55 = vld [vmem:[#allocation3 + $0xd8] sm:$0xff] }
 0x67b   : > { %6870 = vmatmul.f32.gmra.mxu2 %v6771_v37  ;;  %v9048_v37 = vld [vmem:[%s17232_s3 + $0x708] sm:$0xff]  ;;  %6935 = vmatmul.f32.gmra.mxu3 %v16529_v35  ;;  %v7116_v16 = vsel %vm495_vm0, %v7111_v3, %v7115_v57  ;;  %v6776_v35 = vrot.slane %v16018_v30, 1  ;;  %v9081_v30 = vld [vmem:[%s17232_s3 + $0x810] sm:$0xff] }
 0x67c   : > { %v6582_v24 = vpop.f32.mrf.mxu1  ;;  %7215 = vmatmul.f32.gmra.mxu0 %v7116_v16  ;;  %7358 = vmatpush.msrb.mxu2 %v9048_v37 }
 0x67d   : > { %v6583_v5 = vadd.f32 %v6582_v24, %v16416_v61  ;;  %v7119_v61 = vrot.slane %v16061_v32, 7  ;;  %7702 = vmatpush.msrb.mxu0 %v9081_v30 }
 0x67e   : > { %v6345_v7 = vpop.f32.mrf.mxu2  ;;  %v6410_v39 = vpop.f32.mrf.mxu3  ;;  %7359 = vmatpush.msrb.mxu2 %v9047_v1  ;;  %v6778_v1 = vrot.slane %v16061_v32, 1  ;;  %v6651_v32 = vld [vmem:[#allocation3 + $0xd8] sm:$0x1] }
 0x67f   : > { %v6411_v3 = vadd.f32 %v6410_v39, %v6345_v7  ;;  %v16562_v16 = vadd.f32 %v6583_v5, %v16440_v43  ;;  %7271 = vmatmul.f32.gmra.mxu1 %v7106_v36  ;;  %v6777_v43 = vsel %vm1378_vm1, %v16508_v56, %v6776_v35  ;;  %v7120_v24 = vsel %vm495_vm0, %v7115_v57, %v7119_v61 }
 0x680   : > { %v6779_v30 = vsel %vm1378_vm1, %v6774_v0, %v6778_v1 }
 0x681   : > { %v16565_v37 = vadd.f32 %v6411_v3, %v16076_v11  ;;  %v16576_v28 = vpop.f32.mrf.mxu0  ;;  %v7109_v11 = vrot.slane %v16465_v12, 7  ;;  %v6780_v3 = vrot.slane %v16169_v48, 1 }
 0x683   : > { %6873 = vmatmul.f32.gmra.mxu2 %v6775_v26  ;;  %6938 = vmatmul.f32.gmra.mxu3 %v6777_v43  ;;  %v7110_v26 = vsel %vm495_vm0, %v7105_v31, %v7109_v11  ;;  %v9096_v31 = vld [vmem:[%s17232_s3 + $0x888] sm:$0xff]  ;;  %v6781_v0 = vsel %vm1378_vm1, %v6776_v35, %v6780_v3 }
 0x684   : > { %v6585_v7 = vpop.f32.mrf.mxu1  ;;  %7218 = vmatmul.f32.gmra.mxu0 %v7120_v24  ;;  %v7123_v24 = vrot.slane %v16591_v55, 7  ;;  %7768 = vmatpush.msrb.mxu1 %v9096_v31  ;;  %v6996_v31 = vld [vmem:[#allocation3 + $0x58] sm:$0x7f] }
 0x685   : > { %v6586_v5 = vadd.f32 %v6585_v7, %v16453_v33  ;;  %v9080_v33 = vld [vmem:[%s17232_s3 + $0x808] sm:$0xff]  ;;  %v6782_v7 = vrot.slane %v6651_v32, 1  ;;  %v16611_v32 = vld [vmem:[#allocation3 + $0x78] sm:$0xff] }
 0x686   : > { %v6348_v53 = vpop.f32.mrf.mxu2  ;;  %v6413_v39 = vpop.f32.mrf.mxu3  ;;  %7703 = vmatpush.msrb.mxu0 %v9080_v33 }
 0x687   : > { %v6414_v36 = vadd.f32 %v6413_v39, %v6348_v53  ;;  %v16586_v43 = vadd.f32 %v6586_v5, %v16478_v44  ;;  %7274 = vmatmul.f32.gmra.mxu1 %v7110_v26  ;;  %v6652_v53 = vld [vmem:[#allocation3 + $0xf8] sm:$0x1]  ;;  %v7124_v5 = vsel %vm495_vm0, %v7119_v61, %v7123_v24  ;;  %v6783_v33 = vsel %vm1378_vm1, %v6778_v1, %v6782_v7 }
 0x688   : > { %v6784_v35 = vrot.slane %v6652_v53, 1 }
 0x689   : > { %v16589_v57 = vadd.f32 %v6414_v36, %v16107_v62  ;;  %v16600_v44 = vpop.f32.mrf.mxu0  ;;  %v7113_v62 = vrot.slane %v16503_v60, 7 }
 0x68a   : > { %v6785_v53 = vsel %vm1378_vm1, %v6780_v3, %v6784_v35  ;;  %v7490_v35 = vld [vmem:[#allocation3 + $0x68] sm:$0xfe] }
 0x68b   : > { %6876 = vmatmul.f32.gmra.mxu2 %v6779_v30  ;;  %6941 = vmatmul.f32.gmra.mxu3 %v6781_v0  ;;  %v7114_v52 = vsel %vm495_vm0, %v7109_v11, %v7113_v62  ;;  %v7127_v11 = vrot.slane %v6996_v31, 7  ;;  %v7591_v31 = vrot.slane %v7490_v35, 1  ;;  %v6997_v35 = vld [vmem:[#allocation3 + $0x60] sm:$0x7f] }
 0x68c   : > { %v6588_v39 = vpop.f32.mrf.mxu1  ;;  %7221 = vmatmul.f32.gmra.mxu0 %v7124_v5 }
 0x68d   : > { %v6589_v26 = vadd.f32 %v6588_v39, %v16493_v8  ;;  %v9079_v8 = vld [vmem:[%s17232_s3 + $0x800] sm:$0xff] }
 0x68e   : > { %v6351_v36 = vpop.f32.mrf.mxu2  ;;  %v6416_v30 = vpop.f32.mrf.mxu3  ;;  %7704 = vmatpush.msrb.mxu0 %v9079_v8 }
 0x68f   : > { %v6417_v56 = vadd.f32 %v6416_v30, %v6351_v36  ;;  %v16609_v0 = vadd.f32 %v6589_v26, %v16517_v38  ;;  %7277 = vmatmul.f32.gmra.mxu1 %v7114_v52  ;;  %v9095_v38 = vld [vmem:[%s17232_s3 + $0x880] sm:$0xff]  ;;  %v7117_v52 = vrot.slane %v16611_v32, 7 }
 0x690   : > { %7769 = vmatpush.msrb.mxu1 %v9095_v38 }
 0x691   : > { %v6436_v61 = vadd.f32 %v6417_v56, %v16139_v59  ;;  %v16618_v5 = vpop.f32.mrf.mxu0  ;;  %v7128_v59 = vsel %vm495_vm0, %v7123_v24, %v7127_v11  ;;  %v7118_v36 = vsel %vm495_vm0, %v7113_v62, %v7117_v52 }
 0x693   : > { %6879 = vmatmul.f32.gmra.mxu2 %v6783_v33  ;;  %6944 = vmatmul.f32.gmra.mxu3 %v6785_v53  ;;  %v7492_v33 = vld [vmem:[#allocation3 + $0x148] sm:$0xff] }
 0x694   : > { %v6591_v56 = vpop.f32.mrf.mxu1  ;;  %7224 = vmatmul.f32.gmra.mxu0 %v7128_v59  ;;  %v7592_v8 = vrot.slane %v7492_v33, 1 }
 0x695   : > { %v6592_v7 = vadd.f32 %v6591_v56, %v16531_v63  ;;  %v7121_v63 = vrot.slane %v16169_v48, 7  ;;  %v16640_v56 = vld [vmem:[#allocation3 + $0xf8] sm:$0xff]  ;;  %v7494_v48 = vld [vmem:[#allocation3 + $0x28] sm:$0xff] }
 0x696   : > { %v6354_v1 = vpop.f32.mrf.mxu2  ;;  %v6419_v3 = vpop.f32.mrf.mxu3  ;;  %v7593_v53 = vsel %vm1378_vm1, %v7591_v31, %v7592_v8 }
 0x697   : > { %v6420_v39 = vadd.f32 %v6419_v3, %v6354_v1  ;;  %v16628_v26 = vadd.f32 %v6592_v7, %v16565_v37  ;;  %7280 = vmatmul.f32.gmra.mxu1 %v7118_v36  ;;  %v7122_v59 = vsel %vm495_vm0, %v7117_v52, %v7121_v63  ;;  %v7597_v7 = vrot.slane %v7494_v48, 1 }
 0x699   : > { %v6437_v30 = vadd.f32 %v6420_v39, %v16173_v47  ;;  %v7180_v24 = vpop.f32.mrf.mxu0  ;;  %v7598_v3 = vsel %vm1378_vm1, %v7592_v8, %v7597_v7  ;;  %v7602_v8 = vsel %vm1378_vm1, %v7597_v7, %v16199_v50  ;;  %v7491_v50 = vld [vmem:[#allocation3] sm:$0xfe] }
 0x69a   : > { %v7594_v7 = vrot.slane %v7491_v50, 1 }
 0x69b   : > { %7360 = vmatmul.f32.vlgmr.msrb.gmra.mxu2 %v16079_v34  ;;  %7425 = vmatmul.f32.vlgmr.msrb.gmra.mxu3 %v16100_v58 }
 0x69c   : > { %v6594_v62 = vpop.f32.mrf.mxu1  ;;  %7705 = vmatmul.f32.vlgmr.msrb.gmra.mxu0 %v7593_v53 }
 0x69d   : > { %v6595_v37 = vadd.f32 %v6594_v62, %v16576_v28  ;;  %v7125_v28 = vrot.slane %v16640_v56, 7 }
 0x69e   : > { %v6835_v11 = vpop.f32.mrf.mxu2  ;;  %v6900_v38 = vpop.f32.mrf.mxu3 }
 0x69f   : > { %v6901_v47 = vadd.f32 %v6900_v38, %v6835_v11  ;;  %v16638_v34 = vadd.f32 %v6595_v37, %v16589_v57  ;;  %7283 = vmatmul.f32.gmra.mxu1 %v7122_v59 }
 0x6a1   : > { %v6948_v58 = vadd.f32 %v6901_v47, %v16212_v40  ;;  %v7183_v1 = vpop.f32.mrf.mxu0  ;;  %v7126_v40 = vsel %vm495_vm0, %v7121_v63, %v7125_v28 }
 0x6a3   : > { %7363 = vmatmul.f32.gmra.mxu2 %v16110_v23  ;;  %7428 = vmatmul.f32.gmra.mxu3 %v16132_v15  ;;  %v7129_v15 = vrot.slane %v6997_v35, 7 }
 0x6a4   : > { %v6597_v52 = vpop.f32.mrf.mxu1  ;;  %7708 = vmatmul.f32.gmra.mxu0 %v7598_v3 }
 0x6a5   : > { %v6598_v57 = vadd.f32 %v6597_v52, %v16600_v44  ;;  %v7130_v11 = vsel %vm495_vm0, %v7125_v28, %v7129_v15  ;;  %v18182_v15 = vld [vmem:[#allocation86_spill] sm:$0xff] }
 0x6a6   : > { %v6838_v39 = vpop.f32.mrf.mxu2  ;;  %v6903_v36 = vpop.f32.mrf.mxu3 }
 0x6a7   : > { %v6904_v33 = vadd.f32 %v6903_v36, %v6838_v39  ;;  %v16649_v31 = vadd.f32 %v6598_v57, %v6436_v61  ;;  %7286 = vmatmul.f32.gmra.mxu1 %v7126_v40 }
 0x6a9   : > { %v6949_v23 = vadd.f32 %v6904_v33, %v16249_v42  ;;  %v7186_v53 = vpop.f32.mrf.mxu0  ;;  %v7493_v42 = vld [vmem:[#allocation3 + $0x18] sm:$0xff] }
 0x6ab   : > { %7366 = vmatmul.f32.gmra.mxu2 %v16142_v22  ;;  %7431 = vmatmul.f32.gmra.mxu3 %v16164_v2  ;;  %v7595_v2 = vrot.slane %v7493_v42, 1 }
 0x6ac   : > { %v6600_v44 = vpop.f32.mrf.mxu1  ;;  %7711 = vmatmul.f32.gmra.mxu0 %v7602_v8 }
 0x6ad   : > { %v6601_v61 = vadd.f32 %v6600_v44, %v16618_v5  ;;  %v7596_v3 = vsel %vm1378_vm1, %v7594_v7, %v7595_v2  ;;  %v18185_v7 = vld [vmem:[#allocation89_spill] sm:$0xff] }
 0x6ae   : > { %v6841_v62 = vpop.f32.mrf.mxu2  ;;  %v6906_v63 = vpop.f32.mrf.mxu3 }
 0x6af   : > { %v6907_v37 = vadd.f32 %v6906_v63, %v6841_v62  ;;  %v16658_v38 = vadd.f32 %v6601_v61, %v6437_v30  ;;  %7289 = vmatmul.f32.gmra.mxu1 %v7130_v11  ;;  %v18183_v11 = vld [vmem:[#allocation85_spill] sm:$0xff] }
 0x6b0   : > { %v7504_v63 = vld [vmem:[#allocation3 + $0x88] sm:$0xff] }
 0x6b1   : > { %v6950_v22 = vadd.f32 %v6907_v37, %v16289_v18  ;;  %v7189_v47 = vpop.f32.mrf.mxu0  ;;  %v7495_v18 = vld [vmem:[#allocation3 + $0x150] sm:$0xff]  ;;  %v18184_v37 = vld [vmem:[#allocation93_spill] sm:$0xff] }
 0x6b2   : > { %v7599_v39 = vrot.slane %v7495_v18, 1 }
 0x6b3   : > { %7369 = vmatmul.f32.gmra.mxu2 %v16176_v45  ;;  %7434 = vmatmul.f32.gmra.mxu3 %v16201_v41 }
 0x6b4   : > { %v7245_v59 = vpop.f32.mrf.mxu1  ;;  %7714 = vmatmul.f32.gmra.mxu0 %v16246_v14  ;;  %v18181_v14 = vld [vmem:[#allocation90_spill] sm:$0xff]  ;;  %v7604_v61 = vsel %vm1378_vm1, %v7599_v39, %v18183_v11 }
 0x6b5   : > { %v7246_v5 = vadd.f32 %v7245_v59, %v7180_v24 }
 0x6b6   : > { %v6844_v48 = vpop.f32.mrf.mxu2  ;;  %v6909_v28 = vpop.f32.mrf.mxu3 }
 0x6b7   : > { %v6910_v30 = vadd.f32 %v6909_v28, %v6844_v48  ;;  %v16665_v52 = vadd.f32 %v7246_v5, %v6948_v58  ;;  %7770 = vmatmul.f32.vlgmr.msrb.gmra.mxu1 %v7596_v3  ;;  %v7600_v58 = vsel %vm1378_vm1, %v7595_v2, %v7599_v39  ;;  %v7506_v5 = vld [vmem:[#allocation3 + $0x130] sm:$0xff]  ;;  %v9482_v28 = vld [vmem:[#allocation3 + $0x88] sm:$0xff] }
 0x6b9   : > { %v6951_v45 = vadd.f32 %v6910_v30, %v16331_v29  ;;  %v7192_v41 = vpop.f32.mrf.mxu0 }
 0x6bb   : > { %7372 = vmatmul.f32.gmra.mxu2 %v16214_v27  ;;  %7437 = vmatmul.f32.gmra.mxu3 %v16238_v13 }
 0x6bc   : > { %v7248_v57 = vpop.f32.mrf.mxu1  ;;  %7717 = vmatmul.f32.gmra.mxu0 %v18181_v14  ;;  %v18187_v14 = vld [vmem:[#allocation98_spill] sm:$0xff] }
 0x6bd   : > { %v7249_v24 = vadd.f32 %v7248_v57, %v7183_v1 }
 0x6be   : > { %v6847_v36 = vpop.f32.mrf.mxu2  ;;  %v6912_v35 = vpop.f32.mrf.mxu3 }
 0x6bf   : > { %v6913_v33 = vadd.f32 %v6912_v35, %v6847_v36  ;;  %v16672_v40 = vadd.f32 %v7249_v24, %v6949_v23  ;;  %7773 = vmatmul.f32.gmra.mxu1 %v7600_v58  ;;  %v18186_v36 = vld [vmem:[#allocation94_spill] sm:$0xff]  ;;  %v7625_v24 = vrot.slane %v18187_v14, 1 }
 0x6c0   : > { %v9483_v35 = vld [vmem:[#allocation3 + $0x130] sm:$0xff] }
 0x6c1   : > { %v6952_v29 = vadd.f32 %v6913_v33, %v16367_v9  ;;  %v7195_v27 = vpop.f32.mrf.mxu0 }
 0x6c3   : > { %7375 = vmatmul.f32.gmra.mxu2 %v18182_v15  ;;  %7440 = vmatmul.f32.gmra.mxu3 %v16279_v21  ;;  %v7617_v21 = vrot.slane %v7504_v63, 1 }
 0x6c4   : > { %v7251_v13 = vpop.f32.mrf.mxu1  ;;  %7720 = vmatmul.f32.gmra.mxu0 %v16328_v20 }
 0x6c5   : > { %v7252_v44 = vadd.f32 %v7251_v13, %v7186_v53  ;;  %v7618_v20 = vsel %vm1378_vm1, %v16318_v4, %v7617_v21 }
 0x6c6   : > { %v6850_v8 = vpop.f32.mrf.mxu2  ;;  %v6915_v1 = vpop.f32.mrf.mxu3 }
 0x6c7   : > { %v6916_v62 = vadd.f32 %v6915_v1, %v6850_v8  ;;  %v16680_v23 = vadd.f32 %v7252_v44, %v6950_v22  ;;  %7776 = vmatmul.f32.gmra.mxu1 %v7604_v61  ;;  %v18188_v44 = vld [vmem:[#allocation96_spill] sm:$0xff] }
 0x6c8   : > { %v18189_v1 = vld [vmem:[#allocation100_spill] sm:$0xff] }
 0x6c9   : > { %v6953_v9 = vadd.f32 %v6916_v62, %v16400_v51  ;;  %v7198_v42 = vpop.f32.mrf.mxu0  ;;  %v7629_v62 = vrot.slane %v18189_v1, 1 }
 0x6cb   : > { %7378 = vmatmul.f32.gmra.mxu2 %v18184_v37  ;;  %7443 = vmatmul.f32.gmra.mxu3 %v16320_v46  ;;  %v7621_v46 = vrot.slane %v7506_v5, 1  ;;  %v18192_v5 = vld [vmem:[#allocation105_spill] sm:$0xff] }
 0x6cc   : > { %v7254_v53 = vpop.f32.mrf.mxu1  ;;  %7723 = vmatmul.f32.gmra.mxu0 %v7618_v20  ;;  %v18190_v20 = vld [vmem:[#allocation97_spill] sm:$0xff] }
 0x6cd   : > { %v7255_v2 = vadd.f32 %v7254_v53, %v7189_v47  ;;  %v7622_v4 = vsel %vm1378_vm1, %v7617_v21, %v7621_v46 }
 0x6ce   : > { %v6853_v50 = vpop.f32.mrf.mxu2  ;;  %v6918_v59 = vpop.f32.mrf.mxu3 }
 0x6cf   : > { %v6919_v22 = vadd.f32 %v6918_v59, %v6853_v50  ;;  %v16687_v48 = vadd.f32 %v7255_v2, %v6951_v45  ;;  %7779 = vmatmul.f32.gmra.mxu1 %v18185_v7 }
 0x6d1   : > { %v6954_v51 = vadd.f32 %v6919_v22, %v16437_v19  ;;  %v7201_v30 = vpop.f32.mrf.mxu0 }
 0x6d3   : > { %7381 = vmatmul.f32.gmra.mxu2 %v9482_v28  ;;  %7446 = vmatmul.f32.gmra.mxu3 %v16359_v49  ;;  %v7626_v49 = vsel %vm1378_vm1, %v7621_v46, %v7625_v24  ;;  %v7637_v28 = vrot.slane %v18192_v5, 1  ;;  %v18193_v46 = vld [vmem:[#allocation102_spill] sm:$0xff] }
 0x6d4   : > { %v7257_v3 = vpop.f32.mrf.mxu1  ;;  %7726 = vmatmul.f32.gmra.mxu0 %v7622_v4 }
 0x6d5   : > { %v7258_v47 = vadd.f32 %v7257_v3, %v7192_v41 }
 0x6d6   : > { %v6856_v18 = vpop.f32.mrf.mxu2  ;;  %v6921_v39 = vpop.f32.mrf.mxu3 }
 0x6d7   : > { %v6922_v45 = vadd.f32 %v6921_v39, %v6856_v18  ;;  %v16693_v57 = vadd.f32 %v7258_v47, %v6952_v29  ;;  %7782 = vmatmul.f32.gmra.mxu1 %v18186_v36  ;;  %v18194_v36 = vld [vmem:[#allocation101_spill] sm:$0xff] }
 0x6d9   : > { %v6955_v19 = vadd.f32 %v6922_v45, %v16473_v10  ;;  %v7204_v33 = vpop.f32.mrf.mxu0 }
 0x6db   : > { %7384 = vmatmul.f32.gmra.mxu2 %v9483_v35  ;;  %7449 = vmatmul.f32.gmra.mxu3 %v16392_v6  ;;  %v7630_v6 = vsel %vm1378_vm1, %v7625_v24, %v7629_v62 }
 0x6dc   : > { %v7260_v58 = vpop.f32.mrf.mxu1  ;;  %7729 = vmatmul.f32.gmra.mxu0 %v7626_v49 }
 0x6dd   : > { %v7261_v41 = vadd.f32 %v7260_v58, %v7195_v27 }
 0x6de   : > { %v6859_v15 = vpop.f32.mrf.mxu2  ;;  %v6924_v13 = vpop.f32.mrf.mxu3 }
 0x6df   : > { %v6925_v29 = vadd.f32 %v6924_v13, %v6859_v15  ;;  %v16700_v8 = vadd.f32 %v7261_v41, %v6953_v9  ;;  %7785 = vmatmul.f32.gmra.mxu1 %v18188_v44  ;;  %v18195_v41 = vld [vmem:[#allocation103_spill] sm:$0xff]  ;;  %v7645_v13 = vrot.slane %v16591_v55, 1 }
 0x6e1   : > { %v6956_v10 = vadd.f32 %v6925_v29, %v16514_v54  ;;  %v7207_v11 = vpop.f32.mrf.mxu0  ;;  %v9484_v29 = vld [vmem:[#allocation3 + $0xa0] sm:$0xff] }
 0x6e3   : > { %7387 = vmatmul.f32.gmra.mxu2 %v18187_v14  ;;  %7452 = vmatmul.f32.gmra.mxu3 %v16428_v25  ;;  %v7634_v25 = vsel %vm1378_vm1, %v7629_v62, %v16501_v17 }
 0x6e4   : > { %v7263_v61 = vpop.f32.mrf.mxu1  ;;  %7732 = vmatmul.f32.gmra.mxu0 %v7630_v6 }
 0x6e5   : > { %v7264_v27 = vadd.f32 %v7263_v61, %v7198_v42 }
 0x6e6   : > { %v6862_v63 = vpop.f32.mrf.mxu2  ;;  %v6927_v37 = vpop.f32.mrf.mxu3 }
 0x6e7   : > { %v6928_v9 = vadd.f32 %v6927_v37, %v6862_v63  ;;  %v16708_v21 = vadd.f32 %v7264_v27, %v6954_v51  ;;  %7788 = vmatmul.f32.gmra.mxu1 %v18190_v20  ;;  %v18191_v51 = vld [vmem:[#allocation99_spill] sm:$0xff]  ;;  %v18196_v37 = vld [vmem:[#allocation30_spill] sm:$0xff] }
 0x6e9   : > { %v6957_v54 = vadd.f32 %v6928_v9, %v16562_v16  ;;  %v7210_v53 = vpop.f32.mrf.mxu0 }
 0x6eb   : > { %7390 = vmatmul.f32.gmra.mxu2 %v18189_v1  ;;  %7455 = vmatmul.f32.gmra.mxu3 %v16465_v12  ;;  %v7638_v12 = vsel %vm1378_vm1, %v16501_v17, %v7637_v28 }
 0x6ec   : > { %v7266_v50 = vpop.f32.mrf.mxu1  ;;  %7735 = vmatmul.f32.gmra.mxu0 %v7634_v25  ;;  %v7639_v25 = vrot.slane %v16611_v32, 1 }
 0x6ed   : > { %v7267_v42 = vadd.f32 %v7266_v50, %v7201_v30 }
 0x6ee   : > { %v6865_v2 = vpop.f32.mrf.mxu2  ;;  %v6930_v59 = vpop.f32.mrf.mxu3 }
 0x6ef   : > { %v6931_v22 = vadd.f32 %v6930_v59, %v6865_v2  ;;  %v16716_v7 = vadd.f32 %v7267_v42, %v6955_v19  ;;  %7791 = vmatmul.f32.gmra.mxu1 %v18191_v51  ;;  %v7516_v19 = vld [vmem:[#allocation3 + $0xa0] sm:$0xff] }
 0x6f0   : > { %v18197_v51 = vld [vmem:[#allocation104_spill] sm:$0xff] }
 0x6f1   : > { %v6958_v16 = vadd.f32 %v6931_v22, %v16586_v43  ;;  %v7213_v4 = vpop.f32.mrf.mxu0 }
 0x6f3   : > { %7393 = vmatmul.f32.gmra.mxu2 %v18193_v46  ;;  %7458 = vmatmul.f32.gmra.mxu3 %v16503_v60  ;;  %v7641_v60 = vrot.slane %v7516_v19, 1  ;;  %v7522_v46 = vld [vmem:[#allocation3 + $0x38] sm:$0x1] }
 0x6f4   : > { %v7269_v3 = vpop.f32.mrf.mxu1  ;;  %7738 = vmatmul.f32.gmra.mxu0 %v7638_v12 }
 0x6f5   : > { %v7270_v18 = vadd.f32 %v7269_v3, %v7204_v33  ;;  %v7642_v17 = vsel %vm1378_vm1, %v7637_v28, %v7641_v60  ;;  %v7646_v1 = vsel %vm1378_vm1, %v7641_v60, %v7645_v13 }
 0x6f6   : > { %v6868_v30 = vpop.f32.mrf.mxu2  ;;  %v6933_v47 = vpop.f32.mrf.mxu3 }
 0x6f7   : > { %v6934_v39 = vadd.f32 %v6933_v47, %v6868_v30  ;;  %v16725_v45 = vadd.f32 %v7270_v18, %v6956_v10  ;;  %7794 = vmatmul.f32.gmra.mxu1 %v18194_v36  ;;  %v9485_v10 = vld [vmem:[#allocation3 + $0x120] sm:$0xff]  ;;  %v18198_v30 = vld [vmem:[#allocation41_spill] sm:$0xff] }
 0x6f8   : > { %v8839_v18 = vmul.f32 -1.442695, %v18198_v30 }
 0x6f9   : > { %v6959_v43 = vadd.f32 %v6934_v39, %v16609_v0  ;;  %v7216_v14 = vpop.f32.mrf.mxu0 }
 0x6fa   : > { %9251 = vpow2.f32 %v8839_v18  ;;  %v18202_v18 = vld [vmem:[#allocation48_spill] sm:$0xff] }
 0x6fb   : > { %7396 = vmatmul.f32.gmra.mxu2 %v18192_v5  ;;  %7461 = vmatmul.f32.gmra.mxu3 %v16611_v32  ;;  %v7517_v5 = vld [vmem:[#allocation3 + $0x120] sm:$0xff]  ;;  %v7653_v32 = vrot.slane %v7522_v46, 1 }
 0x6fc   : > { %v7272_v24 = vpop.f32.mrf.mxu1  ;;  %7741 = vmatmul.f32.gmra.mxu0 %v7642_v17  ;;  %v7643_v12 = vrot.slane %v7517_v5, 1 }
 0x6fd   : > { %v7273_v33 = vadd.f32 %v7272_v24, %v7207_v11  ;;  %v7647_v24 = vrot.slane %v16640_v56, 1 }
 0x6fe   : > { %v6871_v35 = vpop.f32.mrf.mxu2  ;;  %v6936_v49 = vpop.f32.mrf.mxu3  ;;  %v7644_v60 = vsel %vm1378_vm1, %v7639_v25, %v7643_v12 }
 0x6ff   : > { %v6937_v58 = vadd.f32 %v6936_v49, %v6871_v35  ;;  %v16732_v15 = vadd.f32 %v7273_v33, %v6957_v54  ;;  %7797 = vmatmul.f32.gmra.mxu1 %v18195_v41  ;;  %v18199_v35 = vld [vmem:[#allocation43_spill] sm:$0xff] }
 0x700   : > { %v8840_v33 = vmul.f32 -1.442695, %v18199_v35 }
 0x701   : > { %v6960_v0 = vadd.f32 %v6937_v58, %v16628_v26  ;;  %v7219_v44 = vpop.f32.mrf.mxu0  ;;  %v7309_v26 = vld [vmem:[#allocation3 + $0x58] sm:$0xff] }
 0x702   : > { %v7649_v20 = vrot.slane %v7309_v26, 1  ;;  %9253 = vpow2.f32 %v8840_v33 }
 0x703   : > { %7399 = vmatmul.f32.gmra.mxu2 %v9484_v29  ;;  %7464 = vmatmul.f32.gmra.mxu3 %v9485_v10  ;;  %v7648_v10 = vsel %vm1378_vm1, %v7643_v12, %v7647_v24 }
 0x704   : > { %v7275_v62 = vpop.f32.mrf.mxu1  ;;  %7744 = vmatmul.f32.gmra.mxu0 %v7646_v1  ;;  %v7650_v50 = vsel %vm1378_vm1, %v7645_v13, %v7649_v20 }
 0x705   : > { %v7276_v11 = vadd.f32 %v7275_v62, %v7210_v53 }
 0x706   : > { %v6874_v6 = vpop.f32.mrf.mxu2  ;;  %v6939_v61 = vpop.f32.mrf.mxu3 }
 0x707   : > { %v6940_v63 = vadd.f32 %v6939_v61, %v6874_v6  ;;  %v16738_v27 = vadd.f32 %v7276_v11, %v6958_v16  ;;  %7800 = vmatmul.f32.gmra.mxu1 %v18196_v37  ;;  %v7640_v16 = vsel %vm1378_vm1, %v18197_v51, %v7639_v25  ;;  %v7523_v37 = vld [vmem:[#allocation3 + $0xd0] sm:$0x1] }
 0x708   : > { %v7655_v25 = vrot.slane %v7523_v37, 1 }
 0x709   : > { %v6961_v9 = vadd.f32 %v6940_v63, %v16638_v34  ;;  %v7222_v54 = vpop.f32.mrf.mxu0 }
 0x70b   : > { %7402 = vmatmul.f32.gmra.mxu2 %v16591_v55  ;;  %7467 = vmatmul.f32.gmra.mxu3 %v16640_v56  ;;  %v7310_v55 = vld [vmem:[#allocation3 + $0x60] sm:$0xff] }
 0x70c   : > { %v7278_v53 = vpop.f32.mrf.mxu1  ;;  %7747 = vmatmul.f32.gmra.mxu0 %v7650_v50 }
 0x70d   : > { %v7279_v42 = vadd.f32 %v7278_v53, %v7213_v4  ;;  %v7654_v4 = vsel %vm1378_vm1, %v7649_v20, %v7653_v32 }
 0x70e   : > { %v6877_v2 = vpop.f32.mrf.mxu2  ;;  %v6942_v59 = vpop.f32.mrf.mxu3 }
 0x70f   : > { %v6943_v22 = vadd.f32 %v6942_v59, %v6877_v2  ;;  %v16748_v34 = vadd.f32 %v7279_v42, %v6959_v43  ;;  %7803 = vmatmul.f32.gmra.mxu1 %v7640_v16  ;;  %v18201_v2 = vld [vmem:[#allocation47_spill] sm:$0xff] }
 0x710   : > { %v8842_v42 = vmul.f32 -1.442695, %v18201_v2 }
 0x711   : > { %v6962_v28 = vadd.f32 %v6943_v22, %v16649_v31  ;;  %v7225_v3 = vpop.f32.mrf.mxu0 }
 0x713   : > { %7405 = vmatmul.f32.gmra.mxu2 %v7309_v26  ;;  %7470 = vmatmul.f32.gmra.mxu3 %v7310_v55 }
 0x714   : > { %v7281_v47 = vpop.f32.mrf.mxu1  ;;  %7750 = vmatmul.f32.gmra.mxu0 %v7654_v4 }
 0x715   : > { %v7282_v36 = vadd.f32 %v7281_v47, %v7216_v14  ;;  %v9252_v14 = vpop.eup %9251  ;;  %v8843_v47 = vmul.f32 -1.442695, %v18202_v18 }
 0x716   : > { %v6880_v39 = vpop.f32.mrf.mxu2  ;;  %v6945_v43 = vpop.f32.mrf.mxu3  ;;  %v16762_v62 = vadd.f32 1.0, %v9252_v14  ;;  %v18203_v14 = vld [vmem:[#allocation49_spill] sm:$0xff] }
 0x717   : > { %v6946_v19 = vadd.f32 %v6945_v43, %v6880_v39  ;;  %v16754_v17 = vadd.f32 %v7282_v36, %v6960_v0  ;;  %7806 = vmatmul.f32.gmra.mxu1 %v7644_v60  ;;  %v7651_v0 = vrot.slane %v7310_v55, 1  ;;  %v9254_v26 = vpop.eup %9253 }
 0x718   : > { %9255 = vrcp.f32 %v16762_v62  ;;  %v16769_v50 = vadd.f32 1.0, %v9254_v26 }
 0x719   : > { %v6963_v31 = vadd.f32 %v6946_v19, %v16658_v38  ;;  %v7706_v29 = vpop.f32.mrf.mxu0  ;;  %v18200_v38 = vld [vmem:[#allocation46_spill] sm:$0xff]  ;;  %v7652_v61 = vsel %vm1378_vm1, %v7647_v24, %v7651_v0  ;;  %v7656_v51 = vsel %vm1378_vm1, %v7651_v0, %v7655_v25  ;;  %vm4952_vm1 = vweird.f32 %v16762_v62 }
 0x71a   : > { %v8841_v6 = vmul.f32 -1.442695, %v18200_v38  ;;  %v4956_v0 = vand.u32 2147483647, %v16762_v62  ;;  %v4973_v18 = vand.u32 2147483648, %v16769_v50  ;;  %vm4967_vm13 = vweird.f32 %v16769_v50 }
 0x71c   : > { %v7284_v49 = vpop.f32.mrf.mxu1  ;;  %9257 = vpow2.f32 %v8841_v6  ;;  %vm4957_vm11 = vcmp.eq.f32.partialorder %v4956_v0, 8.507059e+37 }
 0x71d   : > { %v7285_v41 = vadd.f32 %v7284_v49, %v7219_v44  ;;  %9259 = vrcp.f32 %v16769_v50 }
 0x71e   : > { %v7361_v58 = vpop.f32.mrf.mxu2  ;;  %v7426_v13 = vpop.f32.mrf.mxu3  ;;  %9261 = vpow2.f32 %v8842_v42  ;;  %v18206_v42 = vld [vmem:[#allocation9_spill] sm:$0xff] }
 0x71f   : > { %v16760_v1 = vadd.f32 %v7285_v41, %v6961_v9  ;;  %7809 = vmatmul.f32.gmra.mxu1 %v7648_v10  ;;  %v16771_v53 = vpop.eup %9255  ;;  %v7427_v32 = vadd.f32 %v7426_v13, %v7361_v58  ;;  %v8844_v10 = vmul.f32 -1.442695, %v18203_v14 }
 0x720   : > { %v4948_v5 = vmul.f32 %v16771_v53, %v16762_v62  ;;  %vm4953_vm0 = vweird.f32 %v16771_v53 }
 0x721   : > { %v7709_v9 = vpop.f32.mrf.mxu0  ;;  %v7474_v36 = vadd.f32 %v7427_v32, %v16665_v52  ;;  %vm16812_vm10 = vmor %vm4952_vm1, %vm4953_vm0 }
 0x722   : > { %v9258_v55 = vpop.eup %9257  ;;  %v4949_v4 = vsub.f32 1.0, %v4948_v5 }
 0x723   : > { %v16780_v46 = vadd.f32 1.0, %v9258_v55  ;;  %v16784_v30 = vpop.eup %9259 }
 0x724   : > { %v7287_v56 = vpop.f32.mrf.mxu1  ;;  %v9262_v60 = vpop.eup %9261  ;;  %v4963_v24 = vmul.f32 %v16784_v30, %v16769_v50  ;;  %vm4968_vm12 = vweird.f32 %v16784_v30 }
 0x725   : > { %v7288_v44 = vadd.f32 %v7287_v56, %v7222_v54  ;;  %9263 = vrcp.f32 %v16780_v46  ;;  %v16796_v33 = vadd.f32 1.0, %v9262_v60  ;;  %vm16842_vm14 = vmor %vm4967_vm13, %vm4968_vm12  ;;  %vm4982_vm3 = vweird.f32 %v16780_v46 }
 0x726   : > { %v7364_v11 = vpop.f32.mrf.mxu2  ;;  %v7429_v63 = vpop.f32.mrf.mxu3  ;;  %9265 = vpow2.f32 %v8843_v47  ;;  %v4964_v41 = vsub.f32 1.0, %v4963_v24  ;;  %v18207_v47 = vld [vmem:[#allocation51_spill] sm:$0xff] }
 0x727   : > { %v16767_v20 = vadd.f32 %v7288_v44, %v6962_v28  ;;  %7812 = vmatmul.f32.gmra.mxu1 %v7652_v61  ;;  %v7430_v49 = vadd.f32 %v7429_v63, %v7364_v11  ;;  %vm4997_vm7 = vweird.f32 %v16796_v33 }
 0x728   : > { %v4965_v37 = vmul.f32 %v16784_v30, %v4964_v41 }
 0x729   : > { %v16782_v12 = vpop.f32.mrf.mxu0  ;;  %v7475_v56 = vadd.f32 %v7430_v49, %v16672_v40 }
 0x72b   : > { %v16802_v13 = vpop.eup %9263 }
 0x72c   : > { %v7290_v59 = vpop.f32.mrf.mxu1  ;;  %v9266_v63 = vpop.eup %9265  ;;  %vm4983_vm2 = vweird.f32 %v16802_v13 }
 0x72d   : > { %v7291_v54 = vadd.f32 %v7290_v59, %v7225_v3  ;;  %vm16876_vm4 = vmor %vm4982_vm3, %vm4983_vm2 }
 0x72e   : > { %v7367_v22 = vpop.f32.mrf.mxu2  ;;  %v7432_v16 = vpop.f32.mrf.mxu3 }
 0x72f   : > { %v16778_v28 = vadd.f32 %v7291_v54, %v6963_v31  ;;  %7815 = vmatmul.f32.gmra.mxu1 %v7656_v51  ;;  %v4950_v31 = vmul.f32 %v16771_v53, %v4949_v4  ;;  %v7433_v51 = vadd.f32 %v7432_v16, %v7367_v22  ;;  %v4966_v4 = vadd.f32 %v16784_v30, %v4965_v37 }
 0x730   : > { %v4971_v22 = vand.u32 2147483647, %v16769_v50 }
 0x731   : > { %v16798_v58 = vpop.f32.mrf.mxu0  ;;  %v4951_v52 = vadd.f32 %v16771_v53, %v4950_v31  ;;  %v7476_v60 = vadd.f32 %v7433_v51, %v16680_v23 }
 0x732   : > { %vm4972_vm15 = vcmp.eq.f32.partialorder %v4971_v22, 8.507059e+37 }
 0x733   : > { %v4955_v26 = vsel %vm16812_vm10, %v16771_v53, %v4951_v52  ;;  %v4970_v52 = vsel %vm16842_vm14, %v16784_v30, %v4966_v4 }
 0x734   : > { %v7771_v3 = vpop.f32.mrf.mxu1 }
 0x735   : > { %v7772_v43 = vadd.f32 %v7771_v3, %v7706_v29  ;;  %v4958_v29 = vand.u32 2147483648, %v16762_v62  ;;  %v4978_v62 = vmul.f32 %v16802_v13, %v16780_v46  ;;  %v8845_v3 = vmul.f32 -1.442695, %v18207_v47 }
 0x736   : > { %v16787_v39 = vpop.f32.mrf.mxu2  ;;  %v16791_v19 = vpop.f32.mrf.mxu3 }
 0x737   : > { %v7819_v35 = vadd.f32 %v7772_v43, %v7474_v36  ;;  %v4959_v2 = vor.u32 1.1754944e-38, %v4958_v29  ;;  %v4979_v5 = vsub.f32 1.0, %v4978_v62  ;;  %v4974_v29 = vor.u32 1.1754944e-38, %v4973_v18 }
 0x738   : > { %v4988_v62 = vand.u32 2147483648, %v16780_v46 }
 0x739   : > { %9267 = vtanh.f32 %v7819_v35  ;;  %v4960_v54 = vsel %vm4957_vm11, %v4959_v2, %v4955_v26  ;;  %v16827_v55 = vpop.f32.mrf.mxu0  ;;  %v4980_v41 = vmul.f32 %v16802_v13, %v4979_v5  ;;  %v18211_v26 = vld [vmem:[#allocation55_spill] sm:$0xff] }
 0x73a   : > { %9269 = vrcp.f32 %v16796_v33  ;;  %v4989_v47 = vor.u32 1.1754944e-38, %v4988_v62 }
 0x73b   : > { %9271 = vpow2.f32 %v8844_v10  ;;  %v4981_v30 = vadd.f32 %v16802_v13, %v4980_v41 }
 0x73c   : > { %v7774_v38 = vpop.f32.mrf.mxu1 }
 0x73d   : > { %v7775_v61 = vadd.f32 %v7774_v38, %v7709_v9  ;;  %v16825_v9 = vadd.f32 1.0, %v9266_v63  ;;  %v7436_v38 = vadd.f32 %v16791_v19, %v16787_v39  ;;  %v4986_v39 = vand.u32 2147483647, %v16780_v46 }
 0x73e   : > { %v16808_v6 = vpop.f32.mrf.mxu2  ;;  %v16816_v44 = vpop.f32.mrf.mxu3 }
 0x73f   : > { %v9268_v25 = vpop.eup %9267  ;;  %v7820_v40 = vadd.f32 %v7775_v61, %v7475_v56  ;;  %v4975_v56 = vsel %vm4972_vm15, %v4974_v29, %v4970_v52  ;;  %vm4987_vm5 = vcmp.eq.f32.partialorder %v4986_v39, 8.507059e+37  ;;  %v18215_v52 = vld [vmem:[#allocation57_spill] sm:$0xff]  ;;  %vm5012_vm1 = vweird.f32 %v16825_v9 }
 0x740   : > { %v8108_v59 = vsub.f32 %v9268_v25, %v18206_v42  ;;  %v16831_v53 = vpop.eup %9269  ;;  %v8846_v25 = vmul.f32 -1.442695, %v18211_v26 }
 0x741   : > { %9273 = vtanh.f32 %v7820_v40  ;;  %v9272_v49 = vpop.eup %9271  ;;  %v4993_v50 = vmul.f32 %v16831_v53, %v16796_v33  ;;  %v16861_v11 = vpop.f32.mrf.mxu0  ;;  %vm4998_vm6 = vweird.f32 %v16831_v53 }
 0x742   : > { %v8124_v32 = vmul.f32 %v8108_v59, %v4960_v54  ;;  %9275 = vrcp.f32 %v16825_v9  ;;  %v16857_v0 = vadd.f32 1.0, %v9272_v49  ;;  %vm16908_vm8 = vmor %vm4997_vm7, %vm4998_vm6 }
 0x743   : > { %9277 = vpow2.f32 %v8845_v3  ;;  %v4994_v61 = vsub.f32 1.0, %v4993_v50  ;;  %v5003_v50 = vand.u32 2147483648, %v16796_v33 }
 0x744   : > { %v8140_v36 = vadd.f32 %v18206_v42, %v8124_v32  ;;  %v7777_v16 = vpop.f32.mrf.mxu1  ;;  %v7477_v42 = vadd.f32 %v7436_v38, %v16687_v48  ;;  %v4985_v48 = vsel %vm16876_vm4, %v16802_v13, %v4981_v30  ;;  %vm5027_vm13 = vweird.f32 %v16857_v0 }
 0x745   : > { %v7778_v24 = vadd.f32 %v7777_v16, %v16782_v12  ;;  %v18210_v12 = vld [vmem:[#allocation11_spill] sm:$0xff]  ;;  %v4995_v32 = vmul.f32 %v16831_v53, %v4994_v61  ;;  %v7439_v16 = vadd.f32 %v16816_v44, %v16808_v6  ;;  %v5001_v6 = vand.u32 2147483647, %v16796_v33 }
 0x746   : > { %v16838_v43 = vpop.f32.mrf.mxu2  ;;  %v16847_v35 = vpop.f32.mrf.mxu3  ;;  %8172 = vst [vmem:[#allocation2 + $0x30] sm:$0xff] %v8140_v36  ;;  %v5004_v62 = vor.u32 1.1754944e-38, %v5003_v50 }
 0x747   : > { %v9274_v23 = vpop.eup %9273  ;;  %8188 = vst [vmem:[%s9595_s10] sm:$0xff] %v8140_v36  ;;  %v7821_v14 = vadd.f32 %v7778_v24, %v7476_v60  ;;  %v4990_v60 = vsel %vm4987_vm5, %v4989_v47, %v4985_v48  ;;  %v4996_v49 = vadd.f32 %v16831_v53, %v4995_v32  ;;  %vm5002_vm9 = vcmp.eq.f32.partialorder %v5001_v6, 8.507059e+37 }
 0x748   : > { %v8109_v10 = vsub.f32 %v9274_v23, %v18210_v12  ;;  %v16865_v37 = vpop.eup %9275  ;;  %v8847_v23 = vmul.f32 -1.442695, %v18215_v52  ;;  %v7442_v39 = vadd.f32 %v16847_v35, %v16838_v43  ;;  %v5018_v32 = vand.u32 2147483648, %v16825_v9 }
 0x749   : > { %9279 = vtanh.f32 %v7821_v14  ;;  %v9278_v5 = vpop.eup %9277  ;;  %v5008_v46 = vmul.f32 %v16865_v37, %v16825_v9  ;;  %v16895_v31 = vpop.f32.mrf.mxu0  ;;  %v7478_v14 = vadd.f32 %v7439_v16, %v16693_v57  ;;  %v5000_v33 = vsel %vm16908_vm8, %v16831_v53, %v4996_v49 }
 0x74a   : > { %v8125_v63 = vmul.f32 %v8109_v10, %v4975_v56  ;;  %9281 = vrcp.f32 %v16857_v0  ;;  %v16890_v22 = vadd.f32 1.0, %v9278_v5  ;;  %vm5013_vm0 = vweird.f32 %v16865_v37 }
 0x74b   : > { %9283 = vpow2.f32 %v8846_v25  ;;  %v5009_v24 = vsub.f32 1.0, %v5008_v46  ;;  %v18219_v46 = vld [vmem:[#allocation62_spill] sm:$0xff]  ;;  %v5016_v43 = vand.u32 2147483647, %v16825_v9  ;;  %vm16942_vm10 = vmor %vm5012_vm1, %vm5013_vm0 }
 0x74c   : > { %v8141_v2 = vadd.f32 %v18210_v12, %v8125_v63  ;;  %v7780_v19 = vpop.f32.mrf.mxu1  ;;  %v5048_v47 = vand.u32 2147483648, %v16890_v22  ;;  %vm5042_vm3 = vweird.f32 %v16890_v22 }
 0x74d   : > { %v7781_v51 = vadd.f32 %v7780_v19, %v16798_v58  ;;  %v18214_v58 = vld [vmem:[#allocation31_spill] sm:$0xff]  ;;  %v5010_v61 = vmul.f32 %v16865_v37, %v5009_v24  ;;  %v5005_v19 = vsel %vm5002_vm9, %v5004_v62, %v5000_v33  ;;  %vm5017_vm11 = vcmp.eq.f32.partialorder %v5016_v43, 8.507059e+37 }
 0x74e   : > { %v16872_v40 = vpop.f32.mrf.mxu2  ;;  %v16881_v54 = vpop.f32.mrf.mxu3  ;;  %v8157_v4 = vmul.f32 0.0, %v8141_v2 }
 0x74f   : > { %v9280_v18 = vpop.eup %9279  ;;  %v7822_v3 = vadd.f32 %v7781_v51, %v7477_v42  ;;  %v5011_v53 = vadd.f32 %v16865_v37, %v5010_v61 }
 0x750   : > { %8173 = vst [vmem:[#allocation2] sm:$0xff] %v8157_v4  ;;  %v8110_v36 = vsub.f32 %v9280_v18, %v18214_v58  ;;  %v16899_v41 = vpop.eup %9281  ;;  %v7479_v18 = vadd.f32 %v7442_v39, %v16700_v8  ;;  %v5019_v8 = vor.u32 1.1754944e-38, %v5018_v32 }
 0x751   : > { %8189 = vst [vmem:[%s9595_s10 + $0x8] sm:$0xff] %v8157_v4  ;;  %9285 = vtanh.f32 %v7822_v3  ;;  %v9284_v56 = vpop.eup %9283  ;;  %v5023_v63 = vmul.f32 %v16899_v41, %v16857_v0  ;;  %v16931_v51 = vpop.f32.mrf.mxu0  ;;  %v8848_v4 = vmul.f32 -1.442695, %v18219_v46  ;;  %v5015_v9 = vsel %vm16942_vm10, %v16865_v37, %v5011_v53 }
 0x752   : > { %v8126_v13 = vmul.f32 %v8110_v36, %v4990_v60  ;;  %9287 = vrcp.f32 %v16890_v22  ;;  %v16925_v2 = vadd.f32 1.0, %v9284_v56  ;;  %v5020_v6 = vsel %vm5017_vm11, %v5019_v8, %v5015_v9  ;;  %v18223_v56 = vld [vmem:[#allocation69_spill] sm:$0xff] }
 0x753   : > { %9289 = vpow2.f32 %v8847_v23  ;;  %v5024_v42 = vsub.f32 1.0, %v5023_v63  ;;  %vm5028_vm12 = vweird.f32 %v16899_v41  ;;  %v8849_v61 = vmul.f32 -1.442695, %v18223_v56 }
 0x754   : > { %v8142_v29 = vadd.f32 %v18214_v58, %v8126_v13  ;;  %v7783_v44 = vpop.f32.mrf.mxu1  ;;  %vm16976_vm14 = vmor %vm5027_vm13, %vm5028_vm12  ;;  %vm5057_vm7 = vweird.f32 %v16925_v2 }
 0x755   : > { %v7784_v10 = vadd.f32 %v7783_v44, %v16827_v55  ;;  %v18218_v55 = vld [vmem:[#allocation32_spill] sm:$0xff]  ;;  %v5025_v36 = vmul.f32 %v16899_v41, %v5024_v42 }
 0x756   : > { %v16913_v38 = vpop.f32.mrf.mxu2  ;;  %8174 = vst [vmem:[#allocation2 + $0x58] sm:$0xff] %v8142_v29  ;;  %v16921_v57 = vpop.f32.mrf.mxu3 }
 0x757   : > { %v9286_v30 = vpop.eup %9285  ;;  %8190 = vst [vmem:[%s9595_s10 + $0x10] sm:$0xff] %v8142_v29  ;;  %v7823_v26 = vadd.f32 %v7784_v10, %v7478_v14  ;;  %v7445_v29 = vadd.f32 %v16881_v54, %v16872_v40  ;;  %v5026_v14 = vadd.f32 %v16899_v41, %v5025_v36  ;;  %v5033_v10 = vand.u32 2147483648, %v16857_v0 }
 0x758   : > { %v8111_v25 = vsub.f32 %v9286_v30, %v18218_v55  ;;  %v16933_v5 = vpop.eup %9287  ;;  %v5031_v40 = vand.u32 2147483647, %v16857_v0  ;;  %v7448_v32 = vadd.f32 %v16921_v57, %v16913_v38  ;;  %v5046_v38 = vand.u32 2147483647, %v16890_v22 }
 0x759   : > { %9291 = vtanh.f32 %v7823_v26  ;;  %v9290_v58 = vpop.eup %9289  ;;  %v5038_v16 = vmul.f32 %v16933_v5, %v16890_v22  ;;  %v16972_v33 = vpop.f32.mrf.mxu0  ;;  %v7480_v30 = vadd.f32 %v7445_v29, %v16708_v21  ;;  %v5030_v0 = vsel %vm16976_vm14, %v16899_v41, %v5026_v14 }
 0x75a   : > { %v8127_v59 = vmul.f32 %v8111_v25, %v5005_v19  ;;  %9293 = vrcp.f32 %v16925_v2  ;;  %v16958_v23 = vadd.f32 1.0, %v9290_v58  ;;  %v5034_v21 = vor.u32 1.1754944e-38, %v5033_v10 }
 0x75b   : > { %9295 = vpow2.f32 %v8848_v4  ;;  %v5039_v37 = vsub.f32 1.0, %v5038_v16  ;;  %vm5032_vm15 = vcmp.eq.f32.partialorder %v5031_v40, 8.507059e+37  ;;  %vm5043_vm2 = vweird.f32 %v16933_v5 }
 0x75c   : > { %v8143_v48 = vadd.f32 %v18218_v55, %v8127_v59  ;;  %v7786_v35 = vpop.f32.mrf.mxu1  ;;  %v18226_v59 = vld [vmem:[#allocation33_spill] sm:$0xff]  ;;  %v5035_v46 = vsel %vm5032_vm15, %v5034_v21, %v5030_v0  ;;  %v7481_v16 = vadd.f32 %v7448_v32, %v16716_v7  ;;  %vm17006_vm4 = vmor %vm5042_vm3, %vm5043_vm2  ;;  %v5049_v29 = vor.u32 1.1754944e-38, %v5048_v47  ;;  %v18234_v32 = vld [vmem:[#allocation35_spill] sm:$0xff] }
 0x75d   : > { %v7787_v3 = vadd.f32 %v7786_v35, %v16861_v11  ;;  %v18222_v11 = vld [vmem:[#allocation17_spill] sm:$0xff]  ;;  %v5040_v25 = vmul.f32 %v16933_v5, %v5039_v37  ;;  %vm5047_vm5 = vcmp.eq.f32.partialorder %v5046_v38, 8.507059e+37  ;;  %v18230_v37 = vld [vmem:[#allocation34_spill] sm:$0xff]  ;;  %v5063_v40 = vand.u32 2147483648, %v16925_v2 }
 0x75e   : > { %v8159_v60 = vmul.f32 0.0, %v8143_v48  ;;  %v16953_v49 = vpop.f32.mrf.mxu2  ;;  %v16956_v52 = vpop.f32.mrf.mxu3  ;;  %v18235_v38 = vld [vmem:[#allocation26_spill] sm:$0xff]  ;;  %vm5072_vm1 = vweird.f32 %v16958_v23 }
 0x75f   : > { %v9292_v24 = vpop.eup %9291  ;;  %v7824_v13 = vadd.f32 %v7787_v3, %v7479_v18  ;;  %v5041_v41 = vadd.f32 %v16933_v5, %v5040_v25  ;;  %v18227_v3 = vld [vmem:[#allocation75_spill] sm:$0xff]  ;;  %v7451_v14 = vadd.f32 %v16956_v52, %v16953_v49  ;;  %v5061_v49 = vand.u32 2147483647, %v16925_v2 }
 0x760   : > { %8175 = vst [vmem:[#allocation2 + $0x18] sm:$0xff] %v8159_v60  ;;  %v8112_v50 = vsub.f32 %v9292_v24, %v18222_v11  ;;  %v16965_v12 = vpop.eup %9293  ;;  %v8850_v58 = vmul.f32 -1.442695, %v18227_v3 }
 0x761   : > { %8191 = vst [vmem:[%s9595_s10 + $0x18] sm:$0xff] %v8159_v60  ;;  %9297 = vtanh.f32 %v7824_v13  ;;  %v9296_v55 = vpop.eup %9295  ;;  %v5053_v39 = vmul.f32 %v16965_v12, %v16925_v2  ;;  %v5045_v22 = vsel %vm17006_vm4, %v16933_v5, %v5041_v41  ;;  %vm5058_vm6 = vweird.f32 %v16965_v12 }
 0x762   : > { %v8128_v44 = vmul.f32 %v8112_v50, %v5020_v6  ;;  %9299 = vrcp.f32 %v16958_v23  ;;  %v7733_v50 = vpop.f32.mrf.mxu0  ;;  %v5050_v10 = vsel %vm5047_vm5, %v5049_v29, %v5045_v22  ;;  %v7482_v25 = vadd.f32 %v7451_v14, %v16725_v45  ;;  %vm17034_vm8 = vmor %vm5057_vm7, %vm5058_vm6 }
 0x763   : > { %9301 = vpow2.f32 %v8849_v61  ;;  %v5054_v48 = vsub.f32 1.0, %v5053_v39  ;;  %v5064_v45 = vor.u32 1.1754944e-38, %v5063_v40  ;;  %vm5062_vm9 = vcmp.eq.f32.partialorder %v5061_v49, 8.507059e+37 }
 0x764   : > { %v8144_v63 = vadd.f32 %v18222_v11, %v8128_v44  ;;  %v7789_v54 = vpop.f32.mrf.mxu1 }
 0x765   : > { %v7790_v26 = vadd.f32 %v7789_v54, %v16895_v31  ;;  %v16989_v31 = vadd.f32 1.0, %v9296_v55  ;;  %v5055_v8 = vmul.f32 %v16965_v12, %v5054_v48 }
 0x766   : > { %8176 = vst [vmem:[#allocation2 + $0x50] sm:$0xff] %v8144_v63  ;;  %v16993_v4 = vpop.f32.mrf.mxu2  ;;  %v7453_v35 = vpop.f32.mrf.mxu3 }
 0x767   : > { %v9298_v19 = vpop.eup %9297  ;;  %8192 = vst [vmem:[%s9595_s10 + $0x20] sm:$0xff] %v8144_v63  ;;  %v7825_v42 = vadd.f32 %v7790_v26, %v7480_v30  ;;  %v5056_v5 = vadd.f32 %v16965_v12, %v5055_v8  ;;  %v18231_v30 = vld [vmem:[#allocation20_spill] sm:$0xff]  ;;  %vm5087_vm13 = vweird.f32 %v16989_v31 }
 0x768   : > { %v8113_v53 = vsub.f32 %v9298_v19, %v18226_v59  ;;  %v16997_v18 = vpop.eup %9299  ;;  %v8851_v62 = vmul.f32 -1.442695, %v18231_v30 }
 0x769   : > { %9303 = vtanh.f32 %v7825_v42  ;;  %v9302_v24 = vpop.eup %9301  ;;  %v5068_v13 = vmul.f32 %v16997_v18, %v16958_v23  ;;  %v5060_v2 = vsel %vm17034_vm8, %v16965_v12, %v5056_v5  ;;  %vm5073_vm0 = vweird.f32 %v16997_v18 }
 0x76a   : > { %v8129_v43 = vmul.f32 %v8113_v53, %v5035_v46  ;;  %9305 = vrcp.f32 %v16989_v31  ;;  %v17018_v44 = vadd.f32 1.0, %v9302_v24  ;;  %v5065_v41 = vsel %vm5062_vm9, %v5064_v45, %v5060_v2  ;;  %vm17061_vm10 = vmor %vm5072_vm1, %vm5073_vm0 }
 0x76b   : > { %9307 = vpow2.f32 %v8850_v58  ;;  %v5069_v56 = vsub.f32 1.0, %v5068_v13 }
 0x76c   : > { %v8145_v36 = vadd.f32 %v18226_v59, %v8129_v43  ;;  %v7792_v57 = vpop.f32.mrf.mxu1  ;;  %v7454_v43 = vadd.f32 %v7453_v35, %v16993_v4  ;;  %v5076_v4 = vand.u32 2147483647, %v16958_v23  ;;  %vm5102_vm3 = vweird.f32 %v17018_v44 }
 0x76d   : > { %v7793_v9 = vadd.f32 %v7792_v57, %v16931_v51  ;;  %v5070_v21 = vmul.f32 %v16997_v18, %v5069_v56  ;;  %v8852_v57 = vmul.f32 -1.442695, %v18235_v38  ;;  %v18243_v38 = vld [vmem:[#allocation79_spill] sm:$0xff] }
 0x76e   : > { %v8161_v11 = vmul.f32 0.0, %v8145_v36  ;;  %v7391_v54 = vpop.f32.mrf.mxu2  ;;  %v7456_v52 = vpop.f32.mrf.mxu3  ;;  %v5078_v36 = vand.u32 2147483648, %v16958_v23  ;;  %v7483_v60 = vadd.f32 %v7454_v43, %v16732_v15  ;;  %vm5077_vm11 = vcmp.eq.f32.partialorder %v5076_v4, 8.507059e+37 }
 0x76f   : > { %v9304_v7 = vpop.eup %9303  ;;  %v7826_v6 = vadd.f32 %v7793_v9, %v7481_v16  ;;  %v5071_v58 = vadd.f32 %v16997_v18, %v5070_v21  ;;  %v5106_v4 = vand.u32 2147483647, %v17018_v44 }
 0x770   : > { %8177 = vst [vmem:[#allocation2 + $0x68] sm:$0xff] %v8161_v11  ;;  %v8114_v51 = vsub.f32 %v9304_v7, %v18230_v37  ;;  %v17025_v63 = vpop.eup %9305 }
 0x771   : > { %8193 = vst [vmem:[%s9595_s10 + $0x28] sm:$0xff] %v8161_v11  ;;  %9309 = vtanh.f32 %v7826_v6  ;;  %v9308_v19 = vpop.eup %9307  ;;  %v5083_v42 = vmul.f32 %v17025_v63, %v16989_v31  ;;  %v5075_v23 = vsel %vm17061_vm10, %v16997_v18, %v5071_v58  ;;  %v5079_v6 = vor.u32 1.1754944e-38, %v5078_v36 }
 0x772   : > { %v8130_v61 = vmul.f32 %v8114_v51, %v5050_v10  ;;  %9311 = vrcp.f32 %v17018_v44  ;;  %v17047_v48 = vadd.f32 1.0, %v9308_v19  ;;  %v18238_v51 = vld [vmem:[#allocation36_spill] sm:$0xff]  ;;  %v7457_v10 = vadd.f32 %v7456_v52, %v7391_v54 }
 0x773   : > { %9313 = vpow2.f32 %v8851_v62  ;;  %v5084_v47 = vsub.f32 1.0, %v5083_v42  ;;  %v5080_v56 = vsel %vm5077_vm11, %v5079_v6, %v5075_v23  ;;  %vm5088_vm12 = vweird.f32 %v17025_v63 }
 0x774   : > { %v8146_v26 = vadd.f32 %v18230_v37, %v8130_v61  ;;  %v7795_v55 = vpop.f32.mrf.mxu1  ;;  %v5093_v62 = vand.u32 2147483648, %v16989_v31  ;;  %v5091_v54 = vand.u32 2147483647, %v16989_v31  ;;  %vm17086_vm14 = vmor %vm5087_vm13, %vm5088_vm12  ;;  %v5108_v36 = vand.u32 2147483648, %v17018_v44 }
 0x775   : > { %v7796_v0 = vadd.f32 %v7795_v55, %v16972_v33  ;;  %v7736_v33 = vpop.f32.mrf.mxu0  ;;  %v5085_v11 = vmul.f32 %v17025_v63, %v5084_v47  ;;  %vm5107_vm5 = vcmp.eq.f32.partialorder %v5106_v4, 8.507059e+37  ;;  %vm5117_vm7 = vweird.f32 %v17047_v48 }
 0x776   : > { %8178 = vst [vmem:[#allocation2 + $0x8] sm:$0xff] %v8146_v26  ;;  %v7394_v24 = vpop.f32.mrf.mxu2  ;;  %v7459_v29 = vpop.f32.mrf.mxu3  ;;  %vm5092_vm15 = vcmp.eq.f32.partialorder %v5091_v54, 8.507059e+37 }
 0x777   : > { %v9310_v59 = vpop.eup %9309  ;;  %8194 = vst [vmem:[%s9595_s10 + $0x30] sm:$0xff] %v8146_v26  ;;  %v7827_v53 = vadd.f32 %v7796_v0, %v7482_v25  ;;  %v5086_v40 = vadd.f32 %v17025_v63, %v5085_v11  ;;  %v18239_v26 = vld [vmem:[#allocation13_spill] sm:$0xff]  ;;  %v7484_v25 = vadd.f32 %v7457_v10, %v16738_v27  ;;  %v7460_v43 = vadd.f32 %v7459_v29, %v7394_v24 }
 0x778   : > { %v8115_v46 = vsub.f32 %v9310_v59, %v18234_v32  ;;  %v17052_v12 = vpop.eup %9311  ;;  %v8853_v49 = vmul.f32 -1.442695, %v18239_v26  ;;  %v5094_v59 = vor.u32 1.1754944e-38, %v5093_v62  ;;  %v5109_v29 = vor.u32 1.1754944e-38, %v5108_v36 }
 0x779   : > { %9315 = vtanh.f32 %v7827_v53  ;;  %v9314_v13 = vpop.eup %9313  ;;  %v5098_v22 = vmul.f32 %v17052_v12, %v17018_v44  ;;  %v5090_v31 = vsel %vm17086_vm14, %v17025_v63, %v5086_v40  ;;  %v18242_v53 = vld [vmem:[#allocation37_spill] sm:$0xff]  ;;  %vm5103_vm2 = vweird.f32 %v17052_v12 }
 0x77a   : > { %v8131_v3 = vmul.f32 %v8115_v46, %v5065_v41  ;;  %9317 = vrcp.f32 %v17047_v48  ;;  %v17072_v14 = vadd.f32 1.0, %v9314_v13  ;;  %v5095_v41 = vsel %vm5092_vm15, %v5094_v59, %v5090_v31  ;;  %vm17111_vm4 = vmor %vm5102_vm3, %vm5103_vm2  ;;  %v18249_v31 = vld [vmem:[#allocation39_spill] sm:$0xff] }
 0x77b   : > { %9319 = vpow2.f32 %v8852_v57  ;;  %v5099_v61 = vsub.f32 1.0, %v5098_v22  ;;  %v8854_v57 = vmul.f32 -1.442695, %v18243_v38  ;;  %v7485_v9 = vadd.f32 %v7460_v43, %v16748_v34 }
 0x77c   : > { %v8147_v16 = vadd.f32 %v18234_v32, %v8131_v3  ;;  %v7798_v35 = vpop.f32.mrf.mxu1  ;;  %v5121_v26 = vand.u32 2147483647, %v17047_v48  ;;  %vm5132_vm1 = vweird.f32 %v17072_v14 }
 0x77d   : > { %v7799_v8 = vadd.f32 %v7798_v35, %v7733_v50  ;;  %v7739_v18 = vpop.f32.mrf.mxu0  ;;  %v5100_v21 = vmul.f32 %v17052_v12, %v5099_v61 }
 0x77e   : > { %v8163_v7 = vmul.f32 0.0, %v8147_v16  ;;  %v7397_v27 = vpop.f32.mrf.mxu2  ;;  %v7462_v46 = vpop.f32.mrf.mxu3  ;;  %vm5122_vm9 = vcmp.eq.f32.partialorder %v5121_v26, 8.507059e+37 }
 0x77f   : > { %v9316_v15 = vpop.eup %9315  ;;  %v7828_v37 = vadd.f32 %v7799_v8, %v7483_v60  ;;  %v5101_v58 = vadd.f32 %v17052_v12, %v5100_v21 }
 0x780   : > { %8179 = vst [vmem:[#allocation2 + $0x48] sm:$0xff] %v8163_v7  ;;  %v8116_v50 = vsub.f32 %v9316_v15, %v18238_v51  ;;  %v17077_v30 = vpop.eup %9317  ;;  %v18246_v15 = vld [vmem:[#allocation38_spill] sm:$0xff] }
 0x781   : > { %8195 = vst [vmem:[%s9595_s10 + $0x38] sm:$0xff] %v8163_v7  ;;  %9321 = vtanh.f32 %v7828_v37  ;;  %v9320_v19 = vpop.eup %9319  ;;  %v5113_v42 = vmul.f32 %v17077_v30, %v17047_v48  ;;  %v5105_v44 = vsel %vm17111_vm4, %v17052_v12, %v5101_v58  ;;  %vm5118_vm6 = vweird.f32 %v17077_v30 }
 0x782   : > { %v8132_v5 = vmul.f32 %v8116_v50, %v5080_v56  ;;  %9323 = vrcp.f32 %v17072_v14  ;;  %v5110_v50 = vsel %vm5107_vm5, %v5109_v29, %v5105_v44  ;;  %vm17135_vm8 = vmor %vm5117_vm7, %vm5118_vm6  ;;  %v5136_v58 = vand.u32 2147483647, %v17072_v14 }
 0x783   : > { %9325 = vpow2.f32 %v8853_v49  ;;  %v5114_v47 = vsub.f32 1.0, %v5113_v42 }
 0x784   : > { %v8148_v55 = vadd.f32 %v18238_v51, %v8132_v5  ;;  %v7801_v52 = vpop.f32.mrf.mxu1  ;;  %v7463_v51 = vadd.f32 %v7462_v46, %v7397_v27  ;;  %vm5137_vm11 = vcmp.eq.f32.partialorder %v5136_v58, 8.507059e+37 }
 0x785   : > { %v7802_v0 = vadd.f32 %v7801_v52, %v7736_v33  ;;  %v17098_v33 = vadd.f32 1.0, %v9320_v19  ;;  %v7742_v60 = vpop.f32.mrf.mxu0  ;;  %v5115_v11 = vmul.f32 %v17077_v30, %v5114_v47 }
 0x786   : > { %8180 = vst [vmem:[#allocation2 + $0x40] sm:$0xff] %v8148_v55  ;;  %v7400_v10 = vpop.f32.mrf.mxu2  ;;  %v7465_v5 = vpop.f32.mrf.mxu3 }
 0x787   : > { %v9322_v2 = vpop.eup %9321  ;;  %8196 = vst [vmem:[%s9595_s10 + $0x40] sm:$0xff] %v8148_v55  ;;  %v7829_v45 = vadd.f32 %v7802_v0, %v7484_v25  ;;  %v5116_v12 = vadd.f32 %v17077_v30, %v5115_v11  ;;  %v7486_v55 = vadd.f32 %v7463_v51, %v16754_v17  ;;  %v7466_v27 = vadd.f32 %v7465_v5, %v7400_v10 }
 0x788   : > { %v8117_v32 = vsub.f32 %v9322_v2, %v18242_v53  ;;  %v17102_v63 = vpop.eup %9323  ;;  %vm5147_vm13 = vweird.f32 %v17098_v33 }
 0x789   : > { %9327 = vtanh.f32 %v7829_v45  ;;  %v9326_v13 = vpop.eup %9325  ;;  %v5128_v22 = vmul.f32 %v17102_v63, %v17072_v14  ;;  %vm5133_vm0 = vweird.f32 %v17102_v63  ;;  %v7487_v38 = vadd.f32 %v7466_v27, %v16760_v1  ;;  %v18252_v1 = vld [vmem:[#allocation40_spill] sm:$0xff] }
 0x78a   : > { %v8133_v3 = vmul.f32 %v8117_v32, %v5095_v41  ;;  %9329 = vrcp.f32 %v17098_v33  ;;  %v17122_v37 = vadd.f32 1.0, %v9326_v13  ;;  %v5138_v41 = vand.u32 2147483648, %v17072_v14  ;;  %vm17159_vm10 = vmor %vm5132_vm1, %vm5133_vm0 }
 0x78b   : > { %9331 = vpow2.f32 %v8854_v57  ;;  %v5129_v56 = vsub.f32 1.0, %v5128_v22 }
 0x78c   : > { %v8149_v16 = vadd.f32 %v18242_v53, %v8133_v3  ;;  %v7804_v35 = vpop.f32.mrf.mxu1  ;;  %v5139_v24 = vor.u32 1.1754944e-38, %v5138_v41  ;;  %vm5162_vm3 = vweird.f32 %v17122_v37 }
 0x78d   : > { %v7805_v8 = vadd.f32 %v7804_v35, %v7739_v18  ;;  %v5123_v18 = vand.u32 2147483648, %v17047_v48  ;;  %v5130_v39 = vmul.f32 %v17102_v63, %v5129_v56  ;;  %v5120_v48 = vsel %vm17135_vm8, %v17077_v30, %v5116_v12  ;;  %v7745_v19 = vpop.f32.mrf.mxu0 }
 0x78e   : > { %v8165_v7 = vmul.f32 0.0, %v8149_v16  ;;  %v7403_v43 = vpop.f32.mrf.mxu2  ;;  %v7468_v3 = vpop.f32.mrf.mxu3 }
 0x78f   : > { %v9328_v23 = vpop.eup %9327  ;;  %v7830_v34 = vadd.f32 %v7805_v8, %v7485_v9  ;;  %v5124_v17 = vor.u32 1.1754944e-38, %v5123_v18  ;;  %v5131_v46 = vadd.f32 %v17102_v63, %v5130_v39  ;;  %v7469_v22 = vadd.f32 %v7468_v3, %v7403_v43  ;;  %v18256_v43 = vld [vmem:[#allocation44_spill] sm:$0xff] }
 0x790   : > { %8181 = vst [vmem:[#allocation2 + $0x20] sm:$0xff] %v8165_v7  ;;  %v8118_v6 = vsub.f32 %v9328_v23, %v18246_v15  ;;  %v17127_v40 = vpop.eup %9329 }
 0x791   : > { %8197 = vst [vmem:[%s9595_s10 + $0x48] sm:$0xff] %v8165_v7  ;;  %9333 = vtanh.f32 %v7830_v34  ;;  %v9332_v25 = vpop.eup %9331  ;;  %v5143_v0 = vmul.f32 %v17127_v40, %v17098_v33  ;;  %v5125_v45 = vsel %vm5122_vm9, %v5124_v17, %v5120_v48  ;;  %v5135_v14 = vsel %vm17159_vm10, %v17102_v63, %v5131_v46 }
 0x792   : > { %v8134_v61 = vmul.f32 %v8118_v6, %v5110_v50  ;;  %9335 = vrcp.f32 %v17122_v37  ;;  %v17147_v59 = vadd.f32 1.0, %v9332_v25  ;;  %v5140_v7 = vsel %vm5137_vm11, %v5139_v24, %v5135_v14 }
 0x793   : > { %v5144_v53 = vsub.f32 1.0, %v5143_v0  ;;  %vm5148_vm12 = vweird.f32 %v17127_v40  ;;  %v5153_v63 = vand.u32 2147483648, %v17098_v33  ;;  %v5151_v6 = vand.u32 2147483647, %v17098_v33 }
 0x794   : > { %v8150_v62 = vadd.f32 %v18246_v15, %v8134_v61  ;;  %v7807_v49 = vpop.f32.mrf.mxu1  ;;  %v7488_v50 = vadd.f32 %v7469_v22, %v16767_v20  ;;  %vm17180_vm14 = vmor %vm5147_vm13, %vm5148_vm12  ;;  %v5183_v3 = vand.u32 2147483648, %v17147_v59  ;;  %vm5177_vm7 = vweird.f32 %v17147_v59 }
 0x795   : > { %v7808_v52 = vadd.f32 %v7807_v49, %v7742_v60  ;;  %v5145_v4 = vmul.f32 %v17127_v40, %v5144_v53  ;;  %v7748_v11 = vpop.f32.mrf.mxu0  ;;  %v5154_v20 = vor.u32 1.1754944e-38, %v5153_v63  ;;  %vm5152_vm15 = vcmp.eq.f32.partialorder %v5151_v6, 8.507059e+37  ;;  %v18255_v49 = vld [vmem:[#allocation42_spill] sm:$0xff] }
 0x796   : > { %8182 = vst [vmem:[#allocation2 + $0x10] sm:$0xff] %v8150_v62  ;;  %v7406_v12 = vpop.f32.mrf.mxu2  ;;  %v7471_v18 = vpop.f32.mrf.mxu3  ;;  %v5181_v58 = vand.u32 2147483647, %v17147_v59  ;;  %v5184_v57 = vor.u32 1.1754944e-38, %v5183_v3 }
 0x797   : > { %v9334_v21 = vpop.eup %9333  ;;  %8198 = vst [vmem:[%s9595_s10 + $0x50] sm:$0xff] %v8150_v62  ;;  %v7831_v42 = vadd.f32 %v7808_v52, %v7486_v55  ;;  %v5146_v29 = vadd.f32 %v17127_v40, %v5145_v4  ;;  %v7472_v54 = vadd.f32 %v7471_v18, %v7406_v12 }
 0x798   : > { %v8119_v2 = vsub.f32 %v9334_v21, %v18249_v31  ;;  %v17151_v30 = vpop.eup %9335  ;;  %v5166_v21 = vand.u32 2147483647, %v17122_v37  ;;  %vm5182_vm9 = vcmp.eq.f32.partialorder %v5181_v58, 8.507059e+37 }
 0x799   : > { %9337 = vtanh.f32 %v7831_v42  ;;  %v5158_v35 = vmul.f32 %v17151_v30, %v17122_v37  ;;  %v5150_v33 = vsel %vm17180_vm14, %v17127_v40, %v5146_v29  ;;  %vm5163_vm2 = vweird.f32 %v17151_v30 }
 0x79a   : > { %v8135_v32 = vmul.f32 %v8119_v2, %v5125_v45  ;;  %9339 = vrcp.f32 %v17147_v59  ;;  %v5155_v52 = vsel %vm5152_vm15, %v5154_v20, %v5150_v33  ;;  %v7489_v42 = vadd.f32 %v7472_v54, %v16778_v28  ;;  %vm5164_vm4 = vmor %vm5162_vm3, %vm5163_vm2 }
 0x79b   : > { %v5159_v44 = vsub.f32 1.0, %v5158_v35  ;;  %vm5167_vm5 = vcmp.eq.f32.partialorder %v5166_v21, 8.507059e+37 }
 0x79c   : > { %v8151_v47 = vadd.f32 %v18249_v31, %v8135_v32  ;;  %v7810_v36 = vpop.f32.mrf.mxu1 }
 0x79d   : > { %v7811_v16 = vadd.f32 %v7810_v36, %v7745_v19  ;;  %v5160_v61 = vmul.f32 %v17151_v30, %v5159_v44  ;;  %v7751_v48 = vpop.f32.mrf.mxu0  ;;  %v5168_v19 = vand.u32 2147483648, %v17122_v37 }
 0x79e   : > { %v8167_v60 = vmul.f32 0.0, %v8151_v47 }
 0x79f   : > { %v9338_v9 = vpop.eup %9337  ;;  %v7832_v8 = vadd.f32 %v7811_v16, %v7487_v38  ;;  %v5161_v0 = vadd.f32 %v17151_v30, %v5160_v61  ;;  %v5169_v32 = vor.u32 1.1754944e-38, %v5168_v19  ;;  %v18257_v16 = vld [vmem:[#allocation45_spill] sm:$0xff] }
 0x7a0   : > { %8183 = vst [vmem:[#allocation2 + $0x38] sm:$0xff] %v8167_v60  ;;  %v8120_v13 = vsub.f32 %v9338_v9, %v18252_v1  ;;  %v17173_v34 = vpop.eup %9339 }
 0x7a1   : > { %8199 = vst [vmem:[%s9595_s10 + $0x58] sm:$0xff] %v8167_v60  ;;  %9341 = vtanh.f32 %v7832_v8  ;;  %v5173_v5 = vmul.f32 %v17173_v34, %v17147_v59  ;;  %v5165_v45 = vsel %vm5164_vm4, %v17151_v30, %v5161_v0  ;;  %vm5178_vm6 = vweird.f32 %v17173_v34 }
 0x7a2   : > { %v8136_v23 = vmul.f32 %v8120_v13, %v5140_v7  ;;  %v5170_v37 = vsel %vm5167_vm5, %v5169_v32, %v5165_v45  ;;  %vm5179_vm8 = vmor %vm5177_vm7, %vm5178_vm6 }
 0x7a3   : > { %v5174_v25 = vsub.f32 1.0, %v5173_v5 }
 0x7a4   : > { %v8152_v15 = vadd.f32 %v18252_v1, %v8136_v23  ;;  %v7813_v51 = vpop.f32.mrf.mxu1 }
 0x7a5   : > { %v7814_v56 = vadd.f32 %v7813_v51, %v7748_v11  ;;  %v5175_v2 = vmul.f32 %v17173_v34, %v5174_v25 }
 0x7a6   : > { %8184 = vst [vmem:[#allocation2 + $0x60] sm:$0xff] %v8152_v15 }
 0x7a7   : > { %v9342_v62 = vpop.eup %9341  ;;  %8200 = vst [vmem:[%s9595_s10 + $0x60] sm:$0xff] %v8152_v15  ;;  %v7833_v26 = vadd.f32 %v7814_v56, %v7488_v50  ;;  %v5176_v28 = vadd.f32 %v17173_v34, %v5175_v2 }
 0x7a8   : > { %v8121_v55 = vsub.f32 %v9342_v62, %v18255_v49 }
 0x7a9   : > { %9343 = vtanh.f32 %v7833_v26  ;;  %v5180_v36 = vsel %vm5179_vm8, %v17173_v34, %v5176_v28 }
 0x7aa   : > { %v8137_v39 = vmul.f32 %v8121_v55, %v5155_v52  ;;  %v5185_v35 = vsel %vm5182_vm9, %v5184_v57, %v5180_v36 }
 0x7ac   : > { %v8153_v40 = vadd.f32 %v18255_v49, %v8137_v39  ;;  %v7816_v17 = vpop.f32.mrf.mxu1 }
 0x7ad   : > { %v7817_v31 = vadd.f32 %v7816_v17, %v7751_v48 }
 0x7ae   : > { %v8169_v27 = vmul.f32 0.0, %v8153_v40 }
 0x7af   : > { %v9344_v53 = vpop.eup %9343  ;;  %v7834_v46 = vadd.f32 %v7817_v31, %v7489_v42 }
 0x7b0   : > { %8185 = vst [vmem:[#allocation2 + $0x70] sm:$0xff] %v8169_v27  ;;  %v8122_v41 = vsub.f32 %v9344_v53, %v18256_v43 }
 0x7b1   : > { %8201 = vst [vmem:[%s9595_s10 + $0x68] sm:$0xff] %v8169_v27  ;;  %9345 = vtanh.f32 %v7834_v46 }
 0x7b2   : > { %v8138_v47 = vmul.f32 %v8122_v41, %v5170_v37 }
 0x7b4   : > { %v8154_v30 = vadd.f32 %v18256_v43, %v8138_v47 }
 0x7b6   : > { %8186 = vst [vmem:[#allocation2 + $0x78] sm:$0xff] %v8154_v30 }
 0x7b7   : > { %v9346_v38 = vpop.eup %9345  ;;  %8202 = vst [vmem:[%s9595_s10 + $0x70] sm:$0xff] %v8154_v30 }
 0x7b8   : > { %v8123_v4 = vsub.f32 %v9346_v38, %v18257_v16 }
 0x7ba   : > { %v8139_v60 = vmul.f32 %v8123_v4, %v5185_v35 }
 0x7bc   : > { %v8155_v14 = vadd.f32 %v18257_v16, %v8139_v60 }
 0x7be   : > { %v8171_v9 = vmul.f32 0.0, %v8155_v14 }
 0x7c0   : > { %8187 = vst [vmem:[#allocation2 + $0x28] sm:$0xff] %v8171_v9 }
 0x7c1   : > { %8203 = vst [vmem:[%s9595_s10 + $0x78] sm:$0xff] %v8171_v9 }
 0x7c2 PF: > { %s15_s22 = sadd.s32 1, %s9524_s22   ;;  %s18258_s18 = smov %s9516_s20 }
 0x7c3   : > { %p12_p8 = scmp.ge.s32.totalorder %s15_s22, 18   ;;  %s18259_s19 = smov %s9520_s21 }
 0x7c4   : > { %s18260_s20 = smov %s18263_s23  ;;  %s18261_s21 = smov %s18267_s24 }
 0x7c5   :  { %14 = sbr.rel (!%p12_p8) target bundleno = 3 (0x3), region = 90 }

</bundles_post_ra>
